<compile_context>
chip_gen: v5e
topology: v5e:2x2
jax: 0.10.0
libtpu: 0.0.40
codegen_flags: <defaults>
</compile_context>

<pallas_src>
import functools
import math

import jax
import jax.numpy as jnp
from jax.experimental import pallas as pl
from jax.experimental.pallas import tpu as pltpu


# GEMM operands are cast to this dtype (accumulation stays f32 via
# preferred_element_type). bf16 doubles MXU throughput on v6e/v7x and halves
# VMEM/HBM traffic; set to jnp.float32 for bit-closer parity with PyTorch.
COMPUTE_DTYPE = jnp.bfloat16

_VMEM_LIMIT = 32 * 1024 * 1024
_GRID_CPARAMS = pltpu.CompilerParams(
    dimension_semantics=("parallel",), vmem_limit_bytes=_VMEM_LIMIT)
_NOGRID_CPARAMS = pltpu.CompilerParams(vmem_limit_bytes=_VMEM_LIMIT)


# ----------------------------------------------------------------------------
# 3x3 SAME conv (stride 1) with fused bias / residual / ReLU
# ----------------------------------------------------------------------------

def _conv3x3_kernel(*refs, Wp, L, relu_in, relu_out, has_res):
    if has_res:
        x_ref, w_ref, b_ref, res_ref, o_ref = refs
    else:
        x_ref, w_ref, b_ref, o_ref = refs

    x = x_ref[0]                                   # (Hp*Wp, Cin), f32
    if relu_in:
        x = jnp.maximum(x, 0.0)                    # applied once (not per tap)

    acc = None
    for t in range(9):                             # unrolled: 9 accumulating MXU dots
        dy, dx = divmod(t, 3)
        off = dy * Wp + dx
        a = x[off:off + L, :].astype(COMPUTE_DTYPE)        # shifted tap slab (L, Cin)
        d = jnp.dot(a, w_ref[t], preferred_element_type=jnp.float32)
        acc = d if acc is None else acc + d

    acc = acc + b_ref[...]                         # (1, Cout) broadcast
    if has_res:
        acc = acc + res_ref[0]                     # identity / residual add (f32)
    if relu_out:
        acc = jnp.maximum(acc, 0.0)
    o_ref[0] = acc


def conv3x3_same(x, w_oihw, b, *, relu_in=False, relu_out=False, residual=None):
    """TF-SAME 3x3 / stride-1 conv on NHWC input with PyTorch OIHW weights.

    The kernel works in the flattened zero-padded domain: per image the nine conv
    taps are contiguous row-slabs of the (Hp*Wp, Cin) input, so no im2col matrix is
    ever written to HBM. The two wrap-around junk columns per row are stripped here.
    """
    N, H, W, Cin = x.shape
    Cout = int(w_oihw.shape[0])
    Hp, Wp = H + 2, W + 2
    L = (H - 1) * Wp + W                           # rows of the padded-domain output

    xp = jnp.pad(x, ((0, 0), (1, 1), (1, 1), (0, 0))).reshape(N, Hp * Wp, Cin)
    wt = jnp.transpose(w_oihw, (2, 3, 1, 0)).reshape(9, Cin, Cout).astype(COMPUTE_DTYPE)
    b2 = b.reshape(1, Cout).astype(jnp.float32)

    inputs = [xp, wt, b2]
    in_specs = [
        pl.BlockSpec((1, Hp * Wp, Cin), lambda n: (n, 0, 0)),
        pl.BlockSpec((9, Cin, Cout), lambda n: (0, 0, 0)),   # resident across grid
        pl.BlockSpec((1, Cout), lambda n: (0, 0)),
    ]
    has_res = residual is not None
    if has_res:
        resf = jnp.pad(residual, ((0, 0), (0, 0), (0, Wp - W), (0, 0)))
        resf = resf.reshape(N, H * Wp, Cout)[:, :L, :].astype(jnp.float32)
        inputs.append(resf)
        in_specs.append(pl.BlockSpec((1, L, Cout), lambda n: (n, 0, 0)))

    kernel = functools.partial(
        _conv3x3_kernel, Wp=Wp, L=L,
        relu_in=relu_in, relu_out=relu_out, has_res=has_res)

    out = pl.pallas_call(
        kernel,
        grid=(N,),                                  # batch grid: pipelining + megacore
        out_shape=jax.ShapeDtypeStruct((N, L, Cout), jnp.float32),
        in_specs=in_specs,
        out_specs=pl.BlockSpec((1, L, Cout), lambda n: (n, 0, 0)),
        compiler_params=_GRID_CPARAMS,
    )(*inputs)

    # Strip the 2 junk columns per row and restore NHWC.
    out = jnp.pad(out, ((0, 0), (0, H * Wp - L), (0, 0)))
    out = out.reshape(N, H, Wp, Cout)[:, :, :W, :]
    return out


# ----------------------------------------------------------------------------
# MaxPool2d(kernel_size=3, stride=2, padding=1)
# ----------------------------------------------------------------------------

def _maxpool_kernel(ee_ref, eo_ref, oe_ref, oo_ref, o_ref, *, Ho, Wo):
    ee = ee_ref[0]                                 # even rows / even cols of padded input
    eo = eo_ref[0]                                 # even rows / odd  cols
    oe = oe_ref[0]                                 # odd  rows / even cols
    oo = oo_ref[0]                                 # odd  rows / odd  cols
    m = jnp.maximum(ee[:Ho, :Wo], ee[:Ho, 1:Wo + 1])
    m = jnp.maximum(m, ee[1:Ho + 1, :Wo])
    m = jnp.maximum(m, ee[1:Ho + 1, 1:Wo + 1])
    m = jnp.maximum(m, eo[:Ho, :Wo])
    m = jnp.maximum(m, eo[1:Ho + 1, :Wo])
    m = jnp.maximum(m, oe[:Ho, :Wo])
    m = jnp.maximum(m, oe[:Ho, 1:Wo + 1])
    m = jnp.maximum(m, oo[:Ho, :Wo])
    o_ref[0] = m


def maxpool3x3_s2_p1(x):
    """PyTorch MaxPool2d(3, stride=2, padding=1) on NHWC (H, W even)."""
    N, H, W, C = x.shape
    assert H % 2 == 0 and W % 2 == 0
    Ho, Wo = H // 2, W // 2
    xp = jnp.pad(x, ((0, 0), (1, 1), (1, 1), (0, 0)), constant_values=-jnp.inf)
    ee = xp[:, 0::2, 0::2, :]                      # (N, Ho+1, Wo+1, C)
    eo = xp[:, 0::2, 1::2, :]
    oe = xp[:, 1::2, 0::2, :]
    oo = xp[:, 1::2, 1::2, :]
    qspec = pl.BlockSpec((1, Ho + 1, Wo + 1, C), lambda n: (n, 0, 0, 0))
    return pl.pallas_call(
        functools.partial(_maxpool_kernel, Ho=Ho, Wo=Wo),
        grid=(N,),
        out_shape=jax.ShapeDtypeStruct((N, Ho, Wo, C), jnp.float32),
        in_specs=[qspec, qspec, qspec, qspec],
        out_specs=pl.BlockSpec((1, Ho, Wo, C), lambda n: (n, 0, 0, 0)),
        compiler_params=_GRID_CPARAMS,
    )(ee, eo, oe, oo)


# ----------------------------------------------------------------------------
# Fused value head: relu(features) -> fc_h_v -> relu -> fc_z_v
# ----------------------------------------------------------------------------

def _head_kernel(f_ref, wh_ref, bh_ref, wz_ref, bz_ref, o_ref):
    f = jnp.maximum(f_ref[...], 0.0)               # ImpalaCNN final ReLU (fused)
    h = jnp.dot(f.astype(COMPUTE_DTYPE), wh_ref[...],
                preferred_element_type=jnp.float32) + bh_ref[...]
    h = jnp.maximum(h, 0.0)                        # ReLU(fc_h_v(.))
    v = jnp.dot(h.astype(COMPUTE_DTYPE), wz_ref[...],
                preferred_element_type=jnp.float32) + bz_ref[...]
    o_ref[...] = v


def value_head(feat_hwc, params, c_f, h_f, w_f):
    """Single-kernel head. `feat_hwc` is the (H, W, C)-ordered flatten; fc_h_v's
    columns are permuted from PyTorch's (C, H, W) flatten order so the result is
    identical to the reference network."""
    B, F = feat_hwc.shape
    hidden = int(params["fc_h_w"].shape[0])
    wh = params["fc_h_w"].reshape(hidden, c_f, h_f, w_f)
    wh = jnp.transpose(wh, (2, 3, 1, 0)).reshape(F, hidden).astype(COMPUTE_DTYPE)
    bh = params["fc_h_b"].reshape(1, hidden).astype(jnp.float32)
    wz = params["fc_z_w"].T.astype(COMPUTE_DTYPE)          # (hidden, 1)
    bz = params["fc_z_b"].reshape(1, 1).astype(jnp.float32)
    vmem = pl.BlockSpec(memory_space=pltpu.MemorySpace.VMEM)
    return pl.pallas_call(
        _head_kernel,
        out_shape=jax.ShapeDtypeStruct((B, 1), jnp.float32),
        in_specs=[vmem] * 5,
        out_specs=vmem,
        compiler_params=_NOGRID_CPARAMS,
    )(feat_hwc, wh, bh, wz, bz)


# ----------------------------------------------------------------------------
# ImpalaCNN + ValueNetwork forward
# ----------------------------------------------------------------------------

def residual_block(x, p):
    # out = conv2(relu(conv1(relu(x)))) + x ; both ReLUs fused into the conv kernels.
    h = conv3x3_same(x, p["w1"], p["b1"], relu_in=True, relu_out=True)
    return conv3x3_same(h, p["w2"], p["b2"], residual=x)


def impala_layer(x, p):
    x = conv3x3_same(x, p["conv_w"], p["conv_b"])
    x = maxpool3x3_s2_p1(x)
    x = residual_block(x, p["res1"])
    x = residual_block(x, p["res2"])
    return x


def value_network_forward(x_nchw, params):
    """ValueNetwork.forward: value = fc_z_v(relu(fc_h_v(relu(flatten(ImpalaCNN(x))))))."""
    x = jnp.transpose(x_nchw, (0, 2, 3, 1)).astype(jnp.float32)   # NCHW -> NHWC
    for p in params["features"]:
        x = impala_layer(x, p)
    B, h_f, w_f, c_f = x.shape
    feat = x.reshape(B, h_f * w_f * c_f)           # HWC flatten (head weights permuted to match)
    return value_head(feat, params, c_f, h_f, w_f)  # (B, 1)


# ----------------------------------------------------------------------------
# Deterministic parameter initialization (mirrors PyTorch init; synthetic values)
# ----------------------------------------------------------------------------

def _xavier_conv(key, cout, cin, k=3):
    fan_in, fan_out = cin * k * k, cout * k * k
    limit = math.sqrt(6.0 / (fan_in + fan_out))
    return jax.random.uniform(key, (cout, cin, k, k), jnp.float32, -limit, limit)


def _linear(key, out_f, in_f):
    k1, k2 = jax.random.split(key)
    bound = 1.0 / math.sqrt(in_f)
    w = jax.random.uniform(k1, (out_f, in_f), jnp.float32, -bound, bound)
    b = jax.random.uniform(k2, (out_f,), jnp.float32, -bound, bound)
    return w, b


def init_impala(key, cin, channels=(16, 32, 32)):
    layers = []
    c_prev = cin
    for c in channels:
        key, k0, k1, k2, k3, k4 = jax.random.split(key, 6)
        layers.append({
            "conv_w": _xavier_conv(k0, c, c_prev),
            "conv_b": jnp.zeros((c,), jnp.float32),
            "res1": {"w1": _xavier_conv(k1, c, c), "b1": jnp.zeros((c,), jnp.float32),
                     "w2": _xavier_conv(k2, c, c), "b2": jnp.zeros((c,), jnp.float32)},
            "res2": {"w1": _xavier_conv(k3, c, c), "b1": jnp.zeros((c,), jnp.float32),
                     "w2": _xavier_conv(k4, c, c), "b2": jnp.zeros((c,), jnp.float32)},
        })
        c_prev = c
    return layers


def init_params(key, in_channels, conv_output_size, hidden_size):
    kf, kh, kz = jax.random.split(key, 3)
    feats = init_impala(kf, in_channels)
    fc_h_w, fc_h_b = _linear(kh, hidden_size, conv_output_size)
    fc_z_w, fc_z_b = _linear(kz, 1, hidden_size)
    return {"features": feats,
            "fc_h_w": fc_h_w, "fc_h_b": fc_h_b,
            "fc_z_w": fc_z_w, "fc_z_b": fc_z_b}


if __name__ == "__main__":
    key = jax.random.PRNGKey(0)
    B, C, H, W = 2, 3, 16, 16          # small synthetic observation
    hidden_size = 32
    # Three Impala stages each halve the spatial dims: 16 -> 8 -> 4 -> 2, 32 channels out.
    conv_output_size = 32 * (H // 8) * (W // 8)    # = 128

    key, kx, kp = jax.random.split(key, 3)
    x = jax.random.normal(kx, (B, C, H, W), jnp.float32)
    params = init_params(kp, C, conv_output_size, hidden_size)

    value = jax.jit(value_network_forward)(x, params)
    jax.block_until_ready(value)

    assert value.shape == (B, 1)
    assert bool(jnp.all(jnp.isfinite(value)))
    print("KERNEL_OK")
</pallas_src>

<mosaic_0001>
module attributes {stable_mosaic.version = 11 : i64} {
  func.func @_conv3x3_kernel(%arg0: i32, %arg1: memref<1x324x3xf32, #tpu.memory_space<vmem>>, %arg2: memref<9x3x16xbf16, #tpu.memory_space<vmem>>, %arg3: memref<1x16xf32, #tpu.memory_space<vmem>>, %arg4: memref<1x286x16xf32, #tpu.memory_space<vmem>>) attributes {dimension_semantics = [#tpu.dimension_semantics<parallel>], iteration_bounds = array<i64: 2>, scalar_prefetch = 0 : i64, scratch_operands = 0 : i64, tpu.core_type = #tpu.core_type<tc>, window_params = [{transform_indices = @transform_0, window_bounds = array<i64: 1, 324, 3>}, {pipeline_mode = #tpu.pipeline_mode<synchronous>, transform_indices = @transform_1, window_bounds = array<i64: 9, 3, 16>}, {pipeline_mode = #tpu.pipeline_mode<synchronous>, transform_indices = @transform_2, window_bounds = array<i64: 1, 16>}, {transform_indices = @transform_3, window_bounds = array<i64: 1, 286, 16>}]} {
    %c0 = arith.constant 0 : index
    %c0_0 = arith.constant 0 : index
    %c0_1 = arith.constant 0 : index
    %0 = vector.load %arg1[%c0, %c0_0, %c0_1] : memref<1x324x3xf32, #tpu.memory_space<vmem>>, vector<1x324x3xf32>
    %1 = vector.shape_cast %0 : vector<1x324x3xf32> to vector<324x3xf32>
    %2 = vector.extract_strided_slice %1 {offsets = [0, 0], sizes = [286, 3], strides = [1, 1]} : vector<324x3xf32> to vector<286x3xf32>
    %3 = arith.truncf %2 : vector<286x3xf32> to vector<286x3xbf16>
    %c0_2 = arith.constant 0 : index
    %c0_3 = arith.constant 0 : index
    %c0_4 = arith.constant 0 : index
    %4 = vector.load %arg2[%c0_2, %c0_3, %c0_4] : memref<9x3x16xbf16, #tpu.memory_space<vmem>>, vector<1x3x16xbf16>
    %5 = vector.shape_cast %4 : vector<1x3x16xbf16> to vector<3x16xbf16>
    %cst = arith.constant dense<0.000000e+00> : vector<286x16xf32>
    %6 = tpu.matmul %3, %5, %cst {dimension_numbers = #tpu.dot_dimension_numbers<[1], [0], [0], [1], [0, 0, 1, 1], [], []>} : vector<286x3xbf16>, vector<3x16xbf16>, vector<286x16xf32> -> vector<286x16xf32>
    %7 = vector.extract_strided_slice %1 {offsets = [1, 0], sizes = [286, 3], strides = [1, 1]} : vector<324x3xf32> to vector<286x3xf32>
    %8 = arith.truncf %7 : vector<286x3xf32> to vector<286x3xbf16>
    %c1 = arith.constant 1 : index
    %c0_5 = arith.constant 0 : index
    %c0_6 = arith.constant 0 : index
    %9 = vector.load %arg2[%c1, %c0_5, %c0_6] : memref<9x3x16xbf16, #tpu.memory_space<vmem>>, vector<1x3x16xbf16>
    %10 = vector.shape_cast %9 : vector<1x3x16xbf16> to vector<3x16xbf16>
    %cst_7 = arith.constant dense<0.000000e+00> : vector<286x16xf32>
    %11 = tpu.matmul %8, %10, %cst_7 {dimension_numbers = #tpu.dot_dimension_numbers<[1], [0], [0], [1], [0, 0, 1, 1], [], []>} : vector<286x3xbf16>, vector<3x16xbf16>, vector<286x16xf32> -> vector<286x16xf32>
    %12 = arith.addf %6, %11 : vector<286x16xf32>
    %13 = vector.extract_strided_slice %1 {offsets = [2, 0], sizes = [286, 3], strides = [1, 1]} : vector<324x3xf32> to vector<286x3xf32>
    %14 = arith.truncf %13 : vector<286x3xf32> to vector<286x3xbf16>
    %c2 = arith.constant 2 : index
    %c0_8 = arith.constant 0 : index
    %c0_9 = arith.constant 0 : index
    %15 = vector.load %arg2[%c2, %c0_8, %c0_9] : memref<9x3x16xbf16, #tpu.memory_space<vmem>>, vector<1x3x16xbf16>
    %16 = vector.shape_cast %15 : vector<1x3x16xbf16> to vector<3x16xbf16>
    %cst_10 = arith.constant dense<0.000000e+00> : vector<286x16xf32>
    %17 = tpu.matmul %14, %16, %cst_10 {dimension_numbers = #tpu.dot_dimension_numbers<[1], [0], [0], [1], [0, 0, 1, 1], [], []>} : vector<286x3xbf16>, vector<3x16xbf16>, vector<286x16xf32> -> vector<286x16xf32>
    %18 = arith.addf %12, %17 : vector<286x16xf32>
    %19 = vector.extract_strided_slice %1 {offsets = [18, 0], sizes = [286, 3], strides = [1, 1]} : vector<324x3xf32> to vector<286x3xf32>
    %20 = arith.truncf %19 : vector<286x3xf32> to vector<286x3xbf16>
    %c3 = arith.constant 3 : index
    %c0_11 = arith.constant 0 : index
    %c0_12 = arith.constant 0 : index
    %21 = vector.load %arg2[%c3, %c0_11, %c0_12] : memref<9x3x16xbf16, #tpu.memory_space<vmem>>, vector<1x3x16xbf16>
    %22 = vector.shape_cast %21 : vector<1x3x16xbf16> to vector<3x16xbf16>
    %cst_13 = arith.constant dense<0.000000e+00> : vector<286x16xf32>
    %23 = tpu.matmul %20, %22, %cst_13 {dimension_numbers = #tpu.dot_dimension_numbers<[1], [0], [0], [1], [0, 0, 1, 1], [], []>} : vector<286x3xbf16>, vector<3x16xbf16>, vector<286x16xf32> -> vector<286x16xf32>
    %24 = arith.addf %18, %23 : vector<286x16xf32>
    %25 = vector.extract_strided_slice %1 {offsets = [19, 0], sizes = [286, 3], strides = [1, 1]} : vector<324x3xf32> to vector<286x3xf32>
    %26 = arith.truncf %25 : vector<286x3xf32> to vector<286x3xbf16>
    %c4 = arith.constant 4 : index
    %c0_14 = arith.constant 0 : index
    %c0_15 = arith.constant 0 : index
    %27 = vector.load %arg2[%c4, %c0_14, %c0_15] : memref<9x3x16xbf16, #tpu.memory_space<vmem>>, vector<1x3x16xbf16>
    %28 = vector.shape_cast %27 : vector<1x3x16xbf16> to vector<3x16xbf16>
    %cst_16 = arith.constant dense<0.000000e+00> : vector<286x16xf32>
    %29 = tpu.matmul %26, %28, %cst_16 {dimension_numbers = #tpu.dot_dimension_numbers<[1], [0], [0], [1], [0, 0, 1, 1], [], []>} : vector<286x3xbf16>, vector<3x16xbf16>, vector<286x16xf32> -> vector<286x16xf32>
    %30 = arith.addf %24, %29 : vector<286x16xf32>
    %31 = vector.extract_strided_slice %1 {offsets = [20, 0], sizes = [286, 3], strides = [1, 1]} : vector<324x3xf32> to vector<286x3xf32>
    %32 = arith.truncf %31 : vector<286x3xf32> to vector<286x3xbf16>
    %c5 = arith.constant 5 : index
    %c0_17 = arith.constant 0 : index
    %c0_18 = arith.constant 0 : index
    %33 = vector.load %arg2[%c5, %c0_17, %c0_18] : memref<9x3x16xbf16, #tpu.memory_space<vmem>>, vector<1x3x16xbf16>
    %34 = vector.shape_cast %33 : vector<1x3x16xbf16> to vector<3x16xbf16>
    %cst_19 = arith.constant dense<0.000000e+00> : vector<286x16xf32>
    %35 = tpu.matmul %32, %34, %cst_19 {dimension_numbers = #tpu.dot_dimension_numbers<[1], [0], [0], [1], [0, 0, 1, 1], [], []>} : vector<286x3xbf16>, vector<3x16xbf16>, vector<286x16xf32> -> vector<286x16xf32>
    %36 = arith.addf %30, %35 : vector<286x16xf32>
    %37 = vector.extract_strided_slice %1 {offsets = [36, 0], sizes = [286, 3], strides = [1, 1]} : vector<324x3xf32> to vector<286x3xf32>
    %38 = arith.truncf %37 : vector<286x3xf32> to vector<286x3xbf16>
    %c6 = arith.constant 6 : index
    %c0_20 = arith.constant 0 : index
    %c0_21 = arith.constant 0 : index
    %39 = vector.load %arg2[%c6, %c0_20, %c0_21] : memref<9x3x16xbf16, #tpu.memory_space<vmem>>, vector<1x3x16xbf16>
    %40 = vector.shape_cast %39 : vector<1x3x16xbf16> to vector<3x16xbf16>
    %cst_22 = arith.constant dense<0.000000e+00> : vector<286x16xf32>
    %41 = tpu.matmul %38, %40, %cst_22 {dimension_numbers = #tpu.dot_dimension_numbers<[1], [0], [0], [1], [0, 0, 1, 1], [], []>} : vector<286x3xbf16>, vector<3x16xbf16>, vector<286x16xf32> -> vector<286x16xf32>
    %42 = arith.addf %36, %41 : vector<286x16xf32>
    %43 = vector.extract_strided_slice %1 {offsets = [37, 0], sizes = [286, 3], strides = [1, 1]} : vector<324x3xf32> to vector<286x3xf32>
    %44 = arith.truncf %43 : vector<286x3xf32> to vector<286x3xbf16>
    %c7 = arith.constant 7 : index
    %c0_23 = arith.constant 0 : index
    %c0_24 = arith.constant 0 : index
    %45 = vector.load %arg2[%c7, %c0_23, %c0_24] : memref<9x3x16xbf16, #tpu.memory_space<vmem>>, vector<1x3x16xbf16>
    %46 = vector.shape_cast %45 : vector<1x3x16xbf16> to vector<3x16xbf16>
    %cst_25 = arith.constant dense<0.000000e+00> : vector<286x16xf32>
    %47 = tpu.matmul %44, %46, %cst_25 {dimension_numbers = #tpu.dot_dimension_numbers<[1], [0], [0], [1], [0, 0, 1, 1], [], []>} : vector<286x3xbf16>, vector<3x16xbf16>, vector<286x16xf32> -> vector<286x16xf32>
    %48 = arith.addf %42, %47 : vector<286x16xf32>
    %49 = vector.extract_strided_slice %1 {offsets = [38, 0], sizes = [286, 3], strides = [1, 1]} : vector<324x3xf32> to vector<286x3xf32>
    %50 = arith.truncf %49 : vector<286x3xf32> to vector<286x3xbf16>
    %c8 = arith.constant 8 : index
    %c0_26 = arith.constant 0 : index
    %c0_27 = arith.constant 0 : index
    %51 = vector.load %arg2[%c8, %c0_26, %c0_27] : memref<9x3x16xbf16, #tpu.memory_space<vmem>>, vector<1x3x16xbf16>
    %52 = vector.shape_cast %51 : vector<1x3x16xbf16> to vector<3x16xbf16>
    %cst_28 = arith.constant dense<0.000000e+00> : vector<286x16xf32>
    %53 = tpu.matmul %50, %52, %cst_28 {dimension_numbers = #tpu.dot_dimension_numbers<[1], [0], [0], [1], [0, 0, 1, 1], [], []>} : vector<286x3xbf16>, vector<3x16xbf16>, vector<286x16xf32> -> vector<286x16xf32>
    %54 = arith.addf %48, %53 : vector<286x16xf32>
    %c0_29 = arith.constant 0 : index
    %c0_30 = arith.constant 0 : index
    %55 = vector.load %arg3[%c0_29, %c0_30] : memref<1x16xf32, #tpu.memory_space<vmem>>, vector<1x16xf32>
    %56 = vector.broadcast %55 : vector<1x16xf32> to vector<286x16xf32>
    %57 = arith.addf %54, %56 : vector<286x16xf32>
    %c0_31 = arith.constant 0 : index
    %c0_32 = arith.constant 0 : index
    %c0_33 = arith.constant 0 : index
    %58 = vector.load %arg4[%c0_31, %c0_32, %c0_33] : memref<1x286x16xf32, #tpu.memory_space<vmem>>, vector<1x286x16xf32>
    %59 = vector.shape_cast %58 : vector<1x286x16xf32> to vector<286x16xf32>
    %60 = vector.shape_cast %57 : vector<286x16xf32> to vector<1x286x16xf32>
    tpu.vector_store %arg4[%c0_31, %c0_32, %c0_33], %60 {strides = array<i32>} : memref<1x286x16xf32, #tpu.memory_space<vmem>>, vector<1x286x16xf32>,
    return
  }
  func.func @transform_0(%arg0: i32) -> (i32, i32, i32) {
    %c0_i32 = arith.constant 0 : i32
    %c0_i32_0 = arith.constant 0 : i32
    %c0_i32_1 = arith.constant 0 : i32
    return %arg0, %c0_i32, %c0_i32_0 : i32, i32, i32
  }
  func.func @transform_1(%arg0: i32) -> (i32, i32, i32) {
    %c0_i32 = arith.constant 0 : i32
    %c0_i32_0 = arith.constant 0 : i32
    %c0_i32_1 = arith.constant 0 : i32
    %c0_i32_2 = arith.constant 0 : i32
    return %c0_i32, %c0_i32_0, %c0_i32_1 : i32, i32, i32
  }
  func.func @transform_2(%arg0: i32) -> (i32, i32) {
    %c0_i32 = arith.constant 0 : i32
    %c0_i32_0 = arith.constant 0 : i32
    %c0_i32_1 = arith.constant 0 : i32
    return %c0_i32, %c0_i32_0 : i32, i32
  }
  func.func @transform_3(%arg0: i32) -> (i32, i32, i32) {
    %c0_i32 = arith.constant 0 : i32
    %c0_i32_0 = arith.constant 0 : i32
    %c0_i32_1 = arith.constant 0 : i32
    return %arg0, %c0_i32, %c0_i32_0 : i32, i32, i32
  }
}

module attributes {stable_mosaic.version = 11 : i64} {
  func.func @_maxpool_kernel(%arg0: i32, %arg1: memref<1x9x9x16xf32, #tpu.memory_space<vmem>>, %arg2: memref<1x9x9x16xf32, #tpu.memory_space<vmem>>, %arg3: memref<1x9x9x16xf32, #tpu.memory_space<vmem>>, %arg4: memref<1x9x9x16xf32, #tpu.memory_space<vmem>>, %arg5: memref<1x8x8x16xf32, #tpu.memory_space<vmem>>) attributes {dimension_semantics = [#tpu.dimension_semantics<parallel>], iteration_bounds = array<i64: 2>, scalar_prefetch = 0 : i64, scratch_operands = 0 : i64, tpu.core_type = #tpu.core_type<tc>, window_params = [{transform_indices = @transform_0, window_bounds = array<i64: 1, 9, 9, 16>}, {transform_indices = @transform_1, window_bounds = array<i64: 1, 9, 9, 16>}, {transform_indices = @transform_2, window_bounds = array<i64: 1, 9, 9, 16>}, {transform_indices = @transform_3, window_bounds = array<i64: 1, 9, 9, 16>}, {transform_indices = @transform_4, window_bounds = array<i64: 1, 8, 8, 16>}]} {
    %c0 = arith.constant 0 : index
    %c0_0 = arith.constant 0 : index
    %c0_1 = arith.constant 0 : index
    %c0_2 = arith.constant 0 : index
    %0 = vector.load %arg1[%c0, %c0_0, %c0_1, %c0_2] : memref<1x9x9x16xf32, #tpu.memory_space<vmem>>, vector<1x9x9x16xf32>
    %1 = vector.shape_cast %0 : vector<1x9x9x16xf32> to vector<9x9x16xf32>
    %c0_3 = arith.constant 0 : index
    %c0_4 = arith.constant 0 : index
    %c0_5 = arith.constant 0 : index
    %c0_6 = arith.constant 0 : index
    %2 = vector.load %arg2[%c0_3, %c0_4, %c0_5, %c0_6] : memref<1x9x9x16xf32, #tpu.memory_space<vmem>>, vector<1x9x9x16xf32>
    %3 = vector.shape_cast %2 : vector<1x9x9x16xf32> to vector<9x9x16xf32>
    %c0_7 = arith.constant 0 : index
    %c0_8 = arith.constant 0 : index
    %c0_9 = arith.constant 0 : index
    %c0_10 = arith.constant 0 : index
    %4 = vector.load %arg3[%c0_7, %c0_8, %c0_9, %c0_10] : memref<1x9x9x16xf32, #tpu.memory_space<vmem>>, vector<1x9x9x16xf32>
    %5 = vector.shape_cast %4 : vector<1x9x9x16xf32> to vector<9x9x16xf32>
    %c0_11 = arith.constant 0 : index
    %c0_12 = arith.constant 0 : index
    %c0_13 = arith.constant 0 : index
    %c0_14 = arith.constant 0 : index
    %6 = vector.load %arg4[%c0_11, %c0_12, %c0_13, %c0_14] : memref<1x9x9x16xf32, #tpu.memory_space<vmem>>, vector<1x9x9x16xf32>
    %7 = vector.shape_cast %6 : vector<1x9x9x16xf32> to vector<9x9x16xf32>
    %8 = vector.extract_strided_slice %1 {offsets = [0, 0, 0], sizes = [8, 8, 16], strides = [1, 1, 1]} : vector<9x9x16xf32> to vector<8x8x16xf32>
    %9 = vector.extract_strided_slice %1 {offsets = [0, 1, 0], sizes = [8, 8, 16], strides = [1, 1, 1]} : vector<9x9x16xf32> to vector<8x8x16xf32>
    %10 = arith.maximumf %8, %9 : vector<8x8x16xf32>
    %11 = vector.extract_strided_slice %1 {offsets = [1, 0, 0], sizes = [8, 8, 16], strides = [1, 1, 1]} : vector<9x9x16xf32> to vector<8x8x16xf32>
    %12 = arith.maximumf %10, %11 : vector<8x8x16xf32>
    %13 = vector.extract_strided_slice %1 {offsets = [1, 1, 0], sizes = [8, 8, 16], strides = [1, 1, 1]} : vector<9x9x16xf32> to vector<8x8x16xf32>
    %14 = arith.maximumf %12, %13 : vector<8x8x16xf32>
    %15 = vector.extract_strided_slice %3 {offsets = [0, 0, 0], sizes = [8, 8, 16], strides = [1, 1, 1]} : vector<9x9x16xf32> to vector<8x8x16xf32>
    %16 = arith.maximumf %14, %15 : vector<8x8x16xf32>
    %17 = vector.extract_strided_slice %3 {offsets = [1, 0, 0], sizes = [8, 8, 16], strides = [1, 1, 1]} : vector<9x9x16xf32> to vector<8x8x16xf32>
    %18 = arith.maximumf %16, %17 : vector<8x8x16xf32>
    %19 = vector.extract_strided_slice %5 {offsets = [0, 0, 0], sizes = [8, 8, 16], strides = [1, 1, 1]} : vector<9x9x16xf32> to vector<8x8x16xf32>
    %20 = arith.maximumf %18, %19 : vector<8x8x16xf32>
    %21 = vector.extract_strided_slice %5 {offsets = [0, 1, 0], sizes = [8, 8, 16], strides = [1, 1, 1]} : vector<9x9x16xf32> to vector<8x8x16xf32>
    %22 = arith.maximumf %20, %21 : vector<8x8x16xf32>
    %23 = vector.extract_strided_slice %7 {offsets = [0, 0, 0], sizes = [8, 8, 16], strides = [1, 1, 1]} : vector<9x9x16xf32> to vector<8x8x16xf32>
    %24 = arith.maximumf %22, %23 : vector<8x8x16xf32>
    %c0_15 = arith.constant 0 : index
    %c0_16 = arith.constant 0 : index
    %c0_17 = arith.constant 0 : index
    %c0_18 = arith.constant 0 : index
    %25 = vector.load %arg5[%c0_15, %c0_16, %c0_17, %c0_18] : memref<1x8x8x16xf32, #tpu.memory_space<vmem>>, vector<1x8x8x16xf32>
    %26 = vector.shape_cast %25 : vector<1x8x8x16xf32> to vector<8x8x16xf32>
    %27 = vector.shape_cast %24 : vector<8x8x16xf32> to vector<1x8x8x16xf32>
    tpu.vector_store %arg5[%c0_15, %c0_16, %c0_17, %c0_18], %27 {strides = array<i32>} : memref<1x8x8x16xf32, #tpu.memory_space<vmem>>, vector<1x8x8x16xf32>,
    return
  }
  func.func @transform_0(%arg0: i32) -> (i32, i32, i32, i32) {
    %c0_i32 = arith.constant 0 : i32
    %c0_i32_0 = arith.constant 0 : i32
    %c0_i32_1 = arith.constant 0 : i32
    %c0_i32_2 = arith.constant 0 : i32
    return %arg0, %c0_i32, %c0_i32_0, %c0_i32_1 : i32, i32, i32, i32
  }
  func.func @transform_1(%arg0: i32) -> (i32, i32, i32, i32) {
    %c0_i32 = arith.constant 0 : i32
    %c0_i32_0 = arith.constant 0 : i32
    %c0_i32_1 = arith.constant 0 : i32
    %c0_i32_2 = arith.constant 0 : i32
    return %arg0, %c0_i32, %c0_i32_0, %c0_i32_1 : i32, i32, i32, i32
  }
  func.func @transform_2(%arg0: i32) -> (i32, i32, i32, i32) {
    %c0_i32 = arith.constant 0 : i32
    %c0_i32_0 = arith.constant 0 : i32
    %c0_i32_1 = arith.constant 0 : i32
    %c0_i32_2 = arith.constant 0 : i32
    return %arg0, %c0_i32, %c0_i32_0, %c0_i32_1 : i32, i32, i32, i32
  }
  func.func @transform_3(%arg0: i32) -> (i32, i32, i32, i32) {
    %c0_i32 = arith.constant 0 : i32
    %c0_i32_0 = arith.constant 0 : i32
    %c0_i32_1 = arith.constant 0 : i32
    %c0_i32_2 = arith.constant 0 : i32
    return %arg0, %c0_i32, %c0_i32_0, %c0_i32_1 : i32, i32, i32, i32
  }
  func.func @transform_4(%arg0: i32) -> (i32, i32, i32, i32) {
    %c0_i32 = arith.constant 0 : i32
    %c0_i32_0 = arith.constant 0 : i32
    %c0_i32_1 = arith.constant 0 : i32
    %c0_i32_2 = arith.constant 0 : i32
    return %arg0, %c0_i32, %c0_i32_0, %c0_i32_1 : i32, i32, i32, i32
  }
}

module attributes {stable_mosaic.version = 11 : i64} {
  func.func @_conv3x3_kernel(%arg0: i32, %arg1: memref<1x100x16xf32, #tpu.memory_space<vmem>>, %arg2: memref<9x16x16xbf16, #tpu.memory_space<vmem>>, %arg3: memref<1x16xf32, #tpu.memory_space<vmem>>, %arg4: memref<1x78x16xf32, #tpu.memory_space<vmem>>) attributes {dimension_semantics = [#tpu.dimension_semantics<parallel>], iteration_bounds = array<i64: 2>, scalar_prefetch = 0 : i64, scratch_operands = 0 : i64, tpu.core_type = #tpu.core_type<tc>, window_params = [{transform_indices = @transform_0, window_bounds = array<i64: 1, 100, 16>}, {pipeline_mode = #tpu.pipeline_mode<synchronous>, transform_indices = @transform_1, window_bounds = array<i64: 9, 16, 16>}, {pipeline_mode = #tpu.pipeline_mode<synchronous>, transform_indices = @transform_2, window_bounds = array<i64: 1, 16>}, {transform_indices = @transform_3, window_bounds = array<i64: 1, 78, 16>}]} {
    %c0 = arith.constant 0 : index
    %c0_0 = arith.constant 0 : index
    %c0_1 = arith.constant 0 : index
    %0 = vector.load %arg1[%c0, %c0_0, %c0_1] : memref<1x100x16xf32, #tpu.memory_space<vmem>>, vector<1x100x16xf32>
    %1 = vector.shape_cast %0 : vector<1x100x16xf32> to vector<100x16xf32>
    %cst = arith.constant 0.000000e+00 : f32
    %2 = vector.broadcast %cst : f32 to vector<100x16xf32>
    %3 = arith.maximumf %1, %2 : vector<100x16xf32>
    %4 = vector.extract_strided_slice %3 {offsets = [0, 0], sizes = [78, 16], strides = [1, 1]} : vector<100x16xf32> to vector<78x16xf32>
    %5 = arith.truncf %4 : vector<78x16xf32> to vector<78x16xbf16>
    %c0_2 = arith.constant 0 : index
    %c0_3 = arith.constant 0 : index
    %c0_4 = arith.constant 0 : index
    %6 = vector.load %arg2[%c0_2, %c0_3, %c0_4] : memref<9x16x16xbf16, #tpu.memory_space<vmem>>, vector<1x16x16xbf16>
    %7 = vector.shape_cast %6 : vector<1x16x16xbf16> to vector<16x16xbf16>
    %cst_5 = arith.constant dense<0.000000e+00> : vector<78x16xf32>
    %8 = tpu.matmul %5, %7, %cst_5 {dimension_numbers = #tpu.dot_dimension_numbers<[1], [0], [0], [1], [0, 0, 1, 1], [], []>} : vector<78x16xbf16>, vector<16x16xbf16>, vector<78x16xf32> -> vector<78x16xf32>
    %9 = vector.extract_strided_slice %3 {offsets = [1, 0], sizes = [78, 16], strides = [1, 1]} : vector<100x16xf32> to vector<78x16xf32>
    %10 = arith.truncf %9 : vector<78x16xf32> to vector<78x16xbf16>
    %c1 = arith.constant 1 : index
    %c0_6 = arith.constant 0 : index
    %c0_7 = arith.constant 0 : index
    %11 = vector.load %arg2[%c1, %c0_6, %c0_7] : memref<9x16x16xbf16, #tpu.memory_space<vmem>>, vector<1x16x16xbf16>
    %12 = vector.shape_cast %11 : vector<1x16x16xbf16> to vector<16x16xbf16>
    %cst_8 = arith.constant dense<0.000000e+00> : vector<78x16xf32>
    %13 = tpu.matmul %10, %12, %cst_8 {dimension_numbers = #tpu.dot_dimension_numbers<[1], [0], [0], [1], [0, 0, 1, 1], [], []>} : vector<78x16xbf16>, vector<16x16xbf16>, vector<78x16xf32> -> vector<78x16xf32>
    %14 = arith.addf %8, %13 : vector<78x16xf32>
    %15 = vector.extract_strided_slice %3 {offsets = [2, 0], sizes = [78, 16], strides = [1, 1]} : vector<100x16xf32> to vector<78x16xf32>
    %16 = arith.truncf %15 : vector<78x16xf32> to vector<78x16xbf16>
    %c2 = arith.constant 2 : index
    %c0_9 = arith.constant 0 : index
    %c0_10 = arith.constant 0 : index
    %17 = vector.load %arg2[%c2, %c0_9, %c0_10] : memref<9x16x16xbf16, #tpu.memory_space<vmem>>, vector<1x16x16xbf16>
    %18 = vector.shape_cast %17 : vector<1x16x16xbf16> to vector<16x16xbf16>
    %cst_11 = arith.constant dense<0.000000e+00> : vector<78x16xf32>
    %19 = tpu.matmul %16, %18, %cst_11 {dimension_numbers = #tpu.dot_dimension_numbers<[1], [0], [0], [1], [0, 0, 1, 1], [], []>} : vector<78x16xbf16>, vector<16x16xbf16>, vector<78x16xf32> -> vector<78x16xf32>
    %20 = arith.addf %14, %19 : vector<78x16xf32>
    %21 = vector.extract_strided_slice %3 {offsets = [10, 0], sizes = [78, 16], strides = [1, 1]} : vector<100x16xf32> to vector<78x16xf32>
    %22 = arith.truncf %21 : vector<78x16xf32> to vector<78x16xbf16>
    %c3 = arith.constant 3 : index
    %c0_12 = arith.constant 0 : index
    %c0_13 = arith.constant 0 : index
    %23 = vector.load %arg2[%c3, %c0_12, %c0_13] : memref<9x16x16xbf16, #tpu.memory_space<vmem>>, vector<1x16x16xbf16>
    %24 = vector.shape_cast %23 : vector<1x16x16xbf16> to vector<16x16xbf16>
    %cst_14 = arith.constant dense<0.000000e+00> : vector<78x16xf32>
    %25 = tpu.matmul %22, %24, %cst_14 {dimension_numbers = #tpu.dot_dimension_numbers<[1], [0], [0], [1], [0, 0, 1, 1], [], []>} : vector<78x16xbf16>, vector<16x16xbf16>, vector<78x16xf32> -> vector<78x16xf32>
    %26 = arith.addf %20, %25 : vector<78x16xf32>
    %27 = vector.extract_strided_slice %3 {offsets = [11, 0], sizes = [78, 16], strides = [1, 1]} : vector<100x16xf32> to vector<78x16xf32>
    %28 = arith.truncf %27 : vector<78x16xf32> to vector<78x16xbf16>
    %c4 = arith.constant 4 : index
    %c0_15 = arith.constant 0 : index
    %c0_16 = arith.constant 0 : index
    %29 = vector.load %arg2[%c4, %c0_15, %c0_16] : memref<9x16x16xbf16, #tpu.memory_space<vmem>>, vector<1x16x16xbf16>
    %30 = vector.shape_cast %29 : vector<1x16x16xbf16> to vector<16x16xbf16>
    %cst_17 = arith.constant dense<0.000000e+00> : vector<78x16xf32>
    %31 = tpu.matmul %28, %30, %cst_17 {dimension_numbers = #tpu.dot_dimension_numbers<[1], [0], [0], [1], [0, 0, 1, 1], [], []>} : vector<78x16xbf16>, vector<16x16xbf16>, vector<78x16xf32> -> vector<78x16xf32>
    %32 = arith.addf %26, %31 : vector<78x16xf32>
    %33 = vector.extract_strided_slice %3 {offsets = [12, 0], sizes = [78, 16], strides = [1, 1]} : vector<100x16xf32> to vector<78x16xf32>
    %34 = arith.truncf %33 : vector<78x16xf32> to vector<78x16xbf16>
    %c5 = arith.constant 5 : index
    %c0_18 = arith.constant 0 : index
    %c0_19 = arith.constant 0 : index
    %35 = vector.load %arg2[%c5, %c0_18, %c0_19] : memref<9x16x16xbf16, #tpu.memory_space<vmem>>, vector<1x16x16xbf16>
    %36 = vector.shape_cast %35 : vector<1x16x16xbf16> to vector<16x16xbf16>
    %cst_20 = arith.constant dense<0.000000e+00> : vector<78x16xf32>
    %37 = tpu.matmul %34, %36, %cst_20 {dimension_numbers = #tpu.dot_dimension_numbers<[1], [0], [0], [1], [0, 0, 1, 1], [], []>} : vector<78x16xbf16>, vector<16x16xbf16>, vector<78x16xf32> -> vector<78x16xf32>
    %38 = arith.addf %32, %37 : vector<78x16xf32>
    %39 = vector.extract_strided_slice %3 {offsets = [20, 0], sizes = [78, 16], strides = [1, 1]} : vector<100x16xf32> to vector<78x16xf32>
    %40 = arith.truncf %39 : vector<78x16xf32> to vector<78x16xbf16>
    %c6 = arith.constant 6 : index
    %c0_21 = arith.constant 0 : index
    %c0_22 = arith.constant 0 : index
    %41 = vector.load %arg2[%c6, %c0_21, %c0_22] : memref<9x16x16xbf16, #tpu.memory_space<vmem>>, vector<1x16x16xbf16>
    %42 = vector.shape_cast %41 : vector<1x16x16xbf16> to vector<16x16xbf16>
    %cst_23 = arith.constant dense<0.000000e+00> : vector<78x16xf32>
    %43 = tpu.matmul %40, %42, %cst_23 {dimension_numbers = #tpu.dot_dimension_numbers<[1], [0], [0], [1], [0, 0, 1, 1], [], []>} : vector<78x16xbf16>, vector<16x16xbf16>, vector<78x16xf32> -> vector<78x16xf32>
    %44 = arith.addf %38, %43 : vector<78x16xf32>
    %45 = vector.extract_strided_slice %3 {offsets = [21, 0], sizes = [78, 16], strides = [1, 1]} : vector<100x16xf32> to vector<78x16xf32>
    %46 = arith.truncf %45 : vector<78x16xf32> to vector<78x16xbf16>
    %c7 = arith.constant 7 : index
    %c0_24 = arith.constant 0 : index
    %c0_25 = arith.constant 0 : index
    %47 = vector.load %arg2[%c7, %c0_24, %c0_25] : memref<9x16x16xbf16, #tpu.memory_space<vmem>>, vector<1x16x16xbf16>
    %48 = vector.shape_cast %47 : vector<1x16x16xbf16> to vector<16x16xbf16>
    %cst_26 = arith.constant dense<0.000000e+00> : vector<78x16xf32>
    %49 = tpu.matmul %46, %48, %cst_26 {dimension_numbers = #tpu.dot_dimension_numbers<[1], [0], [0], [1], [0, 0, 1, 1], [], []>} : vector<78x16xbf16>, vector<16x16xbf16>, vector<78x16xf32> -> vector<78x16xf32>
    %50 = arith.addf %44, %49 : vector<78x16xf32>
    %51 = vector.extract_strided_slice %3 {offsets = [22, 0], sizes = [78, 16], strides = [1, 1]} : vector<100x16xf32> to vector<78x16xf32>
    %52 = arith.truncf %51 : vector<78x16xf32> to vector<78x16xbf16>
    %c8 = arith.constant 8 : index
    %c0_27 = arith.constant 0 : index
    %c0_28 = arith.constant 0 : index
    %53 = vector.load %arg2[%c8, %c0_27, %c0_28] : memref<9x16x16xbf16, #tpu.memory_space<vmem>>, vector<1x16x16xbf16>
    %54 = vector.shape_cast %53 : vector<1x16x16xbf16> to vector<16x16xbf16>
    %cst_29 = arith.constant dense<0.000000e+00> : vector<78x16xf32>
    %55 = tpu.matmul %52, %54, %cst_29 {dimension_numbers = #tpu.dot_dimension_numbers<[1], [0], [0], [1], [0, 0, 1, 1], [], []>} : vector<78x16xbf16>, vector<16x16xbf16>, vector<78x16xf32> -> vector<78x16xf32>
    %56 = arith.addf %50, %55 : vector<78x16xf32>
    %c0_30 = arith.constant 0 : index
    %c0_31 = arith.constant 0 : index
    %57 = vector.load %arg3[%c0_30, %c0_31] : memref<1x16xf32, #tpu.memory_space<vmem>>, vector<1x16xf32>
    %58 = vector.broadcast %57 : vector<1x16xf32> to vector<78x16xf32>
    %59 = arith.addf %56, %58 : vector<78x16xf32>
    %cst_32 = arith.constant 0.000000e+00 : f32
    %60 = vector.broadcast %cst_32 : f32 to vector<78x16xf32>
    %61 = arith.maximumf %59, %60 : vector<78x16xf32>
    %c0_33 = arith.constant 0 : index
    %c0_34 = arith.constant 0 : index
    %c0_35 = arith.constant 0 : index
    %62 = vector.load %arg4[%c0_33, %c0_34, %c0_35] : memref<1x78x16xf32, #tpu.memory_space<vmem>>, vector<1x78x16xf32>
    %63 = vector.shape_cast %62 : vector<1x78x16xf32> to vector<78x16xf32>
    %64 = vector.shape_cast %61 : vector<78x16xf32> to vector<1x78x16xf32>
    tpu.vector_store %arg4[%c0_33, %c0_34, %c0_35], %64 {strides = array<i32>} : memref<1x78x16xf32, #tpu.memory_space<vmem>>, vector<1x78x16xf32>,
    return
  }
  func.func @transform_0(%arg0: i32) -> (i32, i32, i32) {
    %c0_i32 = arith.constant 0 : i32
    %c0_i32_0 = arith.constant 0 : i32
    %c0_i32_1 = arith.constant 0 : i32
    return %arg0, %c0_i32, %c0_i32_0 : i32, i32, i32
  }
  func.func @transform_1(%arg0: i32) -> (i32, i32, i32) {
    %c0_i32 = arith.constant 0 : i32
    %c0_i32_0 = arith.constant 0 : i32
    %c0_i32_1 = arith.constant 0 : i32
    %c0_i32_2 = arith.constant 0 : i32
    return %c0_i32, %c0_i32_0, %c0_i32_1 : i32, i32, i32
  }
  func.func @transform_2(%arg0: i32) -> (i32, i32) {
    %c0_i32 = arith.constant 0 : i32
    %c0_i32_0 = arith.constant 0 : i32
    %c0_i32_1 = arith.constant 0 : i32
    return %c0_i32, %c0_i32_0 : i32, i32
  }
  func.func @transform_3(%arg0: i32) -> (i32, i32, i32) {
    %c0_i32 = arith.constant 0 : i32
    %c0_i32_0 = arith.constant 0 : i32
    %c0_i32_1 = arith.constant 0 : i32
    return %arg0, %c0_i32, %c0_i32_0 : i32, i32, i32
  }
}

module attributes {stable_mosaic.version = 11 : i64} {
  func.func @_conv3x3_kernel(%arg0: i32, %arg1: memref<1x100x16xf32, #tpu.memory_space<vmem>>, %arg2: memref<9x16x16xbf16, #tpu.memory_space<vmem>>, %arg3: memref<1x16xf32, #tpu.memory_space<vmem>>, %arg4: memref<1x78x16xf32, #tpu.memory_space<vmem>>, %arg5: memref<1x78x16xf32, #tpu.memory_space<vmem>>) attributes {dimension_semantics = [#tpu.dimension_semantics<parallel>], iteration_bounds = array<i64: 2>, scalar_prefetch = 0 : i64, scratch_operands = 0 : i64, tpu.core_type = #tpu.core_type<tc>, window_params = [{transform_indices = @transform_0, window_bounds = array<i64: 1, 100, 16>}, {pipeline_mode = #tpu.pipeline_mode<synchronous>, transform_indices = @transform_1, window_bounds = array<i64: 9, 16, 16>}, {pipeline_mode = #tpu.pipeline_mode<synchronous>, transform_indices = @transform_2, window_bounds = array<i64: 1, 16>}, {transform_indices = @transform_3, window_bounds = array<i64: 1, 78, 16>}, {transform_indices = @transform_4, window_bounds = array<i64: 1, 78, 16>}]} {
    %c0 = arith.constant 0 : index
    %c0_0 = arith.constant 0 : index
    %c0_1 = arith.constant 0 : index
    %0 = vector.load %arg1[%c0, %c0_0, %c0_1] : memref<1x100x16xf32, #tpu.memory_space<vmem>>, vector<1x100x16xf32>
    %1 = vector.shape_cast %0 : vector<1x100x16xf32> to vector<100x16xf32>
    %2 = vector.extract_strided_slice %1 {offsets = [0, 0], sizes = [78, 16], strides = [1, 1]} : vector<100x16xf32> to vector<78x16xf32>
    %3 = arith.truncf %2 : vector<78x16xf32> to vector<78x16xbf16>
    %c0_2 = arith.constant 0 : index
    %c0_3 = arith.constant 0 : index
    %c0_4 = arith.constant 0 : index
    %4 = vector.load %arg2[%c0_2, %c0_3, %c0_4] : memref<9x16x16xbf16, #tpu.memory_space<vmem>>, vector<1x16x16xbf16>
    %5 = vector.shape_cast %4 : vector<1x16x16xbf16> to vector<16x16xbf16>
    %cst = arith.constant dense<0.000000e+00> : vector<78x16xf32>
    %6 = tpu.matmul %3, %5, %cst {dimension_numbers = #tpu.dot_dimension_numbers<[1], [0], [0], [1], [0, 0, 1, 1], [], []>} : vector<78x16xbf16>, vector<16x16xbf16>, vector<78x16xf32> -> vector<78x16xf32>
    %7 = vector.extract_strided_slice %1 {offsets = [1, 0], sizes = [78, 16], strides = [1, 1]} : vector<100x16xf32> to vector<78x16xf32>
    %8 = arith.truncf %7 : vector<78x16xf32> to vector<78x16xbf16>
    %c1 = arith.constant 1 : index
    %c0_5 = arith.constant 0 : index
    %c0_6 = arith.constant 0 : index
    %9 = vector.load %arg2[%c1, %c0_5, %c0_6] : memref<9x16x16xbf16, #tpu.memory_space<vmem>>, vector<1x16x16xbf16>
    %10 = vector.shape_cast %9 : vector<1x16x16xbf16> to vector<16x16xbf16>
    %cst_7 = arith.constant dense<0.000000e+00> : vector<78x16xf32>
    %11 = tpu.matmul %8, %10, %cst_7 {dimension_numbers = #tpu.dot_dimension_numbers<[1], [0], [0], [1], [0, 0, 1, 1], [], []>} : vector<78x16xbf16>, vector<16x16xbf16>, vector<78x16xf32> -> vector<78x16xf32>
    %12 = arith.addf %6, %11 : vector<78x16xf32>
    %13 = vector.extract_strided_slice %1 {offsets = [2, 0], sizes = [78, 16], strides = [1, 1]} : vector<100x16xf32> to vector<78x16xf32>
    %14 = arith.truncf %13 : vector<78x16xf32> to vector<78x16xbf16>
    %c2 = arith.constant 2 : index
    %c0_8 = arith.constant 0 : index
    %c0_9 = arith.constant 0 : index
    %15 = vector.load %arg2[%c2, %c0_8, %c0_9] : memref<9x16x16xbf16, #tpu.memory_space<vmem>>, vector<1x16x16xbf16>
    %16 = vector.shape_cast %15 : vector<1x16x16xbf16> to vector<16x16xbf16>
    %cst_10 = arith.constant dense<0.000000e+00> : vector<78x16xf32>
    %17 = tpu.matmul %14, %16, %cst_10 {dimension_numbers = #tpu.dot_dimension_numbers<[1], [0], [0], [1], [0, 0, 1, 1], [], []>} : vector<78x16xbf16>, vector<16x16xbf16>, vector<78x16xf32> -> vector<78x16xf32>
    %18 = arith.addf %12, %17 : vector<78x16xf32>
    %19 = vector.extract_strided_slice %1 {offsets = [10, 0], sizes = [78, 16], strides = [1, 1]} : vector<100x16xf32> to vector<78x16xf32>
    %20 = arith.truncf %19 : vector<78x16xf32> to vector<78x16xbf16>
    %c3 = arith.constant 3 : index
    %c0_11 = arith.constant 0 : index
    %c0_12 = arith.constant 0 : index
    %21 = vector.load %arg2[%c3, %c0_11, %c0_12] : memref<9x16x16xbf16, #tpu.memory_space<vmem>>, vector<1x16x16xbf16>
    %22 = vector.shape_cast %21 : vector<1x16x16xbf16> to vector<16x16xbf16>
    %cst_13 = arith.constant dense<0.000000e+00> : vector<78x16xf32>
    %23 = tpu.matmul %20, %22, %cst_13 {dimension_numbers = #tpu.dot_dimension_numbers<[1], [0], [0], [1], [0, 0, 1, 1], [], []>} : vector<78x16xbf16>, vector<16x16xbf16>, vector<78x16xf32> -> vector<78x16xf32>
    %24 = arith.addf %18, %23 : vector<78x16xf32>
    %25 = vector.extract_strided_slice %1 {offsets = [11, 0], sizes = [78, 16], strides = [1, 1]} : vector<100x16xf32> to vector<78x16xf32>
    %26 = arith.truncf %25 : vector<78x16xf32> to vector<78x16xbf16>
    %c4 = arith.constant 4 : index
    %c0_14 = arith.constant 0 : index
    %c0_15 = arith.constant 0 : index
    %27 = vector.load %arg2[%c4, %c0_14, %c0_15] : memref<9x16x16xbf16, #tpu.memory_space<vmem>>, vector<1x16x16xbf16>
    %28 = vector.shape_cast %27 : vector<1x16x16xbf16> to vector<16x16xbf16>
    %cst_16 = arith.constant dense<0.000000e+00> : vector<78x16xf32>
    %29 = tpu.matmul %26, %28, %cst_16 {dimension_numbers = #tpu.dot_dimension_numbers<[1], [0], [0], [1], [0, 0, 1, 1], [], []>} : vector<78x16xbf16>, vector<16x16xbf16>, vector<78x16xf32> -> vector<78x16xf32>
    %30 = arith.addf %24, %29 : vector<78x16xf32>
    %31 = vector.extract_strided_slice %1 {offsets = [12, 0], sizes = [78, 16], strides = [1, 1]} : vector<100x16xf32> to vector<78x16xf32>
    %32 = arith.truncf %31 : vector<78x16xf32> to vector<78x16xbf16>
    %c5 = arith.constant 5 : index
    %c0_17 = arith.constant 0 : index
    %c0_18 = arith.constant 0 : index
    %33 = vector.load %arg2[%c5, %c0_17, %c0_18] : memref<9x16x16xbf16, #tpu.memory_space<vmem>>, vector<1x16x16xbf16>
    %34 = vector.shape_cast %33 : vector<1x16x16xbf16> to vector<16x16xbf16>
    %cst_19 = arith.constant dense<0.000000e+00> : vector<78x16xf32>
    %35 = tpu.matmul %32, %34, %cst_19 {dimension_numbers = #tpu.dot_dimension_numbers<[1], [0], [0], [1], [0, 0, 1, 1], [], []>} : vector<78x16xbf16>, vector<16x16xbf16>, vector<78x16xf32> -> vector<78x16xf32>
    %36 = arith.addf %30, %35 : vector<78x16xf32>
    %37 = vector.extract_strided_slice %1 {offsets = [20, 0], sizes = [78, 16], strides = [1, 1]} : vector<100x16xf32> to vector<78x16xf32>
    %38 = arith.truncf %37 : vector<78x16xf32> to vector<78x16xbf16>
    %c6 = arith.constant 6 : index
    %c0_20 = arith.constant 0 : index
    %c0_21 = arith.constant 0 : index
    %39 = vector.load %arg2[%c6, %c0_20, %c0_21] : memref<9x16x16xbf16, #tpu.memory_space<vmem>>, vector<1x16x16xbf16>
    %40 = vector.shape_cast %39 : vector<1x16x16xbf16> to vector<16x16xbf16>
    %cst_22 = arith.constant dense<0.000000e+00> : vector<78x16xf32>
    %41 = tpu.matmul %38, %40, %cst_22 {dimension_numbers = #tpu.dot_dimension_numbers<[1], [0], [0], [1], [0, 0, 1, 1], [], []>} : vector<78x16xbf16>, vector<16x16xbf16>, vector<78x16xf32> -> vector<78x16xf32>
    %42 = arith.addf %36, %41 : vector<78x16xf32>
    %43 = vector.extract_strided_slice %1 {offsets = [21, 0], sizes = [78, 16], strides = [1, 1]} : vector<100x16xf32> to vector<78x16xf32>
    %44 = arith.truncf %43 : vector<78x16xf32> to vector<78x16xbf16>
    %c7 = arith.constant 7 : index
    %c0_23 = arith.constant 0 : index
    %c0_24 = arith.constant 0 : index
    %45 = vector.load %arg2[%c7, %c0_23, %c0_24] : memref<9x16x16xbf16, #tpu.memory_space<vmem>>, vector<1x16x16xbf16>
    %46 = vector.shape_cast %45 : vector<1x16x16xbf16> to vector<16x16xbf16>
    %cst_25 = arith.constant dense<0.000000e+00> : vector<78x16xf32>
    %47 = tpu.matmul %44, %46, %cst_25 {dimension_numbers = #tpu.dot_dimension_numbers<[1], [0], [0], [1], [0, 0, 1, 1], [], []>} : vector<78x16xbf16>, vector<16x16xbf16>, vector<78x16xf32> -> vector<78x16xf32>
    %48 = arith.addf %42, %47 : vector<78x16xf32>
    %49 = vector.extract_strided_slice %1 {offsets = [22, 0], sizes = [78, 16], strides = [1, 1]} : vector<100x16xf32> to vector<78x16xf32>
    %50 = arith.truncf %49 : vector<78x16xf32> to vector<78x16xbf16>
    %c8 = arith.constant 8 : index
    %c0_26 = arith.constant 0 : index
    %c0_27 = arith.constant 0 : index
    %51 = vector.load %arg2[%c8, %c0_26, %c0_27] : memref<9x16x16xbf16, #tpu.memory_space<vmem>>, vector<1x16x16xbf16>
    %52 = vector.shape_cast %51 : vector<1x16x16xbf16> to vector<16x16xbf16>
    %cst_28 = arith.constant dense<0.000000e+00> : vector<78x16xf32>
    %53 = tpu.matmul %50, %52, %cst_28 {dimension_numbers = #tpu.dot_dimension_numbers<[1], [0], [0], [1], [0, 0, 1, 1], [], []>} : vector<78x16xbf16>, vector<16x16xbf16>, vector<78x16xf32> -> vector<78x16xf32>
    %54 = arith.addf %48, %53 : vector<78x16xf32>
    %c0_29 = arith.constant 0 : index
    %c0_30 = arith.constant 0 : index
    %55 = vector.load %arg3[%c0_29, %c0_30] : memref<1x16xf32, #tpu.memory_space<vmem>>, vector<1x16xf32>
    %56 = vector.broadcast %55 : vector<1x16xf32> to vector<78x16xf32>
    %57 = arith.addf %54, %56 : vector<78x16xf32>
    %c0_31 = arith.constant 0 : index
    %c0_32 = arith.constant 0 : index
    %c0_33 = arith.constant 0 : index
    %58 = vector.load %arg4[%c0_31, %c0_32, %c0_33] : memref<1x78x16xf32, #tpu.memory_space<vmem>>, vector<1x78x16xf32>
    %59 = vector.shape_cast %58 : vector<1x78x16xf32> to vector<78x16xf32>
    %60 = arith.addf %57, %59 : vector<78x16xf32>
    %c0_34 = arith.constant 0 : index
    %c0_35 = arith.constant 0 : index
    %c0_36 = arith.constant 0 : index
    %61 = vector.load %arg5[%c0_34, %c0_35, %c0_36] : memref<1x78x16xf32, #tpu.memory_space<vmem>>, vector<1x78x16xf32>
    %62 = vector.shape_cast %61 : vector<1x78x16xf32> to vector<78x16xf32>
    %63 = vector.shape_cast %60 : vector<78x16xf32> to vector<1x78x16xf32>
    tpu.vector_store %arg5[%c0_34, %c0_35, %c0_36], %63 {strides = array<i32>} : memref<1x78x16xf32, #tpu.memory_space<vmem>>, vector<1x78x16xf32>,
    return
  }
  func.func @transform_0(%arg0: i32) -> (i32, i32, i32) {
    %c0_i32 = arith.constant 0 : i32
    %c0_i32_0 = arith.constant 0 : i32
    %c0_i32_1 = arith.constant 0 : i32
    return %arg0, %c0_i32, %c0_i32_0 : i32, i32, i32
  }
  func.func @transform_1(%arg0: i32) -> (i32, i32, i32) {
    %c0_i32 = arith.constant 0 : i32
    %c0_i32_0 = arith.constant 0 : i32
    %c0_i32_1 = arith.constant 0 : i32
    %c0_i32_2 = arith.constant 0 : i32
    return %c0_i32, %c0_i32_0, %c0_i32_1 : i32, i32, i32
  }
  func.func @transform_2(%arg0: i32) -> (i32, i32) {
    %c0_i32 = arith.constant 0 : i32
    %c0_i32_0 = arith.constant 0 : i32
    %c0_i32_1 = arith.constant 0 : i32
    return %c0_i32, %c0_i32_0 : i32, i32
  }
  func.func @transform_3(%arg0: i32) -> (i32, i32, i32) {
    %c0_i32 = arith.constant 0 : i32
    %c0_i32_0 = arith.constant 0 : i32
    %c0_i32_1 = arith.constant 0 : i32
    return %arg0, %c0_i32, %c0_i32_0 : i32, i32, i32
  }
  func.func @transform_4(%arg0: i32) -> (i32, i32, i32) {
    %c0_i32 = arith.constant 0 : i32
    %c0_i32_0 = arith.constant 0 : i32
    %c0_i32_1 = arith.constant 0 : i32
    return %arg0, %c0_i32, %c0_i32_0 : i32, i32, i32
  }
}

module attributes {stable_mosaic.version = 11 : i64} {
  func.func @_conv3x3_kernel(%arg0: i32, %arg1: memref<1x100x16xf32, #tpu.memory_space<vmem>>, %arg2: memref<9x16x32xbf16, #tpu.memory_space<vmem>>, %arg3: memref<1x32xf32, #tpu.memory_space<vmem>>, %arg4: memref<1x78x32xf32, #tpu.memory_space<vmem>>) attributes {dimension_semantics = [#tpu.dimension_semantics<parallel>], iteration_bounds = array<i64: 2>, scalar_prefetch = 0 : i64, scratch_operands = 0 : i64, tpu.core_type = #tpu.core_type<tc>, window_params = [{transform_indices = @transform_0, window_bounds = array<i64: 1, 100, 16>}, {pipeline_mode = #tpu.pipeline_mode<synchronous>, transform_indices = @transform_1, window_bounds = array<i64: 9, 16, 32>}, {pipeline_mode = #tpu.pipeline_mode<synchronous>, transform_indices = @transform_2, window_bounds = array<i64: 1, 32>}, {transform_indices = @transform_3, window_bounds = array<i64: 1, 78, 32>}]} {
    %c0 = arith.constant 0 : index
    %c0_0 = arith.constant 0 : index
    %c0_1 = arith.constant 0 : index
    %0 = vector.load %arg1[%c0, %c0_0, %c0_1] : memref<1x100x16xf32, #tpu.memory_space<vmem>>, vector<1x100x16xf32>
    %1 = vector.shape_cast %0 : vector<1x100x16xf32> to vector<100x16xf32>
    %2 = vector.extract_strided_slice %1 {offsets = [0, 0], sizes = [78, 16], strides = [1, 1]} : vector<100x16xf32> to vector<78x16xf32>
    %3 = arith.truncf %2 : vector<78x16xf32> to vector<78x16xbf16>
    %c0_2 = arith.constant 0 : index
    %c0_3 = arith.constant 0 : index
    %c0_4 = arith.constant 0 : index
    %4 = vector.load %arg2[%c0_2, %c0_3, %c0_4] : memref<9x16x32xbf16, #tpu.memory_space<vmem>>, vector<1x16x32xbf16>
    %5 = vector.shape_cast %4 : vector<1x16x32xbf16> to vector<16x32xbf16>
    %cst = arith.constant dense<0.000000e+00> : vector<78x32xf32>
    %6 = tpu.matmul %3, %5, %cst {dimension_numbers = #tpu.dot_dimension_numbers<[1], [0], [0], [1], [0, 0, 1, 1], [], []>} : vector<78x16xbf16>, vector<16x32xbf16>, vector<78x32xf32> -> vector<78x32xf32>
    %7 = vector.extract_strided_slice %1 {offsets = [1, 0], sizes = [78, 16], strides = [1, 1]} : vector<100x16xf32> to vector<78x16xf32>
    %8 = arith.truncf %7 : vector<78x16xf32> to vector<78x16xbf16>
    %c1 = arith.constant 1 : index
    %c0_5 = arith.constant 0 : index
    %c0_6 = arith.constant 0 : index
    %9 = vector.load %arg2[%c1, %c0_5, %c0_6] : memref<9x16x32xbf16, #tpu.memory_space<vmem>>, vector<1x16x32xbf16>
    %10 = vector.shape_cast %9 : vector<1x16x32xbf16> to vector<16x32xbf16>
    %cst_7 = arith.constant dense<0.000000e+00> : vector<78x32xf32>
    %11 = tpu.matmul %8, %10, %cst_7 {dimension_numbers = #tpu.dot_dimension_numbers<[1], [0], [0], [1], [0, 0, 1, 1], [], []>} : vector<78x16xbf16>, vector<16x32xbf16>, vector<78x32xf32> -> vector<78x32xf32>
    %12 = arith.addf %6, %11 : vector<78x32xf32>
    %13 = vector.extract_strided_slice %1 {offsets = [2, 0], sizes = [78, 16], strides = [1, 1]} : vector<100x16xf32> to vector<78x16xf32>
    %14 = arith.truncf %13 : vector<78x16xf32> to vector<78x16xbf16>
    %c2 = arith.constant 2 : index
    %c0_8 = arith.constant 0 : index
    %c0_9 = arith.constant 0 : index
    %15 = vector.load %arg2[%c2, %c0_8, %c0_9] : memref<9x16x32xbf16, #tpu.memory_space<vmem>>, vector<1x16x32xbf16>
    %16 = vector.shape_cast %15 : vector<1x16x32xbf16> to vector<16x32xbf16>
    %cst_10 = arith.constant dense<0.000000e+00> : vector<78x32xf32>
    %17 = tpu.matmul %14, %16, %cst_10 {dimension_numbers = #tpu.dot_dimension_numbers<[1], [0], [0], [1], [0, 0, 1, 1], [], []>} : vector<78x16xbf16>, vector<16x32xbf16>, vector<78x32xf32> -> vector<78x32xf32>
    %18 = arith.addf %12, %17 : vector<78x32xf32>
    %19 = vector.extract_strided_slice %1 {offsets = [10, 0], sizes = [78, 16], strides = [1, 1]} : vector<100x16xf32> to vector<78x16xf32>
    %20 = arith.truncf %19 : vector<78x16xf32> to vector<78x16xbf16>
    %c3 = arith.constant 3 : index
    %c0_11 = arith.constant 0 : index
    %c0_12 = arith.constant 0 : index
    %21 = vector.load %arg2[%c3, %c0_11, %c0_12] : memref<9x16x32xbf16, #tpu.memory_space<vmem>>, vector<1x16x32xbf16>
    %22 = vector.shape_cast %21 : vector<1x16x32xbf16> to vector<16x32xbf16>
    %cst_13 = arith.constant dense<0.000000e+00> : vector<78x32xf32>
    %23 = tpu.matmul %20, %22, %cst_13 {dimension_numbers = #tpu.dot_dimension_numbers<[1], [0], [0], [1], [0, 0, 1, 1], [], []>} : vector<78x16xbf16>, vector<16x32xbf16>, vector<78x32xf32> -> vector<78x32xf32>
    %24 = arith.addf %18, %23 : vector<78x32xf32>
    %25 = vector.extract_strided_slice %1 {offsets = [11, 0], sizes = [78, 16], strides = [1, 1]} : vector<100x16xf32> to vector<78x16xf32>
    %26 = arith.truncf %25 : vector<78x16xf32> to vector<78x16xbf16>
    %c4 = arith.constant 4 : index
    %c0_14 = arith.constant 0 : index
    %c0_15 = arith.constant 0 : index
    %27 = vector.load %arg2[%c4, %c0_14, %c0_15] : memref<9x16x32xbf16, #tpu.memory_space<vmem>>, vector<1x16x32xbf16>
    %28 = vector.shape_cast %27 : vector<1x16x32xbf16> to vector<16x32xbf16>
    %cst_16 = arith.constant dense<0.000000e+00> : vector<78x32xf32>
    %29 = tpu.matmul %26, %28, %cst_16 {dimension_numbers = #tpu.dot_dimension_numbers<[1], [0], [0], [1], [0, 0, 1, 1], [], []>} : vector<78x16xbf16>, vector<16x32xbf16>, vector<78x32xf32> -> vector<78x32xf32>
    %30 = arith.addf %24, %29 : vector<78x32xf32>
    %31 = vector.extract_strided_slice %1 {offsets = [12, 0], sizes = [78, 16], strides = [1, 1]} : vector<100x16xf32> to vector<78x16xf32>
    %32 = arith.truncf %31 : vector<78x16xf32> to vector<78x16xbf16>
    %c5 = arith.constant 5 : index
    %c0_17 = arith.constant 0 : index
    %c0_18 = arith.constant 0 : index
    %33 = vector.load %arg2[%c5, %c0_17, %c0_18] : memref<9x16x32xbf16, #tpu.memory_space<vmem>>, vector<1x16x32xbf16>
    %34 = vector.shape_cast %33 : vector<1x16x32xbf16> to vector<16x32xbf16>
    %cst_19 = arith.constant dense<0.000000e+00> : vector<78x32xf32>
    %35 = tpu.matmul %32, %34, %cst_19 {dimension_numbers = #tpu.dot_dimension_numbers<[1], [0], [0], [1], [0, 0, 1, 1], [], []>} : vector<78x16xbf16>, vector<16x32xbf16>, vector<78x32xf32> -> vector<78x32xf32>
    %36 = arith.addf %30, %35 : vector<78x32xf32>
    %37 = vector.extract_strided_slice %1 {offsets = [20, 0], sizes = [78, 16], strides = [1, 1]} : vector<100x16xf32> to vector<78x16xf32>
    %38 = arith.truncf %37 : vector<78x16xf32> to vector<78x16xbf16>
    %c6 = arith.constant 6 : index
    %c0_20 = arith.constant 0 : index
    %c0_21 = arith.constant 0 : index
    %39 = vector.load %arg2[%c6, %c0_20, %c0_21] : memref<9x16x32xbf16, #tpu.memory_space<vmem>>, vector<1x16x32xbf16>
    %40 = vector.shape_cast %39 : vector<1x16x32xbf16> to vector<16x32xbf16>
    %cst_22 = arith.constant dense<0.000000e+00> : vector<78x32xf32>
    %41 = tpu.matmul %38, %40, %cst_22 {dimension_numbers = #tpu.dot_dimension_numbers<[1], [0], [0], [1], [0, 0, 1, 1], [], []>} : vector<78x16xbf16>, vector<16x32xbf16>, vector<78x32xf32> -> vector<78x32xf32>
    %42 = arith.addf %36, %41 : vector<78x32xf32>
    %43 = vector.extract_strided_slice %1 {offsets = [21, 0], sizes = [78, 16], strides = [1, 1]} : vector<100x16xf32> to vector<78x16xf32>
    %44 = arith.truncf %43 : vector<78x16xf32> to vector<78x16xbf16>
    %c7 = arith.constant 7 : index
    %c0_23 = arith.constant 0 : index
    %c0_24 = arith.constant 0 : index
    %45 = vector.load %arg2[%c7, %c0_23, %c0_24] : memref<9x16x32xbf16, #tpu.memory_space<vmem>>, vector<1x16x32xbf16>
    %46 = vector.shape_cast %45 : vector<1x16x32xbf16> to vector<16x32xbf16>
    %cst_25 = arith.constant dense<0.000000e+00> : vector<78x32xf32>
    %47 = tpu.matmul %44, %46, %cst_25 {dimension_numbers = #tpu.dot_dimension_numbers<[1], [0], [0], [1], [0, 0, 1, 1], [], []>} : vector<78x16xbf16>, vector<16x32xbf16>, vector<78x32xf32> -> vector<78x32xf32>
    %48 = arith.addf %42, %47 : vector<78x32xf32>
    %49 = vector.extract_strided_slice %1 {offsets = [22, 0], sizes = [78, 16], strides = [1, 1]} : vector<100x16xf32> to vector<78x16xf32>
    %50 = arith.truncf %49 : vector<78x16xf32> to vector<78x16xbf16>
    %c8 = arith.constant 8 : index
    %c0_26 = arith.constant 0 : index
    %c0_27 = arith.constant 0 : index
    %51 = vector.load %arg2[%c8, %c0_26, %c0_27] : memref<9x16x32xbf16, #tpu.memory_space<vmem>>, vector<1x16x32xbf16>
    %52 = vector.shape_cast %51 : vector<1x16x32xbf16> to vector<16x32xbf16>
    %cst_28 = arith.constant dense<0.000000e+00> : vector<78x32xf32>
    %53 = tpu.matmul %50, %52, %cst_28 {dimension_numbers = #tpu.dot_dimension_numbers<[1], [0], [0], [1], [0, 0, 1, 1], [], []>} : vector<78x16xbf16>, vector<16x32xbf16>, vector<78x32xf32> -> vector<78x32xf32>
    %54 = arith.addf %48, %53 : vector<78x32xf32>
    %c0_29 = arith.constant 0 : index
    %c0_30 = arith.constant 0 : index
    %55 = vector.load %arg3[%c0_29, %c0_30] : memref<1x32xf32, #tpu.memory_space<vmem>>, vector<1x32xf32>
    %56 = vector.broadcast %55 : vector<1x32xf32> to vector<78x32xf32>
    %57 = arith.addf %54, %56 : vector<78x32xf32>
    %c0_31 = arith.constant 0 : index
    %c0_32 = arith.constant 0 : index
    %c0_33 = arith.constant 0 : index
    %58 = vector.load %arg4[%c0_31, %c0_32, %c0_33] : memref<1x78x32xf32, #tpu.memory_space<vmem>>, vector<1x78x32xf32>
    %59 = vector.shape_cast %58 : vector<1x78x32xf32> to vector<78x32xf32>
    %60 = vector.shape_cast %57 : vector<78x32xf32> to vector<1x78x32xf32>
    tpu.vector_store %arg4[%c0_31, %c0_32, %c0_33], %60 {strides = array<i32>} : memref<1x78x32xf32, #tpu.memory_space<vmem>>, vector<1x78x32xf32>,
    return
  }
  func.func @transform_0(%arg0: i32) -> (i32, i32, i32) {
    %c0_i32 = arith.constant 0 : i32
    %c0_i32_0 = arith.constant 0 : i32
    %c0_i32_1 = arith.constant 0 : i32
    return %arg0, %c0_i32, %c0_i32_0 : i32, i32, i32
  }
  func.func @transform_1(%arg0: i32) -> (i32, i32, i32) {
    %c0_i32 = arith.constant 0 : i32
    %c0_i32_0 = arith.constant 0 : i32
    %c0_i32_1 = arith.constant 0 : i32
    %c0_i32_2 = arith.constant 0 : i32
    return %c0_i32, %c0_i32_0, %c0_i32_1 : i32, i32, i32
  }
  func.func @transform_2(%arg0: i32) -> (i32, i32) {
    %c0_i32 = arith.constant 0 : i32
    %c0_i32_0 = arith.constant 0 : i32
    %c0_i32_1 = arith.constant 0 : i32
    return %c0_i32, %c0_i32_0 : i32, i32
  }
  func.func @transform_3(%arg0: i32) -> (i32, i32, i32) {
    %c0_i32 = arith.constant 0 : i32
    %c0_i32_0 = arith.constant 0 : i32
    %c0_i32_1 = arith.constant 0 : i32
    return %arg0, %c0_i32, %c0_i32_0 : i32, i32, i32
  }
}

module attributes {stable_mosaic.version = 11 : i64} {
  func.func @_maxpool_kernel(%arg0: i32, %arg1: memref<1x5x5x32xf32, #tpu.memory_space<vmem>>, %arg2: memref<1x5x5x32xf32, #tpu.memory_space<vmem>>, %arg3: memref<1x5x5x32xf32, #tpu.memory_space<vmem>>, %arg4: memref<1x5x5x32xf32, #tpu.memory_space<vmem>>, %arg5: memref<1x4x4x32xf32, #tpu.memory_space<vmem>>) attributes {dimension_semantics = [#tpu.dimension_semantics<parallel>], iteration_bounds = array<i64: 2>, scalar_prefetch = 0 : i64, scratch_operands = 0 : i64, tpu.core_type = #tpu.core_type<tc>, window_params = [{transform_indices = @transform_0, window_bounds = array<i64: 1, 5, 5, 32>}, {transform_indices = @transform_1, window_bounds = array<i64: 1, 5, 5, 32>}, {transform_indices = @transform_2, window_bounds = array<i64: 1, 5, 5, 32>}, {transform_indices = @transform_3, window_bounds = array<i64: 1, 5, 5, 32>}, {transform_indices = @transform_4, window_bounds = array<i64: 1, 4, 4, 32>}]} {
    %c0 = arith.constant 0 : index
    %c0_0 = arith.constant 0 : index
    %c0_1 = arith.constant 0 : index
    %c0_2 = arith.constant 0 : index
    %0 = vector.load %arg1[%c0, %c0_0, %c0_1, %c0_2] : memref<1x5x5x32xf32, #tpu.memory_space<vmem>>, vector<1x5x5x32xf32>
    %1 = vector.shape_cast %0 : vector<1x5x5x32xf32> to vector<5x5x32xf32>
    %c0_3 = arith.constant 0 : index
    %c0_4 = arith.constant 0 : index
    %c0_5 = arith.constant 0 : index
    %c0_6 = arith.constant 0 : index
    %2 = vector.load %arg2[%c0_3, %c0_4, %c0_5, %c0_6] : memref<1x5x5x32xf32, #tpu.memory_space<vmem>>, vector<1x5x5x32xf32>
    %3 = vector.shape_cast %2 : vector<1x5x5x32xf32> to vector<5x5x32xf32>
    %c0_7 = arith.constant 0 : index
    %c0_8 = arith.constant 0 : index
    %c0_9 = arith.constant 0 : index
    %c0_10 = arith.constant 0 : index
    %4 = vector.load %arg3[%c0_7, %c0_8, %c0_9, %c0_10] : memref<1x5x5x32xf32, #tpu.memory_space<vmem>>, vector<1x5x5x32xf32>
    %5 = vector.shape_cast %4 : vector<1x5x5x32xf32> to vector<5x5x32xf32>
    %c0_11 = arith.constant 0 : index
    %c0_12 = arith.constant 0 : index
    %c0_13 = arith.constant 0 : index
    %c0_14 = arith.constant 0 : index
    %6 = vector.load %arg4[%c0_11, %c0_12, %c0_13, %c0_14] : memref<1x5x5x32xf32, #tpu.memory_space<vmem>>, vector<1x5x5x32xf32>
    %7 = vector.shape_cast %6 : vector<1x5x5x32xf32> to vector<5x5x32xf32>
    %8 = vector.extract_strided_slice %1 {offsets = [0, 0, 0], sizes = [4, 4, 32], strides = [1, 1, 1]} : vector<5x5x32xf32> to vector<4x4x32xf32>
    %9 = vector.extract_strided_slice %1 {offsets = [0, 1, 0], sizes = [4, 4, 32], strides = [1, 1, 1]} : vector<5x5x32xf32> to vector<4x4x32xf32>
    %10 = arith.maximumf %8, %9 : vector<4x4x32xf32>
    %11 = vector.extract_strided_slice %1 {offsets = [1, 0, 0], sizes = [4, 4, 32], strides = [1, 1, 1]} : vector<5x5x32xf32> to vector<4x4x32xf32>
    %12 = arith.maximumf %10, %11 : vector<4x4x32xf32>
    %13 = vector.extract_strided_slice %1 {offsets = [1, 1, 0], sizes = [4, 4, 32], strides = [1, 1, 1]} : vector<5x5x32xf32> to vector<4x4x32xf32>
    %14 = arith.maximumf %12, %13 : vector<4x4x32xf32>
    %15 = vector.extract_strided_slice %3 {offsets = [0, 0, 0], sizes = [4, 4, 32], strides = [1, 1, 1]} : vector<5x5x32xf32> to vector<4x4x32xf32>
    %16 = arith.maximumf %14, %15 : vector<4x4x32xf32>
    %17 = vector.extract_strided_slice %3 {offsets = [1, 0, 0], sizes = [4, 4, 32], strides = [1, 1, 1]} : vector<5x5x32xf32> to vector<4x4x32xf32>
    %18 = arith.maximumf %16, %17 : vector<4x4x32xf32>
    %19 = vector.extract_strided_slice %5 {offsets = [0, 0, 0], sizes = [4, 4, 32], strides = [1, 1, 1]} : vector<5x5x32xf32> to vector<4x4x32xf32>
    %20 = arith.maximumf %18, %19 : vector<4x4x32xf32>
    %21 = vector.extract_strided_slice %5 {offsets = [0, 1, 0], sizes = [4, 4, 32], strides = [1, 1, 1]} : vector<5x5x32xf32> to vector<4x4x32xf32>
    %22 = arith.maximumf %20, %21 : vector<4x4x32xf32>
    %23 = vector.extract_strided_slice %7 {offsets = [0, 0, 0], sizes = [4, 4, 32], strides = [1, 1, 1]} : vector<5x5x32xf32> to vector<4x4x32xf32>
    %24 = arith.maximumf %22, %23 : vector<4x4x32xf32>
    %c0_15 = arith.constant 0 : index
    %c0_16 = arith.constant 0 : index
    %c0_17 = arith.constant 0 : index
    %c0_18 = arith.constant 0 : index
    %25 = vector.load %arg5[%c0_15, %c0_16, %c0_17, %c0_18] : memref<1x4x4x32xf32, #tpu.memory_space<vmem>>, vector<1x4x4x32xf32>
    %26 = vector.shape_cast %25 : vector<1x4x4x32xf32> to vector<4x4x32xf32>
    %27 = vector.shape_cast %24 : vector<4x4x32xf32> to vector<1x4x4x32xf32>
    tpu.vector_store %arg5[%c0_15, %c0_16, %c0_17, %c0_18], %27 {strides = array<i32>} : memref<1x4x4x32xf32, #tpu.memory_space<vmem>>, vector<1x4x4x32xf32>,
    return
  }
  func.func @transform_0(%arg0: i32) -> (i32, i32, i32, i32) {
    %c0_i32 = arith.constant 0 : i32
    %c0_i32_0 = arith.constant 0 : i32
    %c0_i32_1 = arith.constant 0 : i32
    %c0_i32_2 = arith.constant 0 : i32
    return %arg0, %c0_i32, %c0_i32_0, %c0_i32_1 : i32, i32, i32, i32
  }
  func.func @transform_1(%arg0: i32) -> (i32, i32, i32, i32) {
    %c0_i32 = arith.constant 0 : i32
    %c0_i32_0 = arith.constant 0 : i32
    %c0_i32_1 = arith.constant 0 : i32
    %c0_i32_2 = arith.constant 0 : i32
    return %arg0, %c0_i32, %c0_i32_0, %c0_i32_1 : i32, i32, i32, i32
  }
  func.func @transform_2(%arg0: i32) -> (i32, i32, i32, i32) {
    %c0_i32 = arith.constant 0 : i32
    %c0_i32_0 = arith.constant 0 : i32
    %c0_i32_1 = arith.constant 0 : i32
    %c0_i32_2 = arith.constant 0 : i32
    return %arg0, %c0_i32, %c0_i32_0, %c0_i32_1 : i32, i32, i32, i32
  }
  func.func @transform_3(%arg0: i32) -> (i32, i32, i32, i32) {
    %c0_i32 = arith.constant 0 : i32
    %c0_i32_0 = arith.constant 0 : i32
    %c0_i32_1 = arith.constant 0 : i32
    %c0_i32_2 = arith.constant 0 : i32
    return %arg0, %c0_i32, %c0_i32_0, %c0_i32_1 : i32, i32, i32, i32
  }
  func.func @transform_4(%arg0: i32) -> (i32, i32, i32, i32) {
    %c0_i32 = arith.constant 0 : i32
    %c0_i32_0 = arith.constant 0 : i32
    %c0_i32_1 = arith.constant 0 : i32
    %c0_i32_2 = arith.constant 0 : i32
    return %arg0, %c0_i32, %c0_i32_0, %c0_i32_1 : i32, i32, i32, i32
  }
}

module attributes {stable_mosaic.version = 11 : i64} {
  func.func @_conv3x3_kernel(%arg0: i32, %arg1: memref<1x36x32xf32, #tpu.memory_space<vmem>>, %arg2: memref<9x32x32xbf16, #tpu.memory_space<vmem>>, %arg3: memref<1x32xf32, #tpu.memory_space<vmem>>, %arg4: memref<1x22x32xf32, #tpu.memory_space<vmem>>) attributes {dimension_semantics = [#tpu.dimension_semantics<parallel>], iteration_bounds = array<i64: 2>, scalar_prefetch = 0 : i64, scratch_operands = 0 : i64, tpu.core_type = #tpu.core_type<tc>, window_params = [{transform_indices = @transform_0, window_bounds = array<i64: 1, 36, 32>}, {pipeline_mode = #tpu.pipeline_mode<synchronous>, transform_indices = @transform_1, window_bounds = array<i64: 9, 32, 32>}, {pipeline_mode = #tpu.pipeline_mode<synchronous>, transform_indices = @transform_2, window_bounds = array<i64: 1, 32>}, {transform_indices = @transform_3, window_bounds = array<i64: 1, 22, 32>}]} {
    %c0 = arith.constant 0 : index
    %c0_0 = arith.constant 0 : index
    %c0_1 = arith.constant 0 : index
    %0 = vector.load %arg1[%c0, %c0_0, %c0_1] : memref<1x36x32xf32, #tpu.memory_space<vmem>>, vector<1x36x32xf32>
    %1 = vector.shape_cast %0 : vector<1x36x32xf32> to vector<36x32xf32>
    %cst = arith.constant 0.000000e+00 : f32
    %2 = vector.broadcast %cst : f32 to vector<36x32xf32>
    %3 = arith.maximumf %1, %2 : vector<36x32xf32>
    %4 = vector.extract_strided_slice %3 {offsets = [0, 0], sizes = [22, 32], strides = [1, 1]} : vector<36x32xf32> to vector<22x32xf32>
    %5 = arith.truncf %4 : vector<22x32xf32> to vector<22x32xbf16>
    %c0_2 = arith.constant 0 : index
    %c0_3 = arith.constant 0 : index
    %c0_4 = arith.constant 0 : index
    %6 = vector.load %arg2[%c0_2, %c0_3, %c0_4] : memref<9x32x32xbf16, #tpu.memory_space<vmem>>, vector<1x32x32xbf16>
    %7 = vector.shape_cast %6 : vector<1x32x32xbf16> to vector<32x32xbf16>
    %cst_5 = arith.constant dense<0.000000e+00> : vector<22x32xf32>
    %8 = tpu.matmul %5, %7, %cst_5 {dimension_numbers = #tpu.dot_dimension_numbers<[1], [0], [0], [1], [0, 0, 1, 1], [], []>} : vector<22x32xbf16>, vector<32x32xbf16>, vector<22x32xf32> -> vector<22x32xf32>
    %9 = vector.extract_strided_slice %3 {offsets = [1, 0], sizes = [22, 32], strides = [1, 1]} : vector<36x32xf32> to vector<22x32xf32>
    %10 = arith.truncf %9 : vector<22x32xf32> to vector<22x32xbf16>
    %c1 = arith.constant 1 : index
    %c0_6 = arith.constant 0 : index
    %c0_7 = arith.constant 0 : index
    %11 = vector.load %arg2[%c1, %c0_6, %c0_7] : memref<9x32x32xbf16, #tpu.memory_space<vmem>>, vector<1x32x32xbf16>
    %12 = vector.shape_cast %11 : vector<1x32x32xbf16> to vector<32x32xbf16>
    %cst_8 = arith.constant dense<0.000000e+00> : vector<22x32xf32>
    %13 = tpu.matmul %10, %12, %cst_8 {dimension_numbers = #tpu.dot_dimension_numbers<[1], [0], [0], [1], [0, 0, 1, 1], [], []>} : vector<22x32xbf16>, vector<32x32xbf16>, vector<22x32xf32> -> vector<22x32xf32>
    %14 = arith.addf %8, %13 : vector<22x32xf32>
    %15 = vector.extract_strided_slice %3 {offsets = [2, 0], sizes = [22, 32], strides = [1, 1]} : vector<36x32xf32> to vector<22x32xf32>
    %16 = arith.truncf %15 : vector<22x32xf32> to vector<22x32xbf16>
    %c2 = arith.constant 2 : index
    %c0_9 = arith.constant 0 : index
    %c0_10 = arith.constant 0 : index
    %17 = vector.load %arg2[%c2, %c0_9, %c0_10] : memref<9x32x32xbf16, #tpu.memory_space<vmem>>, vector<1x32x32xbf16>
    %18 = vector.shape_cast %17 : vector<1x32x32xbf16> to vector<32x32xbf16>
    %cst_11 = arith.constant dense<0.000000e+00> : vector<22x32xf32>
    %19 = tpu.matmul %16, %18, %cst_11 {dimension_numbers = #tpu.dot_dimension_numbers<[1], [0], [0], [1], [0, 0, 1, 1], [], []>} : vector<22x32xbf16>, vector<32x32xbf16>, vector<22x32xf32> -> vector<22x32xf32>
    %20 = arith.addf %14, %19 : vector<22x32xf32>
    %21 = vector.extract_strided_slice %3 {offsets = [6, 0], sizes = [22, 32], strides = [1, 1]} : vector<36x32xf32> to vector<22x32xf32>
    %22 = arith.truncf %21 : vector<22x32xf32> to vector<22x32xbf16>
    %c3 = arith.constant 3 : index
    %c0_12 = arith.constant 0 : index
    %c0_13 = arith.constant 0 : index
    %23 = vector.load %arg2[%c3, %c0_12, %c0_13] : memref<9x32x32xbf16, #tpu.memory_space<vmem>>, vector<1x32x32xbf16>
    %24 = vector.shape_cast %23 : vector<1x32x32xbf16> to vector<32x32xbf16>
    %cst_14 = arith.constant dense<0.000000e+00> : vector<22x32xf32>
    %25 = tpu.matmul %22, %24, %cst_14 {dimension_numbers = #tpu.dot_dimension_numbers<[1], [0], [0], [1], [0, 0, 1, 1], [], []>} : vector<22x32xbf16>, vector<32x32xbf16>, vector<22x32xf32> -> vector<22x32xf32>
    %26 = arith.addf %20, %25 : vector<22x32xf32>
    %27 = vector.extract_strided_slice %3 {offsets = [7, 0], sizes = [22, 32], strides = [1, 1]} : vector<36x32xf32> to vector<22x32xf32>
    %28 = arith.truncf %27 : vector<22x32xf32> to vector<22x32xbf16>
    %c4 = arith.constant 4 : index
    %c0_15 = arith.constant 0 : index
    %c0_16 = arith.constant 0 : index
    %29 = vector.load %arg2[%c4, %c0_15, %c0_16] : memref<9x32x32xbf16, #tpu.memory_space<vmem>>, vector<1x32x32xbf16>
    %30 = vector.shape_cast %29 : vector<1x32x32xbf16> to vector<32x32xbf16>
    %cst_17 = arith.constant dense<0.000000e+00> : vector<22x32xf32>
    %31 = tpu.matmul %28, %30, %cst_17 {dimension_numbers = #tpu.dot_dimension_numbers<[1], [0], [0], [1], [0, 0, 1, 1], [], []>} : vector<22x32xbf16>, vector<32x32xbf16>, vector<22x32xf32> -> vector<22x32xf32>
    %32 = arith.addf %26, %31 : vector<22x32xf32>
    %33 = vector.extract_strided_slice %3 {offsets = [8, 0], sizes = [22, 32], strides = [1, 1]} : vector<36x32xf32> to vector<22x32xf32>
    %34 = arith.truncf %33 : vector<22x32xf32> to vector<22x32xbf16>
    %c5 = arith.constant 5 : index
    %c0_18 = arith.constant 0 : index
    %c0_19 = arith.constant 0 : index
    %35 = vector.load %arg2[%c5, %c0_18, %c0_19] : memref<9x32x32xbf16, #tpu.memory_space<vmem>>, vector<1x32x32xbf16>
    %36 = vector.shape_cast %35 : vector<1x32x32xbf16> to vector<32x32xbf16>
    %cst_20 = arith.constant dense<0.000000e+00> : vector<22x32xf32>
    %37 = tpu.matmul %34, %36, %cst_20 {dimension_numbers = #tpu.dot_dimension_numbers<[1], [0], [0], [1], [0, 0, 1, 1], [], []>} : vector<22x32xbf16>, vector<32x32xbf16>, vector<22x32xf32> -> vector<22x32xf32>
    %38 = arith.addf %32, %37 : vector<22x32xf32>
    %39 = vector.extract_strided_slice %3 {offsets = [12, 0], sizes = [22, 32], strides = [1, 1]} : vector<36x32xf32> to vector<22x32xf32>
    %40 = arith.truncf %39 : vector<22x32xf32> to vector<22x32xbf16>
    %c6 = arith.constant 6 : index
    %c0_21 = arith.constant 0 : index
    %c0_22 = arith.constant 0 : index
    %41 = vector.load %arg2[%c6, %c0_21, %c0_22] : memref<9x32x32xbf16, #tpu.memory_space<vmem>>, vector<1x32x32xbf16>
    %42 = vector.shape_cast %41 : vector<1x32x32xbf16> to vector<32x32xbf16>
    %cst_23 = arith.constant dense<0.000000e+00> : vector<22x32xf32>
    %43 = tpu.matmul %40, %42, %cst_23 {dimension_numbers = #tpu.dot_dimension_numbers<[1], [0], [0], [1], [0, 0, 1, 1], [], []>} : vector<22x32xbf16>, vector<32x32xbf16>, vector<22x32xf32> -> vector<22x32xf32>
    %44 = arith.addf %38, %43 : vector<22x32xf32>
    %45 = vector.extract_strided_slice %3 {offsets = [13, 0], sizes = [22, 32], strides = [1, 1]} : vector<36x32xf32> to vector<22x32xf32>
    %46 = arith.truncf %45 : vector<22x32xf32> to vector<22x32xbf16>
    %c7 = arith.constant 7 : index
    %c0_24 = arith.constant 0 : index
    %c0_25 = arith.constant 0 : index
    %47 = vector.load %arg2[%c7, %c0_24, %c0_25] : memref<9x32x32xbf16, #tpu.memory_space<vmem>>, vector<1x32x32xbf16>
    %48 = vector.shape_cast %47 : vector<1x32x32xbf16> to vector<32x32xbf16>
    %cst_26 = arith.constant dense<0.000000e+00> : vector<22x32xf32>
    %49 = tpu.matmul %46, %48, %cst_26 {dimension_numbers = #tpu.dot_dimension_numbers<[1], [0], [0], [1], [0, 0, 1, 1], [], []>} : vector<22x32xbf16>, vector<32x32xbf16>, vector<22x32xf32> -> vector<22x32xf32>
    %50 = arith.addf %44, %49 : vector<22x32xf32>
    %51 = vector.extract_strided_slice %3 {offsets = [14, 0], sizes = [22, 32], strides = [1, 1]} : vector<36x32xf32> to vector<22x32xf32>
    %52 = arith.truncf %51 : vector<22x32xf32> to vector<22x32xbf16>
    %c8 = arith.constant 8 : index
    %c0_27 = arith.constant 0 : index
    %c0_28 = arith.constant 0 : index
    %53 = vector.load %arg2[%c8, %c0_27, %c0_28] : memref<9x32x32xbf16, #tpu.memory_space<vmem>>, vector<1x32x32xbf16>
    %54 = vector.shape_cast %53 : vector<1x32x32xbf16> to vector<32x32xbf16>
    %cst_29 = arith.constant dense<0.000000e+00> : vector<22x32xf32>
    %55 = tpu.matmul %52, %54, %cst_29 {dimension_numbers = #tpu.dot_dimension_numbers<[1], [0], [0], [1], [0, 0, 1, 1], [], []>} : vector<22x32xbf16>, vector<32x32xbf16>, vector<22x32xf32> -> vector<22x32xf32>
    %56 = arith.addf %50, %55 : vector<22x32xf32>
    %c0_30 = arith.constant 0 : index
    %c0_31 = arith.constant 0 : index
    %57 = vector.load %arg3[%c0_30, %c0_31] : memref<1x32xf32, #tpu.memory_space<vmem>>, vector<1x32xf32>
    %58 = vector.broadcast %57 : vector<1x32xf32> to vector<22x32xf32>
    %59 = arith.addf %56, %58 : vector<22x32xf32>
    %cst_32 = arith.constant 0.000000e+00 : f32
    %60 = vector.broadcast %cst_32 : f32 to vector<22x32xf32>
    %61 = arith.maximumf %59, %60 : vector<22x32xf32>
    %c0_33 = arith.constant 0 : index
    %c0_34 = arith.constant 0 : index
    %c0_35 = arith.constant 0 : index
    %62 = vector.load %arg4[%c0_33, %c0_34, %c0_35] : memref<1x22x32xf32, #tpu.memory_space<vmem>>, vector<1x22x32xf32>
    %63 = vector.shape_cast %62 : vector<1x22x32xf32> to vector<22x32xf32>
    %64 = vector.shape_cast %61 : vector<22x32xf32> to vector<1x22x32xf32>
    tpu.vector_store %arg4[%c0_33, %c0_34, %c0_35], %64 {strides = array<i32>} : memref<1x22x32xf32, #tpu.memory_space<vmem>>, vector<1x22x32xf32>,
    return
  }
  func.func @transform_0(%arg0: i32) -> (i32, i32, i32) {
    %c0_i32 = arith.constant 0 : i32
    %c0_i32_0 = arith.constant 0 : i32
    %c0_i32_1 = arith.constant 0 : i32
    return %arg0, %c0_i32, %c0_i32_0 : i32, i32, i32
  }
  func.func @transform_1(%arg0: i32) -> (i32, i32, i32) {
    %c0_i32 = arith.constant 0 : i32
    %c0_i32_0 = arith.constant 0 : i32
    %c0_i32_1 = arith.constant 0 : i32
    %c0_i32_2 = arith.constant 0 : i32
    return %c0_i32, %c0_i32_0, %c0_i32_1 : i32, i32, i32
  }
  func.func @transform_2(%arg0: i32) -> (i32, i32) {
    %c0_i32 = arith.constant 0 : i32
    %c0_i32_0 = arith.constant 0 : i32
    %c0_i32_1 = arith.constant 0 : i32
    return %c0_i32, %c0_i32_0 : i32, i32
  }
  func.func @transform_3(%arg0: i32) -> (i32, i32, i32) {
    %c0_i32 = arith.constant 0 : i32
    %c0_i32_0 = arith.constant 0 : i32
    %c0_i32_1 = arith.constant 0 : i32
    return %arg0, %c0_i32, %c0_i32_0 : i32, i32, i32
  }
}

module attributes {stable_mosaic.version = 11 : i64} {
  func.func @_conv3x3_kernel(%arg0: i32, %arg1: memref<1x36x32xf32, #tpu.memory_space<vmem>>, %arg2: memref<9x32x32xbf16, #tpu.memory_space<vmem>>, %arg3: memref<1x32xf32, #tpu.memory_space<vmem>>, %arg4: memref<1x22x32xf32, #tpu.memory_space<vmem>>, %arg5: memref<1x22x32xf32, #tpu.memory_space<vmem>>) attributes {dimension_semantics = [#tpu.dimension_semantics<parallel>], iteration_bounds = array<i64: 2>, scalar_prefetch = 0 : i64, scratch_operands = 0 : i64, tpu.core_type = #tpu.core_type<tc>, window_params = [{transform_indices = @transform_0, window_bounds = array<i64: 1, 36, 32>}, {pipeline_mode = #tpu.pipeline_mode<synchronous>, transform_indices = @transform_1, window_bounds = array<i64: 9, 32, 32>}, {pipeline_mode = #tpu.pipeline_mode<synchronous>, transform_indices = @transform_2, window_bounds = array<i64: 1, 32>}, {transform_indices = @transform_3, window_bounds = array<i64: 1, 22, 32>}, {transform_indices = @transform_4, window_bounds = array<i64: 1, 22, 32>}]} {
    %c0 = arith.constant 0 : index
    %c0_0 = arith.constant 0 : index
    %c0_1 = arith.constant 0 : index
    %0 = vector.load %arg1[%c0, %c0_0, %c0_1] : memref<1x36x32xf32, #tpu.memory_space<vmem>>, vector<1x36x32xf32>
    %1 = vector.shape_cast %0 : vector<1x36x32xf32> to vector<36x32xf32>
    %2 = vector.extract_strided_slice %1 {offsets = [0, 0], sizes = [22, 32], strides = [1, 1]} : vector<36x32xf32> to vector<22x32xf32>
    %3 = arith.truncf %2 : vector<22x32xf32> to vector<22x32xbf16>
    %c0_2 = arith.constant 0 : index
    %c0_3 = arith.constant 0 : index
    %c0_4 = arith.constant 0 : index
    %4 = vector.load %arg2[%c0_2, %c0_3, %c0_4] : memref<9x32x32xbf16, #tpu.memory_space<vmem>>, vector<1x32x32xbf16>
    %5 = vector.shape_cast %4 : vector<1x32x32xbf16> to vector<32x32xbf16>
    %cst = arith.constant dense<0.000000e+00> : vector<22x32xf32>
    %6 = tpu.matmul %3, %5, %cst {dimension_numbers = #tpu.dot_dimension_numbers<[1], [0], [0], [1], [0, 0, 1, 1], [], []>} : vector<22x32xbf16>, vector<32x32xbf16>, vector<22x32xf32> -> vector<22x32xf32>
    %7 = vector.extract_strided_slice %1 {offsets = [1, 0], sizes = [22, 32], strides = [1, 1]} : vector<36x32xf32> to vector<22x32xf32>
    %8 = arith.truncf %7 : vector<22x32xf32> to vector<22x32xbf16>
    %c1 = arith.constant 1 : index
    %c0_5 = arith.constant 0 : index
    %c0_6 = arith.constant 0 : index
    %9 = vector.load %arg2[%c1, %c0_5, %c0_6] : memref<9x32x32xbf16, #tpu.memory_space<vmem>>, vector<1x32x32xbf16>
    %10 = vector.shape_cast %9 : vector<1x32x32xbf16> to vector<32x32xbf16>
    %cst_7 = arith.constant dense<0.000000e+00> : vector<22x32xf32>
    %11 = tpu.matmul %8, %10, %cst_7 {dimension_numbers = #tpu.dot_dimension_numbers<[1], [0], [0], [1], [0, 0, 1, 1], [], []>} : vector<22x32xbf16>, vector<32x32xbf16>, vector<22x32xf32> -> vector<22x32xf32>
    %12 = arith.addf %6, %11 : vector<22x32xf32>
    %13 = vector.extract_strided_slice %1 {offsets = [2, 0], sizes = [22, 32], strides = [1, 1]} : vector<36x32xf32> to vector<22x32xf32>
    %14 = arith.truncf %13 : vector<22x32xf32> to vector<22x32xbf16>
    %c2 = arith.constant 2 : index
    %c0_8 = arith.constant 0 : index
    %c0_9 = arith.constant 0 : index
    %15 = vector.load %arg2[%c2, %c0_8, %c0_9] : memref<9x32x32xbf16, #tpu.memory_space<vmem>>, vector<1x32x32xbf16>
    %16 = vector.shape_cast %15 : vector<1x32x32xbf16> to vector<32x32xbf16>
    %cst_10 = arith.constant dense<0.000000e+00> : vector<22x32xf32>
    %17 = tpu.matmul %14, %16, %cst_10 {dimension_numbers = #tpu.dot_dimension_numbers<[1], [0], [0], [1], [0, 0, 1, 1], [], []>} : vector<22x32xbf16>, vector<32x32xbf16>, vector<22x32xf32> -> vector<22x32xf32>
    %18 = arith.addf %12, %17 : vector<22x32xf32>
    %19 = vector.extract_strided_slice %1 {offsets = [6, 0], sizes = [22, 32], strides = [1, 1]} : vector<36x32xf32> to vector<22x32xf32>
    %20 = arith.truncf %19 : vector<22x32xf32> to vector<22x32xbf16>
    %c3 = arith.constant 3 : index
    %c0_11 = arith.constant 0 : index
    %c0_12 = arith.constant 0 : index
    %21 = vector.load %arg2[%c3, %c0_11, %c0_12] : memref<9x32x32xbf16, #tpu.memory_space<vmem>>, vector<1x32x32xbf16>
    %22 = vector.shape_cast %21 : vector<1x32x32xbf16> to vector<32x32xbf16>
    %cst_13 = arith.constant dense<0.000000e+00> : vector<22x32xf32>
    %23 = tpu.matmul %20, %22, %cst_13 {dimension_numbers = #tpu.dot_dimension_numbers<[1], [0], [0], [1], [0, 0, 1, 1], [], []>} : vector<22x32xbf16>, vector<32x32xbf16>, vector<22x32xf32> -> vector<22x32xf32>
    %24 = arith.addf %18, %23 : vector<22x32xf32>
    %25 = vector.extract_strided_slice %1 {offsets = [7, 0], sizes = [22, 32], strides = [1, 1]} : vector<36x32xf32> to vector<22x32xf32>
    %26 = arith.truncf %25 : vector<22x32xf32> to vector<22x32xbf16>
    %c4 = arith.constant 4 : index
    %c0_14 = arith.constant 0 : index
    %c0_15 = arith.constant 0 : index
    %27 = vector.load %arg2[%c4, %c0_14, %c0_15] : memref<9x32x32xbf16, #tpu.memory_space<vmem>>, vector<1x32x32xbf16>
    %28 = vector.shape_cast %27 : vector<1x32x32xbf16> to vector<32x32xbf16>
    %cst_16 = arith.constant dense<0.000000e+00> : vector<22x32xf32>
    %29 = tpu.matmul %26, %28, %cst_16 {dimension_numbers = #tpu.dot_dimension_numbers<[1], [0], [0], [1], [0, 0, 1, 1], [], []>} : vector<22x32xbf16>, vector<32x32xbf16>, vector<22x32xf32> -> vector<22x32xf32>
    %30 = arith.addf %24, %29 : vector<22x32xf32>
    %31 = vector.extract_strided_slice %1 {offsets = [8, 0], sizes = [22, 32], strides = [1, 1]} : vector<36x32xf32> to vector<22x32xf32>
    %32 = arith.truncf %31 : vector<22x32xf32> to vector<22x32xbf16>
    %c5 = arith.constant 5 : index
    %c0_17 = arith.constant 0 : index
    %c0_18 = arith.constant 0 : index
    %33 = vector.load %arg2[%c5, %c0_17, %c0_18] : memref<9x32x32xbf16, #tpu.memory_space<vmem>>, vector<1x32x32xbf16>
    %34 = vector.shape_cast %33 : vector<1x32x32xbf16> to vector<32x32xbf16>
    %cst_19 = arith.constant dense<0.000000e+00> : vector<22x32xf32>
    %35 = tpu.matmul %32, %34, %cst_19 {dimension_numbers = #tpu.dot_dimension_numbers<[1], [0], [0], [1], [0, 0, 1, 1], [], []>} : vector<22x32xbf16>, vector<32x32xbf16>, vector<22x32xf32> -> vector<22x32xf32>
    %36 = arith.addf %30, %35 : vector<22x32xf32>
    %37 = vector.extract_strided_slice %1 {offsets = [12, 0], sizes = [22, 32], strides = [1, 1]} : vector<36x32xf32> to vector<22x32xf32>
    %38 = arith.truncf %37 : vector<22x32xf32> to vector<22x32xbf16>
    %c6 = arith.constant 6 : index
    %c0_20 = arith.constant 0 : index
    %c0_21 = arith.constant 0 : index
    %39 = vector.load %arg2[%c6, %c0_20, %c0_21] : memref<9x32x32xbf16, #tpu.memory_space<vmem>>, vector<1x32x32xbf16>
    %40 = vector.shape_cast %39 : vector<1x32x32xbf16> to vector<32x32xbf16>
    %cst_22 = arith.constant dense<0.000000e+00> : vector<22x32xf32>
    %41 = tpu.matmul %38, %40, %cst_22 {dimension_numbers = #tpu.dot_dimension_numbers<[1], [0], [0], [1], [0, 0, 1, 1], [], []>} : vector<22x32xbf16>, vector<32x32xbf16>, vector<22x32xf32> -> vector<22x32xf32>
    %42 = arith.addf %36, %41 : vector<22x32xf32>
    %43 = vector.extract_strided_slice %1 {offsets = [13, 0], sizes = [22, 32], strides = [1, 1]} : vector<36x32xf32> to vector<22x32xf32>
    %44 = arith.truncf %43 : vector<22x32xf32> to vector<22x32xbf16>
    %c7 = arith.constant 7 : index
    %c0_23 = arith.constant 0 : index
    %c0_24 = arith.constant 0 : index
    %45 = vector.load %arg2[%c7, %c0_23, %c0_24] : memref<9x32x32xbf16, #tpu.memory_space<vmem>>, vector<1x32x32xbf16>
    %46 = vector.shape_cast %45 : vector<1x32x32xbf16> to vector<32x32xbf16>
    %cst_25 = arith.constant dense<0.000000e+00> : vector<22x32xf32>
    %47 = tpu.matmul %44, %46, %cst_25 {dimension_numbers = #tpu.dot_dimension_numbers<[1], [0], [0], [1], [0, 0, 1, 1], [], []>} : vector<22x32xbf16>, vector<32x32xbf16>, vector<22x32xf32> -> vector<22x32xf32>
    %48 = arith.addf %42, %47 : vector<22x32xf32>
    %49 = vector.extract_strided_slice %1 {offsets = [14, 0], sizes = [22, 32], strides = [1, 1]} : vector<36x32xf32> to vector<22x32xf32>
    %50 = arith.truncf %49 : vector<22x32xf32> to vector<22x32xbf16>
    %c8 = arith.constant 8 : index
    %c0_26 = arith.constant 0 : index
    %c0_27 = arith.constant 0 : index
    %51 = vector.load %arg2[%c8, %c0_26, %c0_27] : memref<9x32x32xbf16, #tpu.memory_space<vmem>>, vector<1x32x32xbf16>
    %52 = vector.shape_cast %51 : vector<1x32x32xbf16> to vector<32x32xbf16>
    %cst_28 = arith.constant dense<0.000000e+00> : vector<22x32xf32>
    %53 = tpu.matmul %50, %52, %cst_28 {dimension_numbers = #tpu.dot_dimension_numbers<[1], [0], [0], [1], [0, 0, 1, 1], [], []>} : vector<22x32xbf16>, vector<32x32xbf16>, vector<22x32xf32> -> vector<22x32xf32>
    %54 = arith.addf %48, %53 : vector<22x32xf32>
    %c0_29 = arith.constant 0 : index
    %c0_30 = arith.constant 0 : index
    %55 = vector.load %arg3[%c0_29, %c0_30] : memref<1x32xf32, #tpu.memory_space<vmem>>, vector<1x32xf32>
    %56 = vector.broadcast %55 : vector<1x32xf32> to vector<22x32xf32>
    %57 = arith.addf %54, %56 : vector<22x32xf32>
    %c0_31 = arith.constant 0 : index
    %c0_32 = arith.constant 0 : index
    %c0_33 = arith.constant 0 : index
    %58 = vector.load %arg4[%c0_31, %c0_32, %c0_33] : memref<1x22x32xf32, #tpu.memory_space<vmem>>, vector<1x22x32xf32>
    %59 = vector.shape_cast %58 : vector<1x22x32xf32> to vector<22x32xf32>
    %60 = arith.addf %57, %59 : vector<22x32xf32>
    %c0_34 = arith.constant 0 : index
    %c0_35 = arith.constant 0 : index
    %c0_36 = arith.constant 0 : index
    %61 = vector.load %arg5[%c0_34, %c0_35, %c0_36] : memref<1x22x32xf32, #tpu.memory_space<vmem>>, vector<1x22x32xf32>
    %62 = vector.shape_cast %61 : vector<1x22x32xf32> to vector<22x32xf32>
    %63 = vector.shape_cast %60 : vector<22x32xf32> to vector<1x22x32xf32>
    tpu.vector_store %arg5[%c0_34, %c0_35, %c0_36], %63 {strides = array<i32>} : memref<1x22x32xf32, #tpu.memory_space<vmem>>, vector<1x22x32xf32>,
    return
  }
  func.func @transform_0(%arg0: i32) -> (i32, i32, i32) {
    %c0_i32 = arith.constant 0 : i32
    %c0_i32_0 = arith.constant 0 : i32
    %c0_i32_1 = arith.constant 0 : i32
    return %arg0, %c0_i32, %c0_i32_0 : i32, i32, i32
  }
  func.func @transform_1(%arg0: i32) -> (i32, i32, i32) {
    %c0_i32 = arith.constant 0 : i32
    %c0_i32_0 = arith.constant 0 : i32
    %c0_i32_1 = arith.constant 0 : i32
    %c0_i32_2 = arith.constant 0 : i32
    return %c0_i32, %c0_i32_0, %c0_i32_1 : i32, i32, i32
  }
  func.func @transform_2(%arg0: i32) -> (i32, i32) {
    %c0_i32 = arith.constant 0 : i32
    %c0_i32_0 = arith.constant 0 : i32
    %c0_i32_1 = arith.constant 0 : i32
    return %c0_i32, %c0_i32_0 : i32, i32
  }
  func.func @transform_3(%arg0: i32) -> (i32, i32, i32) {
    %c0_i32 = arith.constant 0 : i32
    %c0_i32_0 = arith.constant 0 : i32
    %c0_i32_1 = arith.constant 0 : i32
    return %arg0, %c0_i32, %c0_i32_0 : i32, i32, i32
  }
  func.func @transform_4(%arg0: i32) -> (i32, i32, i32) {
    %c0_i32 = arith.constant 0 : i32
    %c0_i32_0 = arith.constant 0 : i32
    %c0_i32_1 = arith.constant 0 : i32
    return %arg0, %c0_i32, %c0_i32_0 : i32, i32, i32
  }
}

module attributes {stable_mosaic.version = 11 : i64} {
  func.func @_conv3x3_kernel(%arg0: i32, %arg1: memref<1x36x32xf32, #tpu.memory_space<vmem>>, %arg2: memref<9x32x32xbf16, #tpu.memory_space<vmem>>, %arg3: memref<1x32xf32, #tpu.memory_space<vmem>>, %arg4: memref<1x22x32xf32, #tpu.memory_space<vmem>>) attributes {dimension_semantics = [#tpu.dimension_semantics<parallel>], iteration_bounds = array<i64: 2>, scalar_prefetch = 0 : i64, scratch_operands = 0 : i64, tpu.core_type = #tpu.core_type<tc>, window_params = [{transform_indices = @transform_0, window_bounds = array<i64: 1, 36, 32>}, {pipeline_mode = #tpu.pipeline_mode<synchronous>, transform_indices = @transform_1, window_bounds = array<i64: 9, 32, 32>}, {pipeline_mode = #tpu.pipeline_mode<synchronous>, transform_indices = @transform_2, window_bounds = array<i64: 1, 32>}, {transform_indices = @transform_3, window_bounds = array<i64: 1, 22, 32>}]} {
    %c0 = arith.constant 0 : index
    %c0_0 = arith.constant 0 : index
    %c0_1 = arith.constant 0 : index
    %0 = vector.load %arg1[%c0, %c0_0, %c0_1] : memref<1x36x32xf32, #tpu.memory_space<vmem>>, vector<1x36x32xf32>
    %1 = vector.shape_cast %0 : vector<1x36x32xf32> to vector<36x32xf32>
    %2 = vector.extract_strided_slice %1 {offsets = [0, 0], sizes = [22, 32], strides = [1, 1]} : vector<36x32xf32> to vector<22x32xf32>
    %3 = arith.truncf %2 : vector<22x32xf32> to vector<22x32xbf16>
    %c0_2 = arith.constant 0 : index
    %c0_3 = arith.constant 0 : index
    %c0_4 = arith.constant 0 : index
    %4 = vector.load %arg2[%c0_2, %c0_3, %c0_4] : memref<9x32x32xbf16, #tpu.memory_space<vmem>>, vector<1x32x32xbf16>
    %5 = vector.shape_cast %4 : vector<1x32x32xbf16> to vector<32x32xbf16>
    %cst = arith.constant dense<0.000000e+00> : vector<22x32xf32>
    %6 = tpu.matmul %3, %5, %cst {dimension_numbers = #tpu.dot_dimension_numbers<[1], [0], [0], [1], [0, 0, 1, 1], [], []>} : vector<22x32xbf16>, vector<32x32xbf16>, vector<22x32xf32> -> vector<22x32xf32>
    %7 = vector.extract_strided_slice %1 {offsets = [1, 0], sizes = [22, 32], strides = [1, 1]} : vector<36x32xf32> to vector<22x32xf32>
    %8 = arith.truncf %7 : vector<22x32xf32> to vector<22x32xbf16>
    %c1 = arith.constant 1 : index
    %c0_5 = arith.constant 0 : index
    %c0_6 = arith.constant 0 : index
    %9 = vector.load %arg2[%c1, %c0_5, %c0_6] : memref<9x32x32xbf16, #tpu.memory_space<vmem>>, vector<1x32x32xbf16>
    %10 = vector.shape_cast %9 : vector<1x32x32xbf16> to vector<32x32xbf16>
    %cst_7 = arith.constant dense<0.000000e+00> : vector<22x32xf32>
    %11 = tpu.matmul %8, %10, %cst_7 {dimension_numbers = #tpu.dot_dimension_numbers<[1], [0], [0], [1], [0, 0, 1, 1], [], []>} : vector<22x32xbf16>, vector<32x32xbf16>, vector<22x32xf32> -> vector<22x32xf32>
    %12 = arith.addf %6, %11 : vector<22x32xf32>
    %13 = vector.extract_strided_slice %1 {offsets = [2, 0], sizes = [22, 32], strides = [1, 1]} : vector<36x32xf32> to vector<22x32xf32>
    %14 = arith.truncf %13 : vector<22x32xf32> to vector<22x32xbf16>
    %c2 = arith.constant 2 : index
    %c0_8 = arith.constant 0 : index
    %c0_9 = arith.constant 0 : index
    %15 = vector.load %arg2[%c2, %c0_8, %c0_9] : memref<9x32x32xbf16, #tpu.memory_space<vmem>>, vector<1x32x32xbf16>
    %16 = vector.shape_cast %15 : vector<1x32x32xbf16> to vector<32x32xbf16>
    %cst_10 = arith.constant dense<0.000000e+00> : vector<22x32xf32>
    %17 = tpu.matmul %14, %16, %cst_10 {dimension_numbers = #tpu.dot_dimension_numbers<[1], [0], [0], [1], [0, 0, 1, 1], [], []>} : vector<22x32xbf16>, vector<32x32xbf16>, vector<22x32xf32> -> vector<22x32xf32>
    %18 = arith.addf %12, %17 : vector<22x32xf32>
    %19 = vector.extract_strided_slice %1 {offsets = [6, 0], sizes = [22, 32], strides = [1, 1]} : vector<36x32xf32> to vector<22x32xf32>
    %20 = arith.truncf %19 : vector<22x32xf32> to vector<22x32xbf16>
    %c3 = arith.constant 3 : index
    %c0_11 = arith.constant 0 : index
    %c0_12 = arith.constant 0 : index
    %21 = vector.load %arg2[%c3, %c0_11, %c0_12] : memref<9x32x32xbf16, #tpu.memory_space<vmem>>, vector<1x32x32xbf16>
    %22 = vector.shape_cast %21 : vector<1x32x32xbf16> to vector<32x32xbf16>
    %cst_13 = arith.constant dense<0.000000e+00> : vector<22x32xf32>
    %23 = tpu.matmul %20, %22, %cst_13 {dimension_numbers = #tpu.dot_dimension_numbers<[1], [0], [0], [1], [0, 0, 1, 1], [], []>} : vector<22x32xbf16>, vector<32x32xbf16>, vector<22x32xf32> -> vector<22x32xf32>
    %24 = arith.addf %18, %23 : vector<22x32xf32>
    %25 = vector.extract_strided_slice %1 {offsets = [7, 0], sizes = [22, 32], strides = [1, 1]} : vector<36x32xf32> to vector<22x32xf32>
    %26 = arith.truncf %25 : vector<22x32xf32> to vector<22x32xbf16>
    %c4 = arith.constant 4 : index
    %c0_14 = arith.constant 0 : index
    %c0_15 = arith.constant 0 : index
    %27 = vector.load %arg2[%c4, %c0_14, %c0_15] : memref<9x32x32xbf16, #tpu.memory_space<vmem>>, vector<1x32x32xbf16>
    %28 = vector.shape_cast %27 : vector<1x32x32xbf16> to vector<32x32xbf16>
    %cst_16 = arith.constant dense<0.000000e+00> : vector<22x32xf32>
    %29 = tpu.matmul %26, %28, %cst_16 {dimension_numbers = #tpu.dot_dimension_numbers<[1], [0], [0], [1], [0, 0, 1, 1], [], []>} : vector<22x32xbf16>, vector<32x32xbf16>, vector<22x32xf32> -> vector<22x32xf32>
    %30 = arith.addf %24, %29 : vector<22x32xf32>
    %31 = vector.extract_strided_slice %1 {offsets = [8, 0], sizes = [22, 32], strides = [1, 1]} : vector<36x32xf32> to vector<22x32xf32>
    %32 = arith.truncf %31 : vector<22x32xf32> to vector<22x32xbf16>
    %c5 = arith.constant 5 : index
    %c0_17 = arith.constant 0 : index
    %c0_18 = arith.constant 0 : index
    %33 = vector.load %arg2[%c5, %c0_17, %c0_18] : memref<9x32x32xbf16, #tpu.memory_space<vmem>>, vector<1x32x32xbf16>
    %34 = vector.shape_cast %33 : vector<1x32x32xbf16> to vector<32x32xbf16>
    %cst_19 = arith.constant dense<0.000000e+00> : vector<22x32xf32>
    %35 = tpu.matmul %32, %34, %cst_19 {dimension_numbers = #tpu.dot_dimension_numbers<[1], [0], [0], [1], [0, 0, 1, 1], [], []>} : vector<22x32xbf16>, vector<32x32xbf16>, vector<22x32xf32> -> vector<22x32xf32>
    %36 = arith.addf %30, %35 : vector<22x32xf32>
    %37 = vector.extract_strided_slice %1 {offsets = [12, 0], sizes = [22, 32], strides = [1, 1]} : vector<36x32xf32> to vector<22x32xf32>
    %38 = arith.truncf %37 : vector<22x32xf32> to vector<22x32xbf16>
    %c6 = arith.constant 6 : index
    %c0_20 = arith.constant 0 : index
    %c0_21 = arith.constant 0 : index
    %39 = vector.load %arg2[%c6, %c0_20, %c0_21] : memref<9x32x32xbf16, #tpu.memory_space<vmem>>, vector<1x32x32xbf16>
    %40 = vector.shape_cast %39 : vector<1x32x32xbf16> to vector<32x32xbf16>
    %cst_22 = arith.constant dense<0.000000e+00> : vector<22x32xf32>
    %41 = tpu.matmul %38, %40, %cst_22 {dimension_numbers = #tpu.dot_dimension_numbers<[1], [0], [0], [1], [0, 0, 1, 1], [], []>} : vector<22x32xbf16>, vector<32x32xbf16>, vector<22x32xf32> -> vector<22x32xf32>
    %42 = arith.addf %36, %41 : vector<22x32xf32>
    %43 = vector.extract_strided_slice %1 {offsets = [13, 0], sizes = [22, 32], strides = [1, 1]} : vector<36x32xf32> to vector<22x32xf32>
    %44 = arith.truncf %43 : vector<22x32xf32> to vector<22x32xbf16>
    %c7 = arith.constant 7 : index
    %c0_23 = arith.constant 0 : index
    %c0_24 = arith.constant 0 : index
    %45 = vector.load %arg2[%c7, %c0_23, %c0_24] : memref<9x32x32xbf16, #tpu.memory_space<vmem>>, vector<1x32x32xbf16>
    %46 = vector.shape_cast %45 : vector<1x32x32xbf16> to vector<32x32xbf16>
    %cst_25 = arith.constant dense<0.000000e+00> : vector<22x32xf32>
    %47 = tpu.matmul %44, %46, %cst_25 {dimension_numbers = #tpu.dot_dimension_numbers<[1], [0], [0], [1], [0, 0, 1, 1], [], []>} : vector<22x32xbf16>, vector<32x32xbf16>, vector<22x32xf32> -> vector<22x32xf32>
    %48 = arith.addf %42, %47 : vector<22x32xf32>
    %49 = vector.extract_strided_slice %1 {offsets = [14, 0], sizes = [22, 32], strides = [1, 1]} : vector<36x32xf32> to vector<22x32xf32>
    %50 = arith.truncf %49 : vector<22x32xf32> to vector<22x32xbf16>
    %c8 = arith.constant 8 : index
    %c0_26 = arith.constant 0 : index
    %c0_27 = arith.constant 0 : index
    %51 = vector.load %arg2[%c8, %c0_26, %c0_27] : memref<9x32x32xbf16, #tpu.memory_space<vmem>>, vector<1x32x32xbf16>
    %52 = vector.shape_cast %51 : vector<1x32x32xbf16> to vector<32x32xbf16>
    %cst_28 = arith.constant dense<0.000000e+00> : vector<22x32xf32>
    %53 = tpu.matmul %50, %52, %cst_28 {dimension_numbers = #tpu.dot_dimension_numbers<[1], [0], [0], [1], [0, 0, 1, 1], [], []>} : vector<22x32xbf16>, vector<32x32xbf16>, vector<22x32xf32> -> vector<22x32xf32>
    %54 = arith.addf %48, %53 : vector<22x32xf32>
    %c0_29 = arith.constant 0 : index
    %c0_30 = arith.constant 0 : index
    %55 = vector.load %arg3[%c0_29, %c0_30] : memref<1x32xf32, #tpu.memory_space<vmem>>, vector<1x32xf32>
    %56 = vector.broadcast %55 : vector<1x32xf32> to vector<22x32xf32>
    %57 = arith.addf %54, %56 : vector<22x32xf32>
    %c0_31 = arith.constant 0 : index
    %c0_32 = arith.constant 0 : index
    %c0_33 = arith.constant 0 : index
    %58 = vector.load %arg4[%c0_31, %c0_32, %c0_33] : memref<1x22x32xf32, #tpu.memory_space<vmem>>, vector<1x22x32xf32>
    %59 = vector.shape_cast %58 : vector<1x22x32xf32> to vector<22x32xf32>
    %60 = vector.shape_cast %57 : vector<22x32xf32> to vector<1x22x32xf32>
    tpu.vector_store %arg4[%c0_31, %c0_32, %c0_33], %60 {strides = array<i32>} : memref<1x22x32xf32, #tpu.memory_space<vmem>>, vector<1x22x32xf32>,
    return
  }
  func.func @transform_0(%arg0: i32) -> (i32, i32, i32) {
    %c0_i32 = arith.constant 0 : i32
    %c0_i32_0 = arith.constant 0 : i32
    %c0_i32_1 = arith.constant 0 : i32
    return %arg0, %c0_i32, %c0_i32_0 : i32, i32, i32
  }
  func.func @transform_1(%arg0: i32) -> (i32, i32, i32) {
    %c0_i32 = arith.constant 0 : i32
    %c0_i32_0 = arith.constant 0 : i32
    %c0_i32_1 = arith.constant 0 : i32
    %c0_i32_2 = arith.constant 0 : i32
    return %c0_i32, %c0_i32_0, %c0_i32_1 : i32, i32, i32
  }
  func.func @transform_2(%arg0: i32) -> (i32, i32) {
    %c0_i32 = arith.constant 0 : i32
    %c0_i32_0 = arith.constant 0 : i32
    %c0_i32_1 = arith.constant 0 : i32
    return %c0_i32, %c0_i32_0 : i32, i32
  }
  func.func @transform_3(%arg0: i32) -> (i32, i32, i32) {
    %c0_i32 = arith.constant 0 : i32
    %c0_i32_0 = arith.constant 0 : i32
    %c0_i32_1 = arith.constant 0 : i32
    return %arg0, %c0_i32, %c0_i32_0 : i32, i32, i32
  }
}

module attributes {stable_mosaic.version = 11 : i64} {
  func.func @_maxpool_kernel(%arg0: i32, %arg1: memref<1x3x3x32xf32, #tpu.memory_space<vmem>>, %arg2: memref<1x3x3x32xf32, #tpu.memory_space<vmem>>, %arg3: memref<1x3x3x32xf32, #tpu.memory_space<vmem>>, %arg4: memref<1x3x3x32xf32, #tpu.memory_space<vmem>>, %arg5: memref<1x2x2x32xf32, #tpu.memory_space<vmem>>) attributes {dimension_semantics = [#tpu.dimension_semantics<parallel>], iteration_bounds = array<i64: 2>, scalar_prefetch = 0 : i64, scratch_operands = 0 : i64, tpu.core_type = #tpu.core_type<tc>, window_params = [{transform_indices = @transform_0, window_bounds = array<i64: 1, 3, 3, 32>}, {transform_indices = @transform_1, window_bounds = array<i64: 1, 3, 3, 32>}, {transform_indices = @transform_2, window_bounds = array<i64: 1, 3, 3, 32>}, {transform_indices = @transform_3, window_bounds = array<i64: 1, 3, 3, 32>}, {transform_indices = @transform_4, window_bounds = array<i64: 1, 2, 2, 32>}]} {
    %c0 = arith.constant 0 : index
    %c0_0 = arith.constant 0 : index
    %c0_1 = arith.constant 0 : index
    %c0_2 = arith.constant 0 : index
    %0 = vector.load %arg1[%c0, %c0_0, %c0_1, %c0_2] : memref<1x3x3x32xf32, #tpu.memory_space<vmem>>, vector<1x3x3x32xf32>
    %1 = vector.shape_cast %0 : vector<1x3x3x32xf32> to vector<3x3x32xf32>
    %c0_3 = arith.constant 0 : index
    %c0_4 = arith.constant 0 : index
    %c0_5 = arith.constant 0 : index
    %c0_6 = arith.constant 0 : index
    %2 = vector.load %arg2[%c0_3, %c0_4, %c0_5, %c0_6] : memref<1x3x3x32xf32, #tpu.memory_space<vmem>>, vector<1x3x3x32xf32>
    %3 = vector.shape_cast %2 : vector<1x3x3x32xf32> to vector<3x3x32xf32>
    %c0_7 = arith.constant 0 : index
    %c0_8 = arith.constant 0 : index
    %c0_9 = arith.constant 0 : index
    %c0_10 = arith.constant 0 : index
    %4 = vector.load %arg3[%c0_7, %c0_8, %c0_9, %c0_10] : memref<1x3x3x32xf32, #tpu.memory_space<vmem>>, vector<1x3x3x32xf32>
    %5 = vector.shape_cast %4 : vector<1x3x3x32xf32> to vector<3x3x32xf32>
    %c0_11 = arith.constant 0 : index
    %c0_12 = arith.constant 0 : index
    %c0_13 = arith.constant 0 : index
    %c0_14 = arith.constant 0 : index
    %6 = vector.load %arg4[%c0_11, %c0_12, %c0_13, %c0_14] : memref<1x3x3x32xf32, #tpu.memory_space<vmem>>, vector<1x3x3x32xf32>
    %7 = vector.shape_cast %6 : vector<1x3x3x32xf32> to vector<3x3x32xf32>
    %8 = vector.extract_strided_slice %1 {offsets = [0, 0, 0], sizes = [2, 2, 32], strides = [1, 1, 1]} : vector<3x3x32xf32> to vector<2x2x32xf32>
    %9 = vector.extract_strided_slice %1 {offsets = [0, 1, 0], sizes = [2, 2, 32], strides = [1, 1, 1]} : vector<3x3x32xf32> to vector<2x2x32xf32>
    %10 = arith.maximumf %8, %9 : vector<2x2x32xf32>
    %11 = vector.extract_strided_slice %1 {offsets = [1, 0, 0], sizes = [2, 2, 32], strides = [1, 1, 1]} : vector<3x3x32xf32> to vector<2x2x32xf32>
    %12 = arith.maximumf %10, %11 : vector<2x2x32xf32>
    %13 = vector.extract_strided_slice %1 {offsets = [1, 1, 0], sizes = [2, 2, 32], strides = [1, 1, 1]} : vector<3x3x32xf32> to vector<2x2x32xf32>
    %14 = arith.maximumf %12, %13 : vector<2x2x32xf32>
    %15 = vector.extract_strided_slice %3 {offsets = [0, 0, 0], sizes = [2, 2, 32], strides = [1, 1, 1]} : vector<3x3x32xf32> to vector<2x2x32xf32>
    %16 = arith.maximumf %14, %15 : vector<2x2x32xf32>
    %17 = vector.extract_strided_slice %3 {offsets = [1, 0, 0], sizes = [2, 2, 32], strides = [1, 1, 1]} : vector<3x3x32xf32> to vector<2x2x32xf32>
    %18 = arith.maximumf %16, %17 : vector<2x2x32xf32>
    %19 = vector.extract_strided_slice %5 {offsets = [0, 0, 0], sizes = [2, 2, 32], strides = [1, 1, 1]} : vector<3x3x32xf32> to vector<2x2x32xf32>
    %20 = arith.maximumf %18, %19 : vector<2x2x32xf32>
    %21 = vector.extract_strided_slice %5 {offsets = [0, 1, 0], sizes = [2, 2, 32], strides = [1, 1, 1]} : vector<3x3x32xf32> to vector<2x2x32xf32>
    %22 = arith.maximumf %20, %21 : vector<2x2x32xf32>
    %23 = vector.extract_strided_slice %7 {offsets = [0, 0, 0], sizes = [2, 2, 32], strides = [1, 1, 1]} : vector<3x3x32xf32> to vector<2x2x32xf32>
    %24 = arith.maximumf %22, %23 : vector<2x2x32xf32>
    %c0_15 = arith.constant 0 : index
    %c0_16 = arith.constant 0 : index
    %c0_17 = arith.constant 0 : index
    %c0_18 = arith.constant 0 : index
    %25 = vector.load %arg5[%c0_15, %c0_16, %c0_17, %c0_18] : memref<1x2x2x32xf32, #tpu.memory_space<vmem>>, vector<1x2x2x32xf32>
    %26 = vector.shape_cast %25 : vector<1x2x2x32xf32> to vector<2x2x32xf32>
    %27 = vector.shape_cast %24 : vector<2x2x32xf32> to vector<1x2x2x32xf32>
    tpu.vector_store %arg5[%c0_15, %c0_16, %c0_17, %c0_18], %27 {strides = array<i32>} : memref<1x2x2x32xf32, #tpu.memory_space<vmem>>, vector<1x2x2x32xf32>,
    return
  }
  func.func @transform_0(%arg0: i32) -> (i32, i32, i32, i32) {
    %c0_i32 = arith.constant 0 : i32
    %c0_i32_0 = arith.constant 0 : i32
    %c0_i32_1 = arith.constant 0 : i32
    %c0_i32_2 = arith.constant 0 : i32
    return %arg0, %c0_i32, %c0_i32_0, %c0_i32_1 : i32, i32, i32, i32
  }
  func.func @transform_1(%arg0: i32) -> (i32, i32, i32, i32) {
    %c0_i32 = arith.constant 0 : i32
    %c0_i32_0 = arith.constant 0 : i32
    %c0_i32_1 = arith.constant 0 : i32
    %c0_i32_2 = arith.constant 0 : i32
    return %arg0, %c0_i32, %c0_i32_0, %c0_i32_1 : i32, i32, i32, i32
  }
  func.func @transform_2(%arg0: i32) -> (i32, i32, i32, i32) {
    %c0_i32 = arith.constant 0 : i32
    %c0_i32_0 = arith.constant 0 : i32
    %c0_i32_1 = arith.constant 0 : i32
    %c0_i32_2 = arith.constant 0 : i32
    return %arg0, %c0_i32, %c0_i32_0, %c0_i32_1 : i32, i32, i32, i32
  }
  func.func @transform_3(%arg0: i32) -> (i32, i32, i32, i32) {
    %c0_i32 = arith.constant 0 : i32
    %c0_i32_0 = arith.constant 0 : i32
    %c0_i32_1 = arith.constant 0 : i32
    %c0_i32_2 = arith.constant 0 : i32
    return %arg0, %c0_i32, %c0_i32_0, %c0_i32_1 : i32, i32, i32, i32
  }
  func.func @transform_4(%arg0: i32) -> (i32, i32, i32, i32) {
    %c0_i32 = arith.constant 0 : i32
    %c0_i32_0 = arith.constant 0 : i32
    %c0_i32_1 = arith.constant 0 : i32
    %c0_i32_2 = arith.constant 0 : i32
    return %arg0, %c0_i32, %c0_i32_0, %c0_i32_1 : i32, i32, i32, i32
  }
}

module attributes {stable_mosaic.version = 11 : i64} {
  func.func @_conv3x3_kernel(%arg0: i32, %arg1: memref<1x16x32xf32, #tpu.memory_space<vmem>>, %arg2: memref<9x32x32xbf16, #tpu.memory_space<vmem>>, %arg3: memref<1x32xf32, #tpu.memory_space<vmem>>, %arg4: memref<1x6x32xf32, #tpu.memory_space<vmem>>) attributes {dimension_semantics = [#tpu.dimension_semantics<parallel>], iteration_bounds = array<i64: 2>, scalar_prefetch = 0 : i64, scratch_operands = 0 : i64, tpu.core_type = #tpu.core_type<tc>, window_params = [{transform_indices = @transform_0, window_bounds = array<i64: 1, 16, 32>}, {pipeline_mode = #tpu.pipeline_mode<synchronous>, transform_indices = @transform_1, window_bounds = array<i64: 9, 32, 32>}, {pipeline_mode = #tpu.pipeline_mode<synchronous>, transform_indices = @transform_2, window_bounds = array<i64: 1, 32>}, {transform_indices = @transform_3, window_bounds = array<i64: 1, 6, 32>}]} {
    %c0 = arith.constant 0 : index
    %c0_0 = arith.constant 0 : index
    %c0_1 = arith.constant 0 : index
    %0 = vector.load %arg1[%c0, %c0_0, %c0_1] : memref<1x16x32xf32, #tpu.memory_space<vmem>>, vector<1x16x32xf32>
    %1 = vector.shape_cast %0 : vector<1x16x32xf32> to vector<16x32xf32>
    %cst = arith.constant 0.000000e+00 : f32
    %2 = vector.broadcast %cst : f32 to vector<16x32xf32>
    %3 = arith.maximumf %1, %2 : vector<16x32xf32>
    %4 = vector.extract_strided_slice %3 {offsets = [0, 0], sizes = [6, 32], strides = [1, 1]} : vector<16x32xf32> to vector<6x32xf32>
    %5 = arith.truncf %4 : vector<6x32xf32> to vector<6x32xbf16>
    %c0_2 = arith.constant 0 : index
    %c0_3 = arith.constant 0 : index
    %c0_4 = arith.constant 0 : index
    %6 = vector.load %arg2[%c0_2, %c0_3, %c0_4] : memref<9x32x32xbf16, #tpu.memory_space<vmem>>, vector<1x32x32xbf16>
    %7 = vector.shape_cast %6 : vector<1x32x32xbf16> to vector<32x32xbf16>
    %cst_5 = arith.constant dense<0.000000e+00> : vector<6x32xf32>
    %8 = tpu.matmul %5, %7, %cst_5 {dimension_numbers = #tpu.dot_dimension_numbers<[1], [0], [0], [1], [0, 0, 1, 1], [], []>} : vector<6x32xbf16>, vector<32x32xbf16>, vector<6x32xf32> -> vector<6x32xf32>
    %9 = vector.extract_strided_slice %3 {offsets = [1, 0], sizes = [6, 32], strides = [1, 1]} : vector<16x32xf32> to vector<6x32xf32>
    %10 = arith.truncf %9 : vector<6x32xf32> to vector<6x32xbf16>
    %c1 = arith.constant 1 : index
    %c0_6 = arith.constant 0 : index
    %c0_7 = arith.constant 0 : index
    %11 = vector.load %arg2[%c1, %c0_6, %c0_7] : memref<9x32x32xbf16, #tpu.memory_space<vmem>>, vector<1x32x32xbf16>
    %12 = vector.shape_cast %11 : vector<1x32x32xbf16> to vector<32x32xbf16>
    %cst_8 = arith.constant dense<0.000000e+00> : vector<6x32xf32>
    %13 = tpu.matmul %10, %12, %cst_8 {dimension_numbers = #tpu.dot_dimension_numbers<[1], [0], [0], [1], [0, 0, 1, 1], [], []>} : vector<6x32xbf16>, vector<32x32xbf16>, vector<6x32xf32> -> vector<6x32xf32>
    %14 = arith.addf %8, %13 : vector<6x32xf32>
    %15 = vector.extract_strided_slice %3 {offsets = [2, 0], sizes = [6, 32], strides = [1, 1]} : vector<16x32xf32> to vector<6x32xf32>
    %16 = arith.truncf %15 : vector<6x32xf32> to vector<6x32xbf16>
    %c2 = arith.constant 2 : index
    %c0_9 = arith.constant 0 : index
    %c0_10 = arith.constant 0 : index
    %17 = vector.load %arg2[%c2, %c0_9, %c0_10] : memref<9x32x32xbf16, #tpu.memory_space<vmem>>, vector<1x32x32xbf16>
    %18 = vector.shape_cast %17 : vector<1x32x32xbf16> to vector<32x32xbf16>
    %cst_11 = arith.constant dense<0.000000e+00> : vector<6x32xf32>
    %19 = tpu.matmul %16, %18, %cst_11 {dimension_numbers = #tpu.dot_dimension_numbers<[1], [0], [0], [1], [0, 0, 1, 1], [], []>} : vector<6x32xbf16>, vector<32x32xbf16>, vector<6x32xf32> -> vector<6x32xf32>
    %20 = arith.addf %14, %19 : vector<6x32xf32>
    %21 = vector.extract_strided_slice %3 {offsets = [4, 0], sizes = [6, 32], strides = [1, 1]} : vector<16x32xf32> to vector<6x32xf32>
    %22 = arith.truncf %21 : vector<6x32xf32> to vector<6x32xbf16>
    %c3 = arith.constant 3 : index
    %c0_12 = arith.constant 0 : index
    %c0_13 = arith.constant 0 : index
    %23 = vector.load %arg2[%c3, %c0_12, %c0_13] : memref<9x32x32xbf16, #tpu.memory_space<vmem>>, vector<1x32x32xbf16>
    %24 = vector.shape_cast %23 : vector<1x32x32xbf16> to vector<32x32xbf16>
    %cst_14 = arith.constant dense<0.000000e+00> : vector<6x32xf32>
    %25 = tpu.matmul %22, %24, %cst_14 {dimension_numbers = #tpu.dot_dimension_numbers<[1], [0], [0], [1], [0, 0, 1, 1], [], []>} : vector<6x32xbf16>, vector<32x32xbf16>, vector<6x32xf32> -> vector<6x32xf32>
    %26 = arith.addf %20, %25 : vector<6x32xf32>
    %27 = vector.extract_strided_slice %3 {offsets = [5, 0], sizes = [6, 32], strides = [1, 1]} : vector<16x32xf32> to vector<6x32xf32>
    %28 = arith.truncf %27 : vector<6x32xf32> to vector<6x32xbf16>
    %c4 = arith.constant 4 : index
    %c0_15 = arith.constant 0 : index
    %c0_16 = arith.constant 0 : index
    %29 = vector.load %arg2[%c4, %c0_15, %c0_16] : memref<9x32x32xbf16, #tpu.memory_space<vmem>>, vector<1x32x32xbf16>
    %30 = vector.shape_cast %29 : vector<1x32x32xbf16> to vector<32x32xbf16>
    %cst_17 = arith.constant dense<0.000000e+00> : vector<6x32xf32>
    %31 = tpu.matmul %28, %30, %cst_17 {dimension_numbers = #tpu.dot_dimension_numbers<[1], [0], [0], [1], [0, 0, 1, 1], [], []>} : vector<6x32xbf16>, vector<32x32xbf16>, vector<6x32xf32> -> vector<6x32xf32>
    %32 = arith.addf %26, %31 : vector<6x32xf32>
    %33 = vector.extract_strided_slice %3 {offsets = [6, 0], sizes = [6, 32], strides = [1, 1]} : vector<16x32xf32> to vector<6x32xf32>
    %34 = arith.truncf %33 : vector<6x32xf32> to vector<6x32xbf16>
    %c5 = arith.constant 5 : index
    %c0_18 = arith.constant 0 : index
    %c0_19 = arith.constant 0 : index
    %35 = vector.load %arg2[%c5, %c0_18, %c0_19] : memref<9x32x32xbf16, #tpu.memory_space<vmem>>, vector<1x32x32xbf16>
    %36 = vector.shape_cast %35 : vector<1x32x32xbf16> to vector<32x32xbf16>
    %cst_20 = arith.constant dense<0.000000e+00> : vector<6x32xf32>
    %37 = tpu.matmul %34, %36, %cst_20 {dimension_numbers = #tpu.dot_dimension_numbers<[1], [0], [0], [1], [0, 0, 1, 1], [], []>} : vector<6x32xbf16>, vector<32x32xbf16>, vector<6x32xf32> -> vector<6x32xf32>
    %38 = arith.addf %32, %37 : vector<6x32xf32>
    %39 = vector.extract_strided_slice %3 {offsets = [8, 0], sizes = [6, 32], strides = [1, 1]} : vector<16x32xf32> to vector<6x32xf32>
    %40 = arith.truncf %39 : vector<6x32xf32> to vector<6x32xbf16>
    %c6 = arith.constant 6 : index
    %c0_21 = arith.constant 0 : index
    %c0_22 = arith.constant 0 : index
    %41 = vector.load %arg2[%c6, %c0_21, %c0_22] : memref<9x32x32xbf16, #tpu.memory_space<vmem>>, vector<1x32x32xbf16>
    %42 = vector.shape_cast %41 : vector<1x32x32xbf16> to vector<32x32xbf16>
    %cst_23 = arith.constant dense<0.000000e+00> : vector<6x32xf32>
    %43 = tpu.matmul %40, %42, %cst_23 {dimension_numbers = #tpu.dot_dimension_numbers<[1], [0], [0], [1], [0, 0, 1, 1], [], []>} : vector<6x32xbf16>, vector<32x32xbf16>, vector<6x32xf32> -> vector<6x32xf32>
    %44 = arith.addf %38, %43 : vector<6x32xf32>
    %45 = vector.extract_strided_slice %3 {offsets = [9, 0], sizes = [6, 32], strides = [1, 1]} : vector<16x32xf32> to vector<6x32xf32>
    %46 = arith.truncf %45 : vector<6x32xf32> to vector<6x32xbf16>
    %c7 = arith.constant 7 : index
    %c0_24 = arith.constant 0 : index
    %c0_25 = arith.constant 0 : index
    %47 = vector.load %arg2[%c7, %c0_24, %c0_25] : memref<9x32x32xbf16, #tpu.memory_space<vmem>>, vector<1x32x32xbf16>
    %48 = vector.shape_cast %47 : vector<1x32x32xbf16> to vector<32x32xbf16>
    %cst_26 = arith.constant dense<0.000000e+00> : vector<6x32xf32>
    %49 = tpu.matmul %46, %48, %cst_26 {dimension_numbers = #tpu.dot_dimension_numbers<[1], [0], [0], [1], [0, 0, 1, 1], [], []>} : vector<6x32xbf16>, vector<32x32xbf16>, vector<6x32xf32> -> vector<6x32xf32>
    %50 = arith.addf %44, %49 : vector<6x32xf32>
    %51 = vector.extract_strided_slice %3 {offsets = [10, 0], sizes = [6, 32], strides = [1, 1]} : vector<16x32xf32> to vector<6x32xf32>
    %52 = arith.truncf %51 : vector<6x32xf32> to vector<6x32xbf16>
    %c8 = arith.constant 8 : index
    %c0_27 = arith.constant 0 : index
    %c0_28 = arith.constant 0 : index
    %53 = vector.load %arg2[%c8, %c0_27, %c0_28] : memref<9x32x32xbf16, #tpu.memory_space<vmem>>, vector<1x32x32xbf16>
    %54 = vector.shape_cast %53 : vector<1x32x32xbf16> to vector<32x32xbf16>
    %cst_29 = arith.constant dense<0.000000e+00> : vector<6x32xf32>
    %55 = tpu.matmul %52, %54, %cst_29 {dimension_numbers = #tpu.dot_dimension_numbers<[1], [0], [0], [1], [0, 0, 1, 1], [], []>} : vector<6x32xbf16>, vector<32x32xbf16>, vector<6x32xf32> -> vector<6x32xf32>
    %56 = arith.addf %50, %55 : vector<6x32xf32>
    %c0_30 = arith.constant 0 : index
    %c0_31 = arith.constant 0 : index
    %57 = vector.load %arg3[%c0_30, %c0_31] : memref<1x32xf32, #tpu.memory_space<vmem>>, vector<1x32xf32>
    %58 = vector.broadcast %57 : vector<1x32xf32> to vector<6x32xf32>
    %59 = arith.addf %56, %58 : vector<6x32xf32>
    %cst_32 = arith.constant 0.000000e+00 : f32
    %60 = vector.broadcast %cst_32 : f32 to vector<6x32xf32>
    %61 = arith.maximumf %59, %60 : vector<6x32xf32>
    %c0_33 = arith.constant 0 : index
    %c0_34 = arith.constant 0 : index
    %c0_35 = arith.constant 0 : index
    %62 = vector.load %arg4[%c0_33, %c0_34, %c0_35] : memref<1x6x32xf32, #tpu.memory_space<vmem>>, vector<1x6x32xf32>
    %63 = vector.shape_cast %62 : vector<1x6x32xf32> to vector<6x32xf32>
    %64 = vector.shape_cast %61 : vector<6x32xf32> to vector<1x6x32xf32>
    tpu.vector_store %arg4[%c0_33, %c0_34, %c0_35], %64 {strides = array<i32>} : memref<1x6x32xf32, #tpu.memory_space<vmem>>, vector<1x6x32xf32>,
    return
  }
  func.func @transform_0(%arg0: i32) -> (i32, i32, i32) {
    %c0_i32 = arith.constant 0 : i32
    %c0_i32_0 = arith.constant 0 : i32
    %c0_i32_1 = arith.constant 0 : i32
    return %arg0, %c0_i32, %c0_i32_0 : i32, i32, i32
  }
  func.func @transform_1(%arg0: i32) -> (i32, i32, i32) {
    %c0_i32 = arith.constant 0 : i32
    %c0_i32_0 = arith.constant 0 : i32
    %c0_i32_1 = arith.constant 0 : i32
    %c0_i32_2 = arith.constant 0 : i32
    return %c0_i32, %c0_i32_0, %c0_i32_1 : i32, i32, i32
  }
  func.func @transform_2(%arg0: i32) -> (i32, i32) {
    %c0_i32 = arith.constant 0 : i32
    %c0_i32_0 = arith.constant 0 : i32
    %c0_i32_1 = arith.constant 0 : i32
    return %c0_i32, %c0_i32_0 : i32, i32
  }
  func.func @transform_3(%arg0: i32) -> (i32, i32, i32) {
    %c0_i32 = arith.constant 0 : i32
    %c0_i32_0 = arith.constant 0 : i32
    %c0_i32_1 = arith.constant 0 : i32
    return %arg0, %c0_i32, %c0_i32_0 : i32, i32, i32
  }
}

module attributes {stable_mosaic.version = 11 : i64} {
  func.func @_conv3x3_kernel(%arg0: i32, %arg1: memref<1x16x32xf32, #tpu.memory_space<vmem>>, %arg2: memref<9x32x32xbf16, #tpu.memory_space<vmem>>, %arg3: memref<1x32xf32, #tpu.memory_space<vmem>>, %arg4: memref<1x6x32xf32, #tpu.memory_space<vmem>>, %arg5: memref<1x6x32xf32, #tpu.memory_space<vmem>>) attributes {dimension_semantics = [#tpu.dimension_semantics<parallel>], iteration_bounds = array<i64: 2>, scalar_prefetch = 0 : i64, scratch_operands = 0 : i64, tpu.core_type = #tpu.core_type<tc>, window_params = [{transform_indices = @transform_0, window_bounds = array<i64: 1, 16, 32>}, {pipeline_mode = #tpu.pipeline_mode<synchronous>, transform_indices = @transform_1, window_bounds = array<i64: 9, 32, 32>}, {pipeline_mode = #tpu.pipeline_mode<synchronous>, transform_indices = @transform_2, window_bounds = array<i64: 1, 32>}, {transform_indices = @transform_3, window_bounds = array<i64: 1, 6, 32>}, {transform_indices = @transform_4, window_bounds = array<i64: 1, 6, 32>}]} {
    %c0 = arith.constant 0 : index
    %c0_0 = arith.constant 0 : index
    %c0_1 = arith.constant 0 : index
    %0 = vector.load %arg1[%c0, %c0_0, %c0_1] : memref<1x16x32xf32, #tpu.memory_space<vmem>>, vector<1x16x32xf32>
    %1 = vector.shape_cast %0 : vector<1x16x32xf32> to vector<16x32xf32>
    %2 = vector.extract_strided_slice %1 {offsets = [0, 0], sizes = [6, 32], strides = [1, 1]} : vector<16x32xf32> to vector<6x32xf32>
    %3 = arith.truncf %2 : vector<6x32xf32> to vector<6x32xbf16>
    %c0_2 = arith.constant 0 : index
    %c0_3 = arith.constant 0 : index
    %c0_4 = arith.constant 0 : index
    %4 = vector.load %arg2[%c0_2, %c0_3, %c0_4] : memref<9x32x32xbf16, #tpu.memory_space<vmem>>, vector<1x32x32xbf16>
    %5 = vector.shape_cast %4 : vector<1x32x32xbf16> to vector<32x32xbf16>
    %cst = arith.constant dense<0.000000e+00> : vector<6x32xf32>
    %6 = tpu.matmul %3, %5, %cst {dimension_numbers = #tpu.dot_dimension_numbers<[1], [0], [0], [1], [0, 0, 1, 1], [], []>} : vector<6x32xbf16>, vector<32x32xbf16>, vector<6x32xf32> -> vector<6x32xf32>
    %7 = vector.extract_strided_slice %1 {offsets = [1, 0], sizes = [6, 32], strides = [1, 1]} : vector<16x32xf32> to vector<6x32xf32>
    %8 = arith.truncf %7 : vector<6x32xf32> to vector<6x32xbf16>
    %c1 = arith.constant 1 : index
    %c0_5 = arith.constant 0 : index
    %c0_6 = arith.constant 0 : index
    %9 = vector.load %arg2[%c1, %c0_5, %c0_6] : memref<9x32x32xbf16, #tpu.memory_space<vmem>>, vector<1x32x32xbf16>
    %10 = vector.shape_cast %9 : vector<1x32x32xbf16> to vector<32x32xbf16>
    %cst_7 = arith.constant dense<0.000000e+00> : vector<6x32xf32>
    %11 = tpu.matmul %8, %10, %cst_7 {dimension_numbers = #tpu.dot_dimension_numbers<[1], [0], [0], [1], [0, 0, 1, 1], [], []>} : vector<6x32xbf16>, vector<32x32xbf16>, vector<6x32xf32> -> vector<6x32xf32>
    %12 = arith.addf %6, %11 : vector<6x32xf32>
    %13 = vector.extract_strided_slice %1 {offsets = [2, 0], sizes = [6, 32], strides = [1, 1]} : vector<16x32xf32> to vector<6x32xf32>
    %14 = arith.truncf %13 : vector<6x32xf32> to vector<6x32xbf16>
    %c2 = arith.constant 2 : index
    %c0_8 = arith.constant 0 : index
    %c0_9 = arith.constant 0 : index
    %15 = vector.load %arg2[%c2, %c0_8, %c0_9] : memref<9x32x32xbf16, #tpu.memory_space<vmem>>, vector<1x32x32xbf16>
    %16 = vector.shape_cast %15 : vector<1x32x32xbf16> to vector<32x32xbf16>
    %cst_10 = arith.constant dense<0.000000e+00> : vector<6x32xf32>
    %17 = tpu.matmul %14, %16, %cst_10 {dimension_numbers = #tpu.dot_dimension_numbers<[1], [0], [0], [1], [0, 0, 1, 1], [], []>} : vector<6x32xbf16>, vector<32x32xbf16>, vector<6x32xf32> -> vector<6x32xf32>
    %18 = arith.addf %12, %17 : vector<6x32xf32>
    %19 = vector.extract_strided_slice %1 {offsets = [4, 0], sizes = [6, 32], strides = [1, 1]} : vector<16x32xf32> to vector<6x32xf32>
    %20 = arith.truncf %19 : vector<6x32xf32> to vector<6x32xbf16>
    %c3 = arith.constant 3 : index
    %c0_11 = arith.constant 0 : index
    %c0_12 = arith.constant 0 : index
    %21 = vector.load %arg2[%c3, %c0_11, %c0_12] : memref<9x32x32xbf16, #tpu.memory_space<vmem>>, vector<1x32x32xbf16>
    %22 = vector.shape_cast %21 : vector<1x32x32xbf16> to vector<32x32xbf16>
    %cst_13 = arith.constant dense<0.000000e+00> : vector<6x32xf32>
    %23 = tpu.matmul %20, %22, %cst_13 {dimension_numbers = #tpu.dot_dimension_numbers<[1], [0], [0], [1], [0, 0, 1, 1], [], []>} : vector<6x32xbf16>, vector<32x32xbf16>, vector<6x32xf32> -> vector<6x32xf32>
    %24 = arith.addf %18, %23 : vector<6x32xf32>
    %25 = vector.extract_strided_slice %1 {offsets = [5, 0], sizes = [6, 32], strides = [1, 1]} : vector<16x32xf32> to vector<6x32xf32>
    %26 = arith.truncf %25 : vector<6x32xf32> to vector<6x32xbf16>
    %c4 = arith.constant 4 : index
    %c0_14 = arith.constant 0 : index
    %c0_15 = arith.constant 0 : index
    %27 = vector.load %arg2[%c4, %c0_14, %c0_15] : memref<9x32x32xbf16, #tpu.memory_space<vmem>>, vector<1x32x32xbf16>
    %28 = vector.shape_cast %27 : vector<1x32x32xbf16> to vector<32x32xbf16>
    %cst_16 = arith.constant dense<0.000000e+00> : vector<6x32xf32>
    %29 = tpu.matmul %26, %28, %cst_16 {dimension_numbers = #tpu.dot_dimension_numbers<[1], [0], [0], [1], [0, 0, 1, 1], [], []>} : vector<6x32xbf16>, vector<32x32xbf16>, vector<6x32xf32> -> vector<6x32xf32>
    %30 = arith.addf %24, %29 : vector<6x32xf32>
    %31 = vector.extract_strided_slice %1 {offsets = [6, 0], sizes = [6, 32], strides = [1, 1]} : vector<16x32xf32> to vector<6x32xf32>
    %32 = arith.truncf %31 : vector<6x32xf32> to vector<6x32xbf16>
    %c5 = arith.constant 5 : index
    %c0_17 = arith.constant 0 : index
    %c0_18 = arith.constant 0 : index
    %33 = vector.load %arg2[%c5, %c0_17, %c0_18] : memref<9x32x32xbf16, #tpu.memory_space<vmem>>, vector<1x32x32xbf16>
    %34 = vector.shape_cast %33 : vector<1x32x32xbf16> to vector<32x32xbf16>
    %cst_19 = arith.constant dense<0.000000e+00> : vector<6x32xf32>
    %35 = tpu.matmul %32, %34, %cst_19 {dimension_numbers = #tpu.dot_dimension_numbers<[1], [0], [0], [1], [0, 0, 1, 1], [], []>} : vector<6x32xbf16>, vector<32x32xbf16>, vector<6x32xf32> -> vector<6x32xf32>
    %36 = arith.addf %30, %35 : vector<6x32xf32>
    %37 = vector.extract_strided_slice %1 {offsets = [8, 0], sizes = [6, 32], strides = [1, 1]} : vector<16x32xf32> to vector<6x32xf32>
    %38 = arith.truncf %37 : vector<6x32xf32> to vector<6x32xbf16>
    %c6 = arith.constant 6 : index
    %c0_20 = arith.constant 0 : index
    %c0_21 = arith.constant 0 : index
    %39 = vector.load %arg2[%c6, %c0_20, %c0_21] : memref<9x32x32xbf16, #tpu.memory_space<vmem>>, vector<1x32x32xbf16>
    %40 = vector.shape_cast %39 : vector<1x32x32xbf16> to vector<32x32xbf16>
    %cst_22 = arith.constant dense<0.000000e+00> : vector<6x32xf32>
    %41 = tpu.matmul %38, %40, %cst_22 {dimension_numbers = #tpu.dot_dimension_numbers<[1], [0], [0], [1], [0, 0, 1, 1], [], []>} : vector<6x32xbf16>, vector<32x32xbf16>, vector<6x32xf32> -> vector<6x32xf32>
    %42 = arith.addf %36, %41 : vector<6x32xf32>
    %43 = vector.extract_strided_slice %1 {offsets = [9, 0], sizes = [6, 32], strides = [1, 1]} : vector<16x32xf32> to vector<6x32xf32>
    %44 = arith.truncf %43 : vector<6x32xf32> to vector<6x32xbf16>
    %c7 = arith.constant 7 : index
    %c0_23 = arith.constant 0 : index
    %c0_24 = arith.constant 0 : index
    %45 = vector.load %arg2[%c7, %c0_23, %c0_24] : memref<9x32x32xbf16, #tpu.memory_space<vmem>>, vector<1x32x32xbf16>
    %46 = vector.shape_cast %45 : vector<1x32x32xbf16> to vector<32x32xbf16>
    %cst_25 = arith.constant dense<0.000000e+00> : vector<6x32xf32>
    %47 = tpu.matmul %44, %46, %cst_25 {dimension_numbers = #tpu.dot_dimension_numbers<[1], [0], [0], [1], [0, 0, 1, 1], [], []>} : vector<6x32xbf16>, vector<32x32xbf16>, vector<6x32xf32> -> vector<6x32xf32>
    %48 = arith.addf %42, %47 : vector<6x32xf32>
    %49 = vector.extract_strided_slice %1 {offsets = [10, 0], sizes = [6, 32], strides = [1, 1]} : vector<16x32xf32> to vector<6x32xf32>
    %50 = arith.truncf %49 : vector<6x32xf32> to vector<6x32xbf16>
    %c8 = arith.constant 8 : index
    %c0_26 = arith.constant 0 : index
    %c0_27 = arith.constant 0 : index
    %51 = vector.load %arg2[%c8, %c0_26, %c0_27] : memref<9x32x32xbf16, #tpu.memory_space<vmem>>, vector<1x32x32xbf16>
    %52 = vector.shape_cast %51 : vector<1x32x32xbf16> to vector<32x32xbf16>
    %cst_28 = arith.constant dense<0.000000e+00> : vector<6x32xf32>
    %53 = tpu.matmul %50, %52, %cst_28 {dimension_numbers = #tpu.dot_dimension_numbers<[1], [0], [0], [1], [0, 0, 1, 1], [], []>} : vector<6x32xbf16>, vector<32x32xbf16>, vector<6x32xf32> -> vector<6x32xf32>
    %54 = arith.addf %48, %53 : vector<6x32xf32>
    %c0_29 = arith.constant 0 : index
    %c0_30 = arith.constant 0 : index
    %55 = vector.load %arg3[%c0_29, %c0_30] : memref<1x32xf32, #tpu.memory_space<vmem>>, vector<1x32xf32>
    %56 = vector.broadcast %55 : vector<1x32xf32> to vector<6x32xf32>
    %57 = arith.addf %54, %56 : vector<6x32xf32>
    %c0_31 = arith.constant 0 : index
    %c0_32 = arith.constant 0 : index
    %c0_33 = arith.constant 0 : index
    %58 = vector.load %arg4[%c0_31, %c0_32, %c0_33] : memref<1x6x32xf32, #tpu.memory_space<vmem>>, vector<1x6x32xf32>
    %59 = vector.shape_cast %58 : vector<1x6x32xf32> to vector<6x32xf32>
    %60 = arith.addf %57, %59 : vector<6x32xf32>
    %c0_34 = arith.constant 0 : index
    %c0_35 = arith.constant 0 : index
    %c0_36 = arith.constant 0 : index
    %61 = vector.load %arg5[%c0_34, %c0_35, %c0_36] : memref<1x6x32xf32, #tpu.memory_space<vmem>>, vector<1x6x32xf32>
    %62 = vector.shape_cast %61 : vector<1x6x32xf32> to vector<6x32xf32>
    %63 = vector.shape_cast %60 : vector<6x32xf32> to vector<1x6x32xf32>
    tpu.vector_store %arg5[%c0_34, %c0_35, %c0_36], %63 {strides = array<i32>} : memref<1x6x32xf32, #tpu.memory_space<vmem>>, vector<1x6x32xf32>,
    return
  }
  func.func @transform_0(%arg0: i32) -> (i32, i32, i32) {
    %c0_i32 = arith.constant 0 : i32
    %c0_i32_0 = arith.constant 0 : i32
    %c0_i32_1 = arith.constant 0 : i32
    return %arg0, %c0_i32, %c0_i32_0 : i32, i32, i32
  }
  func.func @transform_1(%arg0: i32) -> (i32, i32, i32) {
    %c0_i32 = arith.constant 0 : i32
    %c0_i32_0 = arith.constant 0 : i32
    %c0_i32_1 = arith.constant 0 : i32
    %c0_i32_2 = arith.constant 0 : i32
    return %c0_i32, %c0_i32_0, %c0_i32_1 : i32, i32, i32
  }
  func.func @transform_2(%arg0: i32) -> (i32, i32) {
    %c0_i32 = arith.constant 0 : i32
    %c0_i32_0 = arith.constant 0 : i32
    %c0_i32_1 = arith.constant 0 : i32
    return %c0_i32, %c0_i32_0 : i32, i32
  }
  func.func @transform_3(%arg0: i32) -> (i32, i32, i32) {
    %c0_i32 = arith.constant 0 : i32
    %c0_i32_0 = arith.constant 0 : i32
    %c0_i32_1 = arith.constant 0 : i32
    return %arg0, %c0_i32, %c0_i32_0 : i32, i32, i32
  }
  func.func @transform_4(%arg0: i32) -> (i32, i32, i32) {
    %c0_i32 = arith.constant 0 : i32
    %c0_i32_0 = arith.constant 0 : i32
    %c0_i32_1 = arith.constant 0 : i32
    return %arg0, %c0_i32, %c0_i32_0 : i32, i32, i32
  }
}

module attributes {stable_mosaic.version = 11 : i64} {
  func.func @_head_kernel(%arg0: memref<2x128xf32, #tpu.memory_space<vmem>>, %arg1: memref<128x32xbf16, #tpu.memory_space<vmem>>, %arg2: memref<1x32xf32, #tpu.memory_space<vmem>>, %arg3: memref<32x1xbf16, #tpu.memory_space<vmem>>, %arg4: memref<1x1xf32, #tpu.memory_space<vmem>>, %arg5: memref<2x1xf32, #tpu.memory_space<vmem>>) attributes {dimension_semantics = [], scalar_prefetch = 0 : i64, scratch_operands = 0 : i64, tpu.core_type = #tpu.core_type<tc>} {
    %c0 = arith.constant 0 : index
    %c0_0 = arith.constant 0 : index
    %0 = vector.load %arg0[%c0, %c0_0] : memref<2x128xf32, #tpu.memory_space<vmem>>, vector<2x128xf32>
    %cst = arith.constant 0.000000e+00 : f32
    %1 = vector.broadcast %cst : f32 to vector<2x128xf32>
    %2 = arith.maximumf %0, %1 : vector<2x128xf32>
    %3 = arith.truncf %2 : vector<2x128xf32> to vector<2x128xbf16>
    %c0_1 = arith.constant 0 : index
    %c0_2 = arith.constant 0 : index
    %4 = vector.load %arg1[%c0_1, %c0_2] : memref<128x32xbf16, #tpu.memory_space<vmem>>, vector<128x32xbf16>
    %cst_3 = arith.constant dense<0.000000e+00> : vector<2x32xf32>
    %5 = tpu.matmul %3, %4, %cst_3 {dimension_numbers = #tpu.dot_dimension_numbers<[1], [0], [0], [1], [0, 0, 1, 1], [], []>} : vector<2x128xbf16>, vector<128x32xbf16>, vector<2x32xf32> -> vector<2x32xf32>
    %c0_4 = arith.constant 0 : index
    %c0_5 = arith.constant 0 : index
    %6 = vector.load %arg2[%c0_4, %c0_5] : memref<1x32xf32, #tpu.memory_space<vmem>>, vector<1x32xf32>
    %7 = vector.broadcast %6 : vector<1x32xf32> to vector<2x32xf32>
    %8 = arith.addf %5, %7 : vector<2x32xf32>
    %cst_6 = arith.constant 0.000000e+00 : f32
    %9 = vector.broadcast %cst_6 : f32 to vector<2x32xf32>
    %10 = arith.maximumf %8, %9 : vector<2x32xf32>
    %11 = arith.truncf %10 : vector<2x32xf32> to vector<2x32xbf16>
    %c0_7 = arith.constant 0 : index
    %c0_8 = arith.constant 0 : index
    %12 = vector.load %arg3[%c0_7, %c0_8] : memref<32x1xbf16, #tpu.memory_space<vmem>>, vector<32x1xbf16>
    %cst_9 = arith.constant dense<0.000000e+00> : vector<2x1xf32>
    %13 = tpu.matmul %11, %12, %cst_9 {dimension_numbers = #tpu.dot_dimension_numbers<[1], [0], [0], [1], [0, 0, 1, 1], [], []>} : vector<2x32xbf16>, vector<32x1xbf16>, vector<2x1xf32> -> vector<2x1xf32>
    %c0_10 = arith.constant 0 : index
    %c0_11 = arith.constant 0 : index
    %14 = vector.load %arg4[%c0_10, %c0_11] : memref<1x1xf32, #tpu.memory_space<vmem>>, vector<1x1xf32>
    %15 = vector.broadcast %14 : vector<1x1xf32> to vector<2x1xf32>
    %16 = arith.addf %13, %15 : vector<2x1xf32>
    %c0_12 = arith.constant 0 : index
    %c0_13 = arith.constant 0 : index
    %17 = vector.load %arg5[%c0_12, %c0_13] : memref<2x1xf32, #tpu.memory_space<vmem>>, vector<2x1xf32>
    tpu.vector_store %arg5[%c0_12, %c0_13], %16 {strides = array<i32>} : memref<2x1xf32, #tpu.memory_space<vmem>>, vector<2x1xf32>,
    return
  }
}

</mosaic_0001>

<bundles_post_ra>
// kernel: value_network_forward.20
= control target key start
LH: loop header
LB: loop body
LE: loop exit
PB: predicated region body
PF: predicated region fallthrough
CT: control target
= control target key end

     0   :  { %s632_s15 = smov 0   ;;  %s787_s0 = inlined_call_operand.vmem [shape: f32[2,9,9,16], index: 0, kind: input, shape index: {}]   ;;  %s788_s1 = inlined_call_operand.vmem [shape: f32[2,9,9,16], index: 1, kind: input, shape index: {}]   ;;  %s789_s2 = inlined_call_operand.vmem [shape: f32[2,9,9,16], index: 2, kind: input, shape index: {}]   ;;  %s790_s3 = inlined_call_operand.vmem [shape: f32[2,9,9,16], index: 3, kind: input, shape index: {}]   ;;  %s791_s4 = inlined_call_operand.vmem [shape: f32[2,8,8,16], index: 4, kind: output, shape index: {}]  }
   0x1 LB: > { %s576_s16 = sadd.s32 4294967295, %s605_s15   ;;  %p580_p0 = scmp.ge.s32.totalorder %s605_s15, 1  ;;  %s605_s15 = sphi %s632_s15, %s14_s15  }
   0x2   : > { %p192_p1 = scmp.lt.s32.totalorder %s605_s15, 3 }
   0x4   : > { %p193_p2 = pnand %p580_p0, %p192_p1 }
   0x5   : > { %p233_p3 = scmp.lt.s32.totalorder (!%p193_p2), %s576_s16, 1 }
   0x6   : > { %196 = sbr.rel (%p193_p2) target bundleno = 56 (0x38), region = 36 }
   0xb   : > { %s793_s16 = smov (!%p233_p3, %s576_s16), 1  ;;  %vm325_vm0 = vcmask 1046528   ;;  %vm476_vm1 = vcmask 130048  }
   0xc   : > { %s643_s17 = smul.u32 144, %s793_s16  ;;  %s589_s30 = sshll.u32 %s793_s16, 6 }
   0xd   : > { %s737_s7 = scalar_lea.vmem %s791_s4, %s589_s30 }
   0xe   : > { %s649_s20 = scalar_lea.vmem %s787_s0, %s643_s17  ;;  %s655_s23 = scalar_lea.vmem %s789_s2, %s643_s17 }
   0xf   : > { %v258_v0 = vld [vmem:[%s649_s20] sm:$0xff]  ;;  %v259_v1 = vld [vmem:[%s649_s20 + $0x8] sm:$0x1]  ;;  %v260_v2 = vld [vmem:[%s649_s20 + $0x10] sm:$0xff]  ;;  %s673_s26 = scalar_lea.vmem %s788_s1, %s643_s17  ;;  %s718_s29 = scalar_lea.vmem %s790_s3, %s643_s17 }
  0x10   : > { %v261_v3 = vld [vmem:[%s649_s20 + $0x18] sm:$0x1]  ;;  %v326_v4 = vrot.slane %v258_v0, 1  ;;  %v327_v5 = vrot.slane %v259_v1, 1  ;;  %v662_v6 = vld [vmem:[%s655_s23] sm:$0xff]  ;;  %v329_v8 = vrot.slane %v260_v2, 1 }
  0x11   : > { %v286_v7 = vld [vmem:[%s655_s23 + $0x8] sm:$0x1]  ;;  %v330_v9 = vrot.slane %v261_v3, 1  ;;  %v428_v11 = vrot.slane %v662_v6, 1  ;;  %v262_v13 = vld [vmem:[%s649_s20 + $0x20] sm:$0xff]  ;;  %v677_v17 = vld [vmem:[%s655_s23 + $0x10] sm:$0xff] }
  0x12   : > { %v328_v10 = vsel %vm325_vm0, %v326_v4, %v327_v5  ;;  %v429_v12 = vrot.slane %v286_v7, 1  ;;  %v263_v14 = vld [vmem:[%s649_s20 + $0x28] sm:$0x1]  ;;  %v288_v18 = vld [vmem:[%s655_s23 + $0x18] sm:$0x1]  ;;  %v332_v19 = vrot.slane %v262_v13, 1 }
  0x13   : > { %v331_v15 = vsel %vm325_vm0, %v329_v8, %v330_v9  ;;  %v358_v16 = vmax.f32 %v258_v0, %v328_v10  ;;  %v333_v20 = vrot.slane %v263_v14, 1  ;;  %v431_v23 = vrot.slane %v677_v17, 1  ;;  %v264_v25 = vld [vmem:[%s649_s20 + $0x30] sm:$0xff]  ;;  %v265_v26 = vld [vmem:[%s649_s20 + $0x38] sm:$0x1]  ;;  %v688_v29 = vld [vmem:[%s655_s23 + $0x20] sm:$0xff] }
  0x14   : > { %v359_v21 = vmax.f32 %v260_v2, %v331_v15  ;;  %v681_v22 = vsel %vm325_vm0, %v428_v11, %v429_v12  ;;  %v432_v24 = vrot.slane %v288_v18, 1  ;;  %v290_v30 = vld [vmem:[%s655_s23 + $0x28] sm:$0x1]  ;;  %v335_v31 = vrot.slane %v264_v25, 1  ;;  %v276_v33 = vld [vmem:[%s673_s26] sm:$0xff]  ;;  %v277_v40 = vld [vmem:[%s673_s26 + $0x10] sm:$0xff] }
  0x15   : > { %v366_v27 = vmax.f32 %v358_v16, %v260_v2  ;;  %v334_v28 = vsel %vm325_vm0, %v332_v19, %v333_v20  ;;  %v336_v32 = vrot.slane %v265_v26, 1  ;;  %v434_v37 = vrot.slane %v688_v29, 1  ;;  %v266_v38 = vld [vmem:[%s649_s20 + $0x40] sm:$0xff]  ;;  %v267_v39 = vld [vmem:[%s649_s20 + $0x48] sm:$0x1]  ;;  %v701_v44 = vld [vmem:[%s655_s23 + $0x30] sm:$0xff] }
  0x16   : > { %v360_v34 = vmax.f32 %v262_v13, %v334_v28  ;;  %v367_v35 = vmax.f32 %v359_v21, %v262_v13  ;;  %v693_v36 = vsel %vm325_vm0, %v431_v23, %v432_v24  ;;  %v435_v43 = vrot.slane %v290_v30, 1  ;;  %v292_v45 = vld [vmem:[%s655_s23 + $0x38] sm:$0x1]  ;;  %v268_v51 = vld [vmem:[%s649_s20 + $0x50] sm:$0xff]  ;;  %v278_v53 = vld [vmem:[%s673_s26 + $0x20] sm:$0xff] }
  0x17   : > { %v380_v41 = vmax.f32 %v366_v27, %v331_v15  ;;  %v337_v42 = vsel %vm325_vm0, %v335_v31, %v336_v32  ;;  %v338_v46 = vrot.slane %v266_v38, 1  ;;  %v339_v50 = vrot.slane %v267_v39, 1  ;;  %v269_v57 = vld [vmem:[%s649_s20 + $0x58] sm:$0x1]  ;;  %v293_v62 = vld [vmem:[%s655_s23 + $0x40] sm:$0xff]  ;;  %v279_v1 = vld [vmem:[%s673_s26 + $0x30] sm:$0xff] }
  0x18   : > { %v381_v47 = vmax.f32 %v367_v35, %v334_v28  ;;  %v361_v48 = vmax.f32 %v264_v25, %v337_v42  ;;  %v368_v49 = vmax.f32 %v360_v34, %v264_v25  ;;  %v707_v54 = vsel %vm325_vm0, %v434_v37, %v435_v43  ;;  %v294_v63 = vld [vmem:[%s655_s23 + $0x48] sm:$0x1]  ;;  %v270_v14 = vld [vmem:[%s649_s20 + $0x60] sm:$0xff]  ;;  %v295_v28 = vld [vmem:[%s655_s23 + $0x50] sm:$0xff] }
  0x19   : > { %v388_v52 = vmax.f32 %v380_v41, %v276_v33  ;;  %v437_v55 = vrot.slane %v701_v44, 1  ;;  %v438_v56 = vrot.slane %v292_v45, 1  ;;  %v340_v60 = vsel %vm325_vm0, %v338_v46, %v339_v50  ;;  %v301_v15 = vld [vmem:[%s718_s29] sm:$0xff]  ;;  %v271_v23 = vld [vmem:[%s649_s20 + $0x68] sm:$0x1]  ;;  %v272_v33 = vld [vmem:[%s649_s20 + $0x70] sm:$0xff] }
  0x1a   : > { %v389_v58 = vmax.f32 %v381_v47, %v277_v40  ;;  %v382_v59 = vmax.f32 %v368_v49, %v337_v42  ;;  %v369_v61 = vmax.f32 %v361_v48, %v266_v38  ;;  %v362_v2 = vmax.f32 %v266_v38, %v340_v60  ;;  %v280_v19 = vld [vmem:[%s673_s26 + $0x40] sm:$0xff]  ;;  %v273_v43 = vld [vmem:[%s649_s20 + $0x78] sm:$0x1]  ;;  %v304_v45 = vld [vmem:[%s718_s29 + $0x30] sm:$0xff] }
  0x1b   : > { %v396_v0 = vmax.f32 %v388_v52, %v277_v40  ;;  %v439_v3 = vsel %vm325_vm0, %v437_v55, %v438_v56  ;;  %v341_v4 = vrot.slane %v268_v51, 1  ;;  %v342_v9 = vrot.slane %v269_v57, 1  ;;  %v303_v35 = vld [vmem:[%s718_s29 + $0x20] sm:$0xff] }
  0x1c   : > { %v397_v5 = vmax.f32 %v389_v58, %v278_v53  ;;  %v390_v7 = vmax.f32 %v382_v59, %v278_v53  ;;  %v383_v8 = vmax.f32 %v369_v61, %v340_v60  ;;  %v370_v11 = vmax.f32 %v362_v2, %v268_v51  ;;  %v274_v53 = vld [vmem:[%s649_s20 + $0x80] sm:$0xff]  ;;  %v298_v61 = vld [vmem:[%s655_s23 + $0x68] sm:$0x1] }
  0x1d   : > { %v404_v10 = vmax.f32 %v396_v0, %v662_v6  ;;  %v440_v12 = vrot.slane %v293_v62, 1  ;;  %v441_v13 = vrot.slane %v294_v63, 1  ;;  %v343_v21 = vsel %vm325_vm0, %v341_v4, %v342_v9  ;;  %v302_v6 = vld [vmem:[%s718_s29 + $0x10] sm:$0xff]  ;;  %v305_v58 = vld [vmem:[%s718_s29 + $0x40] sm:$0xff] }
  0x1e   : > { %v405_v16 = vmax.f32 %v397_v5, %v677_v17  ;;  %v398_v18 = vmax.f32 %v390_v7, %v279_v1  ;;  %v391_v20 = vmax.f32 %v383_v8, %v279_v1  ;;  %v363_v25 = vmax.f32 %v268_v51, %v343_v21  ;;  %v297_v60 = vld [vmem:[%s655_s23 + $0x60] sm:$0xff] }
  0x1f   : > { %v460_v24 = vmax.f32 %v404_v10, %v681_v22  ;;  %v384_v26 = vmax.f32 %v370_v11, %v343_v21  ;;  %v442_v27 = vsel %vm325_vm0, %v440_v12, %v441_v13  ;;  %v296_v22 = vld [vmem:[%s655_s23 + $0x58] sm:$0x1]  ;;  %v344_v32 = vrot.slane %v270_v14, 1  ;;  %v282_v1 = vld [vmem:[%s673_s26 + $0x60] sm:$0xff] }
  0x20   : > { %v461_v17 = vmax.f32 %v405_v16, %v693_v36  ;;  %v406_v30 = vmax.f32 %v398_v18, %v688_v29  ;;  %v399_v31 = vmax.f32 %v391_v20, %v280_v19  ;;  %v345_v38 = vrot.slane %v271_v23, 1  ;;  %v281_v29 = vld [vmem:[%s673_s26 + $0x50] sm:$0xff]  ;;  %v300_v16 = vld [vmem:[%s655_s23 + $0x78] sm:$0x1] }
  0x21   : > { %v468_v34 = vmax.f32 %v460_v24, %v301_v15  ;;  %v392_v37 = vmax.f32 %v384_v26, %v280_v19  ;;  %v371_v39 = vmax.f32 %v363_v25, %v270_v14  ;;  %v443_v42 = vrot.slane %v295_v28, 1  ;;  %v299_v15 = vld [vmem:[%s655_s23 + $0x70] sm:$0xff]  ;;  %v284_v25 = vld [vmem:[%s673_s26 + $0x80] sm:$0xff] }
  0x22   : > { %v469_v40 = vmax.f32 %v461_v17, %v302_v6  ;;  %v462_v41 = vmax.f32 %v406_v30, %v707_v54  ;;  %v407_v36 = vmax.f32 %v399_v31, %v701_v44  ;;  %v346_v47 = vsel %vm325_vm0, %v344_v32, %v345_v38  ;;  %v275_v54 = vld [vmem:[%s649_s20 + $0x88] sm:$0x1]  ;;  %v306_v19 = vld [vmem:[%s718_s29 + $0x50] sm:$0xff]  ;;  %v307_v31 = vld [vmem:[%s718_s29 + $0x60] sm:$0xff] }
  0x23   : > { %477 = vst.msk [vmem:[%s737_s7] sm:$0xff] %vm476_vm1, %v468_v34  ;;  %v400_v46 = vmax.f32 %v392_v37, %v281_v29  ;;  %v444_v48 = vrot.slane %v296_v22, 1  ;;  %v347_v49 = vrot.slane %v272_v33, 1  ;;  %v364_v51 = vmax.f32 %v270_v14, %v346_v47  ;;  %v283_v20 = vld [vmem:[%s673_s26 + $0x70] sm:$0xff] }
  0x24   : > { %478 = vst.msk [vmem:[%s737_s7 + $0x8] sm:$0xff] %vm476_vm1, %v469_v40  ;;  %v470_v50 = vmax.f32 %v462_v41, %v303_v35  ;;  %v463_v44 = vmax.f32 %v407_v36, %v439_v3  ;;  %v385_v52 = vmax.f32 %v371_v39, %v346_v47  ;;  %v348_v56 = vrot.slane %v273_v43, 1  ;;  %v308_v37 = vld [vmem:[%s718_s29 + $0x70] sm:$0xff] }
  0x25   : > { %v408_v55 = vmax.f32 %v400_v46, %v293_v62  ;;  %v372_v63 = vmax.f32 %v364_v51, %v272_v33  ;;  %v376_v3 = vrot.slane %v274_v53, 1  ;;  %v377_v4 = vrot.slane %v275_v54, 1 }
  0x26   : > { %479 = vst.msk [vmem:[%s737_s7 + $0x10] sm:$0xff] %vm476_vm1, %v470_v50  ;;  %v471_v57 = vmax.f32 %v463_v44, %v304_v45  ;;  %v393_v59 = vmax.f32 %v385_v52, %v281_v29  ;;  %v349_v2 = vsel %vm325_vm0, %v347_v49, %v348_v56  ;;  %v445_v5 = vsel %vm325_vm0, %v443_v42, %v444_v48 }
  0x27   : > { %v464_v0 = vmax.f32 %v408_v55, %v442_v27  ;;  %v365_v7 = vmax.f32 %v272_v33, %v349_v2  ;;  %v386_v8 = vmax.f32 %v372_v63, %v349_v2  ;;  %v446_v10 = vrot.slane %v297_v60, 1 }
  0x28   : > { %480 = vst.msk [vmem:[%s737_s7 + $0x18] sm:$0xff] %vm476_vm1, %v471_v57  ;;  %v401_v62 = vmax.f32 %v393_v59, %v282_v1  ;;  %v447_v11 = vrot.slane %v298_v61, 1  ;;  %v378_v12 = vsel %vm325_vm0, %v376_v3, %v377_v4  ;;  %v449_v26 = vrot.slane %v299_v15, 1 }
  0x29   : > { %v472_v9 = vmax.f32 %v464_v0, %v305_v58  ;;  %v394_v14 = vmax.f32 %v386_v8, %v282_v1  ;;  %v373_v18 = vmax.f32 %v365_v7, %v274_v53  ;;  %v450_v27 = vrot.slane %v300_v16, 1 }
  0x2a   : > { %v409_v13 = vmax.f32 %v401_v62, %v295_v28  ;;  %v448_v6 = vsel %vm325_vm0, %v446_v10, %v447_v11 }
  0x2b   : > { %481 = vst.msk [vmem:[%s737_s7 + $0x20] sm:$0xff] %vm476_vm1, %v472_v9  ;;  %v402_v23 = vmax.f32 %v394_v14, %v283_v20  ;;  %v387_v24 = vmax.f32 %v373_v18, %v378_v12  ;;  %v451_v33 = vsel %vm325_vm0, %v449_v26, %v450_v27 }
  0x2c   : > { %v465_v21 = vmax.f32 %v409_v13, %v445_v5 }
  0x2d   : > { %v410_v17 = vmax.f32 %v402_v23, %v297_v60  ;;  %v395_v30 = vmax.f32 %v387_v24, %v283_v20 }
  0x2e   : > { %v473_v28 = vmax.f32 %v465_v21, %v306_v19 }
  0x2f   : > { %v466_v22 = vmax.f32 %v410_v17, %v448_v6  ;;  %v403_v32 = vmax.f32 %v395_v30, %v284_v25 }
  0x30   : > { %482 = vst.msk [vmem:[%s737_s7 + $0x28] sm:$0xff] %vm476_vm1, %v473_v28 }
  0x31   : > { %v474_v34 = vmax.f32 %v466_v22, %v307_v31  ;;  %v411_v35 = vmax.f32 %v403_v32, %v299_v15 }
  0x33   : > { %483 = vst.msk [vmem:[%s737_s7 + $0x30] sm:$0xff] %vm476_vm1, %v474_v34  ;;  %v467_v38 = vmax.f32 %v411_v35, %v451_v33 }
  0x35   : > { %v475_v39 = vmax.f32 %v467_v38, %v308_v37 }
  0x37   : > { %484 = vst.msk [vmem:[%s737_s7 + $0x38] sm:$0xff] %vm476_vm1, %v475_v39 }
  0x38 PF: > { %s14_s15 = sadd.s32 1, %s605_s15  }
  0x39   : > { %p11_p4 = scmp.ge.s32.totalorder %s14_s15, 4  }
  0x3b   :  { %13 = sbr.rel (!%p11_p4) target bundleno = 1 (0x1), region = 75 }

// kernel: value_network_forward.19
= control target key start
LH: loop header
LB: loop body
LE: loop exit
PB: predicated region body
PF: predicated region fallthrough
CT: control target
= control target key end

     0   :  { %s2607_s12 = smov 0   ;;  %s3705_s0 = inlined_call_operand.vmem [shape: f32[2,324,3], index: 0, kind: input, shape index: {}]   ;;  %s3706_s1 = inlined_call_operand.vmem [shape: bf16[9,3,16], index: 1, kind: input, shape index: {}]   ;;  %s3707_s2 = inlined_call_operand.vmem [shape: f32[1,16], index: 2, kind: input, shape index: {}]   ;;  %s3708_s3 = inlined_call_operand.vmem [shape: f32[2,286,16], index: 3, kind: output, shape index: {}]  }
   0x1 LB: > { %s2384_s13 = sadd.s32 4294967295, %s2584_s12   ;;  %p2388_p0 = scmp.ge.s32.totalorder %s2584_s12, 1  ;;  %s2584_s12 = sphi %s2607_s12, %s13_s12  }
   0x2   : > { %p137_p1 = scmp.lt.s32.totalorder %s2584_s12, 3 }
   0x4   : > { %p138_p2 = pnand %p2388_p0, %p137_p1 }
   0x6   : > { %141 = sbr.rel (%p138_p2) target bundleno = 818 (0x332), region = 32 }
   0xb   : > { %v2391_v0 = vld [vmem:[%s3706_s1 + $0x2] sm:$0x3]  ;;  %vm433_vm0 = vcmask 1040384   ;;  %vm434_vm1 = vcmask 1041408   ;;  %p161_p3 = scmp.lt.s32.totalorder %s2384_s13, 1  ;;  %v2586_v1 = vmov 65535  }
   0xc   : > { %v435_v2 = vsel %vm433_vm0, 4294967295, %v2586_v1  ;;  %v2428_v3 = vld [vmem:[%s3706_s1 + $0x4] sm:$0x3]  ;;  %v231_v5 = vld [vmem:[%s3706_s1] sm:$0x3]  ;;  %vm378_vm3 = vcmask 23552  }
   0xd   : > { %v2621_v4 = vsel %vm434_vm1, %v435_v2, 0  ;;  %s3876_s13 = smov (!%p161_p3, %s2384_s13), 1  ;;  %v2466_v6 = vld [vmem:[%s3706_s1 + $0x8] sm:$0x3]  ;;  %vm234_vm2 = vsmask.f32 7424 }
   0xe   : > { %v438_v7 = vand.u32 %v2391_v0, %v2621_v4  ;;  %v788_v8 = vand.u32 %v2428_v3, %v2621_v4  ;;  %v576_v9 = vand.u32 %v2621_v4, %v231_v5  ;;  %v1215_v10 = vand.u32 %v2466_v6, %v2621_v4  ;;  %s2566_s22 = smul.u32 328, %s3876_s13 }
   0xf   : > { %vm697_vm4 = vcmask 1046528   ;;  %vm1078_vm5 = vsmask.f32 6400  ;;  %vm1741_vm6 = vsmask.f32 5376  ;;  %vm1355_vm7 = vcmask 1045504  }
  0x10   : > { %2563 = vmatpush.bf16.msra.mxu1 %v438_v7  ;;  %2564 = vmatpush.bf16.msra.mxu2 %v438_v7  ;;  %s2639_s25 = scalar_lea.vmem %s3705_s0, %s2566_s22  ;;  %vm2021_vm8 = vcmask 1044480   ;;  %s2567_s9 = smul.u32 288, %s3876_s13  ;;  %vm2291_vm9 = vcmask 130048   ;;  %vm2327_vm10 = vcmask 128000  }
  0x11   : > { %447 = vmatpush.bf16.msra.mxu0 %v438_v7  ;;  %v182_v11 = vld [vmem:[%s2639_s25 + $0x50] sm:$0xff]  ;;  %v183_v12 = vld [vmem:[%s2639_s25 + $0x58] sm:$0xff]  ;;  %v184_v13 = vld [vmem:[%s2639_s25 + $0x60] sm:$0xff]  ;;  %2565 = vmatpush.bf16.msra.mxu3 %v438_v7 }
  0x12   : > { %v185_v14 = vld [vmem:[%s2639_s25 + $0x68] sm:$0xff]  ;;  %v2645_v15 = vpack.c.bf16 %v183_v12, %v182_v11  ;;  %v192_v16 = vld [vmem:[%s2639_s25 + $0xa0] sm:$0xff]  ;;  %v194_v19 = vld [vmem:[%s2639_s25 + $0xb0] sm:$0xff]  ;;  %s3450_s16 = scalar_lea.vmem %s3708_s3, %s2567_s9 }
  0x13   : > { %v193_v17 = vld [vmem:[%s2639_s25 + $0xa8] sm:$0xff]  ;;  %v2649_v18 = vpack.c.bf16 %v185_v14, %v184_v13  ;;  %v195_v20 = vld [vmem:[%s2639_s25 + $0xb8] sm:$0xff]  ;;  %v172_v22 = vld [vmem:[%s2639_s25] sm:$0xff] }
  0x14   : > { %797 = vmatpush.bf16.msrb.mxu2 %v788_v8  ;;  %585 = vmatpush.bf16.msrb.mxu1 %v576_v9  ;;  %3748 = vst [vmem:[#allocation2_spill] sm:$0xff] %v2645_v15  ;;  %v2653_v21 = vpack.c.bf16 %v193_v17, %v192_v16  ;;  %v2657_v23 = vshll.u32 %v2645_v15, 16  ;;  %v2660_v24 = vshrl.u32 %v2645_v15, 16  ;;  %v2662_v25 = vpack.c.bf16 %v195_v20, %v194_v19  ;;  %v173_v26 = vld [vmem:[%s2639_s25 + $0x8] sm:$0xff]  ;;  %v174_v27 = vld [vmem:[%s2639_s25 + $0x10] sm:$0xff]  ;;  %v175_v28 = vld [vmem:[%s2639_s25 + $0x18] sm:$0xff] }
  0x15   : > { %1224 = vmatpush.bf16.msrb.mxu0 %v1215_v10  ;;  %3749 = vst [vmem:[#allocation3_spill] sm:$0xff] %v2649_v18  ;;  %v2668_v29 = vshll.u32 %v2649_v18, 16  ;;  %v2676_v32 = vpack.c.bf16 %v173_v26, %v172_v22  ;;  %v2682_v35 = vpack.c.bf16 %v175_v28, %v174_v27  ;;  %v186_v43 = vld [vmem:[%s2639_s25 + $0x70] sm:$0xff]  ;;  %v187_v44 = vld [vmem:[%s2639_s25 + $0x78] sm:$0xff]  ;;  %v196_v47 = vld [vmem:[%s2639_s25 + $0xc0] sm:$0xff]  ;;  %v2734_v5 = vshrl.u32 %v2649_v18, 16 }
  0x16   : > { %3750 = vst [vmem:[#allocation4_spill] sm:$0xff] %v2657_v23  ;;  %v2671_v30 = vshll.u32 %v2653_v21, 16  ;;  %v2674_v31 = vshrl.u32 %v2653_v21, 16  ;;  %v277_v33 = vrot.slane %v2657_v23, 1  ;;  %v2680_v34 = vshll.u32 %v2662_v25, 16  ;;  %v202_v48 = vld [vmem:[%s2639_s25 + $0xf0] sm:$0xff] }
  0x17   : > { %3751 = vst [vmem:[#allocation5_spill] sm:$0xff] %v2660_v24  ;;  %v285_v36 = vrot.slane %v2668_v29, 1  ;;  %v236_v38 = vshrl.u32 %v2676_v32, 16  ;;  %v238_v39 = vshll.u32 %v2676_v32, 16  ;;  %v3709_v42 = vshll.u32 %v2682_v35, 16  ;;  %v203_v49 = vld [vmem:[%s2639_s25 + $0xf8] sm:$0xff] }
  0x18   : > { %3752 = vst [vmem:[#allocation6_spill] sm:$0xff] %v2668_v29  ;;  %v317_v37 = vrot.slane %v2671_v30, 1  ;;  %v281_v40 = vor.u32 %v2660_v24, %v277_v33  ;;  %v325_v41 = vrot.slane %v2680_v34, 1  ;;  %v197_v52 = vld [vmem:[%s2639_s25 + $0xc8] sm:$0xff]  ;;  %v204_v53 = vld [vmem:[%s2639_s25 + $0x100] sm:$0xff]  ;;  %v2710_v57 = vpack.c.bf16 %v187_v44, %v186_v43  ;;  %v206_v13 = vld [vmem:[%s2639_s25 + $0x110] sm:$0xff] }
  0x19   : > { %3753 = vst [vmem:[#allocation7_spill] sm:$0xff] %v2671_v30  ;;  %v240_v46 = vrot.slane %v238_v39, 1  ;;  %v245_v51 = vrot.slane %v3709_v42, 1  ;;  %v205_v54 = vld [vmem:[%s2639_s25 + $0x108] sm:$0xff]  ;;  %v176_v58 = vld [vmem:[%s2639_s25 + $0x20] sm:$0xff]  ;;  %v2714_v60 = vpack.c.bf16 %v203_v49, %v202_v48  ;;  %v2717_v62 = vpack.c.bf16 %v197_v52, %v196_v47  ;;  %v207_v19 = vld [vmem:[%s2639_s25 + $0x118] sm:$0xff] }
  0x1a   : > { %3754 = vst [vmem:[#allocation8_spill] sm:$0xff] %v2674_v31  ;;  %v321_v45 = vor.u32 %v2674_v31, %v317_v37  ;;  %v286_v50 = vsel %vm234_vm2, %v281_v40, %v285_v36  ;;  %v177_v59 = vld [vmem:[%s2639_s25 + $0x28] sm:$0xff]  ;;  %v2719_v63 = vpack.c.bf16 %v205_v54, %v204_v53  ;;  %v2737_v6 = vshll.u32 %v2710_v57, 16  ;;  %v2447_v8 = vld [vmem:[%s3706_s1 + $0x6] sm:$0x3]  ;;  %v190_v20 = vld [vmem:[%s2639_s25 + $0x90] sm:$0xff] }
  0x1b   : > { %3755 = vst [vmem:[#allocation9_spill] sm:$0xff] %v2682_v35  ;;  %2397 = vmatmul.msk.bf16.vlgmr.msra.gmra.mxu1 %vm378_vm3, %v286_v50  ;;  %v241_v56 = vor.u32 %v240_v46, %v236_v38  ;;  %v2723_v0 = vshll.u32 %v2714_v60, 16  ;;  %v2726_v1 = vshrl.u32 %v2714_v60, 16  ;;  %v2728_v2 = vpack.c.bf16 %v177_v59, %v176_v58  ;;  %v191_v22 = vld [vmem:[%s2639_s25 + $0x98] sm:$0xff]  ;;  %v188_v46 = vld [vmem:[%s2639_s25 + $0x80] sm:$0xff]  ;;  %v189_v47 = vld [vmem:[%s2639_s25 + $0x88] sm:$0xff] }
  0x1c   : > { %v326_v55 = vsel %vm234_vm2, %v321_v45, %v325_v41  ;;  %3756 = vst [vmem:[#allocation10_spill] sm:$0xff] %v2710_v57  ;;  %v2731_v3 = vshll.u32 %v2719_v63, 16  ;;  %v2744_v9 = vshrl.u32 %v2662_v25, 16  ;;  %v2747_v10 = vshll.u32 %v2717_v62, 16  ;;  %v198_v48 = vld [vmem:[%s2639_s25 + $0xd0] sm:$0xff]  ;;  %v199_v49 = vld [vmem:[%s2639_s25 + $0xd8] sm:$0xff] }
  0x1d   : > { %2402 = vmatmul.msk.bf16.vlgmr.msra.gmra.mxu2 %vm378_vm3, %v326_v55  ;;  %v246_v61 = vsel %vm234_vm2, %v241_v56, %v245_v51  ;;  %3757 = vst [vmem:[#allocation11_spill] sm:$0xff] %v2728_v2  ;;  %v3711_v7 = vrot.slane %v2723_v0, 1  ;;  %v3710_v14 = vshrl.u32 %v2682_v35, 16  ;;  %v2756_v16 = vshll.u32 %v2728_v2, 16  ;;  %v178_v55 = vld [vmem:[%s2639_s25 + $0x30] sm:$0xff]  ;;  %v179_v56 = vld [vmem:[%s2639_s25 + $0x38] sm:$0xff] }
  0x1e   : > { %2392 = vmatmul.msk.bf16.vlgmr.msra.gmra.mxu0 %vm378_vm3, %v246_v61  ;;  %3758 = vst [vmem:[#allocation12_spill] sm:$0xff] %v2734_v5  ;;  %v365_v11 = vrot.slane %v2731_v3, 1  ;;  %v938_v17 = vand.u32 %v2447_v8, %v2621_v4  ;;  %v289_v26 = vor.u32 %v2734_v5, %v285_v36  ;;  %v293_v27 = vrot.slane %v2737_v6, 1 }
  0x1f   : > { %3759 = vst [vmem:[#allocation13_spill] sm:$0xff] %v2737_v6  ;;  %v361_v12 = vor.u32 %v2726_v1, %v3711_v7  ;;  %v329_v38 = vor.u32 %v2744_v9, %v325_v41  ;;  %v333_v39 = vrot.slane %v2747_v10, 1  ;;  %v2768_v40 = vpack.c.bf16 %v207_v19, %v206_v13  ;;  %v181_v13 = vld [vmem:[%s2639_s25 + $0x48] sm:$0xff] }
  0x20   : > { %3760 = vst [vmem:[#allocation14_spill] sm:$0xff] %v2744_v9  ;;  %947 = vmatpush.bf16.msrb.mxu3 %v938_v17  ;;  %v2770_v43 = vpack.c.bf16 %v191_v22, %v190_v20  ;;  %v249_v36 = vor.u32 %v3710_v14, %v245_v51  ;;  %v253_v44 = vrot.slane %v2756_v16, 1  ;;  %v294_v45 = vsel %vm234_vm2, %v289_v26, %v293_v27 }
  0x21   : > { %3761 = vst [vmem:[#allocation15_spill] sm:$0xff] %v2756_v16  ;;  %v366_v28 = vsel %vm234_vm2, %v361_v12, %v365_v11  ;;  %v334_v41 = vsel %vm234_vm2, %v329_v38, %v333_v39  ;;  %v2782_v50 = vshrl.u32 %v2719_v63, 16  ;;  %v2785_v52 = vshll.u32 %v2768_v40, 16  ;;  %v180_v12 = vld [vmem:[%s2639_s25 + $0x40] sm:$0xff] }
  0x22   : > { %2407 = vmatmul.msk.bf16.vlgmr.msra.gmra.mxu3 %vm378_vm3, %v366_v28  ;;  %v2788_v51 = vshll.u32 %v2770_v43, 16  ;;  %v254_v53 = vsel %vm234_vm2, %v249_v36, %v253_v44  ;;  %v2793_v54 = vpack.c.bf16 %v189_v47, %v188_v46  ;;  %v2797_v58 = vpack.c.bf16 %v199_v49, %v198_v48 }
  0x23   : > { %3762 = vst [vmem:[#allocation16_spill] sm:$0xff] %v2785_v52  ;;  %v369_v59 = vor.u32 %v2782_v50, %v365_v11  ;;  %v373_v61 = vrot.slane %v2785_v52, 1  ;;  %v2806_v17 = vshrl.u32 %v2770_v43, 16  ;;  %v2808_v19 = vpack.c.bf16 %v179_v56, %v178_v55 }
  0x24   : > { %3763 = vst [vmem:[#allocation17_spill] sm:$0xff] %v2788_v51  ;;  %v309_v8 = vrot.slane %v2788_v51, 1  ;;  %v2811_v20 = vshrl.u32 %v2710_v57, 16  ;;  %v2814_v22 = vshll.u32 %v2793_v54, 16  ;;  %v2818_v11 = vshrl.u32 %v2717_v62, 16 }
  0x25   : > { %3764 = vst [vmem:[#allocation18_spill] sm:$0xff] %v2793_v54  ;;  %v2821_v28 = vshll.u32 %v2797_v58, 16  ;;  %v2823_v38 = vpack.c.bf16 %v181_v13, %v180_v12  ;;  %v374_v36 = vsel %vm234_vm2, %v369_v59, %v373_v61  ;;  %v2833_v46 = vshll.u32 %v2808_v19, 16 }
  0x26   : > { %3765 = vst [vmem:[#allocation19_spill] sm:$0xff] %v2806_v17  ;;  %v313_v26 = vor.u32 %v2806_v17, %v309_v8  ;;  %v297_v47 = vor.u32 %v2811_v20, %v293_v27  ;;  %v301_v48 = vrot.slane %v2814_v22, 1  ;;  %v337_v49 = vor.u32 %v2818_v11, %v333_v39  ;;  %v200_v39 = vld [vmem:[%s2639_s25 + $0xe0] sm:$0xff] }
  0x27   : > { %3766 = vst [vmem:[#allocation20_spill] sm:$0xff] %v2808_v19  ;;  %v2841_v55 = vshll.u32 %v2823_v38, 16  ;;  %v261_v56 = vrot.slane %v2833_v46, 1  ;;  %v2849_v13 = vshrl.u32 %v2823_v38, 16  ;;  %v2867_v14 = vshrl.u32 %v2793_v54, 16 }
  0x28   : > { %3767 = vst [vmem:[#allocation21_spill] sm:$0xff] %v2811_v20  ;;  %v302_v59 = vsel %vm234_vm2, %v297_v47, %v301_v48  ;;  %v2860_v47 = vshrl.u32 %v2768_v40, 16 }
  0x29   : > { %3768 = vst [vmem:[#allocation22_spill] sm:$0xff] %v2814_v22  ;;  %v269_v27 = vrot.slane %v2841_v55, 1 }
  0x2a   : > { %3769 = vst [vmem:[#allocation23_spill] sm:$0xff] %v2823_v38 }
  0x2b   : > { %2398 = vmatmul.msk.bf16.gmra.mxu1 %vm378_vm3, %v294_v45  ;;  %v318_v45 = vsel %vm234_vm2, %v313_v26, %v317_v37  ;;  %3770 = vst [vmem:[#allocation24_spill] sm:$0xff] %v2841_v55  ;;  %v201_v26 = vld [vmem:[%s2639_s25 + $0xe8] sm:$0xff]  ;;  %v273_v42 = vor.u32 %v2849_v13, %v269_v27 }
  0x2c   : > { %3771 = vst [vmem:[#allocation25_spill] sm:$0xff] %v2849_v13 }
  0x2d   : > { %2403 = vmatmul.msk.bf16.gmra.mxu2 %vm378_vm3, %v334_v41  ;;  %v2830_v41 = vshrl.u32 %v2728_v2, 16  ;;  %3772 = vst [vmem:[#allocation26_spill] sm:$0xff] %v2867_v14 }
  0x2e   : > { %2393 = vmatmul.msk.bf16.gmra.mxu0 %vm378_vm3, %v254_v53  ;;  %v341_v53 = vrot.slane %v2821_v28, 1 }
  0x2f   : > { %v257_v37 = vor.u32 %v2830_v41, %v253_v44  ;;  %v2857_v44 = vpack.c.bf16 %v201_v26, %v200_v39  ;;  %v2877_v39 = vshrl.u32 %v2808_v19, 16  ;;  %v305_v26 = vor.u32 %v2867_v14, %v301_v48  ;;  %v2504_v48 = vld [vmem:[%s3706_s1 + $0xc] sm:$0x3] }
  0x30   : > { %v342_v12 = vsel %vm234_vm2, %v337_v49, %v341_v53  ;;  %v278_v49 = vsel %vm234_vm2, %v273_v42, %v277_v33 }
  0x31   : > { %v310_v7 = vsel %vm234_vm2, %v305_v26, %v309_v8  ;;  %v701_v8 = vrot.slane %v2728_v2, 1  ;;  %v2542_v26 = vld [vmem:[%s3706_s1 + $0x10] sm:$0x3] }
  0x32   : > { %2408 = vmatmul.msk.bf16.gmra.mxu3 %vm378_vm3, %v374_v36  ;;  %v262_v36 = vsel %vm234_vm2, %v257_v37, %v261_v56  ;;  %v2870_v37 = vshrl.u32 %v2797_v58, 16 }
  0x34   : > { %v345_v33 = vor.u32 %v2870_v37, %v341_v53  ;;  %v1602_v53 = vand.u32 %v2504_v48, %v2621_v4 }
  0x36   : > { %1611 = vmatpush.bf16.msra.mxu2 %v1602_v53  ;;  %v3773_v53 = vrot.slane %v2723_v0, 1 }
  0x3b   : > { %2399 = vmatmul.msk.bf16.gmra.mxu1 %vm378_vm3, %v302_v59  ;;  %v2873_v59 = vshll.u32 %v2857_v44, 16 }
  0x3d   : > { %2404 = vmatmul.msk.bf16.gmra.mxu2 %vm378_vm3, %v342_v12  ;;  %v377_v12 = vor.u32 %v2860_v47, %v373_v61  ;;  %v349_v42 = vrot.slane %v2873_v59, 1 }
  0x3e   : > { %2394 = vmatmul.msk.bf16.gmra.mxu0 %vm378_vm3, %v262_v36  ;;  %v265_v36 = vor.u32 %v2877_v39, %v261_v56  ;;  %v699_v56 = vrot.slane %v2682_v35, 1 }
  0x3f   : > { %v350_v52 = vsel %vm234_vm2, %v345_v33, %v349_v42  ;;  %v2114_v33 = vand.u32 %v2542_v26, %v2621_v4 }
  0x40   : > { %v270_v61 = vsel %vm234_vm2, %v265_v36, %v269_v27  ;;  %v2909_v36 = vshrl.u32 %v2857_v44, 16 }
  0x41   : > { %2123 = vmatpush.bf16.msra.mxu0 %v2114_v33  ;;  %v1082_v33 = vrot.slane %v2830_v41, 1 }
  0x42   : > { %2409 = vmatmul.msk.bf16.gmra.mxu3 %vm378_vm3, %v377_v12  ;;  %v353_v48 = vor.u32 %v2909_v36, %v349_v42  ;;  %v3775_v42 = vshll.u32 %v2682_v35, 16 }
  0x44   : > { %v1080_v26 = vrot.slane %v3775_v42, 2 }
  0x4b   : > { %2400 = vmatmul.msk.bf16.gmra.mxu1 %vm378_vm3, %v310_v7  ;;  %v2523_v7 = vld [vmem:[%s3706_s1 + $0xe] sm:$0x3] }
  0x4c   : > { %v1882_v27 = vand.u32 %v2523_v7, %v2621_v4  ;;  %v358_v7 = vsel %vm234_vm2, %v353_v48, %v3773_v53  ;;  %v1083_v48 = vrot.slane %v2756_v16, 2  ;;  %v1086_v16 = vrot.slane %v2877_v39, 1 }
  0x4d   : > { %2405 = vmatmul.msk.bf16.gmra.mxu2 %vm378_vm3, %v350_v52  ;;  %v2485_v52 = vld [vmem:[%s3706_s1 + $0xa] sm:$0x3] }
  0x4e   : > { %2395 = vmatmul.msk.bf16.gmra.mxu0 %vm378_vm3, %v270_v61  ;;  %v1448_v12 = vand.u32 %v2485_v52, %v2621_v4  ;;  %1891 = vmatpush.bf16.msra.mxu3 %v1882_v27  ;;  %v702_v61 = vsel %vm697_vm4, %v699_v56, %v701_v8  ;;  %v703_v4 = vrot.slane %v2808_v19, 1  ;;  %v3774_v27 = vshrl.u32 %v2682_v35, 16 }
  0x50   : > { %1457 = vmatpush.bf16.msra.mxu1 %v1448_v12  ;;  %v704_v52 = vsel %vm697_vm4, %v701_v8, %v703_v4  ;;  %v1079_v12 = vrot.slane %v3774_v27, 1  ;;  %v705_v27 = vrot.slane %v2823_v38, 1 }
  0x52   : > { %2448 = vmatmul.msk.bf16.vlgmr.msrb.gmra.mxu3 %vm378_vm3, %v702_v61  ;;  %v1081_v53 = vor.u32 %v1080_v26, %v1079_v12  ;;  %v706_v42 = vsel %vm697_vm4, %v703_v4, %v705_v27  ;;  %v1087_v12 = vrot.slane %v2833_v46, 2  ;;  %v707_v26 = vrot.slane %v2645_v15, 1 }
  0x54   : > { %v708_v4 = vsel %vm697_vm4, %v705_v27, %v707_v26 }
  0x5b   : > { %2401 = vmatmul.msk.bf16.gmra.mxu1 %vm378_vm3, %v318_v45  ;;  %v698_v45 = vrot.slane %v2676_v32, 1 }
  0x5d   : > { %2406 = vmatmul.msk.bf16.gmra.mxu2 %vm378_vm3, %v358_v7  ;;  %v700_v7 = vsel %vm697_vm4, %v698_v45, %v699_v56  ;;  %v1088_v56 = vor.u32 %v1087_v12, %v1086_v16 }
  0x5e   : > { %2396 = vmatmul.msk.bf16.gmra.mxu0 %vm378_vm3, %v278_v49  ;;  %v1084_v49 = vor.u32 %v1083_v48, %v1082_v33  ;;  %v1090_v33 = vrot.slane %v2849_v13, 1  ;;  %v1091_v48 = vrot.slane %v2841_v55, 2 }
  0x60   : > { %v1085_v8 = vsel %vm1078_vm5, %v1081_v53, %v1084_v49  ;;  %v1092_v16 = vor.u32 %v1091_v48, %v1090_v33 }
  0x62   : > { %2449 = vmatmul.msk.bf16.gmra.mxu3 %vm378_vm3, %v704_v52  ;;  %v1093_v45 = vsel %vm1078_vm5, %v1088_v56, %v1092_v16 }
  0x6b   : > { %2410 = vmatmul.msk.bf16.vlgmr.msrb.gmra.mxu1 %vm378_vm3, %v2676_v32  ;;  %v1089_v32 = vsel %vm1078_vm5, %v1084_v49, %v1088_v56  ;;  %v1094_v49 = vrot.slane %v2660_v24, 1  ;;  %v711_v56 = vrot.slane %v2710_v57, 1 }
  0x6d   : > { %2429 = vmatmul.msk.bf16.vlgmr.msrb.gmra.mxu2 %vm378_vm3, %v700_v7  ;;  %v1095_v7 = vrot.slane %v2657_v23, 2 }
  0x6e   : > { %2467 = vmatmul.msk.bf16.vlgmr.msrb.gmra.mxu0 %vm378_vm3, %v1085_v8 }
  0x6f   : > { %v1096_v8 = vor.u32 %v1095_v7, %v1094_v49  ;;  %v1099_v49 = vrot.slane %v2668_v29, 2  ;;  %v713_v29 = vrot.slane %v2793_v54, 1 }
  0x72   : > { %2450 = vmatmul.msk.bf16.gmra.mxu3 %vm378_vm3, %v706_v42 }
  0x7b   : > { %2411 = vmatmul.msk.bf16.gmra.mxu1 %vm378_vm3, %v2682_v35 }
  0x7d   : > { %2430 = vmatmul.msk.bf16.gmra.mxu2 %vm378_vm3, %v702_v61  ;;  %v709_v61 = vrot.slane %v2649_v18, 1 }
  0x7e   : > { %2468 = vmatmul.msk.bf16.gmra.mxu0 %vm378_vm3, %v1089_v32 }
  0x7f   : > { %v710_v53 = vsel %vm697_vm4, %v707_v26, %v709_v61  ;;  %v712_v33 = vsel %vm697_vm4, %v709_v61, %v711_v56 }
  0x82   : > { %2451 = vmatmul.msk.bf16.gmra.mxu3 %vm378_vm3, %v708_v4 }
  0x8b   : > { %2412 = vmatmul.msk.bf16.gmra.mxu1 %vm378_vm3, %v2728_v2 }
  0x8d   : > { %2431 = vmatmul.msk.bf16.gmra.mxu2 %vm378_vm3, %v704_v52  ;;  %v1097_v52 = vsel %vm1078_vm5, %v1092_v16, %v1096_v8 }
  0x8e   : > { %2469 = vmatmul.msk.bf16.gmra.mxu0 %vm378_vm3, %v1093_v45  ;;  %v1098_v45 = vrot.slane %v2734_v5, 1 }
  0x92   : > { %2452 = vmatmul.msk.bf16.gmra.mxu3 %vm378_vm3, %v710_v53 }
  0x98   : > { %v2961_v27 = vpop.f32.mrf.mxu1 }
  0x9b   : > { %v2963_v12 = vpop.f32.mrf.mxu0  ;;  %2413 = vmatmul.msk.bf16.gmra.mxu1 %vm378_vm3, %v2808_v19 }
  0x9d   : > { %2432 = vmatmul.msk.bf16.gmra.mxu2 %vm378_vm3, %v706_v42  ;;  %v1100_v42 = vor.u32 %v1099_v49, %v1098_v45 }
  0x9e   : > { %2470 = vmatmul.msk.bf16.gmra.mxu0 %vm378_vm3, %v1097_v52 }
  0x9f   : > { %v1101_v61 = vsel %vm1078_vm5, %v1096_v8, %v1100_v42  ;;  %v1103_v8 = vrot.slane %v2737_v6, 2 }
  0xa0   : > { %v2971_v32 = vpop.f32.mrf.mxu2  ;;  %v2973_v26 = vpop.f32.mrf.mxu1 }
  0xa1   : > { %3776 = vst [vmem:[#allocation27_spill] sm:$0xff] %v2971_v32 }
  0xa2   : > { %2453 = vmatmul.msk.bf16.gmra.mxu3 %vm378_vm3, %v712_v33 }
  0xa3   : > { %v2976_v48 = vpop.f32.mrf.mxu0 }
  0xa5   : > { %v2985_v52 = vpop.f32.mrf.mxu3 }
  0xa6   : > { %3778 = vst [vmem:[#allocation29_spill] sm:$0xff] %v2985_v52  ;;  %v714_v52 = vsel %vm697_vm4, %v711_v56, %v713_v29 }
  0xa8   : > { %v2981_v16 = vpop.f32.mrf.mxu2  ;;  %v2983_v7 = vpop.f32.mrf.mxu1 }
  0xa9   : > { %3777 = vst [vmem:[#allocation28_spill] sm:$0xff] %v2981_v16 }
  0xab   : > { %v2987_v32 = vpop.f32.mrf.mxu0  ;;  %2414 = vmatmul.msk.bf16.gmra.mxu1 %vm378_vm3, %v2823_v38  ;;  %v1102_v38 = vrot.slane %v2811_v20, 1 }
  0xad   : > { %2433 = vmatmul.msk.bf16.gmra.mxu2 %vm378_vm3, %v708_v4  ;;  %v2999_v49 = vpop.f32.mrf.mxu3 }
  0xae   : > { %2471 = vmatmul.msk.bf16.gmra.mxu0 %vm378_vm3, %v1101_v61  ;;  %3780 = vst [vmem:[#allocation31_spill] sm:$0xff] %v2999_v49  ;;  %v1104_v61 = vor.u32 %v1103_v8, %v1102_v38  ;;  %v715_v49 = vrot.slane %v2770_v43, 1 }
  0xb0   : > { %v2995_v5 = vpop.f32.mrf.mxu2  ;;  %v2997_v45 = vpop.f32.mrf.mxu1  ;;  %v1105_v56 = vsel %vm1078_vm5, %v1100_v42, %v1104_v61  ;;  %v1107_v42 = vrot.slane %v2814_v22, 2 }
  0xb1   : > { %3779 = vst [vmem:[#allocation30_spill] sm:$0xff] %v2995_v5 }
  0xb2   : > { %2454 = vmatmul.msk.bf16.gmra.mxu3 %vm378_vm3, %v714_v52 }
  0xb3   : > { %v3002_v16 = vpop.f32.mrf.mxu0 }
  0xb5   : > { %v3011_v5 = vpop.f32.mrf.mxu3 }
  0xb6   : > { %3782 = vst [vmem:[#allocation33_spill] sm:$0xff] %v3011_v5  ;;  %v716_v5 = vsel %vm697_vm4, %v713_v29, %v715_v49 }
  0xb8   : > { %v3007_v4 = vpop.f32.mrf.mxu2  ;;  %v3009_v23 = vpop.f32.mrf.mxu1 }
  0xb9   : > { %3781 = vst [vmem:[#allocation32_spill] sm:$0xff] %v3007_v4  ;;  %v1106_v4 = vrot.slane %v2867_v14, 1 }
  0xbb   : > { %v3013_v24 = vpop.f32.mrf.mxu0  ;;  %2415 = vmatmul.msk.bf16.gmra.mxu1 %vm378_vm3, %v2645_v15 }
  0xbd   : > { %2434 = vmatmul.msk.bf16.gmra.mxu2 %vm378_vm3, %v710_v53  ;;  %v3025_v8 = vpop.f32.mrf.mxu3 }
  0xbe   : > { %2472 = vmatmul.msk.bf16.gmra.mxu0 %vm378_vm3, %v1105_v56  ;;  %3784 = vst [vmem:[#allocation35_spill] sm:$0xff] %v3025_v8  ;;  %v1108_v56 = vor.u32 %v1107_v42, %v1106_v4  ;;  %v717_v8 = vrot.slane %v2653_v21, 1 }
  0xc0   : > { %v3021_v6 = vpop.f32.mrf.mxu2  ;;  %v3023_v38 = vpop.f32.mrf.mxu1  ;;  %v1109_v29 = vsel %vm1078_vm5, %v1104_v61, %v1108_v56  ;;  %v1111_v61 = vrot.slane %v2788_v51, 2 }
  0xc1   : > { %3783 = vst [vmem:[#allocation34_spill] sm:$0xff] %v3021_v6 }
  0xc2   : > { %2455 = vmatmul.msk.bf16.gmra.mxu3 %vm378_vm3, %v716_v5 }
  0xc3   : > { %v3028_v20 = vpop.f32.mrf.mxu0 }
  0xc5   : > { %v3037_v6 = vpop.f32.mrf.mxu3 }
  0xc6   : > { %3786 = vst [vmem:[#allocation37_spill] sm:$0xff] %v3037_v6  ;;  %v718_v6 = vsel %vm697_vm4, %v715_v49, %v717_v8 }
  0xc8   : > { %v3033_v53 = vpop.f32.mrf.mxu2  ;;  %v3035_v15 = vpop.f32.mrf.mxu1 }
  0xc9   : > { %3785 = vst [vmem:[#allocation36_spill] sm:$0xff] %v3033_v53  ;;  %v1110_v53 = vrot.slane %v2806_v17, 1 }
  0xcb   : > { %v3039_v19 = vpop.f32.mrf.mxu0  ;;  %2416 = vmatmul.msk.bf16.gmra.mxu1 %vm378_vm3, %v2649_v18 }
  0xcd   : > { %2435 = vmatmul.msk.bf16.gmra.mxu2 %vm378_vm3, %v712_v33  ;;  %v3051_v42 = vpop.f32.mrf.mxu3 }
  0xce   : > { %2473 = vmatmul.msk.bf16.gmra.mxu0 %vm378_vm3, %v1109_v29  ;;  %3789 = vst [vmem:[#allocation40_spill] sm:$0xff] %v3051_v42  ;;  %v1112_v29 = vor.u32 %v1111_v61, %v1110_v53  ;;  %v719_v42 = vrot.slane %v2662_v25, 1 }
  0xd0   : > { %v3047_v22 = vpop.f32.mrf.mxu2  ;;  %v3049_v4 = vpop.f32.mrf.mxu1  ;;  %v1113_v49 = vsel %vm1078_vm5, %v1108_v56, %v1112_v29  ;;  %v3076_v61 = vsel %vm697_vm4, %v717_v8, %v719_v42  ;;  %v1115_v56 = vrot.slane %v2671_v30, 2  ;;  %v721_v30 = vrot.slane %v2717_v62, 1 }
  0xd1   : > { %3787 = vst [vmem:[#allocation38_spill] sm:$0xff] %v3047_v22 }
  0xd2   : > { %3788 = vst [vmem:[#allocation39_spill] sm:$0xff] %v3049_v4  ;;  %2456 = vmatmul.msk.bf16.gmra.mxu3 %vm378_vm3, %v718_v6  ;;  %v3094_v13 = vsel %vm697_vm4, %v719_v42, %v721_v30 }
  0xd3   : > { %v3054_v14 = vpop.f32.mrf.mxu0 }
  0xd5   : > { %v949_v22 = vpop.f32.mrf.mxu3 }
  0xd8   : > { %v3059_v33 = vpop.f32.mrf.mxu2  ;;  %v3061_v18 = vpop.f32.mrf.mxu1 }
  0xd9   : > { %3790 = vst [vmem:[#allocation41_spill] sm:$0xff] %v3059_v33 }
  0xda   : > { %3791 = vst [vmem:[#allocation42_spill] sm:$0xff] %v3061_v18 }
  0xdb   : > { %v3063_v2 = vpop.f32.mrf.mxu0  ;;  %2417 = vmatmul.msk.bf16.gmra.mxu1 %vm378_vm3, %v2710_v57  ;;  %v1114_v57 = vrot.slane %v2674_v31, 1 }
  0xdd   : > { %2436 = vmatmul.msk.bf16.gmra.mxu2 %vm378_vm3, %v714_v52  ;;  %v951_v53 = vpop.f32.mrf.mxu3 }
  0xde   : > { %2474 = vmatmul.msk.bf16.gmra.mxu0 %vm378_vm3, %v1113_v49  ;;  %v1116_v49 = vor.u32 %v1115_v56, %v1114_v57 }
  0xe0   : > { %v3071_v51 = vpop.f32.mrf.mxu2  ;;  %v3073_v17 = vpop.f32.mrf.mxu1  ;;  %v1117_v8 = vsel %vm1078_vm5, %v1112_v29, %v1116_v49  ;;  %v1119_v29 = vrot.slane %v2680_v34, 2 }
  0xe1   : > { %3792 = vst [vmem:[#allocation43_spill] sm:$0xff] %v3071_v51 }
  0xe2   : > { %3793 = vst [vmem:[#allocation44_spill] sm:$0xff] %v3073_v17  ;;  %2457 = vmatmul.msk.bf16.gmra.mxu3 %vm378_vm3, %v3076_v61 }
  0xe3   : > { %v3078_v33 = vpop.f32.mrf.mxu0 }
  0xe5   : > { %v954_v51 = vpop.f32.mrf.mxu3 }
  0xe8   : > { %v3084_v52 = vpop.f32.mrf.mxu2  ;;  %v587_v35 = vpop.f32.mrf.mxu1 }
  0xe9   : > { %3794 = vst [vmem:[#allocation45_spill] sm:$0xff] %v3084_v52  ;;  %v588_v31 = vadd.f32 %v587_v35, %v2963_v12 }
  0xeb   : > { %v1226_v18 = vpop.f32.mrf.mxu0  ;;  %2418 = vmatmul.msk.bf16.gmra.mxu1 %vm378_vm3, %v2793_v54  ;;  %v1118_v54 = vrot.slane %v2744_v9, 1 }
  0xed   : > { %2437 = vmatmul.msk.bf16.gmra.mxu2 %vm378_vm3, %v716_v5  ;;  %v956_v57 = vpop.f32.mrf.mxu3 }
  0xee   : > { %2475 = vmatmul.msk.bf16.gmra.mxu0 %vm378_vm3, %v1117_v8 }
  0xf0   : > { %v799_v17 = vpop.f32.mrf.mxu2  ;;  %v589_v52 = vpop.f32.mrf.mxu1 }
  0xf1   : > { %v889_v55 = vadd.f32 %v799_v17, %v588_v31  ;;  %v590_v35 = vadd.f32 %v589_v52, %v2976_v48  ;;  %v1120_v31 = vor.u32 %v1119_v29, %v1118_v54  ;;  %v723_v54 = vrot.slane %v2797_v58, 1 }
  0xf2   : > { %2458 = vmatmul.msk.bf16.gmra.mxu3 %vm378_vm3, %v3094_v13 }
  0xf3   : > { %v1039_v56 = vadd.f32 %v949_v22, %v889_v55  ;;  %v1228_v4 = vpop.f32.mrf.mxu0  ;;  %v1121_v9 = vsel %vm1078_vm5, %v1116_v49, %v1120_v31  ;;  %v1122_v49 = vrot.slane %v2818_v11, 1 }
  0xf5   : > { %v3098_v5 = vadd.f32 %v1226_v18, %v1039_v56  ;;  %v959_v22 = vpop.f32.mrf.mxu3 }
  0xf8   : > { %v801_v12 = vpop.f32.mrf.mxu2  ;;  %v592_v8 = vpop.f32.mrf.mxu1 }
  0xf9   : > { %v890_v17 = vadd.f32 %v801_v12, %v590_v35  ;;  %v593_v56 = vadd.f32 %v592_v8, %v2987_v32  ;;  %v3113_v12 = vsel %vm697_vm4, %v721_v30, %v723_v54 }
  0xfb   : > { %v1040_v55 = vadd.f32 %v951_v53, %v890_v17  ;;  %v1231_v42 = vpop.f32.mrf.mxu0  ;;  %2419 = vmatmul.msk.bf16.gmra.mxu1 %vm378_vm3, %v2770_v43 }
  0xfd   : > { %2438 = vmatmul.msk.bf16.gmra.mxu2 %vm378_vm3, %v718_v6  ;;  %v3107_v18 = vadd.f32 %v1228_v4, %v1040_v55  ;;  %v961_v53 = vpop.f32.mrf.mxu3  ;;  %v1123_v6 = vrot.slane %v2747_v10, 2 }
  0xfe   : > { %2476 = vmatmul.msk.bf16.gmra.mxu0 %vm378_vm3, %v1121_v9 }
  0xff   : > { %v1124_v8 = vor.u32 %v1123_v6, %v1122_v49 }
 0x100   : > { %v804_v48 = vpop.f32.mrf.mxu2  ;;  %v594_v29 = vpop.f32.mrf.mxu1 }
 0x101   : > { %v891_v52 = vadd.f32 %v804_v48, %v593_v56  ;;  %v595_v9 = vadd.f32 %v594_v29, %v3002_v16  ;;  %v725_v16 = vrot.slane %v2857_v44, 1 }
 0x102   : > { %2459 = vmatmul.msk.bf16.gmra.mxu3 %vm378_vm3, %v3113_v12 }
 0x103   : > { %v1041_v35 = vadd.f32 %v954_v51, %v891_v52  ;;  %v1233_v17 = vpop.f32.mrf.mxu0  ;;  %v1125_v52 = vsel %vm1078_vm5, %v1120_v31, %v1124_v8 }
 0x105   : > { %v3117_v4 = vadd.f32 %v1231_v42, %v1041_v35  ;;  %v964_v51 = vpop.f32.mrf.mxu3 }
 0x108   : > { %v806_v32 = vpop.f32.mrf.mxu2  ;;  %v597_v56 = vpop.f32.mrf.mxu1 }
 0x109   : > { %v892_v55 = vadd.f32 %v806_v32, %v595_v9  ;;  %v598_v35 = vadd.f32 %v597_v56, %v3013_v24  ;;  %v3133_v32 = vsel %vm697_vm4, %v723_v54, %v725_v16 }
 0x10b   : > { %v1042_v48 = vadd.f32 %v956_v57, %v892_v55  ;;  %v1236_v30 = vpop.f32.mrf.mxu0  ;;  %2420 = vmatmul.msk.bf16.gmra.mxu1 %vm378_vm3, %v2653_v21  ;;  %v1126_v55 = vrot.slane %v2870_v37, 1 }
 0x10d   : > { %2439 = vmatmul.msk.bf16.gmra.mxu2 %vm378_vm3, %v3076_v61  ;;  %v3127_v42 = vadd.f32 %v1233_v17, %v1042_v48  ;;  %v966_v6 = vpop.f32.mrf.mxu3  ;;  %v1127_v61 = vrot.slane %v2821_v28, 2 }
 0x10e   : > { %2477 = vmatmul.msk.bf16.gmra.mxu0 %vm378_vm3, %v1125_v52 }
 0x10f   : > { %v1128_v48 = vor.u32 %v1127_v61, %v1126_v55 }
 0x110   : > { %v809_v29 = vpop.f32.mrf.mxu2  ;;  %v599_v57 = vpop.f32.mrf.mxu1 }
 0x111   : > { %v893_v49 = vadd.f32 %v809_v29, %v598_v35  ;;  %v600_v24 = vadd.f32 %v599_v57, %v3028_v20  ;;  %v727_v20 = vrot.slane %v2714_v60, 1 }
 0x112   : > { %2460 = vmatmul.msk.bf16.gmra.mxu3 %vm378_vm3, %v3133_v32 }
 0x113   : > { %v1043_v9 = vadd.f32 %v959_v22, %v893_v49  ;;  %v1238_v31 = vpop.f32.mrf.mxu0  ;;  %v1129_v49 = vsel %vm1078_vm5, %v1124_v8, %v1128_v48 }
 0x115   : > { %v3137_v17 = vadd.f32 %v1236_v30, %v1043_v9  ;;  %v969_v22 = vpop.f32.mrf.mxu3 }
 0x118   : > { %v811_v56 = vpop.f32.mrf.mxu2  ;;  %v602_v35 = vpop.f32.mrf.mxu1 }
 0x119   : > { %v894_v52 = vadd.f32 %v811_v56, %v600_v24  ;;  %v603_v9 = vadd.f32 %v602_v35, %v3039_v19  ;;  %v3153_v56 = vsel %vm697_vm4, %v725_v16, %v727_v20 }
 0x11b   : > { %v1044_v29 = vadd.f32 %v961_v53, %v894_v52  ;;  %v1241_v54 = vpop.f32.mrf.mxu0  ;;  %2421 = vmatmul.msk.bf16.gmra.mxu1 %vm378_vm3, %v2662_v25  ;;  %v1130_v52 = vrot.slane %v2909_v36, 1 }
 0x11d   : > { %2440 = vmatmul.msk.bf16.gmra.mxu2 %vm378_vm3, %v3094_v13  ;;  %v3147_v30 = vadd.f32 %v1238_v31, %v1044_v29  ;;  %v971_v61 = vpop.f32.mrf.mxu3  ;;  %v1131_v13 = vrot.slane %v2873_v59, 2 }
 0x11e   : > { %2478 = vmatmul.msk.bf16.gmra.mxu0 %vm378_vm3, %v1129_v49 }
 0x11f   : > { %v1132_v29 = vor.u32 %v1131_v13, %v1130_v52 }
 0x120   : > { %v814_v57 = vpop.f32.mrf.mxu2  ;;  %v604_v53 = vpop.f32.mrf.mxu1 }
 0x121   : > { %v895_v55 = vadd.f32 %v814_v57, %v603_v9  ;;  %v605_v19 = vadd.f32 %v604_v53, %v3054_v14  ;;  %v729_v14 = vrot.slane %v2719_v63, 1 }
 0x122   : > { %2461 = vmatmul.msk.bf16.gmra.mxu3 %vm378_vm3, %v3153_v56 }
 0x123   : > { %v1045_v24 = vadd.f32 %v964_v51, %v895_v55  ;;  %v1243_v8 = vpop.f32.mrf.mxu0  ;;  %v1133_v55 = vsel %vm1078_vm5, %v1128_v48, %v1132_v29 }
 0x125   : > { %v3157_v31 = vadd.f32 %v1241_v54, %v1045_v24  ;;  %v974_v51 = vpop.f32.mrf.mxu3 }
 0x128   : > { %v816_v35 = vpop.f32.mrf.mxu2  ;;  %v607_v9 = vpop.f32.mrf.mxu1 }
 0x129   : > { %v896_v49 = vadd.f32 %v816_v35, %v605_v19  ;;  %v608_v24 = vadd.f32 %v607_v9, %v3063_v2  ;;  %v3173_v35 = vsel %vm697_vm4, %v727_v20, %v729_v14 }
 0x12b   : > { %v1046_v57 = vadd.f32 %v966_v6, %v896_v49  ;;  %v1246_v16 = vpop.f32.mrf.mxu0  ;;  %2422 = vmatmul.msk.bf16.gmra.mxu1 %vm378_vm3, %v2717_v62  ;;  %v1134_v49 = vrot.slane %v2726_v1, 1 }
 0x12d   : > { %2441 = vmatmul.msk.bf16.gmra.mxu2 %vm378_vm3, %v3113_v12  ;;  %v3167_v54 = vadd.f32 %v1243_v8, %v1046_v57  ;;  %v976_v13 = vpop.f32.mrf.mxu3  ;;  %v1135_v12 = vrot.slane %v2723_v0, 2 }
 0x12e   : > { %2479 = vmatmul.msk.bf16.gmra.mxu0 %vm378_vm3, %v1133_v55 }
 0x12f   : > { %v1136_v57 = vor.u32 %v1135_v12, %v1134_v49 }
 0x130   : > { %v819_v53 = vpop.f32.mrf.mxu2  ;;  %v609_v6 = vpop.f32.mrf.mxu1 }
 0x131   : > { %v897_v52 = vadd.f32 %v819_v53, %v608_v24  ;;  %v610_v2 = vadd.f32 %v609_v6, %v3078_v33  ;;  %v3192_v33 = vrot.slane %v2768_v40, 1 }
 0x132   : > { %2462 = vmatmul.msk.bf16.gmra.mxu3 %vm378_vm3, %v3173_v35 }
 0x133   : > { %v1047_v19 = vadd.f32 %v969_v22, %v897_v52  ;;  %v1248_v48 = vpop.f32.mrf.mxu0  ;;  %v1137_v52 = vsel %vm1078_vm5, %v1132_v29, %v1136_v57  ;;  %v3196_v29 = vsel %vm697_vm4, %v729_v14, %v3192_v33 }
 0x135   : > { %v3177_v8 = vadd.f32 %v1246_v16, %v1047_v19  ;;  %v979_v22 = vpop.f32.mrf.mxu3 }
 0x137   : > { %3795 = vst [vmem:[#allocation46_spill] sm:$0xff] %v3177_v8 }
 0x138   : > { %v821_v9 = vpop.f32.mrf.mxu2  ;;  %v612_v24 = vpop.f32.mrf.mxu1 }
 0x139   : > { %v898_v55 = vadd.f32 %v821_v9, %v610_v2  ;;  %v613_v19 = vadd.f32 %v612_v24, %v2961_v27  ;;  %v1139_v27 = vrot.slane %v2731_v3, 2 }
 0x13b   : > { %v1048_v53 = vadd.f32 %v971_v61, %v898_v55  ;;  %v1251_v20 = vpop.f32.mrf.mxu0  ;;  %2423 = vmatmul.msk.bf16.gmra.mxu1 %vm378_vm3, %v2797_v58 }
 0x13d   : > { %2442 = vmatmul.msk.bf16.gmra.mxu2 %vm378_vm3, %v3133_v32  ;;  %v3187_v16 = vadd.f32 %v1248_v48, %v1048_v53  ;;  %v981_v12 = vpop.f32.mrf.mxu3  ;;  %v1138_v48 = vrot.slane %v2782_v50, 1 }
 0x13e   : > { %2480 = vmatmul.msk.bf16.gmra.mxu0 %vm378_vm3, %v1137_v52  ;;  %v208_v52 = vld [vmem:[%s2639_s25 + $0x120] sm:$0xff] }
 0x13f   : > { %3796 = vst [vmem:[#allocation47_spill] sm:$0xff] %v3187_v16  ;;  %v1140_v53 = vor.u32 %v1139_v27, %v1138_v48 }
 0x140   : > { %v824_v61 = vpop.f32.mrf.mxu2  ;;  %v614_v49 = vpop.f32.mrf.mxu1 }
 0x141   : > { %v899_v6 = vadd.f32 %v824_v61, %v613_v19  ;;  %v615_v55 = vadd.f32 %v614_v49, %v2973_v26 }
 0x142   : > { %2463 = vmatmul.msk.bf16.gmra.mxu3 %vm378_vm3, %v3196_v29 }
 0x143   : > { %v1049_v2 = vadd.f32 %v974_v51, %v899_v6  ;;  %v1253_v32 = vpop.f32.mrf.mxu0  ;;  %v209_v51 = vld [vmem:[%s2639_s25 + $0x128] sm:$0xff] }
 0x144   : > { %v3207_v16 = vpack.c.bf16 %v209_v51, %v208_v52  ;;  %v1142_v51 = vrot.slane %v2860_v47, 1 }
 0x145   : > { %v3200_v9 = vadd.f32 %v1251_v20, %v1049_v2  ;;  %v984_v14 = vpop.f32.mrf.mxu3  ;;  %v1141_v20 = vsel %vm1078_vm5, %v1136_v57, %v1140_v53 }
 0x146   : > { %v929_v2 = vrot.slane %v3207_v16, 1 }
 0x148   : > { %v826_v24 = vpop.f32.mrf.mxu2  ;;  %v617_v61 = vpop.f32.mrf.mxu1  ;;  %v930_v52 = vsel %vm697_vm4, %v3192_v33, %v929_v2 }
 0x149   : > { %v900_v19 = vadd.f32 %v826_v24, %v615_v55  ;;  %v618_v49 = vadd.f32 %v617_v61, %v2983_v7 }
 0x14b   : > { %v1050_v6 = vadd.f32 %v976_v13, %v900_v19  ;;  %v1256_v8 = vpop.f32.mrf.mxu0  ;;  %2424 = vmatmul.msk.bf16.gmra.mxu1 %vm378_vm3, %v2857_v44 }
 0x14d   : > { %2443 = vmatmul.msk.bf16.gmra.mxu2 %vm378_vm3, %v3153_v56  ;;  %v3214_v26 = vadd.f32 %v1253_v32, %v1050_v6  ;;  %v986_v55 = vpop.f32.mrf.mxu3  ;;  %v3798_v56 = vld [vmem:[#allocation16_spill] sm:$0xff] }
 0x14e   : > { %2481 = vmatmul.msk.bf16.gmra.mxu0 %vm378_vm3, %v1141_v20  ;;  %v1143_v32 = vrot.slane %v3798_v56, 2 }
 0x14f   : > { %3797 = vst [vmem:[#allocation48_spill] sm:$0xff] %v3214_v26 }
 0x150   : > { %v829_v13 = vpop.f32.mrf.mxu2  ;;  %v619_v27 = vpop.f32.mrf.mxu1  ;;  %v1144_v6 = vor.u32 %v1143_v32, %v1142_v51 }
 0x151   : > { %v901_v48 = vadd.f32 %v829_v13, %v618_v49  ;;  %v620_v7 = vadd.f32 %v619_v27, %v2997_v45  ;;  %v3745_v27 = vshrl.u32 %v3207_v16, 16 }
 0x152   : > { %2464 = vmatmul.msk.bf16.gmra.mxu3 %vm378_vm3, %v930_v52  ;;  %v1145_v26 = vsel %vm1078_vm5, %v1140_v53, %v1144_v6 }
 0x153   : > { %v1051_v24 = vadd.f32 %v979_v22, %v901_v48  ;;  %v1258_v57 = vpop.f32.mrf.mxu0  ;;  %v1149_v53 = vrot.slane %v3745_v27, 1 }
 0x155   : > { %v3223_v19 = vadd.f32 %v1256_v8, %v1051_v24  ;;  %v989_v13 = vpop.f32.mrf.mxu3 }
 0x158   : > { %v831_v61 = vpop.f32.mrf.mxu2  ;;  %v622_v49 = vpop.f32.mrf.mxu1 }
 0x159   : > { %v902_v20 = vadd.f32 %v831_v61, %v620_v7  ;;  %v623_v24 = vadd.f32 %v622_v49, %v3009_v23 }
 0x15b   : > { %v1052_v22 = vadd.f32 %v981_v12, %v902_v20  ;;  %v1261_v48 = vpop.f32.mrf.mxu0  ;;  %2425 = vmatmul.msk.bf16.gmra.mxu1 %vm378_vm3, %v2714_v60  ;;  %v3746_v12 = vshll.u32 %v3207_v16, 16 }
 0x15d   : > { %2444 = vmatmul.msk.bf16.gmra.mxu2 %vm378_vm3, %v3173_v35  ;;  %v3232_v8 = vadd.f32 %v1258_v57, %v1052_v22  ;;  %v991_v32 = vpop.f32.mrf.mxu3  ;;  %v1152_v35 = vrot.slane %v3746_v12, 2  ;;  %v3808_v12 = vld [vmem:[#allocation9_spill] sm:$0xff] }
 0x15e   : > { %2482 = vmatmul.msk.bf16.gmra.mxu0 %vm378_vm3, %v1145_v26 }
 0x15f   : > { %3799 = vst [vmem:[#allocation16_spill] sm:$0xff] %v3232_v8  ;;  %v1153_v20 = vor.u32 %v1152_v35, %v1149_v53  ;;  %v1745_v8 = vrot.slane %v2877_v39, 2 }
 0x160   : > { %v834_v45 = vpop.f32.mrf.mxu2  ;;  %v624_v51 = vpop.f32.mrf.mxu1 }
 0x161   : > { %v903_v52 = vadd.f32 %v834_v45, %v623_v24  ;;  %v625_v23 = vadd.f32 %v624_v51, %v3023_v38  ;;  %v1154_v38 = vsel %vm1078_vm5, %v1144_v6, %v1153_v20 }
 0x162   : > { %2465 = vmatmul.msk.bf16.gmra.mxu3 %vm378_vm3, %v929_v2  ;;  %v3256_v2 = vld [vmem:[%s2639_s25 + $0x130] sm:$0xff] }
 0x163   : > { %v1053_v7 = vadd.f32 %v984_v14, %v903_v52  ;;  %v1263_v61 = vpop.f32.mrf.mxu0  ;;  %v1742_v14 = vrot.slane %v2830_v41, 2  ;;  %v3800_v52 = vld [vmem:[#allocation15_spill] sm:$0xff]  ;;  %v3264_v53 = vpack.c.bf16 %v3256_v2, %v3256_v2 }
 0x164   : > { %v1743_v27 = vrot.slane %v3800_v52, 3 }
 0x165   : > { %v3242_v57 = vadd.f32 %v1261_v48, %v1053_v7  ;;  %v994_v24 = vpop.f32.mrf.mxu3  ;;  %v1746_v48 = vrot.slane %v2833_v46, 3  ;;  %3801 = vst [vmem:[#allocation15_spill] sm:$0xff] %v3264_v53 }
 0x166   : > { %v1744_v39 = vor.u32 %v1743_v27, %v1742_v14 }
 0x168   : > { %v836_v26 = vpop.f32.mrf.mxu2  ;;  %v627_v22 = vpop.f32.mrf.mxu1 }
 0x169   : > { %v904_v49 = vadd.f32 %v836_v26, %v625_v23  ;;  %v628_v41 = vadd.f32 %v627_v22, %v3035_v15 }
 0x16b   : > { %v1054_v45 = vadd.f32 %v986_v55, %v904_v49  ;;  %v1266_v7 = vpop.f32.mrf.mxu0  ;;  %2426 = vmatmul.msk.bf16.gmra.mxu1 %vm378_vm3, %v2719_v63  ;;  %v1747_v55 = vor.u32 %v1746_v48, %v1745_v8  ;;  %v1156_v49 = vshll.u32 %v3264_v53, 16  ;;  %v3803_v8 = vld [vmem:[#allocation39_spill] sm:$0xff] }
 0x16d   : > { %2445 = vmatmul.msk.bf16.gmra.mxu2 %vm378_vm3, %v3196_v29  ;;  %v3258_v51 = vadd.f32 %v1263_v61, %v1054_v45  ;;  %v996_v23 = vpop.f32.mrf.mxu3  ;;  %v1748_v26 = vsel %vm1741_vm6, %v1744_v39, %v1747_v55  ;;  %v1158_v14 = vrot.slane %v1156_v49, 2 }
 0x16e   : > { %2483 = vmatmul.msk.bf16.gmra.mxu0 %vm378_vm3, %v1154_v38 }
 0x170   : > { %v839_v46 = vpop.f32.mrf.mxu2  ;;  %v629_v35 = vpop.f32.mrf.mxu1 }
 0x171   : > { %v905_v6 = vadd.f32 %v839_v46, %v628_v41  ;;  %v630_v27 = vadd.f32 %v629_v35, %v3803_v8  ;;  %v3804_v41 = vld [vmem:[#allocation25_spill] sm:$0xff] }
 0x172   : > { %2524 = vmatmul.msk.bf16.vlgmr.msra.gmra.mxu3 %vm378_vm3, %v1748_v26  ;;  %v1749_v46 = vrot.slane %v3804_v41, 2 }
 0x173   : > { %v1055_v29 = vadd.f32 %v989_v13, %v905_v6  ;;  %v1268_v61 = vpop.f32.mrf.mxu0  ;;  %v3805_v13 = vld [vmem:[#allocation24_spill] sm:$0xff] }
 0x174   : > { %v1750_v6 = vrot.slane %v3805_v13, 3 }
 0x175   : > { %v3268_v15 = vadd.f32 %v1266_v7, %v1055_v29  ;;  %v999_v48 = vpop.f32.mrf.mxu3  ;;  %v1159_v7 = vsel %vm1078_vm5, %v1153_v20, %v1158_v14  ;;  %v3807_v29 = vld [vmem:[#allocation42_spill] sm:$0xff]  ;;  %v1356_v20 = vrot.slane %v3808_v12, 2  ;;  %v3809_v14 = vld [vmem:[#allocation11_spill] sm:$0xff] }
 0x176   : > { %v1357_v53 = vrot.slane %v3809_v14, 2 }
 0x177   : > { %3802 = vst [vmem:[#allocation49_spill] sm:$0xff] %v3268_v15 }
 0x178   : > { %v841_v22 = vpop.f32.mrf.mxu2  ;;  %v632_v52 = vpop.f32.mrf.mxu1  ;;  %v1358_v12 = vsel %vm1355_vm7, %v1356_v20, %v1357_v53 }
 0x179   : > { %v906_v45 = vadd.f32 %v841_v22, %v630_v27  ;;  %v633_v26 = vadd.f32 %v632_v52, %v3807_v29 }
 0x17b   : > { %v1056_v38 = vadd.f32 %v991_v32, %v906_v45  ;;  %v1271_v39 = vpop.f32.mrf.mxu0  ;;  %2427 = vmatmul.msk.bf16.gmra.mxu1 %vm378_vm3, %v2768_v40  ;;  %v1751_v32 = vor.u32 %v1750_v6, %v1749_v46 }
 0x17d   : > { %2446 = vmatmul.msk.bf16.gmra.mxu2 %vm378_vm3, %v3192_v33  ;;  %v3279_v35 = vadd.f32 %v1268_v61, %v1056_v38  ;;  %v1001_v22 = vpop.f32.mrf.mxu3  ;;  %v1752_v41 = vsel %vm1741_vm6, %v1747_v55, %v1751_v32  ;;  %v3811_v61 = vld [vmem:[#allocation20_spill] sm:$0xff] }
 0x17e   : > { %2484 = vmatmul.msk.bf16.gmra.mxu0 %vm378_vm3, %v1159_v7  ;;  %v1359_v52 = vrot.slane %v3811_v61, 2  ;;  %v3812_v38 = vld [vmem:[#allocation44_spill] sm:$0xff]  ;;  %v2022_v7 = vrot.slane %v3809_v14, 3 }
 0x17f   : > { %3806 = vst [vmem:[#allocation39_spill] sm:$0xff] %v3279_v35 }
 0x180   : > { %v844_v49 = vpop.f32.mrf.mxu2  ;;  %v634_v27 = vpop.f32.mrf.mxu1 }
 0x181   : > { %v907_v8 = vadd.f32 %v844_v49, %v633_v26  ;;  %v635_v46 = vadd.f32 %v634_v27, %v3812_v38 }
 0x182   : > { %2525 = vmatmul.msk.bf16.gmra.mxu3 %vm378_vm3, %v1752_v41 }
 0x183   : > { %v1057_v45 = vadd.f32 %v994_v24, %v907_v8  ;;  %v1273_v13 = vpop.f32.mrf.mxu0  ;;  %v2023_v24 = vrot.slane %v3811_v61, 3  ;;  %v3813_v8 = vld [vmem:[#allocation5_spill] sm:$0xff]  ;;  %v3816_v61 = vld [vmem:[#allocation27_spill] sm:$0xff] }
 0x185   : > { %v3286_v33 = vadd.f32 %v1271_v39, %v1057_v45  ;;  %v1004_v26 = vpop.f32.mrf.mxu3  ;;  %v1360_v39 = vsel %vm1355_vm7, %v1357_v53, %v1359_v52  ;;  %v1753_v45 = vrot.slane %v3813_v8, 2  ;;  %v2024_v27 = vsel %vm2021_vm8, %v2022_v7, %v2023_v24  ;;  %v3818_v7 = vld [vmem:[#allocation23_spill] sm:$0xff] }
 0x186   : > { %v1361_v15 = vrot.slane %v3818_v7, 2 }
 0x187   : > { %3810 = vst [vmem:[#allocation25_spill] sm:$0xff] %v3286_v33  ;;  %v3814_v33 = vld [vmem:[#allocation4_spill] sm:$0xff] }
 0x188   : > { %v846_v6 = vpop.f32.mrf.mxu2  ;;  %v637_v29 = vpop.f32.mrf.mxu1  ;;  %v1754_v41 = vrot.slane %v3814_v33, 3 }
 0x189   : > { %v908_v55 = vadd.f32 %v846_v6, %v635_v46  ;;  %v638_v20 = vadd.f32 %v637_v29, %v3816_v61 }
 0x18a   : > { %v1755_v38 = vor.u32 %v1754_v41, %v1753_v45 }
 0x18b   : > { %v1058_v49 = vadd.f32 %v996_v23, %v908_v55  ;;  %v1276_v35 = vpop.f32.mrf.mxu0  ;;  %2486 = vmatmul.msk.bf16.vlgmr.msra.gmra.mxu1 %vm378_vm3, %v1358_v12 }
 0x18c   : > { %v1756_v33 = vsel %vm1741_vm6, %v1751_v32, %v1755_v38 }
 0x18d   : > { %2505 = vmatmul.msk.bf16.vlgmr.msra.gmra.mxu2 %vm378_vm3, %v1360_v39  ;;  %v3300_v14 = vadd.f32 %v1273_v13, %v1058_v49  ;;  %v1006_v6 = vpop.f32.mrf.mxu3  ;;  %v3819_v13 = vld [vmem:[#allocation28_spill] sm:$0xff] }
 0x18e   : > { %2543 = vmatmul.msk.bf16.vlgmr.msra.gmra.mxu0 %vm378_vm3, %v2024_v27  ;;  %v2025_v27 = vrot.slane %v3818_v7, 3  ;;  %v3823_v7 = vld [vmem:[#allocation30_spill] sm:$0xff] }
 0x18f   : > { %3815 = vst [vmem:[#allocation24_spill] sm:$0xff] %v3300_v14 }
 0x190   : > { %v849_v53 = vpop.f32.mrf.mxu2  ;;  %v639_v46 = vpop.f32.mrf.mxu1 }
 0x191   : > { %v909_v23 = vadd.f32 %v849_v53, %v638_v20  ;;  %v640_v49 = vadd.f32 %v639_v46, %v3819_v13  ;;  %v1362_v20 = vsel %vm1355_vm7, %v1359_v52, %v1361_v15  ;;  %v3820_v53 = vld [vmem:[#allocation12_spill] sm:$0xff] }
 0x192   : > { %2526 = vmatmul.msk.bf16.gmra.mxu3 %vm378_vm3, %v1756_v33  ;;  %v1757_v32 = vrot.slane %v3820_v53, 2  ;;  %v2026_v33 = vsel %vm2021_vm8, %v2023_v24, %v2025_v27  ;;  %v3825_v24 = vld [vmem:[#allocation2_spill] sm:$0xff] }
 0x193   : > { %v1059_v55 = vadd.f32 %v999_v48, %v909_v23  ;;  %v1278_v8 = vpop.f32.mrf.mxu0  ;;  %v3821_v23 = vld [vmem:[#allocation6_spill] sm:$0xff]  ;;  %v1363_v14 = vrot.slane %v3825_v24, 2 }
 0x195   : > { %v3305_v12 = vadd.f32 %v1276_v35, %v1059_v55  ;;  %v1009_v61 = vpop.f32.mrf.mxu3  ;;  %v1758_v35 = vrot.slane %v3821_v23, 3 }
 0x197   : > { %3817 = vst [vmem:[#allocation42_spill] sm:$0xff] %v3305_v12 }
 0x198   : > { %v851_v29 = vpop.f32.mrf.mxu2  ;;  %v642_v41 = vpop.f32.mrf.mxu1 }
 0x199   : > { %v910_v45 = vadd.f32 %v851_v29, %v640_v49  ;;  %v643_v13 = vadd.f32 %v642_v41, %v3823_v7  ;;  %v1759_v49 = vor.u32 %v1758_v35, %v1757_v32 }
 0x19b   : > { %v1060_v48 = vadd.f32 %v1001_v22, %v910_v45  ;;  %v1281_v55 = vpop.f32.mrf.mxu0  ;;  %2487 = vmatmul.msk.bf16.gmra.mxu1 %vm378_vm3, %v1360_v39  ;;  %v1760_v23 = vsel %vm1741_vm6, %v1755_v38, %v1759_v49 }
 0x19d   : > { %2506 = vmatmul.msk.bf16.gmra.mxu2 %vm378_vm3, %v1362_v20  ;;  %v3317_v46 = vadd.f32 %v1278_v8, %v1060_v48  ;;  %v1011_v45 = vpop.f32.mrf.mxu3  ;;  %v3826_v8 = vld [vmem:[#allocation32_spill] sm:$0xff] }
 0x19e   : > { %2544 = vmatmul.msk.bf16.gmra.mxu0 %vm378_vm3, %v2026_v33  ;;  %v2027_v33 = vrot.slane %v3825_v24, 3  ;;  %v3830_v24 = vld [vmem:[#allocation34_spill] sm:$0xff] }
 0x19f   : > { %3822 = vst [vmem:[#allocation9_spill] sm:$0xff] %v3317_v46 }
 0x1a0   : > { %v854_v52 = vpop.f32.mrf.mxu2  ;;  %v644_v29 = vpop.f32.mrf.mxu1 }
 0x1a1   : > { %v911_v22 = vadd.f32 %v854_v52, %v643_v13  ;;  %v645_v48 = vadd.f32 %v644_v29, %v3826_v8  ;;  %v1364_v13 = vsel %vm1355_vm7, %v1361_v15, %v1363_v14  ;;  %v3827_v52 = vld [vmem:[#allocation21_spill] sm:$0xff] }
 0x1a2   : > { %2527 = vmatmul.msk.bf16.gmra.mxu3 %vm378_vm3, %v1760_v23  ;;  %v1761_v38 = vrot.slane %v3827_v52, 2  ;;  %v2028_v23 = vsel %vm2021_vm8, %v2025_v27, %v2027_v33  ;;  %v3832_v27 = vld [vmem:[#allocation3_spill] sm:$0xff] }
 0x1a3   : > { %v1061_v53 = vadd.f32 %v1004_v26, %v911_v22  ;;  %v1283_v12 = vpop.f32.mrf.mxu0  ;;  %v3828_v22 = vld [vmem:[#allocation13_spill] sm:$0xff]  ;;  %v1365_v46 = vrot.slane %v3832_v27, 2 }
 0x1a5   : > { %v3322_v39 = vadd.f32 %v1281_v55, %v1061_v53  ;;  %v1014_v7 = vpop.f32.mrf.mxu3  ;;  %v1762_v55 = vrot.slane %v3828_v22, 3 }
 0x1a7   : > { %3824 = vst [vmem:[#allocation11_spill] sm:$0xff] %v3322_v39 }
 0x1a8   : > { %v856_v41 = vpop.f32.mrf.mxu2  ;;  %v647_v35 = vpop.f32.mrf.mxu1 }
 0x1a9   : > { %v912_v32 = vadd.f32 %v856_v41, %v645_v48  ;;  %v648_v8 = vadd.f32 %v647_v35, %v3830_v24  ;;  %v1763_v48 = vor.u32 %v1762_v55, %v1761_v38 }
 0x1ab   : > { %v1062_v26 = vadd.f32 %v1006_v6, %v912_v32  ;;  %v1286_v53 = vpop.f32.mrf.mxu0  ;;  %2488 = vmatmul.msk.bf16.gmra.mxu1 %vm378_vm3, %v1362_v20  ;;  %v1764_v22 = vsel %vm1741_vm6, %v1759_v49, %v1763_v48 }
 0x1ad   : > { %2507 = vmatmul.msk.bf16.gmra.mxu2 %vm378_vm3, %v1364_v13  ;;  %v3334_v29 = vadd.f32 %v1283_v12, %v1062_v26  ;;  %v1016_v32 = vpop.f32.mrf.mxu3  ;;  %v3833_v12 = vld [vmem:[#allocation36_spill] sm:$0xff] }
 0x1ae   : > { %2545 = vmatmul.msk.bf16.gmra.mxu0 %vm378_vm3, %v2028_v23  ;;  %v2029_v23 = vrot.slane %v3832_v27, 3  ;;  %v3837_v27 = vld [vmem:[#allocation38_spill] sm:$0xff] }
 0x1af   : > { %3829 = vst [vmem:[#allocation20_spill] sm:$0xff] %v3334_v29 }
 0x1b0   : > { %v859_v15 = vpop.f32.mrf.mxu2  ;;  %v649_v41 = vpop.f32.mrf.mxu1 }
 0x1b1   : > { %v913_v6 = vadd.f32 %v859_v15, %v648_v8  ;;  %v650_v26 = vadd.f32 %v649_v41, %v3833_v12  ;;  %v1366_v8 = vsel %vm1355_vm7, %v1363_v14, %v1365_v46  ;;  %v3834_v15 = vld [vmem:[#allocation26_spill] sm:$0xff] }
 0x1b2   : > { %2528 = vmatmul.msk.bf16.gmra.mxu3 %vm378_vm3, %v1764_v22  ;;  %v1765_v49 = vrot.slane %v3834_v15, 2  ;;  %v2030_v22 = vsel %vm2021_vm8, %v2027_v33, %v2029_v23  ;;  %v3839_v33 = vld [vmem:[#allocation10_spill] sm:$0xff] }
 0x1b3   : > { %v1063_v52 = vadd.f32 %v1009_v61, %v913_v6  ;;  %v1288_v39 = vpop.f32.mrf.mxu0  ;;  %v3835_v6 = vld [vmem:[#allocation22_spill] sm:$0xff]  ;;  %v1367_v29 = vrot.slane %v3839_v33, 2 }
 0x1b5   : > { %v3339_v20 = vadd.f32 %v1286_v53, %v1063_v52  ;;  %v1019_v24 = vpop.f32.mrf.mxu3  ;;  %v1766_v53 = vrot.slane %v3835_v6, 3 }
 0x1b7   : > { %3831 = vst [vmem:[#allocation44_spill] sm:$0xff] %v3339_v20 }
 0x1b8   : > { %v861_v35 = vpop.f32.mrf.mxu2  ;;  %v652_v55 = vpop.f32.mrf.mxu1 }
 0x1b9   : > { %v914_v38 = vadd.f32 %v861_v35, %v650_v26  ;;  %v653_v12 = vadd.f32 %v652_v55, %v3837_v27  ;;  %v1767_v26 = vor.u32 %v1766_v53, %v1765_v49 }
 0x1bb   : > { %v1064_v61 = vadd.f32 %v1011_v45, %v914_v38  ;;  %v1291_v52 = vpop.f32.mrf.mxu0  ;;  %2489 = vmatmul.msk.bf16.gmra.mxu1 %vm378_vm3, %v1364_v13  ;;  %v1768_v6 = vsel %vm1741_vm6, %v1763_v48, %v1767_v26 }
 0x1bd   : > { %2508 = vmatmul.msk.bf16.gmra.mxu2 %vm378_vm3, %v1366_v8  ;;  %v3351_v41 = vadd.f32 %v1288_v39, %v1064_v61  ;;  %v1021_v38 = vpop.f32.mrf.mxu3  ;;  %v3840_v39 = vld [vmem:[#allocation41_spill] sm:$0xff] }
 0x1be   : > { %2546 = vmatmul.msk.bf16.gmra.mxu0 %vm378_vm3, %v2030_v22  ;;  %v2031_v22 = vrot.slane %v3839_v33, 3  ;;  %v3843_v33 = vld [vmem:[#allocation43_spill] sm:$0xff] }
 0x1bf   : > { %3836 = vst [vmem:[#allocation5_spill] sm:$0xff] %v3351_v41 }
 0x1c0   : > { %v864_v14 = vpop.f32.mrf.mxu2  ;;  %v654_v35 = vpop.f32.mrf.mxu1 }
 0x1c1   : > { %v915_v45 = vadd.f32 %v864_v14, %v653_v12  ;;  %v655_v61 = vadd.f32 %v654_v35, %v3840_v39  ;;  %v1368_v12 = vsel %vm1355_vm7, %v1365_v46, %v1367_v29  ;;  %v3841_v14 = vld [vmem:[#allocation19_spill] sm:$0xff] }
 0x1c2   : > { %2529 = vmatmul.msk.bf16.gmra.mxu3 %vm378_vm3, %v1768_v6  ;;  %v1769_v48 = vrot.slane %v3841_v14, 2  ;;  %v2032_v6 = vsel %vm2021_vm8, %v2029_v23, %v2031_v22  ;;  %v3845_v23 = vld [vmem:[#allocation18_spill] sm:$0xff] }
 0x1c3   : > { %v1065_v15 = vadd.f32 %v1014_v7, %v915_v45  ;;  %v1293_v20 = vpop.f32.mrf.mxu0  ;;  %v3842_v45 = vld [vmem:[#allocation17_spill] sm:$0xff]  ;;  %v1369_v41 = vrot.slane %v3845_v23, 2 }
 0x1c5   : > { %v3356_v13 = vadd.f32 %v1291_v52, %v1065_v15  ;;  %v1024_v27 = vpop.f32.mrf.mxu3  ;;  %v1770_v52 = vrot.slane %v3842_v45, 3 }
 0x1c7   : > { %3838 = vst [vmem:[#allocation4_spill] sm:$0xff] %v3356_v13 }
 0x1c8   : > { %v866_v55 = vpop.f32.mrf.mxu2  ;;  %v657_v53 = vpop.f32.mrf.mxu1 }
 0x1c9   : > { %v916_v49 = vadd.f32 %v866_v55, %v655_v61  ;;  %v658_v39 = vadd.f32 %v657_v53, %v3843_v33  ;;  %v1771_v61 = vor.u32 %v1770_v52, %v1769_v48 }
 0x1cb   : > { %v1066_v7 = vadd.f32 %v1016_v32, %v916_v49  ;;  %v1296_v15 = vpop.f32.mrf.mxu0  ;;  %2490 = vmatmul.msk.bf16.gmra.mxu1 %vm378_vm3, %v1366_v8  ;;  %v1772_v45 = vsel %vm1741_vm6, %v1767_v26, %v1771_v61 }
 0x1cd   : > { %2509 = vmatmul.msk.bf16.gmra.mxu2 %vm378_vm3, %v1368_v12  ;;  %v3368_v35 = vadd.f32 %v1293_v20, %v1066_v7  ;;  %v1026_v49 = vpop.f32.mrf.mxu3  ;;  %v3846_v20 = vld [vmem:[#allocation45_spill] sm:$0xff] }
 0x1ce   : > { %2547 = vmatmul.msk.bf16.gmra.mxu0 %vm378_vm3, %v2032_v6  ;;  %v2033_v6 = vrot.slane %v3845_v23, 3  ;;  %v3849_v23 = vld [vmem:[#allocation29_spill] sm:$0xff] }
 0x1d0   : > { %v869_v46 = vpop.f32.mrf.mxu2  ;;  %v659_v55 = vpop.f32.mrf.mxu1 }
 0x1d1   : > { %v917_v32 = vadd.f32 %v869_v46, %v658_v39  ;;  %v660_v7 = vadd.f32 %v659_v55, %v3846_v20  ;;  %v1370_v39 = vsel %vm1355_vm7, %v1367_v29, %v1369_v41  ;;  %v3847_v46 = vld [vmem:[#allocation8_spill] sm:$0xff] }
 0x1d2   : > { %2530 = vmatmul.msk.bf16.gmra.mxu3 %vm378_vm3, %v1772_v45  ;;  %v1773_v26 = vrot.slane %v3847_v46, 2  ;;  %v2034_v45 = vsel %vm2021_vm8, %v2031_v22, %v2033_v6  ;;  %v1371_v22 = vrot.slane %v2770_v43, 2 }
 0x1d3   : > { %v1067_v14 = vadd.f32 %v1019_v24, %v917_v32  ;;  %v1298_v13 = vpop.f32.mrf.mxu0  ;;  %v3848_v32 = vld [vmem:[#allocation7_spill] sm:$0xff] }
 0x1d5   : > { %v3373_v8 = vadd.f32 %v1296_v15, %v1067_v14  ;;  %v1029_v33 = vpop.f32.mrf.mxu3  ;;  %v1774_v15 = vrot.slane %v3848_v32, 3 }
 0x1d7   : > { %3844 = vst [vmem:[#allocation27_spill] sm:$0xff] %v3373_v8 }
 0x1d8   : > { %v871_v53 = vpop.f32.mrf.mxu2  ;;  %v662_v52 = vpop.f32.mrf.mxu1 }
 0x1d9   : > { %v918_v48 = vadd.f32 %v871_v53, %v660_v7  ;;  %v663_v20 = vadd.f32 %v662_v52, %v3849_v23  ;;  %v1775_v7 = vor.u32 %v1774_v15, %v1773_v26 }
 0x1db   : > { %v1068_v24 = vadd.f32 %v1021_v38, %v918_v48  ;;  %v1301_v14 = vpop.f32.mrf.mxu0  ;;  %2491 = vmatmul.msk.bf16.gmra.mxu1 %vm378_vm3, %v1368_v12  ;;  %v1776_v32 = vsel %vm1741_vm6, %v1771_v61, %v1775_v7 }
 0x1dd   : > { %2510 = vmatmul.msk.bf16.gmra.mxu2 %vm378_vm3, %v1370_v39  ;;  %v3385_v55 = vadd.f32 %v1298_v13, %v1068_v24  ;;  %v1031_v48 = vpop.f32.mrf.mxu3  ;;  %v3850_v13 = vld [vmem:[#allocation31_spill] sm:$0xff] }
 0x1de   : > { %2548 = vmatmul.msk.bf16.gmra.mxu0 %vm378_vm3, %v2034_v45  ;;  %v2035_v45 = vrot.slane %v2770_v43, 3  ;;  %v3852_v43 = vld [vmem:[#allocation33_spill] sm:$0xff] }
 0x1e0   : > { %v874_v29 = vpop.f32.mrf.mxu2  ;;  %v664_v53 = vpop.f32.mrf.mxu1 }
 0x1e1   : > { %v919_v38 = vadd.f32 %v874_v29, %v663_v20  ;;  %v665_v24 = vadd.f32 %v664_v53, %v3850_v13  ;;  %v1372_v20 = vsel %vm1355_vm7, %v1369_v41, %v1371_v22  ;;  %v3851_v29 = vld [vmem:[#allocation14_spill] sm:$0xff] }
 0x1e2   : > { %2531 = vmatmul.msk.bf16.gmra.mxu3 %vm378_vm3, %v1776_v32  ;;  %v1777_v61 = vrot.slane %v3851_v29, 2 }
 0x1e3   : > { %v1069_v46 = vadd.f32 %v1024_v27, %v919_v38  ;;  %v1303_v8 = vpop.f32.mrf.mxu0 }
 0x1e5   : > { %v3390_v12 = vadd.f32 %v1301_v14, %v1069_v46  ;;  %v1034_v23 = vpop.f32.mrf.mxu3  ;;  %v1778_v14 = vrot.slane %v2680_v34, 3  ;;  %v2036_v46 = vsel %vm2021_vm8, %v2033_v6, %v2035_v45  ;;  %v1373_v6 = vrot.slane %v2653_v21, 2 }
 0x1e7   : > { %v1779_v13 = vor.u32 %v1778_v14, %v1777_v61 }
 0x1e8   : > { %v876_v52 = vpop.f32.mrf.mxu2  ;;  %v667_v15 = vpop.f32.mrf.mxu1 }
 0x1e9   : > { %v920_v26 = vadd.f32 %v876_v52, %v665_v24  ;;  %v668_v32 = vadd.f32 %v667_v15, %v3852_v43  ;;  %v1780_v34 = vsel %vm1741_vm6, %v1775_v7, %v1779_v13  ;;  %v1781_v7 = vrot.slane %v2818_v11, 2 }
 0x1eb   : > { %v1070_v27 = vadd.f32 %v1026_v49, %v920_v26  ;;  %v1306_v38 = vpop.f32.mrf.mxu0  ;;  %2492 = vmatmul.msk.bf16.gmra.mxu1 %vm378_vm3, %v1370_v39 }
 0x1ed   : > { %2511 = vmatmul.msk.bf16.gmra.mxu2 %vm378_vm3, %v1372_v20  ;;  %v3402_v53 = vadd.f32 %v1303_v8, %v1070_v27  ;;  %v1036_v52 = vpop.f32.mrf.mxu3  ;;  %v3853_v8 = vld [vmem:[#allocation35_spill] sm:$0xff] }
 0x1ee   : > { %2549 = vmatmul.msk.bf16.gmra.mxu0 %vm378_vm3, %v2036_v46  ;;  %v2037_v46 = vrot.slane %v2653_v21, 3  ;;  %v3854_v21 = vld [vmem:[#allocation37_spill] sm:$0xff] }
 0x1f0   : > { %v879_v41 = vpop.f32.mrf.mxu2  ;;  %v669_v24 = vpop.f32.mrf.mxu1 }
 0x1f1   : > { %v921_v49 = vadd.f32 %v879_v41, %v668_v32  ;;  %v670_v27 = vadd.f32 %v669_v24, %v3853_v8  ;;  %v1374_v32 = vsel %vm1355_vm7, %v1371_v22, %v1373_v6 }
 0x1f2   : > { %2532 = vmatmul.msk.bf16.gmra.mxu3 %vm378_vm3, %v1780_v34 }
 0x1f3   : > { %v1071_v26 = vadd.f32 %v1029_v33, %v921_v49  ;;  %v1308_v29 = vpop.f32.mrf.mxu0  ;;  %v2038_v49 = vsel %vm2021_vm8, %v2035_v45, %v2037_v46  ;;  %v1375_v45 = vrot.slane %v2662_v25, 2 }
 0x1f5   : > { %v3407_v39 = vadd.f32 %v1306_v38, %v1071_v26  ;;  %v1893_v43 = vpop.f32.mrf.mxu3  ;;  %v1782_v38 = vrot.slane %v2747_v10, 3 }
 0x1f7   : > { %v1783_v34 = vor.u32 %v1782_v38, %v1781_v7 }
 0x1f8   : > { %v881_v15 = vpop.f32.mrf.mxu2  ;;  %v672_v14 = vpop.f32.mrf.mxu1 }
 0x1f9   : > { %v922_v61 = vadd.f32 %v881_v15, %v670_v27  ;;  %v673_v26 = vadd.f32 %v672_v14, %v3854_v21  ;;  %v1784_v10 = vsel %vm1741_vm6, %v1779_v13, %v1783_v34  ;;  %v1376_v21 = vsel %vm1355_vm7, %v1373_v6, %v1375_v45 }
 0x1fa   : > { %v1785_v13 = vrot.slane %v2870_v37, 2 }
 0x1fb   : > { %v1072_v33 = vadd.f32 %v1031_v48, %v922_v61  ;;  %v1311_v41 = vpop.f32.mrf.mxu0  ;;  %2493 = vmatmul.msk.bf16.gmra.mxu1 %vm378_vm3, %v1372_v20 }
 0x1fd   : > { %2512 = vmatmul.msk.bf16.gmra.mxu2 %vm378_vm3, %v1374_v32  ;;  %v3419_v24 = vadd.f32 %v1308_v29, %v1072_v33  ;;  %v1895_v11 = vpop.f32.mrf.mxu3  ;;  %v3855_v29 = vld [vmem:[#allocation40_spill] sm:$0xff]  ;;  %v2039_v33 = vrot.slane %v2662_v25, 3 }
 0x1fe   : > { %2550 = vmatmul.msk.bf16.gmra.mxu0 %vm378_vm3, %v2038_v49 }
 0x200   : > { %v884_v22 = vpop.f32.mrf.mxu2  ;;  %v674_v8 = vpop.f32.mrf.mxu1 }
 0x201   : > { %v923_v48 = vadd.f32 %v884_v22, %v673_v26  ;;  %v675_v61 = vadd.f32 %v674_v8, %v3855_v29  ;;  %v2040_v22 = vsel %vm2021_vm8, %v2037_v46, %v2039_v33 }
 0x202   : > { %2533 = vmatmul.msk.bf16.gmra.mxu3 %vm378_vm3, %v1784_v10 }
 0x203   : > { %v1073_v27 = vadd.f32 %v1034_v23, %v923_v48  ;;  %v1313_v15 = vpop.f32.mrf.mxu0 }
 0x205   : > { %v3424_v20 = vadd.f32 %v1311_v41, %v1073_v27  ;;  %v1898_v49 = vpop.f32.mrf.mxu3  ;;  %v1786_v41 = vrot.slane %v2821_v28, 3 }
 0x207   : > { %v1787_v6 = vor.u32 %v1786_v41, %v1785_v13  ;;  %v1789_v41 = vrot.slane %v2909_v36, 2 }
 0x208   : > { %v886_v14 = vpop.f32.mrf.mxu2  ;;  %v1459_v38 = vpop.f32.mrf.mxu1 }
 0x209   : > { %v924_v7 = vadd.f32 %v886_v14, %v675_v61  ;;  %v1549_v25 = vadd.f32 %v1459_v38, %v3098_v5  ;;  %v1788_v46 = vsel %vm1741_vm6, %v1783_v34, %v1787_v6  ;;  %v1377_v5 = vrot.slane %v2717_v62, 2 }
 0x20a   : > { %v2041_v34 = vrot.slane %v2717_v62, 3 }
 0x20b   : > { %v1074_v23 = vadd.f32 %v1036_v52, %v924_v7  ;;  %v2125_v26 = vpop.f32.mrf.mxu0  ;;  %2494 = vmatmul.msk.bf16.gmra.mxu1 %vm378_vm3, %v1374_v32  ;;  %v3444_v32 = vld [vmem:[%s3707_s2] ss:$0 sm:$0xff] }
 0x20d   : > { %2513 = vmatmul.msk.bf16.gmra.mxu2 %vm378_vm3, %v1376_v21  ;;  %v3436_v48 = vadd.f32 %v1313_v15, %v1074_v23  ;;  %v1900_v37 = vpop.f32.mrf.mxu3  ;;  %v1378_v23 = vsel %vm1355_vm7, %v1375_v45, %v1377_v5 }
 0x20e   : > { %2551 = vmatmul.msk.bf16.gmra.mxu0 %vm378_vm3, %v2040_v22 }
 0x210   : > { %v1613_v8 = vpop.f32.mrf.mxu2  ;;  %v1461_v27 = vpop.f32.mrf.mxu1 }
 0x211   : > { %v1703_v52 = vadd.f32 %v1613_v8, %v1549_v25  ;;  %v1550_v29 = vadd.f32 %v1461_v27, %v3107_v18  ;;  %v2042_v18 = vsel %vm2021_vm8, %v2039_v33, %v2041_v34 }
 0x212   : > { %2534 = vmatmul.msk.bf16.gmra.mxu3 %vm378_vm3, %v1788_v46  ;;  %v1379_v46 = vrot.slane %v2797_v58, 2 }
 0x213   : > { %v1983_v28 = vadd.f32 %v1893_v43, %v1703_v52  ;;  %v2127_v10 = vpop.f32.mrf.mxu0 }
 0x215   : > { %v2215_v15 = vadd.f32 %v2125_v26, %v1983_v28  ;;  %v1903_v38 = vpop.f32.mrf.mxu3  ;;  %v1790_v26 = vrot.slane %v2873_v59, 3 }
 0x217   : > { %v2255_v43 = vadd.f32 %v3444_v32, %v2215_v15  ;;  %v1791_v45 = vor.u32 %v1790_v26, %v1789_v41 }
 0x218   : > { %v1615_v61 = vpop.f32.mrf.mxu2  ;;  %v1464_v7 = vpop.f32.mrf.mxu1 }
 0x219   : > { %2292 = vst.msk [vmem:[%s3450_s16] sm:$0xff] %vm2291_vm9, %v2255_v43  ;;  %v1704_v14 = vadd.f32 %v1615_v61, %v1550_v29  ;;  %v1551_v8 = vadd.f32 %v1464_v7, %v3117_v4  ;;  %v1792_v33 = vsel %vm1741_vm6, %v1787_v6, %v1791_v45  ;;  %v2043_v43 = vrot.slane %v2797_v58, 3 }
 0x21a   : > { %v1380_v6 = vsel %vm1355_vm7, %v1377_v5, %v1379_v46  ;;  %v1793_v7 = vrot.slane %v2726_v1, 2 }
 0x21b   : > { %v1984_v13 = vadd.f32 %v1895_v11, %v1704_v14  ;;  %v2130_v22 = vpop.f32.mrf.mxu0  ;;  %2495 = vmatmul.msk.bf16.gmra.mxu1 %vm378_vm3, %v1376_v21 }
 0x21d   : > { %v2216_v25 = vadd.f32 %v2127_v10, %v1984_v13  ;;  %2514 = vmatmul.msk.bf16.gmra.mxu2 %vm378_vm3, %v1378_v23  ;;  %v1905_v52 = vpop.f32.mrf.mxu3  ;;  %v1794_v13 = vrot.slane %v2723_v0, 3 }
 0x21e   : > { %2552 = vmatmul.msk.bf16.gmra.mxu0 %vm378_vm3, %v2042_v18 }
 0x21f   : > { %v2256_v62 = vadd.f32 %v3444_v32, %v2216_v25  ;;  %v1795_v5 = vor.u32 %v1794_v13, %v1793_v7  ;;  %v1383_v13 = vrot.slane %v2714_v60, 2 }
 0x220   : > { %v1618_v11 = vpop.f32.mrf.mxu2  ;;  %v1466_v36 = vpop.f32.mrf.mxu1 }
 0x221   : > { %2293 = vst.msk [vmem:[%s3450_s16 + $0x8] sm:$0xff] %vm2291_vm9, %v2256_v62  ;;  %v1705_v59 = vadd.f32 %v1618_v11, %v1551_v8  ;;  %v1552_v10 = vadd.f32 %v1466_v36, %v3127_v42  ;;  %v2044_v42 = vsel %vm2021_vm8, %v2041_v34, %v2043_v43  ;;  %v1796_v34 = vsel %vm1741_vm6, %v1791_v45, %v1795_v5 }
 0x222   : > { %2535 = vmatmul.msk.bf16.gmra.mxu3 %vm378_vm3, %v1792_v33  ;;  %v1381_v8 = vrot.slane %v2857_v44, 2  ;;  %v2045_v36 = vrot.slane %v2857_v44, 3 }
 0x223   : > { %v1985_v21 = vadd.f32 %v1898_v49, %v1705_v59  ;;  %v2132_v27 = vpop.f32.mrf.mxu0 }
 0x224   : > { %v1382_v45 = vsel %vm1355_vm7, %v1379_v46, %v1381_v8 }
 0x225   : > { %v2217_v28 = vadd.f32 %v2130_v22, %v1985_v21  ;;  %v1908_v49 = vpop.f32.mrf.mxu3 }
 0x227   : > { %v2257_v4 = vadd.f32 %v3444_v32, %v2217_v28  ;;  %v1797_v28 = vrot.slane %v2782_v50, 2 }
 0x228   : > { %v1620_v15 = vpop.f32.mrf.mxu2  ;;  %v1469_v61 = vpop.f32.mrf.mxu1 }
 0x229   : > { %2294 = vst.msk [vmem:[%s3450_s16 + $0x10] sm:$0xff] %vm2291_vm9, %v2257_v4  ;;  %v1706_v29 = vadd.f32 %v1620_v15, %v1552_v10  ;;  %v1553_v22 = vadd.f32 %v1469_v61, %v3137_v17  ;;  %v1798_v4 = vrot.slane %v2731_v3, 3 }
 0x22b   : > { %v1986_v14 = vadd.f32 %v1900_v37, %v1706_v29  ;;  %v2135_v41 = vpop.f32.mrf.mxu0  ;;  %2496 = vmatmul.msk.bf16.gmra.mxu1 %vm378_vm3, %v1378_v23  ;;  %v1799_v46 = vor.u32 %v1798_v4, %v1797_v28 }
 0x22d   : > { %v2218_v26 = vadd.f32 %v2132_v27, %v1986_v14  ;;  %2515 = vmatmul.msk.bf16.gmra.mxu2 %vm378_vm3, %v1380_v6  ;;  %v1910_v18 = vpop.f32.mrf.mxu3 }
 0x22e   : > { %2553 = vmatmul.msk.bf16.gmra.mxu0 %vm378_vm3, %v2044_v42 }
 0x22f   : > { %v2258_v58 = vadd.f32 %v3444_v32, %v2218_v26  ;;  %v2047_v26 = vrot.slane %v2714_v60, 3 }
 0x230   : > { %v1623_v37 = vpop.f32.mrf.mxu2  ;;  %v1471_v1 = vpop.f32.mrf.mxu1 }
 0x231   : > { %2295 = vst.msk [vmem:[%s3450_s16 + $0x18] sm:$0xff] %vm2291_vm9, %v2258_v58  ;;  %v1707_v0 = vadd.f32 %v1623_v37, %v1553_v22  ;;  %v1554_v11 = vadd.f32 %v1471_v1, %v3147_v30  ;;  %v2046_v30 = vsel %vm2021_vm8, %v2043_v43, %v2045_v36  ;;  %v1800_v43 = vsel %vm1741_vm6, %v1795_v5, %v1799_v46 }
 0x232   : > { %2536 = vmatmul.msk.bf16.gmra.mxu3 %vm378_vm3, %v1796_v34  ;;  %v1384_v5 = vsel %vm1355_vm7, %v1381_v8, %v1383_v13  ;;  %v1802_v1 = vrot.slane %v3798_v56, 3 }
 0x233   : > { %v1987_v23 = vadd.f32 %v1903_v38, %v1707_v0  ;;  %v2137_v25 = vpop.f32.mrf.mxu0  ;;  %v1801_v0 = vrot.slane %v2860_v47, 2 }
 0x235   : > { %v2219_v62 = vadd.f32 %v2135_v41, %v1987_v23  ;;  %v1913_v38 = vpop.f32.mrf.mxu3  ;;  %v1803_v8 = vor.u32 %v1802_v1, %v1801_v0 }
 0x237   : > { %v2259_v17 = vadd.f32 %v3444_v32, %v2219_v62 }
 0x238   : > { %v1625_v59 = vpop.f32.mrf.mxu2  ;;  %v1474_v33 = vpop.f32.mrf.mxu1 }
 0x239   : > { %2296 = vst.msk [vmem:[%s3450_s16 + $0x20] sm:$0xff] %vm2291_vm9, %v2259_v17  ;;  %v1708_v21 = vadd.f32 %v1625_v59, %v1554_v11  ;;  %v1555_v29 = vadd.f32 %v1474_v33, %v3157_v31  ;;  %v1804_v59 = vsel %vm1741_vm6, %v1799_v46, %v1803_v8  ;;  %v1385_v33 = vrot.slane %v2719_v63, 2 }
 0x23a   : > { %v3858_v46 = vshrl.u32 %v3207_v16, 16 }
 0x23b   : > { %v1988_v27 = vadd.f32 %v1905_v52, %v1708_v21  ;;  %v2140_v10 = vpop.f32.mrf.mxu0  ;;  %2497 = vmatmul.msk.bf16.gmra.mxu1 %vm378_vm3, %v1380_v6 }
 0x23d   : > { %v2220_v15 = vadd.f32 %v2137_v25, %v1988_v27  ;;  %2516 = vmatmul.msk.bf16.gmra.mxu2 %vm378_vm3, %v1382_v45  ;;  %v1915_v61 = vpop.f32.mrf.mxu3  ;;  %v3856_v25 = vld [vmem:[#allocation46_spill] sm:$0xff]  ;;  %v3857_v27 = vld [vmem:[#allocation47_spill] sm:$0xff] }
 0x23e   : > { %2554 = vmatmul.msk.bf16.gmra.mxu0 %vm378_vm3, %v2046_v30 }
 0x23f   : > { %v2260_v44 = vadd.f32 %v3444_v32, %v2220_v15 }
 0x240   : > { %v1628_v52 = vpop.f32.mrf.mxu2  ;;  %v1476_v50 = vpop.f32.mrf.mxu1 }
 0x241   : > { %2297 = vst.msk [vmem:[%s3450_s16 + $0x28] sm:$0xff] %vm2291_vm9, %v2260_v44  ;;  %v1709_v3 = vadd.f32 %v1628_v52, %v1555_v29  ;;  %v1556_v41 = vadd.f32 %v1476_v50, %v3167_v54  ;;  %v2048_v54 = vsel %vm2021_vm8, %v2045_v36, %v2047_v26  ;;  %v1386_v44 = vsel %vm1355_vm7, %v1383_v13, %v1385_v33  ;;  %v211_v13 = vld [vmem:[%s2639_s25 + $0x138] sm:$0xff] }
 0x242   : > { %2537 = vmatmul.msk.bf16.gmra.mxu3 %vm378_vm3, %v1800_v43  ;;  %v1805_v52 = vrot.slane %v3858_v46, 2 }
 0x243   : > { %v1989_v6 = vadd.f32 %v1908_v49, %v1709_v3  ;;  %v2142_v14 = vpop.f32.mrf.mxu0  ;;  %v3859_v3 = vshll.u32 %v3207_v16, 16 }
 0x245   : > { %v2221_v7 = vadd.f32 %v2140_v10, %v1989_v6  ;;  %v1918_v49 = vpop.f32.mrf.mxu3  ;;  %v2049_v10 = vrot.slane %v2719_v63, 3  ;;  %v1806_v50 = vrot.slane %v3859_v3, 3  ;;  %v3861_v3 = vld [vmem:[#allocation16_spill] sm:$0xff] }
 0x247   : > { %v2261_v31 = vadd.f32 %v3444_v32, %v2221_v7  ;;  %v2050_v63 = vsel %vm2021_vm8, %v2047_v26, %v2049_v10  ;;  %v3550_v26 = vpack.c.bf16 %v211_v13, %v3256_v2  ;;  %v2051_v2 = vrot.slane %v2768_v40, 3 }
 0x248   : > { %v1630_v42 = vpop.f32.mrf.mxu2  ;;  %v1479_v22 = vpop.f32.mrf.mxu1 }
 0x249   : > { %2298 = vst.msk [vmem:[%s3450_s16 + $0x30] sm:$0xff] %vm2291_vm9, %v2261_v31  ;;  %v1710_v58 = vadd.f32 %v1630_v42, %v1556_v41  ;;  %v1557_v62 = vadd.f32 %v1479_v22, %v3856_v25 }
 0x24b   : > { %v1990_v37 = vadd.f32 %v1910_v18, %v1710_v58  ;;  %v2145_v23 = vpop.f32.mrf.mxu0  ;;  %2498 = vmatmul.msk.bf16.gmra.mxu1 %vm378_vm3, %v1382_v45 }
 0x24d   : > { %v2222_v34 = vadd.f32 %v2142_v14, %v1990_v37  ;;  %2517 = vmatmul.msk.bf16.gmra.mxu2 %vm378_vm3, %v1384_v5  ;;  %v1920_v17 = vpop.f32.mrf.mxu3 }
 0x24e   : > { %2555 = vmatmul.msk.bf16.gmra.mxu0 %vm378_vm3, %v2048_v54 }
 0x24f   : > { %v2262_v60 = vadd.f32 %v3444_v32, %v2222_v34  ;;  %v1810_v34 = vshrl.u32 %v3550_v26, 16 }
 0x250   : > { %v1633_v18 = vpop.f32.mrf.mxu2  ;;  %v1481_v56 = vpop.f32.mrf.mxu1 }
 0x251   : > { %2299 = vst.msk [vmem:[%s3450_s16 + $0x38] sm:$0xff] %vm2291_vm9, %v2262_v60  ;;  %v1711_v47 = vadd.f32 %v1633_v18, %v1557_v62  ;;  %v1558_v28 = vadd.f32 %v1481_v56, %v3857_v27  ;;  %v1813_v60 = vshll.u32 %v3550_v26, 16  ;;  %v1812_v56 = vrot.slane %v1810_v34, 2 }
 0x252   : > { %2538 = vmatmul.msk.bf16.gmra.mxu3 %vm378_vm3, %v1804_v59 }
 0x253   : > { %v1991_v11 = vadd.f32 %v1913_v38, %v1711_v47  ;;  %v2147_v36 = vpop.f32.mrf.mxu0 }
 0x255   : > { %v2223_v21 = vadd.f32 %v2145_v23, %v1991_v11  ;;  %v1923_v15 = vpop.f32.mrf.mxu3  ;;  %v3860_v23 = vld [vmem:[#allocation48_spill] sm:$0xff]  ;;  %v1815_v11 = vrot.slane %v1813_v60, 3 }
 0x257   : > { %v2263_v45 = vadd.f32 %v3444_v32, %v2223_v21  ;;  %v1816_v27 = vor.u32 %v1815_v11, %v1812_v56 }
 0x258   : > { %v1635_v4 = vpop.f32.mrf.mxu2  ;;  %v1484_v38 = vpop.f32.mrf.mxu1 }
 0x259   : > { %2300 = vst.msk [vmem:[%s3450_s16 + $0x40] sm:$0xff] %vm2291_vm9, %v2263_v45  ;;  %v1712_v30 = vadd.f32 %v1635_v4, %v1558_v28  ;;  %v1559_v7 = vadd.f32 %v1484_v38, %v3200_v9  ;;  %v1387_v9 = vrot.slane %v2768_v40, 2 }
 0x25b   : > { %v1992_v29 = vadd.f32 %v1915_v61, %v1712_v30  ;;  %v2150_v6 = vpop.f32.mrf.mxu0  ;;  %2499 = vmatmul.msk.bf16.gmra.mxu1 %vm378_vm3, %v1384_v5  ;;  %v1807_v61 = vor.u32 %v1806_v50, %v1805_v52  ;;  %v1388_v18 = vsel %vm1355_vm7, %v1385_v33, %v1387_v9  ;;  %v212_v33 = vld [vmem:[%s2639_s25 + $0x140] sm:$0xf] }
 0x25d   : > { %v2224_v43 = vadd.f32 %v2147_v36, %v1992_v29  ;;  %2518 = vmatmul.msk.bf16.gmra.mxu2 %vm378_vm3, %v1386_v44  ;;  %v1925_v58 = vpop.f32.mrf.mxu3  ;;  %v1808_v5 = vsel %vm1741_vm6, %v1803_v8, %v1807_v61  ;;  %v2052_v36 = vsel %vm2021_vm8, %v2049_v10, %v2051_v2  ;;  %v1817_v10 = vsel %vm1741_vm6, %v1807_v61, %v1816_v27 }
 0x25e   : > { %2556 = vmatmul.msk.bf16.gmra.mxu0 %vm378_vm3, %v2050_v63 }
 0x25f   : > { %v2264_v14 = vadd.f32 %v3444_v32, %v2224_v43  ;;  %v2053_v43 = vrot.slane %v3207_v16, 3 }
 0x260   : > { %v1638_v31 = vpop.f32.mrf.mxu2  ;;  %v1486_v42 = vpop.f32.mrf.mxu1 }
 0x261   : > { %2301 = vst.msk [vmem:[%s3450_s16 + $0x48] sm:$0xff] %vm2291_vm9, %v2264_v14  ;;  %v1713_v41 = vadd.f32 %v1638_v31, %v1559_v7  ;;  %v1560_v54 = vadd.f32 %v1486_v42, %v3860_v23 }
 0x262   : > { %2539 = vmatmul.msk.bf16.gmra.mxu3 %vm378_vm3, %v1808_v5  ;;  %v2054_v5 = vsel %vm2021_vm8, %v2051_v2, %v2053_v43 }
 0x263   : > { %v1993_v22 = vadd.f32 %v1918_v49, %v1713_v41  ;;  %v2152_v37 = vpop.f32.mrf.mxu0 }
 0x265   : > { %v2225_v0 = vadd.f32 %v2150_v6, %v1993_v22  ;;  %v1928_v8 = vpop.f32.mrf.mxu3 }
 0x267   : > { %v2265_v1 = vadd.f32 %v3444_v32, %v2225_v0 }
 0x268   : > { %v1640_v25 = vpop.f32.mrf.mxu2  ;;  %v1489_v62 = vpop.f32.mrf.mxu1 }
 0x269   : > { %2302 = vst.msk [vmem:[%s3450_s16 + $0x50] sm:$0xff] %vm2291_vm9, %v2265_v1  ;;  %v1714_v49 = vadd.f32 %v1640_v25, %v1560_v54  ;;  %v1561_v45 = vadd.f32 %v1489_v62, %v3223_v19  ;;  %v3576_v19 = vrot.slane %v3207_v16, 2 }
 0x26b   : > { %v1994_v47 = vadd.f32 %v1920_v17, %v1714_v49  ;;  %v2155_v59 = vpop.f32.mrf.mxu0  ;;  %2500 = vmatmul.msk.bf16.gmra.mxu1 %vm378_vm3, %v1386_v44  ;;  %v3573_v44 = vpack.c.bf16 %v212_v33, %v212_v33  ;;  %v1390_v13 = vsel %vm1355_vm7, %v1387_v9, %v3576_v19  ;;  %v1591_v49 = vrot.slane %v3550_v26, 2 }
 0x26d   : > { %v2226_v21 = vadd.f32 %v2152_v37, %v1994_v47  ;;  %2519 = vmatmul.msk.bf16.gmra.mxu2 %vm378_vm3, %v1388_v18  ;;  %v1930_v30 = vpop.f32.mrf.mxu3  ;;  %v1819_v6 = vshrl.u32 %v3573_v44, 16  ;;  %v1822_v63 = vshll.u32 %v3573_v44, 16  ;;  %v2055_v47 = vrot.slane %v3550_v26, 3  ;;  %v3862_v26 = vld [vmem:[#allocation49_spill] sm:$0xff] }
 0x26e   : > { %2557 = vmatmul.msk.bf16.gmra.mxu0 %vm378_vm3, %v2052_v36 }
 0x26f   : > { %v2266_v40 = vadd.f32 %v3444_v32, %v2226_v21  ;;  %v1821_v41 = vrot.slane %v1819_v6, 2  ;;  %v1824_v42 = vrot.slane %v1822_v63, 3 }
 0x270   : > { %v1643_v28 = vpop.f32.mrf.mxu2  ;;  %v1491_v4 = vpop.f32.mrf.mxu1 }
 0x271   : > { %2303 = vst.msk [vmem:[%s3450_s16 + $0x58] sm:$0xff] %vm2291_vm9, %v2266_v40  ;;  %v1715_v17 = vadd.f32 %v1643_v28, %v1561_v45  ;;  %v1562_v50 = vadd.f32 %v1491_v4, %v3861_v3  ;;  %v1825_v1 = vor.u32 %v1824_v42, %v1821_v41  ;;  %v2056_v40 = vsel %vm2021_vm8, %v2053_v43, %v2055_v47 }
 0x272   : > { %2540 = vmatmul.msk.bf16.gmra.mxu3 %vm378_vm3, %v1817_v10 }
 0x273   : > { %v1995_v38 = vadd.f32 %v1923_v15, %v1715_v17  ;;  %v2157_v29 = vpop.f32.mrf.mxu0  ;;  %v1826_v60 = vsel %vm1741_vm6, %v1816_v27, %v1825_v1 }
 0x275   : > { %v2227_v46 = vadd.f32 %v2155_v59, %v1995_v38  ;;  %v1933_v61 = vpop.f32.mrf.mxu3  ;;  %v1592_v59 = vsel %vm1355_vm7, %v3576_v19, %v1591_v49 }
 0x277   : > { %v2267_v52 = vadd.f32 %v3444_v32, %v2227_v46 }
 0x278   : > { %v1645_v15 = vpop.f32.mrf.mxu2  ;;  %v1494_v7 = vpop.f32.mrf.mxu1 }
 0x279   : > { %2304 = vst.msk [vmem:[%s3450_s16 + $0x60] sm:$0xff] %vm2291_vm9, %v2267_v52  ;;  %v1716_v14 = vadd.f32 %v1645_v15, %v1562_v50  ;;  %v1563_v0 = vadd.f32 %v1494_v7, %v3242_v57  ;;  %v1593_v52 = vrot.slane %v3573_v44, 2  ;;  %v3864_v50 = vld [vmem:[#allocation39_spill] sm:$0xff]  ;;  %v2057_v15 = vrot.slane %v3573_v44, 3 }
 0x27b   : > { %v1996_v31 = vadd.f32 %v1925_v58, %v1716_v14  ;;  %v2160_v22 = vpop.f32.mrf.mxu0  ;;  %2501 = vmatmul.msk.bf16.gmra.mxu1 %vm378_vm3, %v1388_v18  ;;  %v2058_v42 = vsel %vm2021_vm8, %v2055_v47, %v2057_v15 }
 0x27d   : > { %v2228_v37 = vadd.f32 %v2157_v29, %v1996_v31  ;;  %2520 = vmatmul.msk.bf16.gmra.mxu2 %vm378_vm3, %v1390_v13  ;;  %v1935_v54 = vpop.f32.mrf.mxu3  ;;  %v3863_v29 = vld [vmem:[#allocation15_spill] sm:$0xff] }
 0x27e   : > { %2558 = vmatmul.msk.bf16.gmra.mxu0 %vm378_vm3, %v2054_v5  ;;  %v1391_v46 = vrot.slane %v3863_v29, 2  ;;  %v3865_v5 = vld [vmem:[#allocation25_spill] sm:$0xff] }
 0x27f   : > { %v2268_v16 = vadd.f32 %v3444_v32, %v2228_v37 }
 0x280   : > { %v1648_v9 = vpop.f32.mrf.mxu2  ;;  %v1496_v23 = vpop.f32.mrf.mxu1  ;;  %v1392_v7 = vsel %vm1355_vm7, %v3576_v19, %v1391_v46 }
 0x281   : > { %2305 = vst.msk [vmem:[%s3450_s16 + $0x68] sm:$0xff] %vm2291_vm9, %v2268_v16  ;;  %v1717_v58 = vadd.f32 %v1648_v9, %v1563_v0  ;;  %v1564_v62 = vadd.f32 %v1496_v23, %v3258_v51 }
 0x282   : > { %2541 = vmatmul.msk.bf16.gmra.mxu3 %vm378_vm3, %v1826_v60 }
 0x283   : > { %v1997_v34 = vadd.f32 %v1928_v8, %v1717_v58  ;;  %v2162_v25 = vpop.f32.mrf.mxu0 }
 0x285   : > { %v2229_v2 = vadd.f32 %v2160_v22, %v1997_v34  ;;  %v1938_v11 = vpop.f32.mrf.mxu3  ;;  %v3866_v34 = vld [vmem:[#allocation24_spill] sm:$0xff] }
 0x287   : > { %v2269_v57 = vadd.f32 %v3444_v32, %v2229_v2 }
 0x288   : > { %v1650_v18 = vpop.f32.mrf.mxu2  ;;  %v1499_v8 = vpop.f32.mrf.mxu1 }
 0x289   : > { %2306 = vst.msk [vmem:[%s3450_s16 + $0x70] sm:$0xff] %vm2291_vm9, %v2269_v57  ;;  %v1718_v56 = vadd.f32 %v1650_v18, %v1564_v62  ;;  %v1565_v27 = vadd.f32 %v1499_v8, %v3862_v26  ;;  %v3867_v8 = vld [vmem:[#allocation42_spill] sm:$0xff] }
 0x28b   : > { %v1998_v36 = vadd.f32 %v1930_v30, %v1718_v56  ;;  %v2165_v21 = vpop.f32.mrf.mxu0  ;;  %2502 = vmatmul.msk.bf16.gmra.mxu1 %vm378_vm3, %v1390_v13  ;;  %v1594_v13 = vsel %vm1355_vm7, %v1591_v49, %v1593_v52 }
 0x28d   : > { %v2230_v45 = vadd.f32 %v2162_v25, %v1998_v36  ;;  %2521 = vmatmul.msk.bf16.gmra.mxu2 %vm378_vm3, %v1592_v59  ;;  %v1940_v4 = vpop.f32.mrf.mxu3 }
 0x28e   : > { %2559 = vmatmul.msk.bf16.gmra.mxu0 %vm378_vm3, %v2056_v40 }
 0x28f   : > { %v2270_v51 = vadd.f32 %v3444_v32, %v2230_v45 }
 0x290   : > { %v1653_v28 = vpop.f32.mrf.mxu2  ;;  %v1501_v17 = vpop.f32.mrf.mxu1 }
 0x291   : > { %2307 = vst.msk [vmem:[%s3450_s16 + $0x78] sm:$0xff] %vm2291_vm9, %v2270_v51  ;;  %v1719_v33 = vadd.f32 %v1653_v28, %v1565_v27  ;;  %v1566_v6 = vadd.f32 %v1501_v17, %v3864_v50  ;;  %v3868_v28 = vld [vmem:[#allocation9_spill] sm:$0xff] }
 0x293   : > { %v1999_v30 = vadd.f32 %v1933_v61, %v1719_v33  ;;  %v2167_v38 = vpop.f32.mrf.mxu0 }
 0x295   : > { %v2231_v10 = vadd.f32 %v2165_v21, %v1999_v30  ;;  %v1943_v61 = vpop.f32.mrf.mxu3 }
 0x297   : > { %v2271_v3 = vadd.f32 %v3444_v32, %v2231_v10 }
 0x298   : > { %v1655_v63 = vpop.f32.mrf.mxu2  ;;  %v1504_v14 = vpop.f32.mrf.mxu1 }
 0x299   : > { %2308 = vst.msk [vmem:[%s3450_s16 + $0x80] sm:$0xff] %vm2291_vm9, %v2271_v3  ;;  %v1720_v43 = vadd.f32 %v1655_v63, %v1566_v6  ;;  %v1567_v37 = vadd.f32 %v1504_v14, %v3865_v5  ;;  %v3869_v3 = vld [vmem:[#allocation11_spill] sm:$0xff] }
 0x29b   : > { %v2000_v31 = vadd.f32 %v1935_v54, %v1720_v43  ;;  %v2170_v41 = vpop.f32.mrf.mxu0  ;;  %2503 = vmatmul.msk.bf16.gmra.mxu1 %vm378_vm3, %v1392_v7 }
 0x29d   : > { %v2232_v22 = vadd.f32 %v2167_v38, %v2000_v31  ;;  %2522 = vmatmul.msk.bf16.gmra.mxu2 %vm378_vm3, %v1594_v13  ;;  %v1945_v1 = vpop.f32.mrf.mxu3  ;;  %v3870_v31 = vld [vmem:[#allocation20_spill] sm:$0xff] }
 0x29e   : > { %2560 = vmatmul.msk.bf16.gmra.mxu0 %vm378_vm3, %v2058_v42 }
 0x29f   : > { %v2272_v44 = vadd.f32 %v3444_v32, %v2232_v22 }
 0x2a0   : > { %v1658_v19 = vpop.f32.mrf.mxu2  ;;  %v1506_v0 = vpop.f32.mrf.mxu1 }
 0x2a1   : > { %2309 = vst.msk [vmem:[%s3450_s16 + $0x88] sm:$0xff] %vm2291_vm9, %v2272_v44  ;;  %v1721_v16 = vadd.f32 %v1658_v19, %v1567_v37  ;;  %v1568_v60 = vadd.f32 %v1506_v0, %v3866_v34  ;;  %v3871_v0 = vld [vmem:[#allocation44_spill] sm:$0xff] }
 0x2a3   : > { %v2001_v9 = vadd.f32 %v1938_v11, %v1721_v16  ;;  %v2172_v58 = vpop.f32.mrf.mxu0 }
 0x2a5   : > { %v2233_v23 = vadd.f32 %v2170_v41, %v2001_v9  ;;  %v1948_v57 = vpop.f32.mrf.mxu3 }
 0x2a7   : > { %v2273_v54 = vadd.f32 %v3444_v32, %v2233_v23 }
 0x2a8   : > { %v1660_v25 = vpop.f32.mrf.mxu2  ;;  %v1509_v49 = vpop.f32.mrf.mxu1 }
 0x2a9   : > { %2310 = vst.msk [vmem:[%s3450_s16 + $0x90] sm:$0xff] %vm2291_vm9, %v2273_v54  ;;  %v1722_v2 = vadd.f32 %v1660_v25, %v1568_v60  ;;  %v1569_v11 = vadd.f32 %v1509_v49, %v3867_v8  ;;  %v3872_v49 = vld [vmem:[#allocation5_spill] sm:$0xff] }
 0x2ab   : > { %v2002_v62 = vadd.f32 %v1940_v4, %v1722_v2  ;;  %v2175_v18 = vpop.f32.mrf.mxu0 }
 0x2ad   : > { %v2234_v47 = vadd.f32 %v2172_v58, %v2002_v62  ;;  %v1950_v40 = vpop.f32.mrf.mxu3 }
 0x2af   : > { %v2274_v56 = vadd.f32 %v3444_v32, %v2234_v47 }
 0x2b0   : > { %v1663_v59 = vpop.f32.mrf.mxu2  ;;  %v1511_v21 = vpop.f32.mrf.mxu1 }
 0x2b1   : > { %2311 = vst.msk [vmem:[%s3450_s16 + $0x98] sm:$0xff] %vm2291_vm9, %v2274_v56  ;;  %v1723_v36 = vadd.f32 %v1663_v59, %v1569_v11  ;;  %v1570_v33 = vadd.f32 %v1511_v21, %v3868_v28  ;;  %v3873_v21 = vld [vmem:[#allocation4_spill] sm:$0xff] }
 0x2b3   : > { %v2003_v45 = vadd.f32 %v1943_v61, %v1723_v36  ;;  %v2177_v51 = vpop.f32.mrf.mxu0 }
 0x2b5   : > { %v2235_v26 = vadd.f32 %v2175_v18, %v2003_v45  ;;  %v1953_v29 = vpop.f32.mrf.mxu3 }
 0x2b7   : > { %v2275_v27 = vadd.f32 %v3444_v32, %v2235_v26 }
 0x2b8   : > { %v1665_v17 = vpop.f32.mrf.mxu2  ;;  %v1514_v30 = vpop.f32.mrf.mxu1 }
 0x2b9   : > { %2312 = vst.msk [vmem:[%s3450_s16 + $0xa0] sm:$0xff] %vm2291_vm9, %v2275_v27  ;;  %v1724_v4 = vadd.f32 %v1665_v17, %v1570_v33  ;;  %v1571_v50 = vadd.f32 %v1514_v30, %v3869_v3 }
 0x2bb   : > { %v2004_v38 = vadd.f32 %v1945_v1, %v1724_v4  ;;  %v2180_v10 = vpop.f32.mrf.mxu0 }
 0x2bd   : > { %v2236_v46 = vadd.f32 %v2177_v51, %v2004_v38  ;;  %v1955_v61 = vpop.f32.mrf.mxu3 }
 0x2bf   : > { %v2276_v52 = vadd.f32 %v3444_v32, %v2236_v46 }
 0x2c0   : > { %v1668_v6 = vpop.f32.mrf.mxu2  ;;  %v1516_v15 = vpop.f32.mrf.mxu1 }
 0x2c1   : > { %2313 = vst.msk [vmem:[%s3450_s16 + $0xa8] sm:$0xff] %vm2291_vm9, %v2276_v52  ;;  %v1725_v63 = vadd.f32 %v1668_v6, %v1571_v50  ;;  %v1572_v41 = vadd.f32 %v1516_v15, %v3870_v31 }
 0x2c3   : > { %v2005_v43 = vadd.f32 %v1948_v57, %v1725_v63  ;;  %v2182_v14 = vpop.f32.mrf.mxu0  ;;  %v3874_v63 = vld [vmem:[#allocation27_spill] sm:$0xff] }
 0x2c5   : > { %v2237_v7 = vadd.f32 %v2180_v10, %v2005_v43  ;;  %v1958_v58 = vpop.f32.mrf.mxu3 }
 0x2c7   : > { %v2277_v13 = vadd.f32 %v3444_v32, %v2237_v7 }
 0x2c8   : > { %v1670_v42 = vpop.f32.mrf.mxu2  ;;  %v1519_v44 = vpop.f32.mrf.mxu1 }
 0x2c9   : > { %2314 = vst.msk [vmem:[%s3450_s16 + $0xb0] sm:$0xff] %vm2291_vm9, %v2277_v13  ;;  %v1726_v22 = vadd.f32 %v1670_v42, %v1572_v41  ;;  %v1573_v1 = vadd.f32 %v1519_v44, %v3871_v0 }
 0x2cb   : > { %v2006_v5 = vadd.f32 %v1950_v40, %v1726_v22  ;;  %v2185_v37 = vpop.f32.mrf.mxu0 }
 0x2cd   : > { %v2238_v19 = vadd.f32 %v2182_v14, %v2006_v5  ;;  %v1960_v56 = vpop.f32.mrf.mxu3 }
 0x2cf   : > { %v2278_v16 = vadd.f32 %v3444_v32, %v2238_v19 }
 0x2d0   : > { %v1673_v9 = vpop.f32.mrf.mxu2  ;;  %v1521_v54 = vpop.f32.mrf.mxu1 }
 0x2d1   : > { %2315 = vst.msk [vmem:[%s3450_s16 + $0xb8] sm:$0xff] %vm2291_vm9, %v2278_v16  ;;  %v1727_v23 = vadd.f32 %v1673_v9, %v1573_v1  ;;  %v1574_v57 = vadd.f32 %v1521_v54, %v3872_v49 }
 0x2d3   : > { %v2007_v34 = vadd.f32 %v1953_v29, %v1727_v23  ;;  %v2187_v60 = vpop.f32.mrf.mxu0 }
 0x2d5   : > { %v2239_v25 = vadd.f32 %v2185_v37, %v2007_v34  ;;  %v1963_v33 = vpop.f32.mrf.mxu3 }
 0x2d7   : > { %v2279_v2 = vadd.f32 %v3444_v32, %v2239_v25 }
 0x2d8   : > { %v1675_v62 = vpop.f32.mrf.mxu2  ;;  %v1524_v47 = vpop.f32.mrf.mxu1 }
 0x2d9   : > { %2316 = vst.msk [vmem:[%s3450_s16 + $0xc0] sm:$0xff] %vm2291_vm9, %v2279_v2  ;;  %v1728_v18 = vadd.f32 %v1675_v62, %v1574_v57  ;;  %v1575_v40 = vadd.f32 %v1524_v47, %v3873_v21 }
 0x2db   : > { %v2008_v8 = vadd.f32 %v1955_v61, %v1728_v18  ;;  %v2190_v11 = vpop.f32.mrf.mxu0 }
 0x2dd   : > { %v2240_v59 = vadd.f32 %v2187_v60, %v2008_v8  ;;  %v1965_v50 = vpop.f32.mrf.mxu3 }
 0x2df   : > { %v2280_v36 = vadd.f32 %v3444_v32, %v2240_v59 }
 0x2e0   : > { %v1678_v45 = vpop.f32.mrf.mxu2  ;;  %v1526_v26 = vpop.f32.mrf.mxu1 }
 0x2e1   : > { %2317 = vst.msk [vmem:[%s3450_s16 + $0xc8] sm:$0xff] %vm2291_vm9, %v2280_v36  ;;  %v1729_v51 = vadd.f32 %v1678_v45, %v1575_v40  ;;  %v1576_v30 = vadd.f32 %v1526_v26, %v3368_v35 }
 0x2e3   : > { %v2009_v27 = vadd.f32 %v1958_v58, %v1729_v51  ;;  %v2192_v28 = vpop.f32.mrf.mxu0 }
 0x2e5   : > { %v2241_v17 = vadd.f32 %v2190_v11, %v2009_v27  ;;  %v1968_v22 = vpop.f32.mrf.mxu3 }
 0x2e7   : > { %v2281_v4 = vadd.f32 %v3444_v32, %v2241_v17 }
 0x2e8   : > { %v1680_v38 = vpop.f32.mrf.mxu2  ;;  %v1529_v29 = vpop.f32.mrf.mxu1 }
 0x2e9   : > { %2318 = vst.msk [vmem:[%s3450_s16 + $0xd0] sm:$0xff] %vm2291_vm9, %v2281_v4  ;;  %v1730_v10 = vadd.f32 %v1680_v38, %v1576_v30  ;;  %v1577_v15 = vadd.f32 %v1529_v29, %v3874_v63 }
 0x2eb   : > { %v2010_v46 = vadd.f32 %v1960_v56, %v1730_v10  ;;  %v2195_v52 = vpop.f32.mrf.mxu0 }
 0x2ed   : > { %v2242_v3 = vadd.f32 %v2192_v28, %v2010_v46 }
 0x2ef   : > { %v2282_v6 = vadd.f32 %v3444_v32, %v2242_v3 }
 0x2f0   : > { %v1683_v43 = vpop.f32.mrf.mxu2  ;;  %v1531_v7 = vpop.f32.mrf.mxu1 }
 0x2f1   : > { %2319 = vst.msk [vmem:[%s3450_s16 + $0xd8] sm:$0xff] %vm2291_vm9, %v2282_v6  ;;  %v1731_v14 = vadd.f32 %v1683_v43, %v1577_v15  ;;  %v1578_v41 = vadd.f32 %v1531_v7, %v3385_v55  ;;  %v1970_v55 = vpop.f32.mrf.mxu3 }
 0x2f3   : > { %v2011_v35 = vadd.f32 %v1963_v33, %v1731_v14  ;;  %v2197_v61 = vpop.f32.mrf.mxu0 }
 0x2f5   : > { %v2243_v13 = vadd.f32 %v2195_v52, %v2011_v35 }
 0x2f7   : > { %v2283_v31 = vadd.f32 %v3444_v32, %v2243_v13 }
 0x2f8   : > { %v1685_v42 = vpop.f32.mrf.mxu2  ;;  %v1534_v5 = vpop.f32.mrf.mxu1 }
 0x2f9   : > { %2320 = vst.msk [vmem:[%s3450_s16 + $0xe0] sm:$0xff] %vm2291_vm9, %v2283_v31  ;;  %v1732_v44 = vadd.f32 %v1685_v42, %v1578_v41  ;;  %v1579_v1 = vadd.f32 %v1534_v5, %v3390_v12  ;;  %v1973_v18 = vpop.f32.mrf.mxu3 }
 0x2fb   : > { %v2012_v37 = vadd.f32 %v1965_v50, %v1732_v44  ;;  %v2200_v19 = vpop.f32.mrf.mxu0 }
 0x2fd   : > { %v2244_v16 = vadd.f32 %v2197_v61, %v2012_v37 }
 0x2ff   : > { %v2284_v0 = vadd.f32 %v3444_v32, %v2244_v16 }
 0x300   : > { %v1688_v9 = vpop.f32.mrf.mxu2  ;;  %v1536_v23 = vpop.f32.mrf.mxu1 }
 0x301   : > { %2321 = vst.msk [vmem:[%s3450_s16 + $0xe8] sm:$0xff] %vm2291_vm9, %v2284_v0  ;;  %v1733_v58 = vadd.f32 %v1688_v9, %v1579_v1  ;;  %v1580_v2 = vadd.f32 %v1536_v23, %v3402_v53  ;;  %v1975_v45 = vpop.f32.mrf.mxu3 }
 0x303   : > { %v2013_v54 = vadd.f32 %v1968_v22, %v1733_v58  ;;  %v2202_v34 = vpop.f32.mrf.mxu0 }
 0x305   : > { %v2245_v60 = vadd.f32 %v2200_v19, %v2013_v54 }
 0x307   : > { %v2285_v25 = vadd.f32 %v3444_v32, %v2245_v60 }
 0x308   : > { %v1690_v49 = vpop.f32.mrf.mxu2  ;;  %v1539_v62 = vpop.f32.mrf.mxu1 }
 0x309   : > { %2322 = vst.msk [vmem:[%s3450_s16 + $0xf0] sm:$0xff] %vm2291_vm9, %v2285_v25  ;;  %v1734_v57 = vadd.f32 %v1690_v49, %v1580_v2  ;;  %v1581_v11 = vadd.f32 %v1539_v62, %v3407_v39  ;;  %v1978_v10 = vpop.f32.mrf.mxu3 }
 0x30b   : > { %v2014_v12 = vadd.f32 %v1970_v55, %v1734_v57  ;;  %v2205_v56 = vpop.f32.mrf.mxu0 }
 0x30d   : > { %v2246_v47 = vadd.f32 %v2202_v34, %v2014_v12 }
 0x30f   : > { %v2286_v8 = vadd.f32 %v3444_v32, %v2246_v47 }
 0x310   : > { %v1693_v59 = vpop.f32.mrf.mxu2  ;;  %v1541_v21 = vpop.f32.mrf.mxu1 }
 0x311   : > { %2323 = vst.msk [vmem:[%s3450_s16 + $0xf8] sm:$0xff] %vm2291_vm9, %v2286_v8  ;;  %v1735_v36 = vadd.f32 %v1693_v59, %v1581_v11  ;;  %v1582_v26 = vadd.f32 %v1541_v21, %v3419_v24  ;;  %v1980_v14 = vpop.f32.mrf.mxu3 }
 0x313   : > { %v2015_v53 = vadd.f32 %v1973_v18, %v1735_v36  ;;  %v2207_v27 = vpop.f32.mrf.mxu0 }
 0x315   : > { %v2247_v40 = vadd.f32 %v2205_v56, %v2015_v53 }
 0x317   : > { %v2287_v51 = vadd.f32 %v3444_v32, %v2247_v40 }
 0x318   : > { %v1695_v28 = vpop.f32.mrf.mxu2  ;;  %v1544_v17 = vpop.f32.mrf.mxu1 }
 0x319   : > { %2324 = vst.msk [vmem:[%s3450_s16 + $0x100] sm:$0xff] %vm2291_vm9, %v2287_v51  ;;  %v1736_v33 = vadd.f32 %v1695_v28, %v1582_v26  ;;  %v1583_v38 = vadd.f32 %v1544_v17, %v3424_v20 }
 0x31b   : > { %v2016_v39 = vadd.f32 %v1975_v45, %v1736_v33  ;;  %v2210_v24 = vpop.f32.mrf.mxu0 }
 0x31d   : > { %v2248_v4 = vadd.f32 %v2207_v27, %v2016_v39 }
 0x31f   : > { %v2288_v30 = vadd.f32 %v3444_v32, %v2248_v4 }
 0x320   : > { %v1698_v29 = vpop.f32.mrf.mxu2  ;;  %v1546_v3 = vpop.f32.mrf.mxu1 }
 0x321   : > { %2325 = vst.msk [vmem:[%s3450_s16 + $0x108] sm:$0xff] %vm2291_vm9, %v2288_v30  ;;  %v1737_v46 = vadd.f32 %v1698_v29, %v1583_v38  ;;  %v1584_v63 = vadd.f32 %v1546_v3, %v3436_v48 }
 0x323   : > { %v2017_v52 = vadd.f32 %v1978_v10, %v1737_v46  ;;  %v2212_v7 = vpop.f32.mrf.mxu0 }
 0x325   : > { %v2249_v50 = vadd.f32 %v2210_v24, %v2017_v52 }
 0x327   : > { %v2289_v6 = vadd.f32 %v3444_v32, %v2249_v50 }
 0x328   : > { %v1700_v15 = vpop.f32.mrf.mxu2 }
 0x329   : > { %2326 = vst.msk [vmem:[%s3450_s16 + $0x110] sm:$0xff] %vm2291_vm9, %v2289_v6  ;;  %v1738_v43 = vadd.f32 %v1700_v15, %v1584_v63 }
 0x32b   : > { %v2018_v20 = vadd.f32 %v1980_v14, %v1738_v43 }
 0x32d   : > { %v2250_v35 = vadd.f32 %v2212_v7, %v2018_v20 }
 0x32f   : > { %v2290_v61 = vadd.f32 %v3444_v32, %v2250_v35 }
 0x331   : > { %2328 = vst.msk [vmem:[%s3450_s16 + $0x118] sm:$0x3f] %vm2327_vm10, %v2290_v61 }
 0x332 PF: > { %s13_s12 = sadd.s32 1, %s2584_s12  }
 0x333   : > { %p10_p4 = scmp.ge.s32.totalorder %s13_s12, 4  }
 0x335   :  { %12 = sbr.rel (!%p10_p4) target bundleno = 1 (0x1), region = 70 }

// kernel: value_network_forward.21
= control target key start
LH: loop header
LB: loop body
LE: loop exit
PB: predicated region body
PF: predicated region fallthrough
CT: control target
= control target key end

     0   :  { %s1236_s12 = smov 0   ;;  %s1601_s0 = inlined_call_operand.vmem [shape: f32[2,100,16], index: 0, kind: input, shape index: {}]   ;;  %s1602_s1 = inlined_call_operand.vmem [shape: bf16[9,16,16], index: 1, kind: input, shape index: {}]   ;;  %s1603_s2 = inlined_call_operand.vmem [shape: f32[1,16], index: 2, kind: input, shape index: {}]   ;;  %s1604_s3 = inlined_call_operand.vmem [shape: f32[2,78,16], index: 3, kind: output, shape index: {}]  }
   0x1 LB: > { %s1079_s13 = sadd.s32 4294967295, %s1214_s12   ;;  %p1083_p0 = scmp.ge.s32.totalorder %s1214_s12, 1  ;;  %s1214_s12 = sphi %s1236_s12, %s13_s12  }
   0x2   : > { %p137_p1 = scmp.lt.s32.totalorder %s1214_s12, 3 }
   0x4   : > { %p138_p2 = pnand %p1083_p0, %p137_p1 }
   0x5   : > { %p161_p3 = scmp.lt.s32.totalorder (!%p138_p2), %s1079_s13, 1 }
   0x6   : > { %141 = sbr.rel (%p138_p2) target bundleno = 355 (0x163), region = 32 }
   0xb   : > { %v1186_v0 = vld [vmem:[%s1602_s1 + $0x8] sm:$0xff]  ;;  %v1187_v1 = vld [vmem:[%s1602_s1 + $0x10] sm:$0xff]  ;;  %v1185_v2 = vld [vmem:[%s1602_s1] sm:$0xff]  ;;  %s1606_s13 = smov (!%p161_p3, %s1079_s13), 1  ;;  %vm208_vm0 = vsmask.f32 7424 }
   0xc   : > { %1194 = vmatpush.bf16.msra.mxu1 %v1186_v0  ;;  %1195 = vmatpush.bf16.msra.mxu2 %v1186_v0  ;;  %s1197_s20 = smul.u32 104, %s1606_s13  ;;  %v1188_v3 = vld [vmem:[%s1602_s1 + $0x18] sm:$0xff]  ;;  %v1189_v4 = vld [vmem:[%s1602_s1 + $0x20] sm:$0xff]  ;;  %vm254_vm1 = vcmask 130048   ;;  %v1191_v49 = vld [vmem:[%s1602_s1 + $0x30] sm:$0xff]  ;;  %vm362_vm2 = vcmask 1046528  }
   0xd   : > { %1196 = vmatpush.bf16.msra.mxu3 %v1186_v0  ;;  %277 = vmatpush.bf16.msra.mxu0 %v1186_v0  ;;  %v1192_v50 = vld [vmem:[%s1602_s1 + $0x38] sm:$0xff]  ;;  %v1190_v51 = vld [vmem:[%s1602_s1 + $0x28] sm:$0xff]  ;;  %v1193_v53 = vld [vmem:[%s1602_s1 + $0x40] sm:$0xff]  ;;  %vm528_vm3 = vsmask.f32 6400  ;;  %vm647_vm4 = vcmask 1045504  }
   0xe   : > { %s1265_s27 = scalar_lea.vmem %s1601_s0, %s1197_s20  ;;  %vm810_vm5 = vsmask.f32 5376  ;;  %vm912_vm6 = vcmask 1044480   ;;  %s1198_s11 = smul.u32 80, %s1606_s13  ;;  %vm1022_vm7 = vcmask 128000  }
   0xf   : > { %v174_v5 = vld [vmem:[%s1265_s27 + $0x10] sm:$0xff]  ;;  %v175_v6 = vld [vmem:[%s1265_s27 + $0x18] sm:$0xff]  ;;  %v176_v7 = vld [vmem:[%s1265_s27 + $0x20] sm:$0xff] }
  0x10   : > { %400 = vmatpush.bf16.msrb.mxu2 %v1187_v1  ;;  %327 = vmatpush.bf16.msrb.mxu1 %v1185_v2  ;;  %v1271_v8 = vld [vmem:[%s1265_s27 + $0x28] sm:$0xff]  ;;  %v187_v9 = vmax.f32 %v174_v5, 0.0  ;;  %v188_v10 = vmax.f32 %v175_v6, 0.0  ;;  %v189_v11 = vmax.f32 %v176_v7, 0.0  ;;  %v1274_v12 = vld [vmem:[%s1265_s27 + $0x30] sm:$0xff]  ;;  %v1277_v13 = vld [vmem:[%s1265_s27 + $0x38] sm:$0xff]  ;;  %s1560_s16 = scalar_lea.vmem %s1604_s3, %s1198_s11 }
  0x11   : > { %487 = vmatpush.bf16.msrb.mxu3 %v1188_v3  ;;  %606 = vmatpush.bf16.msrb.mxu0 %v1189_v4  ;;  %v190_v14 = vmax.f32 %v1271_v8, 0.0  ;;  %v191_v15 = vmax.f32 %v1274_v12, 0.0  ;;  %v192_v16 = vmax.f32 %v1277_v13, 0.0  ;;  %v1283_v17 = vld [vmem:[%s1265_s27 + $0x40] sm:$0xff]  ;;  %v1286_v18 = vld [vmem:[%s1265_s27 + $0x48] sm:$0xff] }
  0x12   : > { %v172_v19 = vld [vmem:[%s1265_s27] sm:$0xff]  ;;  %v1289_v20 = vpack.c.bf16 %v188_v10, %v187_v9  ;;  %v193_v21 = vmax.f32 %v1283_v17, 0.0  ;;  %v194_v22 = vmax.f32 %v1286_v18, 0.0  ;;  %v173_v23 = vld [vmem:[%s1265_s27 + $0x8] sm:$0xff]  ;;  %v1351_v56 = vpack.c.bf16 %v189_v11, %v188_v10 }
  0x13   : > { %v1296_v24 = vpack.c.bf16 %v190_v14, %v189_v11  ;;  %v1302_v25 = vpack.c.bf16 %v192_v16, %v191_v15  ;;  %v185_v26 = vmax.f32 %v172_v19, 0.0  ;;  %v186_v30 = vmax.f32 %v173_v23, 0.0 }
  0x14   : > { %v217_v27 = vshll.u32 %v1289_v20, 16  ;;  %v221_v28 = vshrl.u32 %v1289_v20, 16  ;;  %v1310_v29 = vpack.c.bf16 %v194_v22, %v193_v21  ;;  %v538_v60 = vshrl.u32 %v1351_v56, 16 }
  0x15   : > { %v225_v31 = vshll.u32 %v1296_v24, 16  ;;  %v229_v32 = vshrl.u32 %v1296_v24, 16  ;;  %v233_v33 = vshll.u32 %v1302_v25, 16  ;;  %v198_v41 = vpack.c.bf16 %v186_v30, %v185_v26 }
  0x16   : > { %v219_v34 = vrot.slane %v217_v27, 1  ;;  %v241_v35 = vshll.u32 %v1310_v29, 16  ;;  %v245_v36 = vshrl.u32 %v1310_v29, 16  ;;  %v1348_v54 = vpack.c.bf16 %v187_v9, %v186_v30 }
  0x17   : > { %v227_v37 = vrot.slane %v225_v31, 1  ;;  %v235_v38 = vrot.slane %v233_v33, 1  ;;  %v210_v45 = vshrl.u32 %v198_v41, 16  ;;  %v212_v46 = vshll.u32 %v198_v41, 16 }
  0x18   : > { %v223_v39 = vor.u32 %v221_v28, %v219_v34  ;;  %v243_v40 = vrot.slane %v241_v35, 1  ;;  %v237_v57 = vshrl.u32 %v1302_v25, 16  ;;  %v530_v58 = vshrl.u32 %v1348_v54, 16 }
  0x19   : > { %v231_v42 = vor.u32 %v229_v32, %v227_v37  ;;  %v214_v48 = vrot.slane %v212_v46, 1  ;;  %v533_v59 = vshll.u32 %v1348_v54, 16  ;;  %v541_v61 = vshll.u32 %v1351_v56, 16 }
  0x1a   : > { %v228_v43 = vsel %vm208_vm0, %v223_v39, %v227_v37  ;;  %v247_v44 = vor.u32 %v245_v36, %v243_v40  ;;  %v239_v62 = vor.u32 %v237_v57, %v235_v38  ;;  %v450_v63 = vrot.slane %v1348_v54, 1 }
  0x1b   : > { %1093 = vmatmul.msk.bf16.vlgmr.msra.gmra.mxu1 %vm254_vm1, %v228_v43  ;;  %v236_v47 = vsel %vm208_vm0, %v231_v42, %v235_v38  ;;  %v215_v52 = vor.u32 %v214_v48, %v210_v45  ;;  %v451_v0 = vrot.slane %v1351_v56, 1  ;;  %v532_v1 = vrot.slane %v530_v58, 1 }
  0x1c   : > { %1094 = vmatmul.msk.bf16.vlgmr.msra.gmra.mxu2 %vm254_vm1, %v236_v47  ;;  %1096 = vmatmul.msk.bf16.vlgmr.msra.gmra.mxu3 %vm254_vm1, %v247_v44  ;;  %v535_v2 = vrot.slane %v533_v59, 2  ;;  %v540_v3 = vrot.slane %v538_v60, 1  ;;  %v543_v4 = vrot.slane %v541_v61, 2  ;;  %v244_v5 = vsel %vm208_vm0, %v239_v62, %v243_v40  ;;  %v1401_v47 = vld [vmem:[%s1265_s27 + $0x50] sm:$0xff] }
  0x1d   : > { %770 = vmatpush.bf16.msra.mxu2 %v1191_v49  ;;  %872 = vmatpush.bf16.msra.mxu3 %v1192_v50  ;;  %v220_v55 = vsel %vm208_vm0, %v215_v52, %v219_v34  ;;  %v452_v6 = vsel %vm362_vm2, %v450_v63, %v451_v0  ;;  %v1373_v11 = vpack.c.bf16 %v191_v15, %v190_v14  ;;  %v363_v26 = vrot.slane %v198_v41, 1 }
  0x1e   : > { %687 = vmatpush.bf16.msra.mxu1 %v1190_v51  ;;  %1092 = vmatmul.msk.bf16.vlgmr.msra.gmra.mxu0 %vm254_vm1, %v220_v55  ;;  %v536_v7 = vor.u32 %v535_v2, %v532_v1  ;;  %v544_v9 = vor.u32 %v543_v4, %v540_v3  ;;  %v364_v30 = vrot.slane %v1289_v20, 1  ;;  %v1391_v15 = vpack.c.bf16 %v193_v21, %v192_v16 }
  0x1f   : > { %952 = vmatpush.bf16.msra.mxu0 %v1193_v53  ;;  %v547_v19 = vshrl.u32 %v1373_v11, 16  ;;  %v550_v23 = vshll.u32 %v1373_v11, 16  ;;  %v453_v34 = vrot.slane %v1373_v11, 1  ;;  %v366_v42 = vrot.slane %v1296_v24, 1 }
  0x20   : > { %v545_v10 = vsel %vm528_vm3, %v536_v7, %v544_v9  ;;  %v365_v39 = vsel %vm362_vm2, %v363_v26, %v364_v30  ;;  %v556_v40 = vshrl.u32 %v1391_v15, 16  ;;  %v455_v43 = vrot.slane %v1391_v15, 1 }
  0x21   : > { %v549_v37 = vrot.slane %v547_v19, 1  ;;  %v552_v38 = vrot.slane %v550_v23, 2  ;;  %v454_v8 = vsel %vm362_vm2, %v451_v0, %v453_v34  ;;  %v367_v46 = vsel %vm362_vm2, %v364_v30, %v366_v42  ;;  %v183_v0 = vld [vmem:[%s1265_s27 + $0x58] sm:$0xff] }
  0x22   : > { %v558_v44 = vrot.slane %v556_v40, 1  ;;  %v456_v13 = vsel %vm362_vm2, %v453_v34, %v455_v43  ;;  %v195_v17 = vmax.f32 %v1401_v47, 0.0  ;;  %v368_v51 = vrot.slane %v1302_v25, 1 }
  0x23   : > { %v553_v12 = vor.u32 %v552_v38, %v549_v37  ;;  %v815_v58 = vrot.slane %v225_v31, 3  ;;  %v814_v18 = vrot.slane %v229_v32, 2  ;;  %v648_v60 = vrot.slane %v1348_v54, 2 }
  0x24   : > { %v1411_v48 = vpack.c.bf16 %v195_v17, %v194_v22  ;;  %v369_v22 = vsel %vm362_vm2, %v366_v42, %v368_v51  ;;  %v649_v61 = vrot.slane %v1351_v56, 2  ;;  %v811_v62 = vrot.slane %v221_v28, 2 }
  0x25   : > { %v554_v14 = vsel %vm528_vm3, %v544_v9, %v553_v12  ;;  %v812_v32 = vrot.slane %v217_v27, 3  ;;  %v816_v54 = vor.u32 %v815_v58, %v814_v18  ;;  %v651_v56 = vrot.slane %v1373_v11, 2 }
  0x26   : > { %v565_v49 = vshrl.u32 %v1411_v48, 16  ;;  %v568_v50 = vshll.u32 %v1411_v48, 16  ;;  %v457_v52 = vrot.slane %v1411_v48, 1  ;;  %v650_v31 = vsel %vm647_vm4, %v648_v60, %v649_v61 }
  0x27   : > { %v196_v1 = vmax.f32 %v183_v0, 0.0  ;;  %v813_v2 = vor.u32 %v812_v32, %v811_v62  ;;  %v652_v3 = vsel %vm647_vm4, %v649_v61, %v651_v56  ;;  %v913_v11 = vrot.slane %v1289_v20, 3 }
  0x28   : > { %v567_v53 = vrot.slane %v565_v49, 1  ;;  %v570_v55 = vrot.slane %v568_v50, 2  ;;  %v458_v59 = vsel %vm362_vm2, %v455_v43, %v457_v52  ;;  %v914_v19 = vrot.slane %v1296_v24, 3 }
  0x29   : > { %v817_v4 = vsel %vm810_vm5, %v813_v2, %v816_v54  ;;  %v818_v26 = vrot.slane %v237_v57, 2  ;;  %v819_v30 = vrot.slane %v233_v33, 3  ;;  %v731_v34 = vrot.slane %v1289_v20, 2 }
  0x2a   : > { %v571_v63 = vor.u32 %v570_v55, %v567_v53  ;;  %v915_v23 = vsel %vm912_vm6, %v913_v11, %v914_v19  ;;  %v732_v37 = vrot.slane %v1296_v24, 2  ;;  %v655_v60 = vrot.slane %v1411_v48, 2 }
  0x2b   : > { %1101 = vmatmul.msk.bf16.vlgmr.msrb.gmra.mxu1 %vm254_vm1, %v198_v41  ;;  %v559_v41 = vshll.u32 %v1391_v15, 16  ;;  %v820_v38 = vor.u32 %v819_v30, %v818_v26  ;;  %v736_v61 = vrot.slane %v1310_v29, 2 }
  0x2c   : > { %1095 = vmatmul.msk.bf16.gmra.mxu2 %vm254_vm1, %v244_v5  ;;  %1123 = vmatmul.msk.bf16.vlgmr.msrb.gmra.mxu3 %vm254_vm1, %v452_v6  ;;  %v1441_v5 = vpack.c.bf16 %v196_v1, %v196_v1  ;;  %v370_v6 = vrot.slane %v1310_v29, 1 }
  0x2d   : > { %v561_v45 = vrot.slane %v559_v41, 2 }
  0x2e   : > { %1134 = vmatmul.msk.bf16.vlgmr.msrb.gmra.mxu0 %vm254_vm1, %v545_v10  ;;  %v574_v27 = vshll.u32 %v1441_v5, 16  ;;  %v371_v7 = vsel %vm362_vm2, %v368_v51, %v370_v6 }
  0x2f   : > { %v562_v16 = vor.u32 %v561_v45, %v558_v44  ;;  %v653_v45 = vrot.slane %v1391_v15, 2 }
  0x30   : > { %v576_v9 = vrot.slane %v574_v27, 2 }
  0x31   : > { %v563_v21 = vsel %vm528_vm3, %v553_v12, %v562_v16  ;;  %v572_v28 = vsel %vm528_vm3, %v562_v16, %v571_v63  ;;  %v916_v12 = vrot.slane %v1302_v25, 3 }
  0x32   : > { %v577_v10 = vsel %vm528_vm3, %v571_v63, %v576_v9  ;;  %v657_v9 = vrot.slane %v1441_v5, 2 }
  0x33   : > { %v917_v33 = vsel %vm912_vm6, %v914_v19, %v916_v12 }
  0x34   : > { %v658_v30 = vsel %vm647_vm4, %v655_v60, %v657_v9 }
  0x3b   : > { %1102 = vmatmul.msk.bf16.gmra.mxu1 %vm254_vm1, %v1289_v20  ;;  %v822_v20 = vrot.slane %v245_v36, 2 }
  0x3c   : > { %1112 = vmatmul.msk.bf16.vlgmr.msrb.gmra.mxu2 %vm254_vm1, %v365_v39  ;;  %1124 = vmatmul.msk.bf16.gmra.mxu3 %vm254_vm1, %v454_v8  ;;  %v733_v39 = vsel %vm647_vm4, %v731_v34, %v732_v37  ;;  %v821_v8 = vsel %vm810_vm5, %v816_v54, %v820_v38  ;;  %v656_v54 = vsel %vm647_vm4, %v653_v45, %v655_v60 }
  0x3e   : > { %1135 = vmatmul.msk.bf16.gmra.mxu0 %vm254_vm1, %v554_v14  ;;  %v1468_v14 = vpack.c.bf16 %v196_v1, %v195_v17  ;;  %v918_v17 = vrot.slane %v1310_v29, 3 }
  0x40   : > { %v827_v57 = vshrl.u32 %v1468_v14, 16  ;;  %v830_v40 = vshll.u32 %v1468_v14, 16  ;;  %v919_v50 = vsel %vm912_vm6, %v916_v12, %v918_v17  ;;  %v920_v1 = vrot.slane %v1468_v14, 3 }
  0x42   : > { %v829_v41 = vrot.slane %v827_v57, 2  ;;  %v832_v42 = vrot.slane %v830_v40, 3 }
  0x44   : > { %v833_v44 = vor.u32 %v832_v42, %v829_v41 }
  0x4b   : > { %1103 = vmatmul.msk.bf16.gmra.mxu1 %vm254_vm1, %v1296_v24  ;;  %v823_v24 = vrot.slane %v241_v35, 3  ;;  %v654_v35 = vsel %vm647_vm4, %v651_v56, %v653_v45 }
  0x4c   : > { %1113 = vmatmul.msk.bf16.gmra.mxu2 %vm254_vm1, %v367_v46  ;;  %1125 = vmatmul.msk.bf16.gmra.mxu3 %vm254_vm1, %v456_v13  ;;  %v734_v46 = vrot.slane %v1302_v25, 2 }
  0x4d   : > { %v824_v43 = vor.u32 %v823_v24, %v822_v20 }
  0x4e   : > { %1136 = vmatmul.msk.bf16.gmra.mxu0 %vm254_vm1, %v563_v21  ;;  %v735_v47 = vsel %vm647_vm4, %v732_v37, %v734_v46  ;;  %v184_v21 = vld [vmem:[%s1265_s27 + $0x60] sm:$0xf] }
  0x4f   : > { %v834_v36 = vsel %vm810_vm5, %v824_v43, %v833_v44  ;;  %v825_v16 = vsel %vm810_vm5, %v820_v38, %v824_v43  ;;  %v197_v49 = vmax.f32 %v184_v21, 0.0 }
  0x5b   : > { %1104 = vmatmul.msk.bf16.gmra.mxu1 %vm254_vm1, %v1302_v25  ;;  %v1492_v25 = vpack.c.bf16 %v197_v49, %v197_v49 }
  0x5c   : > { %1114 = vmatmul.msk.bf16.gmra.mxu2 %vm254_vm1, %v369_v22  ;;  %1126 = vmatmul.msk.bf16.gmra.mxu3 %vm254_vm1, %v458_v59 }
  0x5d   : > { %v836_v53 = vshrl.u32 %v1492_v25, 16  ;;  %v839_v55 = vshll.u32 %v1492_v25, 16  ;;  %v922_v48 = vrot.slane %v1492_v25, 3  ;;  %v740_v24 = vrot.slane %v1492_v25, 2 }
  0x5e   : > { %1137 = vmatmul.msk.bf16.gmra.mxu0 %vm254_vm1, %v572_v28  ;;  %v737_v28 = vsel %vm647_vm4, %v734_v46, %v736_v61 }
  0x5f   : > { %v838_v18 = vrot.slane %v836_v53, 2  ;;  %v841_v22 = vrot.slane %v839_v55, 3 }
  0x61   : > { %v842_v59 = vor.u32 %v841_v22, %v838_v18 }
  0x63   : > { %v843_v62 = vsel %vm810_vm5, %v833_v44, %v842_v59 }
  0x6b   : > { %1105 = vmatmul.msk.bf16.gmra.mxu1 %vm254_vm1, %v1310_v29  ;;  %v923_v29 = vsel %vm912_vm6, %v920_v1, %v922_v48 }
  0x6c   : > { %1115 = vmatmul.msk.bf16.gmra.mxu2 %vm254_vm1, %v371_v7  ;;  %1127 = vmatmul.msk.bf16.gmra.mxu3 %vm254_vm1, %v457_v52 }
  0x6e   : > { %1138 = vmatmul.msk.bf16.gmra.mxu0 %vm254_vm1, %v577_v10  ;;  %v738_v10 = vrot.slane %v1468_v14, 2 }
  0x70   : > { %v739_v37 = vsel %vm647_vm4, %v736_v61, %v738_v10  ;;  %v741_v45 = vsel %vm647_vm4, %v738_v10, %v740_v24 }
  0x7b   : > { %1145 = vmatmul.msk.bf16.vlgmr.msra.gmra.mxu1 %vm254_vm1, %v650_v31 }
  0x7c   : > { %1116 = vmatmul.msk.bf16.gmra.mxu2 %vm254_vm1, %v370_v6  ;;  %1167 = vmatmul.msk.bf16.vlgmr.msra.gmra.mxu3 %vm254_vm1, %v817_v4 }
  0x7e   : > { %1178 = vmatmul.msk.bf16.vlgmr.msra.gmra.mxu0 %vm254_vm1, %v915_v23 }
  0x8b   : > { %1146 = vmatmul.msk.bf16.gmra.mxu1 %vm254_vm1, %v652_v3  ;;  %v921_v3 = vsel %vm912_vm6, %v918_v17, %v920_v1 }
  0x8c   : > { %1156 = vmatmul.msk.bf16.vlgmr.msra.gmra.mxu2 %vm254_vm1, %v733_v39  ;;  %1168 = vmatmul.msk.bf16.gmra.mxu3 %vm254_vm1, %v821_v8 }
  0x8e   : > { %1179 = vmatmul.msk.bf16.gmra.mxu0 %vm254_vm1, %v917_v33 }
  0x98   : > { %v284_v13 = vpop.f32.mrf.mxu1 }
  0x9b   : > { %1147 = vmatmul.msk.bf16.gmra.mxu1 %vm254_vm1, %v654_v35  ;;  %v279_v15 = vpop.f32.mrf.mxu0 }
  0x9c   : > { %1157 = vmatmul.msk.bf16.gmra.mxu2 %vm254_vm1, %v735_v47  ;;  %1169 = vmatmul.msk.bf16.gmra.mxu3 %vm254_vm1, %v825_v16 }
  0x9e   : > { %1180 = vmatmul.msk.bf16.gmra.mxu0 %vm254_vm1, %v919_v50 }
  0x9f   : > { %v289_v51 = vpop.f32.mrf.mxu2  ;;  %v1495_v52 = vpop.f32.mrf.mxu3 }
  0xa0   : > { %v286_v58 = vpop.f32.mrf.mxu1 }
  0xa3   : > { %v281_v63 = vpop.f32.mrf.mxu0 }
  0xa7   : > { %v291_v31 = vpop.f32.mrf.mxu2  ;;  %v1503_v0 = vpop.f32.mrf.mxu3 }
  0xa8   : > { %v329_v32 = vpop.f32.mrf.mxu1 }
  0xa9   : > { %v330_v56 = vadd.f32 %v329_v32, %v279_v15 }
  0xab   : > { %1148 = vmatmul.msk.bf16.gmra.mxu1 %vm254_vm1, %v656_v54  ;;  %v608_v2 = vpop.f32.mrf.mxu0 }
  0xac   : > { %1158 = vmatmul.msk.bf16.gmra.mxu2 %vm254_vm1, %v737_v28  ;;  %1170 = vmatmul.msk.bf16.gmra.mxu3 %vm254_vm1, %v834_v36 }
  0xae   : > { %1181 = vmatmul.msk.bf16.gmra.mxu0 %vm254_vm1, %v921_v3 }
  0xaf   : > { %v294_v4 = vpop.f32.mrf.mxu2  ;;  %v489_v6 = vpop.f32.mrf.mxu3 }
  0xb0   : > { %v331_v27 = vpop.f32.mrf.mxu1 }
  0xb1   : > { %v332_v7 = vadd.f32 %v331_v27, %v281_v63 }
  0xb3   : > { %v610_v11 = vpop.f32.mrf.mxu0 }
  0xb7   : > { %v296_v19 = vpop.f32.mrf.mxu2  ;;  %v491_v23 = vpop.f32.mrf.mxu3 }
  0xb8   : > { %v334_v26 = vpop.f32.mrf.mxu1 }
  0xb9   : > { %v335_v34 = vadd.f32 %v334_v26, %v284_v13 }
  0xbb   : > { %1149 = vmatmul.msk.bf16.gmra.mxu1 %vm254_vm1, %v658_v30  ;;  %v613_v38 = vpop.f32.mrf.mxu0 }
  0xbc   : > { %1159 = vmatmul.msk.bf16.gmra.mxu2 %vm254_vm1, %v739_v37  ;;  %1171 = vmatmul.msk.bf16.gmra.mxu3 %vm254_vm1, %v843_v62 }
  0xbe   : > { %1182 = vmatmul.msk.bf16.gmra.mxu0 %vm254_vm1, %v923_v29 }
  0xbf   : > { %v402_v39 = vpop.f32.mrf.mxu2  ;;  %v494_v5 = vpop.f32.mrf.mxu3 }
  0xc0   : > { %v427_v8 = vadd.f32 %v402_v39, %v330_v56  ;;  %v336_v12 = vpop.f32.mrf.mxu1 }
  0xc1   : > { %v337_v14 = vadd.f32 %v336_v12, %v286_v58 }
  0xc2   : > { %v514_v33 = vadd.f32 %v489_v6, %v427_v8 }
  0xc3   : > { %v615_v57 = vpop.f32.mrf.mxu0 }
  0xc4   : > { %v1523_v20 = vadd.f32 %v608_v2, %v514_v33 }
  0xc7   : > { %v404_v40 = vpop.f32.mrf.mxu2  ;;  %v496_v41 = vpop.f32.mrf.mxu3 }
  0xc8   : > { %v428_v42 = vadd.f32 %v404_v40, %v332_v7  ;;  %v339_v43 = vpop.f32.mrf.mxu1 }
  0xc9   : > { %v340_v44 = vadd.f32 %v339_v43, %v289_v51 }
  0xca   : > { %v515_v46 = vadd.f32 %v491_v23, %v428_v42 }
  0xcb   : > { %v618_v13 = vpop.f32.mrf.mxu0 }
  0xcc   : > { %1160 = vmatmul.msk.bf16.gmra.mxu2 %vm254_vm1, %v741_v45  ;;  %v1528_v36 = vadd.f32 %v610_v11, %v515_v46 }
  0xcf   : > { %v407_v35 = vpop.f32.mrf.mxu2  ;;  %v499_v47 = vpop.f32.mrf.mxu3 }
  0xd0   : > { %v429_v16 = vadd.f32 %v407_v35, %v335_v34  ;;  %v341_v17 = vpop.f32.mrf.mxu1 }
  0xd1   : > { %v342_v21 = vadd.f32 %v341_v17, %v291_v31  ;;  %v1552_v17 = vld [vmem:[%s1603_s2] ss:$0 sm:$0xff] }
  0xd2   : > { %v516_v49 = vadd.f32 %v494_v5, %v429_v16 }
  0xd3   : > { %v620_v15 = vpop.f32.mrf.mxu0 }
  0xd4   : > { %v1530_v25 = vadd.f32 %v613_v38, %v516_v49 }
  0xd7   : > { %v409_v50 = vpop.f32.mrf.mxu2  ;;  %v501_v53 = vpop.f32.mrf.mxu3 }
  0xd8   : > { %v430_v51 = vadd.f32 %v409_v50, %v337_v14  ;;  %v344_v55 = vpop.f32.mrf.mxu1 }
  0xd9   : > { %v345_v58 = vadd.f32 %v344_v55, %v294_v4 }
  0xda   : > { %v517_v18 = vadd.f32 %v496_v41, %v430_v51 }
  0xdb   : > { %v623_v59 = vpop.f32.mrf.mxu0 }
  0xdc   : > { %v1532_v22 = vadd.f32 %v615_v57, %v517_v18 }
  0xdf   : > { %v412_v60 = vpop.f32.mrf.mxu2  ;;  %v504_v61 = vpop.f32.mrf.mxu3 }
  0xe0   : > { %v431_v62 = vadd.f32 %v412_v60, %v340_v44  ;;  %v346_v63 = vpop.f32.mrf.mxu1 }
  0xe1   : > { %v347_v32 = vadd.f32 %v346_v63, %v296_v19 }
  0xe2   : > { %v518_v54 = vadd.f32 %v499_v47, %v431_v62 }
  0xe3   : > { %v625_v56 = vpop.f32.mrf.mxu0 }
  0xe4   : > { %v1534_v31 = vadd.f32 %v618_v13, %v518_v54 }
  0xe7   : > { %v414_v28 = vpop.f32.mrf.mxu2  ;;  %v506_v1 = vpop.f32.mrf.mxu3 }
  0xe8   : > { %v432_v48 = vadd.f32 %v414_v28, %v342_v21  ;;  %v349_v29 = vpop.f32.mrf.mxu1 }
  0xe9   : > { %v350_v39 = vadd.f32 %v349_v29, %v1495_v52 }
  0xea   : > { %v519_v2 = vadd.f32 %v501_v53, %v432_v48 }
  0xeb   : > { %v628_v4 = vpop.f32.mrf.mxu0 }
  0xec   : > { %v1536_v3 = vadd.f32 %v620_v15, %v519_v2 }
  0xef   : > { %v417_v6 = vpop.f32.mrf.mxu2  ;;  %v509_v27 = vpop.f32.mrf.mxu3 }
  0xf0   : > { %v433_v7 = vadd.f32 %v417_v6, %v345_v58  ;;  %v351_v9 = vpop.f32.mrf.mxu1 }
  0xf1   : > { %v352_v40 = vadd.f32 %v351_v9, %v1503_v0 }
  0xf2   : > { %v520_v10 = vadd.f32 %v504_v61, %v433_v7 }
  0xf3   : > { %v630_v19 = vpop.f32.mrf.mxu0 }
  0xf4   : > { %v1538_v11 = vadd.f32 %v623_v59, %v520_v10 }
  0xf7   : > { %v419_v23 = vpop.f32.mrf.mxu2  ;;  %v511_v26 = vpop.f32.mrf.mxu3 }
  0xf8   : > { %v434_v30 = vadd.f32 %v419_v23, %v347_v32  ;;  %v689_v34 = vpop.f32.mrf.mxu1 }
  0xf9   : > { %v714_v52 = vadd.f32 %v689_v34, %v1523_v20 }
  0xfa   : > { %v521_v37 = vadd.f32 %v506_v1, %v434_v30 }
  0xfb   : > { %v954_v14 = vpop.f32.mrf.mxu0 }
  0xfc   : > { %v1540_v38 = vadd.f32 %v625_v56, %v521_v37 }
  0xff   : > { %v422_v5 = vpop.f32.mrf.mxu2  ;;  %v874_v8 = vpop.f32.mrf.mxu3 }
 0x100   : > { %v435_v12 = vadd.f32 %v422_v5, %v350_v39  ;;  %v691_v24 = vpop.f32.mrf.mxu1 }
 0x101   : > { %v715_v15 = vadd.f32 %v691_v24, %v1528_v36 }
 0x102   : > { %v522_v33 = vadd.f32 %v509_v27, %v435_v12 }
 0x103   : > { %v956_v45 = vpop.f32.mrf.mxu0 }
 0x104   : > { %v1543_v57 = vadd.f32 %v628_v4, %v522_v33 }
 0x107   : > { %v424_v41 = vpop.f32.mrf.mxu2  ;;  %v876_v43 = vpop.f32.mrf.mxu3 }
 0x108   : > { %v436_v42 = vadd.f32 %v424_v41, %v352_v40  ;;  %v694_v13 = vpop.f32.mrf.mxu1 }
 0x109   : > { %v716_v36 = vadd.f32 %v694_v13, %v1530_v25 }
 0x10a   : > { %v523_v44 = vadd.f32 %v511_v26, %v436_v42 }
 0x10b   : > { %v959_v49 = vpop.f32.mrf.mxu0 }
 0x10c   : > { %v1546_v46 = vadd.f32 %v630_v19, %v523_v44 }
 0x10f   : > { %v772_v35 = vpop.f32.mrf.mxu2  ;;  %v879_v0 = vpop.f32.mrf.mxu3 }
 0x110   : > { %v797_v47 = vadd.f32 %v772_v35, %v714_v52  ;;  %v696_v20 = vpop.f32.mrf.mxu1 }
 0x111   : > { %v717_v1 = vadd.f32 %v696_v20, %v1532_v22 }
 0x112   : > { %v899_v16 = vadd.f32 %v874_v8, %v797_v47 }
 0x113   : > { %v961_v62 = vpop.f32.mrf.mxu0 }
 0x114   : > { %v979_v21 = vadd.f32 %v954_v14, %v899_v16 }
 0x116   : > { %v993_v50 = vadd.f32 %v1552_v17, %v979_v21 }
 0x117   : > { %v774_v53 = vpop.f32.mrf.mxu2  ;;  %v881_v59 = vpop.f32.mrf.mxu3 }
 0x118   : > { %v1003_v51 = vmax.f32 %v993_v50, 0.0  ;;  %v798_v55 = vadd.f32 %v774_v53, %v715_v15  ;;  %v699_v54 = vpop.f32.mrf.mxu1 }
 0x119   : > { %v718_v10 = vadd.f32 %v699_v54, %v1534_v31 }
 0x11a   : > { %1013 = vst.msk [vmem:[%s1560_s16] sm:$0xff] %vm254_vm1, %v1003_v51  ;;  %v900_v58 = vadd.f32 %v876_v43, %v798_v55 }
 0x11b   : > { %v964_v6 = vpop.f32.mrf.mxu0 }
 0x11c   : > { %v980_v18 = vadd.f32 %v956_v45, %v900_v58 }
 0x11e   : > { %v994_v60 = vadd.f32 %v1552_v17, %v980_v18 }
 0x11f   : > { %v777_v61 = vpop.f32.mrf.mxu2  ;;  %v884_v2 = vpop.f32.mrf.mxu3 }
 0x120   : > { %v1004_v63 = vmax.f32 %v994_v60, 0.0  ;;  %v799_v32 = vadd.f32 %v777_v61, %v716_v36  ;;  %v701_v7 = vpop.f32.mrf.mxu1 }
 0x121   : > { %v719_v8 = vadd.f32 %v701_v7, %v1536_v3 }
 0x122   : > { %1014 = vst.msk [vmem:[%s1560_s16 + $0x8] sm:$0xff] %vm254_vm1, %v1004_v63  ;;  %v901_v56 = vadd.f32 %v879_v0, %v799_v32 }
 0x123   : > { %v966_v37 = vpop.f32.mrf.mxu0 }
 0x124   : > { %v981_v28 = vadd.f32 %v959_v49, %v901_v56 }
 0x126   : > { %v995_v48 = vadd.f32 %v1552_v17, %v981_v28 }
 0x127   : > { %v779_v29 = vpop.f32.mrf.mxu2  ;;  %v886_v30 = vpop.f32.mrf.mxu3 }
 0x128   : > { %v1005_v25 = vmax.f32 %v995_v48, 0.0  ;;  %v800_v4 = vadd.f32 %v779_v29, %v717_v1  ;;  %v704_v5 = vpop.f32.mrf.mxu1 }
 0x129   : > { %v720_v43 = vadd.f32 %v704_v5, %v1538_v11 }
 0x12a   : > { %1015 = vst.msk [vmem:[%s1560_s16 + $0x10] sm:$0xff] %vm254_vm1, %v1005_v25  ;;  %v902_v27 = vadd.f32 %v881_v59, %v800_v4 }
 0x12b   : > { %v969_v42 = vpop.f32.mrf.mxu0 }
 0x12c   : > { %v982_v9 = vadd.f32 %v961_v62, %v902_v27 }
 0x12e   : > { %v996_v19 = vadd.f32 %v1552_v17, %v982_v9 }
 0x12f   : > { %v782_v23 = vpop.f32.mrf.mxu2  ;;  %v889_v40 = vpop.f32.mrf.mxu3 }
 0x130   : > { %v1006_v22 = vmax.f32 %v996_v19, 0.0  ;;  %v801_v26 = vadd.f32 %v782_v23, %v718_v10  ;;  %v706_v45 = vpop.f32.mrf.mxu1 }
 0x131   : > { %v721_v0 = vadd.f32 %v706_v45, %v1540_v38 }
 0x132   : > { %1016 = vst.msk [vmem:[%s1560_s16 + $0x18] sm:$0xff] %vm254_vm1, %v1006_v22  ;;  %v903_v34 = vadd.f32 %v884_v2, %v801_v26 }
 0x133   : > { %v971_v49 = vpop.f32.mrf.mxu0 }
 0x134   : > { %v983_v39 = vadd.f32 %v964_v6, %v903_v34 }
 0x136   : > { %v997_v12 = vadd.f32 %v1552_v17, %v983_v39 }
 0x137   : > { %v784_v14 = vpop.f32.mrf.mxu2  ;;  %v891_v16 = vpop.f32.mrf.mxu3 }
 0x138   : > { %v1007_v31 = vmax.f32 %v997_v12, 0.0  ;;  %v802_v33 = vadd.f32 %v784_v14, %v719_v8  ;;  %v709_v20 = vpop.f32.mrf.mxu1 }
 0x139   : > { %v722_v55 = vadd.f32 %v709_v20, %v1543_v57 }
 0x13a   : > { %1017 = vst.msk [vmem:[%s1560_s16 + $0x20] sm:$0xff] %vm254_vm1, %v1007_v31  ;;  %v904_v24 = vadd.f32 %v886_v30, %v802_v33 }
 0x13b   : > { %v974_v60 = vpop.f32.mrf.mxu0 }
 0x13c   : > { %v984_v41 = vadd.f32 %v966_v37, %v904_v24 }
 0x13e   : > { %v998_v44 = vadd.f32 %v1552_v17, %v984_v41 }
 0x13f   : > { %v787_v13 = vpop.f32.mrf.mxu2  ;;  %v894_v18 = vpop.f32.mrf.mxu3 }
 0x140   : > { %v1008_v3 = vmax.f32 %v998_v44, 0.0  ;;  %v803_v52 = vadd.f32 %v787_v13, %v720_v43  ;;  %v711_v62 = vpop.f32.mrf.mxu1 }
 0x141   : > { %v723_v32 = vadd.f32 %v711_v62, %v1546_v46 }
 0x142   : > { %1018 = vst.msk [vmem:[%s1560_s16 + $0x28] sm:$0xff] %vm254_vm1, %v1008_v3  ;;  %v905_v35 = vadd.f32 %v889_v40, %v803_v52 }
 0x143   : > { %v976_v29 = vpop.f32.mrf.mxu0 }
 0x144   : > { %v985_v47 = vadd.f32 %v969_v42, %v905_v35 }
 0x146   : > { %v999_v21 = vadd.f32 %v1552_v17, %v985_v47 }
 0x147   : > { %v789_v15 = vpop.f32.mrf.mxu2  ;;  %v896_v1 = vpop.f32.mrf.mxu3 }
 0x148   : > { %v1009_v11 = vmax.f32 %v999_v21, 0.0  ;;  %v804_v50 = vadd.f32 %v789_v15, %v721_v0 }
 0x14a   : > { %1019 = vst.msk [vmem:[%s1560_s16 + $0x30] sm:$0xff] %vm254_vm1, %v1009_v11  ;;  %v906_v53 = vadd.f32 %v891_v16, %v804_v50 }
 0x14c   : > { %v986_v51 = vadd.f32 %v971_v49, %v906_v53 }
 0x14e   : > { %v1000_v58 = vadd.f32 %v1552_v17, %v986_v51 }
 0x14f   : > { %v792_v59 = vpop.f32.mrf.mxu2 }
 0x150   : > { %v1010_v38 = vmax.f32 %v1000_v58, 0.0  ;;  %v805_v36 = vadd.f32 %v792_v59, %v722_v55 }
 0x152   : > { %1020 = vst.msk [vmem:[%s1560_s16 + $0x38] sm:$0xff] %vm254_vm1, %v1010_v38  ;;  %v907_v61 = vadd.f32 %v894_v18, %v805_v36 }
 0x154   : > { %v987_v63 = vadd.f32 %v974_v60, %v907_v61 }
 0x156   : > { %v1001_v54 = vadd.f32 %v1552_v17, %v987_v63 }
 0x157   : > { %v794_v56 = vpop.f32.mrf.mxu2 }
 0x158   : > { %v1011_v57 = vmax.f32 %v1001_v54, 0.0  ;;  %v806_v28 = vadd.f32 %v794_v56, %v723_v32 }
 0x15a   : > { %1021 = vst.msk [vmem:[%s1560_s16 + $0x40] sm:$0xff] %vm254_vm1, %v1011_v57  ;;  %v908_v48 = vadd.f32 %v896_v1, %v806_v28 }
 0x15c   : > { %v988_v2 = vadd.f32 %v976_v29, %v908_v48 }
 0x15e   : > { %v1002_v25 = vadd.f32 %v1552_v17, %v988_v2 }
 0x160   : > { %v1012_v4 = vmax.f32 %v1002_v25, 0.0 }
 0x162   : > { %1023 = vst.msk [vmem:[%s1560_s16 + $0x48] sm:$0x3f] %vm1022_vm7, %v1012_v4 }
 0x163 PF: > { %s13_s12 = sadd.s32 1, %s1214_s12  }
 0x164   : > { %p10_p4 = scmp.ge.s32.totalorder %s13_s12, 4  }
 0x166   :  { %12 = sbr.rel (!%p10_p4) target bundleno = 1 (0x1), region = 70 }

// kernel: value_network_forward.22
= control target key start
LH: loop header
LB: loop body
LE: loop exit
PB: predicated region body
PF: predicated region fallthrough
CT: control target
= control target key end

     0   :  { %s1298_s15 = smov 0   ;;  %s1660_s0 = inlined_call_operand.vmem [shape: f32[2,100,16], index: 0, kind: input, shape index: {}]   ;;  %s1661_s1 = inlined_call_operand.vmem [shape: bf16[9,16,16], index: 1, kind: input, shape index: {}]   ;;  %s1662_s2 = inlined_call_operand.vmem [shape: f32[1,16], index: 2, kind: input, shape index: {}]   ;;  %s1663_s3 = inlined_call_operand.vmem [shape: f32[2,78,16], index: 3, kind: input, shape index: {}]   ;;  %s1664_s4 = inlined_call_operand.vmem [shape: f32[2,78,16], index: 4, kind: output, shape index: {}]  }
   0x1 LB: > { %s1135_s16 = sadd.s32 4294967295, %s1271_s15   ;;  %p1139_p0 = scmp.ge.s32.totalorder %s1271_s15, 1  ;;  %s1271_s15 = sphi %s1298_s15, %s14_s15  }
   0x2   : > { %p172_p1 = scmp.lt.s32.totalorder %s1271_s15, 3 }
   0x4   : > { %p173_p2 = pnand %p1139_p0, %p172_p1 }
   0x5   : > { %p203_p3 = scmp.lt.s32.totalorder (!%p173_p2), %s1135_s16, 1 }
   0x6   : > { %176 = sbr.rel (%p173_p2) target bundleno = 353 (0x161), region = 36 }
   0xb   : > { %v1243_v0 = vld [vmem:[%s1661_s1 + $0x8] sm:$0xff]  ;;  %v1244_v1 = vld [vmem:[%s1661_s1 + $0x10] sm:$0xff]  ;;  %v1242_v2 = vld [vmem:[%s1661_s1] sm:$0xff]  ;;  %s1666_s16 = smov (!%p203_p3, %s1135_s16), 1  ;;  %vm242_vm0 = vsmask.f32 7424 }
   0xc   : > { %1251 = vmatpush.bf16.msra.mxu1 %v1243_v0  ;;  %1252 = vmatpush.bf16.msra.mxu2 %v1243_v0  ;;  %v1245_v3 = vld [vmem:[%s1661_s1 + $0x18] sm:$0xff]  ;;  %v1246_v4 = vld [vmem:[%s1661_s1 + $0x20] sm:$0xff]  ;;  %s1254_s27 = smul.u32 104, %s1666_s16  ;;  %vm288_vm1 = vcmask 130048   ;;  %v1248_v39 = vld [vmem:[%s1661_s1 + $0x30] sm:$0xff]  ;;  %vm396_vm2 = vcmask 1046528  }
   0xd   : > { %1253 = vmatpush.bf16.msra.mxu3 %v1243_v0  ;;  %311 = vmatpush.bf16.msra.mxu0 %v1243_v0  ;;  %v1249_v40 = vld [vmem:[%s1661_s1 + $0x38] sm:$0xff]  ;;  %v1247_v41 = vld [vmem:[%s1661_s1 + $0x28] sm:$0xff]  ;;  %v1250_v43 = vld [vmem:[%s1661_s1 + $0x40] sm:$0xff]  ;;  %vm562_vm3 = vsmask.f32 6400  ;;  %vm681_vm5 = vcmask 1045504  }
   0xe   : > { %s1327_s30 = scalar_lea.vmem %s1660_s0, %s1254_s27  ;;  %vm844_vm4 = vsmask.f32 5376  ;;  %vm946_vm6 = vcmask 1044480   ;;  %s1255_s13 = smul.u32 80, %s1666_s16  ;;  %vm1066_vm7 = vcmask 128000  }
   0xf   : > { %v221_v5 = vld [vmem:[%s1327_s30 + $0x10] sm:$0xff]  ;;  %v222_v6 = vld [vmem:[%s1327_s30 + $0x18] sm:$0xff]  ;;  %v223_v7 = vld [vmem:[%s1327_s30 + $0x20] sm:$0xff] }
  0x10   : > { %434 = vmatpush.bf16.msrb.mxu2 %v1244_v1  ;;  %361 = vmatpush.bf16.msrb.mxu1 %v1242_v2  ;;  %v1333_v8 = vld [vmem:[%s1327_s30 + $0x28] sm:$0xff]  ;;  %v1335_v9 = vpack.c.bf16 %v222_v6, %v221_v5  ;;  %v1338_v10 = vld [vmem:[%s1327_s30 + $0x30] sm:$0xff]  ;;  %v1341_v11 = vld [vmem:[%s1327_s30 + $0x38] sm:$0xff]  ;;  %v1403_v46 = vpack.c.bf16 %v223_v7, %v222_v6  ;;  %s1597_s18 = scalar_lea.vmem %s1663_s3, %s1255_s13  ;;  %s1610_s22 = scalar_lea.vmem %s1664_s4, %s1255_s13 }
  0x11   : > { %521 = vmatpush.bf16.msrb.mxu3 %v1245_v3  ;;  %640 = vmatpush.bf16.msrb.mxu0 %v1246_v4  ;;  %v1344_v12 = vpack.c.bf16 %v1333_v8, %v223_v7  ;;  %v1348_v13 = vpack.c.bf16 %v1341_v11, %v1338_v10  ;;  %v1351_v14 = vld [vmem:[%s1327_s30 + $0x40] sm:$0xff]  ;;  %v1354_v15 = vld [vmem:[%s1327_s30 + $0x48] sm:$0xff]  ;;  %v1423_v0 = vpack.c.bf16 %v1338_v10, %v1333_v8 }
  0x12   : > { %v251_v16 = vshll.u32 %v1335_v9, 16  ;;  %v255_v17 = vshrl.u32 %v1335_v9, 16  ;;  %v1360_v18 = vpack.c.bf16 %v1354_v15, %v1351_v14  ;;  %v219_v22 = vld [vmem:[%s1327_s30] sm:$0xff]  ;;  %v220_v23 = vld [vmem:[%s1327_s30 + $0x8] sm:$0xff]  ;;  %v572_v50 = vshrl.u32 %v1403_v46, 16 }
  0x13   : > { %v259_v19 = vshll.u32 %v1344_v12, 16  ;;  %v263_v20 = vshrl.u32 %v1344_v12, 16  ;;  %v267_v21 = vshll.u32 %v1348_v13, 16  ;;  %v232_v31 = vpack.c.bf16 %v220_v23, %v219_v22 }
  0x14   : > { %v253_v24 = vrot.slane %v251_v16, 1  ;;  %v275_v25 = vshll.u32 %v1360_v18, 16  ;;  %v279_v26 = vshrl.u32 %v1360_v18, 16  ;;  %v1400_v44 = vpack.c.bf16 %v221_v5, %v220_v23 }
  0x15   : > { %v261_v27 = vrot.slane %v259_v19, 1  ;;  %v269_v28 = vrot.slane %v267_v21, 1  ;;  %v244_v35 = vshrl.u32 %v232_v31, 16  ;;  %v246_v36 = vshll.u32 %v232_v31, 16 }
  0x16   : > { %v257_v29 = vor.u32 %v255_v17, %v253_v24  ;;  %v277_v30 = vrot.slane %v275_v25, 1  ;;  %v271_v47 = vshrl.u32 %v1348_v13, 16  ;;  %v564_v48 = vshrl.u32 %v1400_v44, 16 }
  0x17   : > { %v265_v32 = vor.u32 %v263_v20, %v261_v27  ;;  %v248_v38 = vrot.slane %v246_v36, 1  ;;  %v567_v49 = vshll.u32 %v1400_v44, 16  ;;  %v575_v51 = vshll.u32 %v1403_v46, 16 }
  0x18   : > { %v262_v33 = vsel %vm242_vm0, %v257_v29, %v261_v27  ;;  %v281_v34 = vor.u32 %v279_v26, %v277_v30  ;;  %v273_v52 = vor.u32 %v271_v47, %v269_v28  ;;  %v484_v53 = vrot.slane %v1400_v44, 1 }
  0x19   : > { %1150 = vmatmul.msk.bf16.vlgmr.msra.gmra.mxu1 %vm288_vm1, %v262_v33  ;;  %v270_v37 = vsel %vm242_vm0, %v265_v32, %v269_v28  ;;  %v249_v42 = vor.u32 %v248_v38, %v244_v35  ;;  %v485_v54 = vrot.slane %v1403_v46, 1  ;;  %v566_v55 = vrot.slane %v564_v48, 1 }
  0x1a   : > { %1151 = vmatmul.msk.bf16.vlgmr.msra.gmra.mxu2 %vm288_vm1, %v270_v37  ;;  %1153 = vmatmul.msk.bf16.vlgmr.msra.gmra.mxu3 %vm288_vm1, %v281_v34  ;;  %v569_v56 = vrot.slane %v567_v49, 2  ;;  %v574_v57 = vrot.slane %v572_v50, 1  ;;  %v577_v58 = vrot.slane %v575_v51, 2  ;;  %v278_v59 = vsel %vm242_vm0, %v273_v52, %v277_v30 }
  0x1b   : > { %804 = vmatpush.bf16.msra.mxu2 %v1248_v39  ;;  %906 = vmatpush.bf16.msra.mxu3 %v1249_v40  ;;  %v254_v45 = vsel %vm242_vm0, %v249_v42, %v253_v24  ;;  %v486_v60 = vsel %vm396_vm2, %v484_v53, %v485_v54  ;;  %v581_v1 = vshrl.u32 %v1423_v0, 16  ;;  %v584_v2 = vshll.u32 %v1423_v0, 16  ;;  %v230_v53 = vld [vmem:[%s1327_s30 + $0x58] sm:$0xff] }
  0x1c   : > { %721 = vmatpush.bf16.msra.mxu1 %v1247_v41  ;;  %1149 = vmatmul.msk.bf16.vlgmr.msra.gmra.mxu0 %vm288_vm1, %v254_v45  ;;  %v570_v61 = vor.u32 %v569_v56, %v566_v55  ;;  %v578_v62 = vor.u32 %v577_v58, %v574_v57  ;;  %v397_v3 = vrot.slane %v232_v31, 1  ;;  %v398_v4 = vrot.slane %v1335_v9, 1 }
  0x1d   : > { %986 = vmatpush.bf16.msra.mxu0 %v1250_v43  ;;  %v487_v5 = vrot.slane %v1423_v0, 1  ;;  %v583_v6 = vrot.slane %v581_v1, 1  ;;  %v586_v7 = vrot.slane %v584_v2, 2  ;;  %v1439_v10 = vpack.c.bf16 %v1351_v14, %v1341_v11  ;;  %v229_v11 = vld [vmem:[%s1327_s30 + $0x50] sm:$0xff] }
  0x1e   : > { %v579_v63 = vsel %vm562_vm3, %v570_v61, %v578_v62  ;;  %v399_v22 = vsel %vm396_vm2, %v397_v3, %v398_v4  ;;  %v400_v29 = vrot.slane %v1344_v12, 1  ;;  %v1455_v36 = vpack.c.bf16 %v229_v11, %v1354_v15 }
  0x1f   : > { %v488_v23 = vsel %vm396_vm2, %v485_v54, %v487_v5  ;;  %v587_v24 = vor.u32 %v586_v7, %v583_v6  ;;  %v590_v27 = vshrl.u32 %v1439_v10, 16  ;;  %v593_v28 = vshll.u32 %v1439_v10, 16 }
  0x20   : > { %v489_v30 = vrot.slane %v1439_v10, 1  ;;  %v401_v33 = vsel %vm396_vm2, %v398_v4, %v400_v29  ;;  %v599_v37 = vshrl.u32 %v1455_v36, 16  ;;  %v602_v38 = vshll.u32 %v1455_v36, 16 }
  0x21   : > { %v588_v8 = vsel %vm562_vm3, %v578_v62, %v587_v24  ;;  %v595_v32 = vrot.slane %v593_v28, 2  ;;  %v402_v39 = vrot.slane %v1348_v13, 1  ;;  %v491_v40 = vrot.slane %v1455_v36, 1 }
  0x22   : > { %v490_v34 = vsel %vm396_vm2, %v487_v5, %v489_v30  ;;  %v601_v41 = vrot.slane %v599_v37, 1  ;;  %v604_v42 = vrot.slane %v602_v38, 2  ;;  %v849_v43 = vrot.slane %v259_v19, 3 }
  0x23   : > { %v848_v15 = vrot.slane %v263_v20, 2  ;;  %v403_v45 = vsel %vm396_vm2, %v400_v29, %v402_v39  ;;  %v492_v48 = vsel %vm396_vm2, %v489_v30, %v491_v40  ;;  %v845_v49 = vrot.slane %v255_v17, 2 }
  0x24   : > { %v605_v50 = vor.u32 %v604_v42, %v601_v41  ;;  %v846_v19 = vrot.slane %v251_v16, 3  ;;  %v1480_v17 = vpack.c.bf16 %v230_v53, %v230_v53  ;;  %v404_v55 = vrot.slane %v1360_v18, 1 }
  0x25   : > { %v850_v51 = vor.u32 %v849_v43, %v848_v15  ;;  %v947_v62 = vrot.slane %v1335_v9, 3  ;;  %v685_v2 = vrot.slane %v1423_v0, 2  ;;  %v765_v3 = vrot.slane %v1335_v9, 2 }
  0x26   : > { %v847_v52 = vor.u32 %v846_v19, %v845_v49  ;;  %v608_v56 = vshll.u32 %v1480_v17, 16  ;;  %v405_v57 = vsel %vm396_vm2, %v402_v39, %v404_v55  ;;  %v766_v4 = vrot.slane %v1344_v12, 2 }
  0x27   : > { %v687_v30 = vrot.slane %v1439_v10, 2  ;;  %v231_v10 = vld [vmem:[%s1327_s30 + $0x60] sm:$0xf] }
  0x28   : > { %v851_v54 = vsel %vm844_vm4, %v847_v52, %v850_v51  ;;  %v610_v58 = vrot.slane %v608_v56, 2  ;;  %v767_v7 = vsel %vm681_vm5, %v765_v3, %v766_v4 }
  0x29   : > { %1158 = vmatmul.msk.bf16.vlgmr.msrb.gmra.mxu1 %vm288_vm1, %v232_v31  ;;  %v592_v31 = vrot.slane %v590_v27, 1 }
  0x2a   : > { %1152 = vmatmul.msk.bf16.gmra.mxu2 %vm288_vm1, %v278_v59  ;;  %1180 = vmatmul.msk.bf16.vlgmr.msrb.gmra.mxu3 %vm288_vm1, %v486_v60  ;;  %v611_v16 = vsel %vm562_vm3, %v605_v50, %v610_v58  ;;  %v682_v59 = vrot.slane %v1400_v44, 2  ;;  %v683_v60 = vrot.slane %v1403_v46, 2  ;;  %v852_v44 = vrot.slane %v271_v47, 2 }
  0x2b   : > { %v596_v35 = vor.u32 %v595_v32, %v592_v31  ;;  %v853_v46 = vrot.slane %v267_v21, 3  ;;  %v857_v21 = vrot.slane %v275_v25, 3  ;;  %v768_v31 = vrot.slane %v1348_v13, 2 }
  0x2c   : > { %1191 = vmatmul.msk.bf16.vlgmr.msrb.gmra.mxu0 %vm288_vm1, %v579_v63  ;;  %v684_v61 = vsel %vm681_vm5, %v682_v59, %v683_v60  ;;  %v948_v63 = vrot.slane %v1344_v12, 3  ;;  %v686_v6 = vsel %vm681_vm5, %v683_v60, %v685_v2  ;;  %v688_v25 = vsel %vm681_vm5, %v685_v2, %v687_v30 }
  0x2d   : > { %v597_v14 = vsel %vm562_vm3, %v587_v24, %v596_v35  ;;  %v606_v20 = vsel %vm562_vm3, %v596_v35, %v605_v50  ;;  %v854_v5 = vor.u32 %v853_v46, %v852_v44  ;;  %v1512_v24 = vpack.c.bf16 %v230_v53, %v229_v11 }
  0x2e   : > { %v949_v1 = vsel %vm946_vm6, %v947_v62, %v948_v63  ;;  %v952_v35 = vrot.slane %v1360_v18, 3  ;;  %v1536_v11 = vpack.c.bf16 %v231_v10, %v231_v10 }
  0x2f   : > { %v861_v47 = vshrl.u32 %v1512_v24, 16  ;;  %v864_v0 = vshll.u32 %v1512_v24, 16  ;;  %v772_v62 = vrot.slane %v1512_v24, 2 }
  0x30   : > { %v870_v39 = vshrl.u32 %v1536_v11, 16 }
  0x31   : > { %v866_v27 = vrot.slane %v864_v0, 3 }
  0x32   : > { %v872_v42 = vrot.slane %v870_v39, 2 }
  0x39   : > { %1159 = vmatmul.msk.bf16.gmra.mxu1 %vm288_vm1, %v1335_v9 }
  0x3a   : > { %1169 = vmatmul.msk.bf16.vlgmr.msrb.gmra.mxu2 %vm288_vm1, %v399_v22  ;;  %1181 = vmatmul.msk.bf16.gmra.mxu3 %vm288_vm1, %v488_v23  ;;  %v855_v22 = vsel %vm844_vm4, %v850_v51, %v854_v5  ;;  %v950_v23 = vrot.slane %v1348_v13, 3 }
  0x3c   : > { %1192 = vmatmul.msk.bf16.gmra.mxu0 %vm288_vm1, %v588_v8  ;;  %v951_v9 = vsel %vm946_vm6, %v948_v63, %v950_v23  ;;  %v863_v8 = vrot.slane %v861_v47, 2 }
  0x3e   : > { %v867_v29 = vor.u32 %v866_v27, %v863_v8 }
  0x49   : > { %1160 = vmatmul.msk.bf16.gmra.mxu1 %vm288_vm1, %v1344_v12  ;;  %v856_v12 = vrot.slane %v279_v26, 2 }
  0x4a   : > { %1170 = vmatmul.msk.bf16.gmra.mxu2 %vm288_vm1, %v401_v33  ;;  %1182 = vmatmul.msk.bf16.gmra.mxu3 %vm288_vm1, %v490_v34  ;;  %v769_v33 = vsel %vm681_vm5, %v766_v4, %v768_v31 }
  0x4b   : > { %v858_v28 = vor.u32 %v857_v21, %v856_v12  ;;  %v774_v12 = vrot.slane %v1536_v11, 2 }
  0x4c   : > { %1193 = vmatmul.msk.bf16.gmra.mxu0 %vm288_vm1, %v597_v14  ;;  %v953_v14 = vsel %vm946_vm6, %v950_v23, %v952_v35 }
  0x4d   : > { %v868_v26 = vsel %vm844_vm4, %v858_v28, %v867_v29  ;;  %v859_v34 = vsel %vm844_vm4, %v854_v5, %v858_v28 }
  0x59   : > { %1161 = vmatmul.msk.bf16.gmra.mxu1 %vm288_vm1, %v1348_v13 }
  0x5a   : > { %1171 = vmatmul.msk.bf16.gmra.mxu2 %vm288_vm1, %v403_v45  ;;  %1183 = vmatmul.msk.bf16.gmra.mxu3 %vm288_vm1, %v492_v48  ;;  %v689_v45 = vrot.slane %v1455_v36, 2  ;;  %v770_v48 = vrot.slane %v1360_v18, 2  ;;  %v956_v36 = vrot.slane %v1536_v11, 3 }
  0x5c   : > { %1194 = vmatmul.msk.bf16.gmra.mxu0 %vm288_vm1, %v606_v20  ;;  %v690_v52 = vsel %vm681_vm5, %v687_v30, %v689_v45  ;;  %v773_v4 = vsel %vm681_vm5, %v770_v48, %v772_v62 }
  0x69   : > { %1162 = vmatmul.msk.bf16.gmra.mxu1 %vm288_vm1, %v1360_v18 }
  0x6a   : > { %1172 = vmatmul.msk.bf16.gmra.mxu2 %vm288_vm1, %v405_v57  ;;  %1184 = vmatmul.msk.bf16.gmra.mxu3 %vm288_vm1, %v491_v40  ;;  %v873_v40 = vshll.u32 %v1536_v11, 16 }
  0x6c   : > { %1195 = vmatmul.msk.bf16.gmra.mxu0 %vm288_vm1, %v611_v16  ;;  %v875_v43 = vrot.slane %v873_v40, 3 }
  0x6e   : > { %v876_v15 = vor.u32 %v875_v43, %v872_v42 }
  0x70   : > { %v877_v49 = vsel %vm844_vm4, %v867_v29, %v876_v15  ;;  %v775_v29 = vsel %vm681_vm5, %v772_v62, %v774_v12 }
  0x79   : > { %1202 = vmatmul.msk.bf16.vlgmr.msra.gmra.mxu1 %vm288_vm1, %v684_v61  ;;  %v691_v61 = vrot.slane %v1480_v17, 2 }
  0x7a   : > { %1173 = vmatmul.msk.bf16.gmra.mxu2 %vm288_vm1, %v404_v55  ;;  %1224 = vmatmul.msk.bf16.vlgmr.msra.gmra.mxu3 %vm288_vm1, %v851_v54  ;;  %v771_v54 = vsel %vm681_vm5, %v768_v31, %v770_v48  ;;  %v954_v55 = vrot.slane %v1512_v24, 3 }
  0x7b   : > { %v692_v2 = vsel %vm681_vm5, %v689_v45, %v691_v61 }
  0x7c   : > { %1235 = vmatmul.msk.bf16.vlgmr.msra.gmra.mxu0 %vm288_vm1, %v949_v1  ;;  %v957_v18 = vsel %vm946_vm6, %v954_v55, %v956_v36  ;;  %v955_v57 = vsel %vm946_vm6, %v952_v35, %v954_v55 }
  0x89   : > { %1203 = vmatmul.msk.bf16.gmra.mxu1 %vm288_vm1, %v686_v6 }
  0x8a   : > { %1213 = vmatmul.msk.bf16.vlgmr.msra.gmra.mxu2 %vm288_vm1, %v767_v7  ;;  %1225 = vmatmul.msk.bf16.gmra.mxu3 %vm288_vm1, %v855_v22 }
  0x8c   : > { %1236 = vmatmul.msk.bf16.gmra.mxu0 %vm288_vm1, %v951_v9 }
  0x96   : > { %v318_v32 = vpop.f32.mrf.mxu1 }
  0x99   : > { %1204 = vmatmul.msk.bf16.gmra.mxu1 %vm288_vm1, %v688_v25  ;;  %v313_v13 = vpop.f32.mrf.mxu0 }
  0x9a   : > { %1214 = vmatmul.msk.bf16.gmra.mxu2 %vm288_vm1, %v769_v33  ;;  %1226 = vmatmul.msk.bf16.gmra.mxu3 %vm288_vm1, %v859_v34 }
  0x9c   : > { %1237 = vmatmul.msk.bf16.gmra.mxu0 %vm288_vm1, %v953_v14 }
  0x9d   : > { %v323_v37 = vpop.f32.mrf.mxu2  ;;  %v1539_v38 = vpop.f32.mrf.mxu3 }
  0x9e   : > { %v320_v41 = vpop.f32.mrf.mxu1 }
  0xa1   : > { %v315_v50 = vpop.f32.mrf.mxu0 }
  0xa5   : > { %v325_v19 = vpop.f32.mrf.mxu2  ;;  %v1547_v51 = vpop.f32.mrf.mxu3 }
  0xa6   : > { %v363_v20 = vpop.f32.mrf.mxu1 }
  0xa7   : > { %v364_v53 = vadd.f32 %v363_v20, %v313_v13 }
  0xa9   : > { %1205 = vmatmul.msk.bf16.gmra.mxu1 %vm288_vm1, %v690_v52  ;;  %v642_v56 = vpop.f32.mrf.mxu0 }
  0xaa   : > { %1215 = vmatmul.msk.bf16.gmra.mxu2 %vm288_vm1, %v771_v54  ;;  %1227 = vmatmul.msk.bf16.gmra.mxu3 %vm288_vm1, %v868_v26 }
  0xac   : > { %1238 = vmatmul.msk.bf16.gmra.mxu0 %vm288_vm1, %v955_v57 }
  0xad   : > { %v328_v58 = vpop.f32.mrf.mxu2  ;;  %v523_v16 = vpop.f32.mrf.mxu3 }
  0xae   : > { %v365_v59 = vpop.f32.mrf.mxu1 }
  0xaf   : > { %v366_v60 = vadd.f32 %v365_v59, %v315_v50 }
  0xb1   : > { %v644_v63 = vpop.f32.mrf.mxu0 }
  0xb5   : > { %v330_v1 = vpop.f32.mrf.mxu2  ;;  %v525_v44 = vpop.f32.mrf.mxu3 }
  0xb6   : > { %v368_v46 = vpop.f32.mrf.mxu1 }
  0xb7   : > { %v369_v3 = vadd.f32 %v368_v46, %v318_v32 }
  0xb9   : > { %1206 = vmatmul.msk.bf16.gmra.mxu1 %vm288_vm1, %v692_v2  ;;  %v647_v5 = vpop.f32.mrf.mxu0 }
  0xba   : > { %1216 = vmatmul.msk.bf16.gmra.mxu2 %vm288_vm1, %v773_v4  ;;  %1228 = vmatmul.msk.bf16.gmra.mxu3 %vm288_vm1, %v877_v49 }
  0xbc   : > { %1239 = vmatmul.msk.bf16.gmra.mxu0 %vm288_vm1, %v957_v18 }
  0xbd   : > { %v436_v6 = vpop.f32.mrf.mxu2  ;;  %v528_v17 = vpop.f32.mrf.mxu3 }
  0xbe   : > { %v461_v7 = vadd.f32 %v436_v6, %v364_v53  ;;  %v370_v22 = vpop.f32.mrf.mxu1 }
  0xbf   : > { %v371_v23 = vadd.f32 %v370_v22, %v320_v41 }
  0xc0   : > { %v548_v24 = vadd.f32 %v523_v16, %v461_v7 }
  0xc1   : > { %v649_v21 = vpop.f32.mrf.mxu0 }
  0xc2   : > { %v1567_v9 = vadd.f32 %v642_v56, %v548_v24 }
  0xc5   : > { %v438_v47 = vpop.f32.mrf.mxu2  ;;  %v530_v0 = vpop.f32.mrf.mxu3 }
  0xc6   : > { %v462_v8 = vadd.f32 %v438_v47, %v366_v60  ;;  %v373_v27 = vpop.f32.mrf.mxu1 }
  0xc7   : > { %v374_v28 = vadd.f32 %v373_v27, %v323_v37 }
  0xc8   : > { %v549_v30 = vadd.f32 %v525_v44, %v462_v8 }
  0xc9   : > { %v652_v26 = vpop.f32.mrf.mxu0 }
  0xca   : > { %1217 = vmatmul.msk.bf16.gmra.mxu2 %vm288_vm1, %v775_v29  ;;  %v1572_v31 = vadd.f32 %v644_v63, %v549_v30 }
  0xcd   : > { %v441_v32 = vpop.f32.mrf.mxu2  ;;  %v533_v25 = vpop.f32.mrf.mxu3 }
  0xce   : > { %v463_v33 = vadd.f32 %v441_v32, %v369_v3  ;;  %v375_v34 = vpop.f32.mrf.mxu1 }
  0xcf   : > { %v376_v35 = vadd.f32 %v375_v34, %v325_v19 }
  0xd0   : > { %v550_v10 = vadd.f32 %v528_v17, %v463_v33  ;;  %v1602_v33 = vld [vmem:[%s1662_s2] ss:$0 sm:$0xff] }
  0xd1   : > { %v654_v13 = vpop.f32.mrf.mxu0 }
  0xd2   : > { %v1574_v11 = vadd.f32 %v647_v5, %v550_v10  ;;  %v1037_v10 = vld [vmem:[%s1597_s18] sm:$0xff] }
  0xd5   : > { %v443_v14 = vpop.f32.mrf.mxu2  ;;  %v535_v39 = vpop.f32.mrf.mxu3 }
  0xd6   : > { %v464_v37 = vadd.f32 %v443_v14, %v371_v23  ;;  %v378_v40 = vpop.f32.mrf.mxu1 }
  0xd7   : > { %v379_v41 = vadd.f32 %v378_v40, %v328_v58 }
  0xd8   : > { %v551_v42 = vadd.f32 %v530_v0, %v464_v37 }
  0xd9   : > { %v657_v15 = vpop.f32.mrf.mxu0 }
  0xda   : > { %v1576_v43 = vadd.f32 %v649_v21, %v551_v42 }
  0xdd   : > { %v446_v45 = vpop.f32.mrf.mxu2  ;;  %v538_v48 = vpop.f32.mrf.mxu3 }
  0xde   : > { %v465_v49 = vadd.f32 %v446_v45, %v374_v28  ;;  %v380_v50 = vpop.f32.mrf.mxu1  ;;  %v1038_v45 = vld [vmem:[%s1597_s18 + $0x8] sm:$0xff] }
  0xdf   : > { %v381_v20 = vadd.f32 %v380_v50, %v330_v1 }
  0xe0   : > { %v552_v52 = vadd.f32 %v533_v25, %v465_v49 }
  0xe1   : > { %v659_v53 = vpop.f32.mrf.mxu0 }
  0xe2   : > { %v1578_v19 = vadd.f32 %v652_v26, %v552_v52 }
  0xe5   : > { %v448_v54 = vpop.f32.mrf.mxu2  ;;  %v540_v55 = vpop.f32.mrf.mxu3 }
  0xe6   : > { %v466_v36 = vadd.f32 %v448_v54, %v376_v35  ;;  %v383_v18 = vpop.f32.mrf.mxu1 }
  0xe7   : > { %v384_v6 = vadd.f32 %v383_v18, %v1539_v38  ;;  %v1039_v18 = vld [vmem:[%s1597_s18 + $0x10] sm:$0xff] }
  0xe8   : > { %v553_v56 = vadd.f32 %v535_v39, %v466_v36 }
  0xe9   : > { %v662_v58 = vpop.f32.mrf.mxu0 }
  0xea   : > { %v1580_v57 = vadd.f32 %v654_v13, %v553_v56 }
  0xed   : > { %v451_v16 = vpop.f32.mrf.mxu2  ;;  %v543_v59 = vpop.f32.mrf.mxu3 }
  0xee   : > { %v467_v60 = vadd.f32 %v451_v16, %v379_v41  ;;  %v385_v61 = vpop.f32.mrf.mxu1 }
  0xef   : > { %v386_v47 = vadd.f32 %v385_v61, %v1547_v51 }
  0xf0   : > { %v554_v62 = vadd.f32 %v538_v48, %v467_v60 }
  0xf1   : > { %v664_v1 = vpop.f32.mrf.mxu0 }
  0xf2   : > { %v1582_v63 = vadd.f32 %v657_v15, %v554_v62 }
  0xf5   : > { %v453_v44 = vpop.f32.mrf.mxu2  ;;  %v545_v46 = vpop.f32.mrf.mxu3 }
  0xf6   : > { %v468_v2 = vadd.f32 %v453_v44, %v381_v20  ;;  %v723_v3 = vpop.f32.mrf.mxu1 }
  0xf7   : > { %v748_v38 = vadd.f32 %v723_v3, %v1567_v9 }
  0xf8   : > { %v555_v4 = vadd.f32 %v540_v55, %v468_v2 }
  0xf9   : > { %v988_v23 = vpop.f32.mrf.mxu0 }
  0xfa   : > { %v1584_v5 = vadd.f32 %v659_v53, %v555_v4 }
  0xfd   : > { %v456_v17 = vpop.f32.mrf.mxu2  ;;  %v908_v7 = vpop.f32.mrf.mxu3 }
  0xfe   : > { %v469_v22 = vadd.f32 %v456_v17, %v384_v6  ;;  %v725_v12 = vpop.f32.mrf.mxu1 }
  0xff   : > { %v749_v13 = vadd.f32 %v725_v12, %v1572_v31  ;;  %v1041_v12 = vld [vmem:[%s1597_s18 + $0x20] sm:$0xff] }
 0x100   : > { %v556_v24 = vadd.f32 %v543_v59, %v469_v22 }
 0x101   : > { %v990_v29 = vpop.f32.mrf.mxu0 }
 0x102   : > { %v1587_v21 = vadd.f32 %v662_v58, %v556_v24 }
 0x105   : > { %v458_v0 = vpop.f32.mrf.mxu2  ;;  %v910_v27 = vpop.f32.mrf.mxu3 }
 0x106   : > { %v470_v8 = vadd.f32 %v458_v0, %v386_v47  ;;  %v728_v26 = vpop.f32.mrf.mxu1 }
 0x107   : > { %v750_v48 = vadd.f32 %v728_v26, %v1574_v11 }
 0x108   : > { %v557_v28 = vadd.f32 %v545_v46, %v470_v8  ;;  %v1040_v46 = vld [vmem:[%s1597_s18 + $0x18] sm:$0xff] }
 0x109   : > { %v993_v9 = vpop.f32.mrf.mxu0 }
 0x10a   : > { %v1590_v30 = vadd.f32 %v664_v1, %v557_v28 }
 0x10d   : > { %v806_v32 = vpop.f32.mrf.mxu2  ;;  %v913_v34 = vpop.f32.mrf.mxu3 }
 0x10e   : > { %v831_v25 = vadd.f32 %v806_v32, %v748_v38  ;;  %v730_v39 = vpop.f32.mrf.mxu1  ;;  %v1042_v38 = vld [vmem:[%s1597_s18 + $0x28] sm:$0xff] }
 0x10f   : > { %v751_v56 = vadd.f32 %v730_v39, %v1576_v43 }
 0x110   : > { %v933_v51 = vadd.f32 %v908_v7, %v831_v25 }
 0x111   : > { %v995_v20 = vpop.f32.mrf.mxu0 }
 0x112   : > { %v1013_v35 = vadd.f32 %v988_v23, %v933_v51 }
 0x114   : > { %v1027_v14 = vadd.f32 %v1602_v33, %v1013_v35 }
 0x115   : > { %v808_v37 = vpop.f32.mrf.mxu2  ;;  %v915_v31 = vpop.f32.mrf.mxu3 }
 0x116   : > { %v1047_v40 = vadd.f32 %v1037_v10, %v1027_v14  ;;  %v832_v41 = vadd.f32 %v808_v37, %v749_v13  ;;  %v733_v54 = vpop.f32.mrf.mxu1  ;;  %v1043_v14 = vld [vmem:[%s1597_s18 + $0x30] sm:$0xff] }
 0x117   : > { %v752_v2 = vadd.f32 %v733_v54, %v1578_v19 }
 0x118   : > { %1057 = vst.msk [vmem:[%s1610_s22] sm:$0xff] %vm288_vm1, %v1047_v40  ;;  %v934_v42 = vadd.f32 %v910_v27, %v832_v41 }
 0x119   : > { %v998_v61 = vpop.f32.mrf.mxu0 }
 0x11a   : > { %v1014_v15 = vadd.f32 %v990_v29, %v934_v42 }
 0x11c   : > { %v1028_v49 = vadd.f32 %v1602_v33, %v1014_v15 }
 0x11d   : > { %v811_v50 = vpop.f32.mrf.mxu2  ;;  %v918_v11 = vpop.f32.mrf.mxu3 }
 0x11e   : > { %v1048_v52 = vadd.f32 %v1038_v45, %v1028_v49  ;;  %v833_v53 = vadd.f32 %v811_v50, %v750_v48  ;;  %v735_v1 = vpop.f32.mrf.mxu1  ;;  %v1044_v49 = vld [vmem:[%s1597_s18 + $0x38] sm:$0xff] }
 0x11f   : > { %v753_v47 = vadd.f32 %v735_v1, %v1580_v57 }
 0x120   : > { %1058 = vst.msk [vmem:[%s1610_s22 + $0x8] sm:$0xff] %vm288_vm1, %v1048_v52  ;;  %v935_v55 = vadd.f32 %v913_v34, %v833_v53 }
 0x121   : > { %v1000_v22 = vpop.f32.mrf.mxu0 }
 0x122   : > { %v1015_v36 = vadd.f32 %v993_v9, %v935_v55 }
 0x124   : > { %v1029_v58 = vadd.f32 %v1602_v33, %v1015_v36 }
 0x125   : > { %v813_v16 = vpop.f32.mrf.mxu2  ;;  %v920_v17 = vpop.f32.mrf.mxu3 }
 0x126   : > { %v1049_v59 = vadd.f32 %v1039_v18, %v1029_v58  ;;  %v834_v60 = vadd.f32 %v813_v16, %v751_v56  ;;  %v738_v24 = vpop.f32.mrf.mxu1  ;;  %v1045_v58 = vld [vmem:[%s1597_s18 + $0x40] sm:$0xff] }
 0x127   : > { %v754_v25 = vadd.f32 %v738_v24, %v1582_v63 }
 0x128   : > { %1059 = vst.msk [vmem:[%s1610_s22 + $0x10] sm:$0xff] %vm288_vm1, %v1049_v59  ;;  %v936_v62 = vadd.f32 %v915_v31, %v834_v60 }
 0x129   : > { %v1003_v32 = vpop.f32.mrf.mxu0 }
 0x12a   : > { %v1016_v44 = vadd.f32 %v995_v20, %v936_v62 }
 0x12c   : > { %v1030_v3 = vadd.f32 %v1602_v33, %v1016_v44 }
 0x12d   : > { %v816_v43 = vpop.f32.mrf.mxu2  ;;  %v923_v29 = vpop.f32.mrf.mxu3 }
 0x12e   : > { %v1050_v4 = vadd.f32 %v1040_v46, %v1030_v3  ;;  %v835_v6 = vadd.f32 %v816_v43, %v752_v2  ;;  %v740_v34 = vpop.f32.mrf.mxu1  ;;  %v1046_v46 = vld [vmem:[%s1597_s18 + $0x48] sm:$0x3f] }
 0x12f   : > { %v755_v37 = vadd.f32 %v740_v34, %v1584_v5 }
 0x130   : > { %1060 = vst.msk [vmem:[%s1610_s22 + $0x18] sm:$0xff] %vm288_vm1, %v1050_v4  ;;  %v937_v7 = vadd.f32 %v918_v11, %v835_v6 }
 0x131   : > { %v1005_v41 = vpop.f32.mrf.mxu0 }
 0x132   : > { %v1017_v23 = vadd.f32 %v998_v61, %v937_v7 }
 0x134   : > { %v1031_v0 = vadd.f32 %v1602_v33, %v1017_v23 }
 0x135   : > { %v818_v19 = vpop.f32.mrf.mxu2  ;;  %v925_v39 = vpop.f32.mrf.mxu3 }
 0x136   : > { %v1051_v8 = vadd.f32 %v1041_v12, %v1031_v0  ;;  %v836_v27 = vadd.f32 %v818_v19, %v753_v47  ;;  %v743_v45 = vpop.f32.mrf.mxu1 }
 0x137   : > { %v756_v50 = vadd.f32 %v743_v45, %v1587_v21 }
 0x138   : > { %1061 = vst.msk [vmem:[%s1610_s22 + $0x20] sm:$0xff] %vm288_vm1, %v1051_v8  ;;  %v938_v28 = vadd.f32 %v920_v17, %v836_v27 }
 0x139   : > { %v1008_v55 = vpop.f32.mrf.mxu0 }
 0x13a   : > { %v1018_v26 = vadd.f32 %v1000_v22, %v938_v28 }
 0x13c   : > { %v1032_v51 = vadd.f32 %v1602_v33, %v1018_v26 }
 0x13d   : > { %v821_v57 = vpop.f32.mrf.mxu2  ;;  %v928_v52 = vpop.f32.mrf.mxu3 }
 0x13e   : > { %v1052_v35 = vadd.f32 %v1042_v38, %v1032_v51  ;;  %v837_v10 = vadd.f32 %v821_v57, %v754_v25  ;;  %v745_v18 = vpop.f32.mrf.mxu1 }
 0x13f   : > { %v757_v16 = vadd.f32 %v745_v18, %v1590_v30 }
 0x140   : > { %1062 = vst.msk [vmem:[%s1610_s22 + $0x28] sm:$0xff] %vm288_vm1, %v1052_v35  ;;  %v939_v9 = vadd.f32 %v923_v29, %v837_v10 }
 0x141   : > { %v1010_v1 = vpop.f32.mrf.mxu0 }
 0x142   : > { %v1019_v13 = vadd.f32 %v1003_v32, %v939_v9 }
 0x144   : > { %v1033_v40 = vadd.f32 %v1602_v33, %v1019_v13 }
 0x145   : > { %v823_v63 = vpop.f32.mrf.mxu2  ;;  %v930_v61 = vpop.f32.mrf.mxu3 }
 0x146   : > { %v1053_v42 = vadd.f32 %v1043_v14, %v1033_v40  ;;  %v838_v15 = vadd.f32 %v823_v63, %v755_v37 }
 0x148   : > { %1063 = vst.msk [vmem:[%s1610_s22 + $0x30] sm:$0xff] %vm288_vm1, %v1053_v42  ;;  %v940_v31 = vadd.f32 %v925_v39, %v838_v15 }
 0x14a   : > { %v1020_v48 = vadd.f32 %v1005_v41, %v940_v31 }
 0x14c   : > { %v1034_v20 = vadd.f32 %v1602_v33, %v1020_v48 }
 0x14d   : > { %v826_v5 = vpop.f32.mrf.mxu2 }
 0x14e   : > { %v1054_v53 = vadd.f32 %v1044_v49, %v1034_v20  ;;  %v839_v54 = vadd.f32 %v826_v5, %v756_v50 }
 0x150   : > { %1064 = vst.msk [vmem:[%s1610_s22 + $0x38] sm:$0xff] %vm288_vm1, %v1054_v53  ;;  %v941_v36 = vadd.f32 %v928_v52, %v839_v54 }
 0x152   : > { %v1021_v56 = vadd.f32 %v1008_v55, %v941_v36 }
 0x154   : > { %v1035_v21 = vadd.f32 %v1602_v33, %v1021_v56 }
 0x155   : > { %v828_v11 = vpop.f32.mrf.mxu2 }
 0x156   : > { %v1055_v59 = vadd.f32 %v1045_v58, %v1035_v21  ;;  %v840_v60 = vadd.f32 %v828_v11, %v757_v16 }
 0x158   : > { %1065 = vst.msk [vmem:[%s1610_s22 + $0x40] sm:$0xff] %vm288_vm1, %v1055_v59  ;;  %v942_v62 = vadd.f32 %v930_v61, %v840_v60 }
 0x15a   : > { %v1022_v44 = vadd.f32 %v1010_v1, %v942_v62 }
 0x15c   : > { %v1036_v2 = vadd.f32 %v1602_v33, %v1022_v44 }
 0x15e   : > { %v1056_v3 = vadd.f32 %v1046_v46, %v1036_v2 }
 0x160   : > { %1067 = vst.msk [vmem:[%s1610_s22 + $0x48] sm:$0x3f] %vm1066_vm7, %v1056_v3 }
 0x161 PF: > { %s14_s15 = sadd.s32 1, %s1271_s15  }
 0x162   : > { %p11_p4 = scmp.ge.s32.totalorder %s14_s15, 4  }
 0x164   :  { %13 = sbr.rel (!%p11_p4) target bundleno = 1 (0x1), region = 77 }

// kernel: value_network_forward.25
= control target key start
LH: loop header
LB: loop body
LE: loop exit
PB: predicated region body
PF: predicated region fallthrough
CT: control target
= control target key end

     0   :  { %s1214_s12 = smov 0   ;;  %s1561_s0 = inlined_call_operand.vmem [shape: f32[2,100,16], index: 0, kind: input, shape index: {}]   ;;  %s1562_s1 = inlined_call_operand.vmem [shape: bf16[9,16,32], index: 1, kind: input, shape index: {}]   ;;  %s1563_s2 = inlined_call_operand.vmem [shape: f32[1,32], index: 2, kind: input, shape index: {}]   ;;  %s1564_s3 = inlined_call_operand.vmem [shape: f32[2,78,32], index: 3, kind: output, shape index: {}]  }
   0x1 LB: > { %s1057_s13 = sadd.s32 4294967295, %s1192_s12   ;;  %p1061_p0 = scmp.ge.s32.totalorder %s1192_s12, 1  ;;  %s1192_s12 = sphi %s1214_s12, %s13_s12  }
   0x2   : > { %p137_p1 = scmp.lt.s32.totalorder %s1192_s12, 3 }
   0x4   : > { %p138_p2 = pnand %p1061_p0, %p137_p1 }
   0x5   : > { %p161_p3 = scmp.lt.s32.totalorder (!%p138_p2), %s1057_s13, 1 }
   0x6   : > { %141 = sbr.rel (%p138_p2) target bundleno = 351 (0x15f), region = 32 }
   0xb   : > { %v1164_v0 = vld [vmem:[%s1562_s1 + $0x8] sm:$0xff]  ;;  %v1165_v1 = vld [vmem:[%s1562_s1 + $0x10] sm:$0xff]  ;;  %v1163_v2 = vld [vmem:[%s1562_s1] sm:$0xff]  ;;  %s1566_s13 = smov (!%p161_p3, %s1057_s13), 1  ;;  %vm195_vm0 = vsmask.f32 7424 }
   0xc   : > { %1172 = vmatpush.bf16.msra.mxu1 %v1164_v0  ;;  %1173 = vmatpush.bf16.msra.mxu2 %v1164_v0  ;;  %v1166_v3 = vld [vmem:[%s1562_s1 + $0x18] sm:$0xff]  ;;  %v1167_v4 = vld [vmem:[%s1562_s1 + $0x20] sm:$0xff]  ;;  %s1175_s24 = smul.u32 104, %s1566_s13  ;;  %vm241_vm1 = vcmask 130048   ;;  %v1169_v39 = vld [vmem:[%s1562_s1 + $0x30] sm:$0xff]  ;;  %vm349_vm2 = vcmask 1046528  }
   0xd   : > { %1174 = vmatpush.bf16.msra.mxu3 %v1164_v0  ;;  %264 = vmatpush.bf16.msra.mxu0 %v1164_v0  ;;  %v1170_v40 = vld [vmem:[%s1562_s1 + $0x38] sm:$0xff]  ;;  %v1168_v41 = vld [vmem:[%s1562_s1 + $0x28] sm:$0xff]  ;;  %v1171_v43 = vld [vmem:[%s1562_s1 + $0x40] sm:$0xff]  ;;  %vm515_vm3 = vsmask.f32 6400  ;;  %vm634_vm5 = vcmask 1045504  }
   0xe   : > { %s1243_s27 = scalar_lea.vmem %s1561_s0, %s1175_s24  ;;  %vm797_vm4 = vsmask.f32 5376  ;;  %vm899_vm6 = vcmask 1044480   ;;  %s1176_s9 = smul.u32 80, %s1566_s13  ;;  %vm990_vm7 = vcmask 261120   ;;  %vm1000_vm8 = vcmask 259072  }
   0xf   : > { %v174_v5 = vld [vmem:[%s1243_s27 + $0x10] sm:$0xff]  ;;  %v175_v6 = vld [vmem:[%s1243_s27 + $0x18] sm:$0xff]  ;;  %v176_v7 = vld [vmem:[%s1243_s27 + $0x20] sm:$0xff] }
  0x10   : > { %387 = vmatpush.bf16.msrb.mxu2 %v1165_v1  ;;  %314 = vmatpush.bf16.msrb.mxu1 %v1163_v2  ;;  %v1249_v8 = vld [vmem:[%s1243_s27 + $0x28] sm:$0xff]  ;;  %v1251_v9 = vpack.c.bf16 %v175_v6, %v174_v5  ;;  %v1254_v10 = vld [vmem:[%s1243_s27 + $0x30] sm:$0xff]  ;;  %v1257_v11 = vld [vmem:[%s1243_s27 + $0x38] sm:$0xff]  ;;  %v1319_v46 = vpack.c.bf16 %v176_v7, %v175_v6  ;;  %s1518_s16 = scalar_lea.vmem %s1564_s3, %s1176_s9 }
  0x11   : > { %474 = vmatpush.bf16.msrb.mxu3 %v1166_v3  ;;  %593 = vmatpush.bf16.msrb.mxu0 %v1167_v4  ;;  %v1260_v12 = vpack.c.bf16 %v1249_v8, %v176_v7  ;;  %v1264_v13 = vpack.c.bf16 %v1257_v11, %v1254_v10  ;;  %v1267_v14 = vld [vmem:[%s1243_s27 + $0x40] sm:$0xff]  ;;  %v1270_v15 = vld [vmem:[%s1243_s27 + $0x48] sm:$0xff]  ;;  %v1339_v0 = vpack.c.bf16 %v1254_v10, %v1249_v8 }
  0x12   : > { %v204_v16 = vshll.u32 %v1251_v9, 16  ;;  %v208_v17 = vshrl.u32 %v1251_v9, 16  ;;  %v1276_v18 = vpack.c.bf16 %v1270_v15, %v1267_v14  ;;  %v172_v22 = vld [vmem:[%s1243_s27] sm:$0xff]  ;;  %v173_v23 = vld [vmem:[%s1243_s27 + $0x8] sm:$0xff]  ;;  %v525_v50 = vshrl.u32 %v1319_v46, 16 }
  0x13   : > { %v212_v19 = vshll.u32 %v1260_v12, 16  ;;  %v216_v20 = vshrl.u32 %v1260_v12, 16  ;;  %v220_v21 = vshll.u32 %v1264_v13, 16  ;;  %v185_v31 = vpack.c.bf16 %v173_v23, %v172_v22 }
  0x14   : > { %v206_v24 = vrot.slane %v204_v16, 1  ;;  %v228_v25 = vshll.u32 %v1276_v18, 16  ;;  %v232_v26 = vshrl.u32 %v1276_v18, 16  ;;  %v1316_v44 = vpack.c.bf16 %v174_v5, %v173_v23 }
  0x15   : > { %v214_v27 = vrot.slane %v212_v19, 1  ;;  %v222_v28 = vrot.slane %v220_v21, 1  ;;  %v197_v35 = vshrl.u32 %v185_v31, 16  ;;  %v199_v36 = vshll.u32 %v185_v31, 16 }
  0x16   : > { %v210_v29 = vor.u32 %v208_v17, %v206_v24  ;;  %v230_v30 = vrot.slane %v228_v25, 1  ;;  %v224_v47 = vshrl.u32 %v1264_v13, 16  ;;  %v517_v48 = vshrl.u32 %v1316_v44, 16 }
  0x17   : > { %v218_v32 = vor.u32 %v216_v20, %v214_v27  ;;  %v201_v38 = vrot.slane %v199_v36, 1  ;;  %v520_v49 = vshll.u32 %v1316_v44, 16  ;;  %v528_v51 = vshll.u32 %v1319_v46, 16 }
  0x18   : > { %v215_v33 = vsel %vm195_vm0, %v210_v29, %v214_v27  ;;  %v234_v34 = vor.u32 %v232_v26, %v230_v30  ;;  %v226_v52 = vor.u32 %v224_v47, %v222_v28  ;;  %v437_v53 = vrot.slane %v1316_v44, 1 }
  0x19   : > { %1071 = vmatmul.msk.bf16.vlgmr.msra.gmra.mxu1 %vm241_vm1, %v215_v33  ;;  %v223_v37 = vsel %vm195_vm0, %v218_v32, %v222_v28  ;;  %v202_v42 = vor.u32 %v201_v38, %v197_v35  ;;  %v438_v54 = vrot.slane %v1319_v46, 1  ;;  %v519_v55 = vrot.slane %v517_v48, 1 }
  0x1a   : > { %1072 = vmatmul.msk.bf16.vlgmr.msra.gmra.mxu2 %vm241_vm1, %v223_v37  ;;  %1074 = vmatmul.msk.bf16.vlgmr.msra.gmra.mxu3 %vm241_vm1, %v234_v34  ;;  %v522_v56 = vrot.slane %v520_v49, 2  ;;  %v527_v57 = vrot.slane %v525_v50, 1  ;;  %v530_v58 = vrot.slane %v528_v51, 2  ;;  %v231_v59 = vsel %vm195_vm0, %v226_v52, %v230_v30 }
  0x1b   : > { %757 = vmatpush.bf16.msra.mxu2 %v1169_v39  ;;  %859 = vmatpush.bf16.msra.mxu3 %v1170_v40  ;;  %v207_v45 = vsel %vm195_vm0, %v202_v42, %v206_v24  ;;  %v439_v60 = vsel %vm349_vm2, %v437_v53, %v438_v54  ;;  %v534_v1 = vshrl.u32 %v1339_v0, 16  ;;  %v537_v2 = vshll.u32 %v1339_v0, 16  ;;  %v183_v53 = vld [vmem:[%s1243_s27 + $0x58] sm:$0xff] }
  0x1c   : > { %674 = vmatpush.bf16.msra.mxu1 %v1168_v41  ;;  %1070 = vmatmul.msk.bf16.vlgmr.msra.gmra.mxu0 %vm241_vm1, %v207_v45  ;;  %v523_v61 = vor.u32 %v522_v56, %v519_v55  ;;  %v531_v62 = vor.u32 %v530_v58, %v527_v57  ;;  %v350_v3 = vrot.slane %v185_v31, 1  ;;  %v351_v4 = vrot.slane %v1251_v9, 1 }
  0x1d   : > { %939 = vmatpush.bf16.msra.mxu0 %v1171_v43  ;;  %v440_v5 = vrot.slane %v1339_v0, 1  ;;  %v536_v6 = vrot.slane %v534_v1, 1  ;;  %v539_v7 = vrot.slane %v537_v2, 2  ;;  %v1355_v10 = vpack.c.bf16 %v1267_v14, %v1257_v11  ;;  %v182_v11 = vld [vmem:[%s1243_s27 + $0x50] sm:$0xff] }
  0x1e   : > { %v532_v63 = vsel %vm515_vm3, %v523_v61, %v531_v62  ;;  %v352_v22 = vsel %vm349_vm2, %v350_v3, %v351_v4  ;;  %v353_v29 = vrot.slane %v1260_v12, 1  ;;  %v1371_v36 = vpack.c.bf16 %v182_v11, %v1270_v15 }
  0x1f   : > { %v441_v23 = vsel %vm349_vm2, %v438_v54, %v440_v5  ;;  %v540_v24 = vor.u32 %v539_v7, %v536_v6  ;;  %v543_v27 = vshrl.u32 %v1355_v10, 16  ;;  %v546_v28 = vshll.u32 %v1355_v10, 16 }
  0x20   : > { %v442_v30 = vrot.slane %v1355_v10, 1  ;;  %v354_v33 = vsel %vm349_vm2, %v351_v4, %v353_v29  ;;  %v552_v37 = vshrl.u32 %v1371_v36, 16  ;;  %v555_v38 = vshll.u32 %v1371_v36, 16 }
  0x21   : > { %v541_v8 = vsel %vm515_vm3, %v531_v62, %v540_v24  ;;  %v548_v32 = vrot.slane %v546_v28, 2  ;;  %v355_v39 = vrot.slane %v1264_v13, 1  ;;  %v444_v40 = vrot.slane %v1371_v36, 1 }
  0x22   : > { %v443_v34 = vsel %vm349_vm2, %v440_v5, %v442_v30  ;;  %v554_v41 = vrot.slane %v552_v37, 1  ;;  %v557_v42 = vrot.slane %v555_v38, 2  ;;  %v802_v43 = vrot.slane %v212_v19, 3 }
  0x23   : > { %v801_v15 = vrot.slane %v216_v20, 2  ;;  %v356_v45 = vsel %vm349_vm2, %v353_v29, %v355_v39  ;;  %v445_v48 = vsel %vm349_vm2, %v442_v30, %v444_v40  ;;  %v798_v49 = vrot.slane %v208_v17, 2 }
  0x24   : > { %v558_v50 = vor.u32 %v557_v42, %v554_v41  ;;  %v799_v19 = vrot.slane %v204_v16, 3  ;;  %v1396_v17 = vpack.c.bf16 %v183_v53, %v183_v53  ;;  %v357_v55 = vrot.slane %v1276_v18, 1 }
  0x25   : > { %v803_v51 = vor.u32 %v802_v43, %v801_v15  ;;  %v900_v62 = vrot.slane %v1251_v9, 3  ;;  %v638_v2 = vrot.slane %v1339_v0, 2  ;;  %v718_v3 = vrot.slane %v1251_v9, 2 }
  0x26   : > { %v800_v52 = vor.u32 %v799_v19, %v798_v49  ;;  %v561_v56 = vshll.u32 %v1396_v17, 16  ;;  %v358_v57 = vsel %vm349_vm2, %v355_v39, %v357_v55  ;;  %v719_v4 = vrot.slane %v1260_v12, 2 }
  0x27   : > { %v640_v30 = vrot.slane %v1355_v10, 2  ;;  %v184_v10 = vld [vmem:[%s1243_s27 + $0x60] sm:$0xf] }
  0x28   : > { %v804_v54 = vsel %vm797_vm4, %v800_v52, %v803_v51  ;;  %v563_v58 = vrot.slane %v561_v56, 2  ;;  %v720_v7 = vsel %vm634_vm5, %v718_v3, %v719_v4 }
  0x29   : > { %1079 = vmatmul.msk.bf16.vlgmr.msrb.gmra.mxu1 %vm241_vm1, %v185_v31  ;;  %v545_v31 = vrot.slane %v543_v27, 1 }
  0x2a   : > { %1073 = vmatmul.msk.bf16.gmra.mxu2 %vm241_vm1, %v231_v59  ;;  %1101 = vmatmul.msk.bf16.vlgmr.msrb.gmra.mxu3 %vm241_vm1, %v439_v60  ;;  %v564_v16 = vsel %vm515_vm3, %v558_v50, %v563_v58  ;;  %v635_v59 = vrot.slane %v1316_v44, 2  ;;  %v636_v60 = vrot.slane %v1319_v46, 2  ;;  %v805_v44 = vrot.slane %v224_v47, 2 }
  0x2b   : > { %v549_v35 = vor.u32 %v548_v32, %v545_v31  ;;  %v806_v46 = vrot.slane %v220_v21, 3  ;;  %v810_v21 = vrot.slane %v228_v25, 3  ;;  %v721_v31 = vrot.slane %v1264_v13, 2 }
  0x2c   : > { %1112 = vmatmul.msk.bf16.vlgmr.msrb.gmra.mxu0 %vm241_vm1, %v532_v63  ;;  %v637_v61 = vsel %vm634_vm5, %v635_v59, %v636_v60  ;;  %v901_v63 = vrot.slane %v1260_v12, 3  ;;  %v639_v6 = vsel %vm634_vm5, %v636_v60, %v638_v2  ;;  %v641_v25 = vsel %vm634_vm5, %v638_v2, %v640_v30 }
  0x2d   : > { %v550_v14 = vsel %vm515_vm3, %v540_v24, %v549_v35  ;;  %v559_v20 = vsel %vm515_vm3, %v549_v35, %v558_v50  ;;  %v807_v5 = vor.u32 %v806_v46, %v805_v44  ;;  %v1428_v24 = vpack.c.bf16 %v183_v53, %v182_v11 }
  0x2e   : > { %v902_v1 = vsel %vm899_vm6, %v900_v62, %v901_v63  ;;  %v905_v35 = vrot.slane %v1276_v18, 3  ;;  %v1452_v11 = vpack.c.bf16 %v184_v10, %v184_v10 }
  0x2f   : > { %v814_v47 = vshrl.u32 %v1428_v24, 16  ;;  %v817_v0 = vshll.u32 %v1428_v24, 16  ;;  %v725_v62 = vrot.slane %v1428_v24, 2 }
  0x30   : > { %v823_v39 = vshrl.u32 %v1452_v11, 16 }
  0x31   : > { %v819_v27 = vrot.slane %v817_v0, 3 }
  0x32   : > { %v825_v42 = vrot.slane %v823_v39, 2 }
  0x39   : > { %1080 = vmatmul.msk.bf16.gmra.mxu1 %vm241_vm1, %v1251_v9 }
  0x3a   : > { %1090 = vmatmul.msk.bf16.vlgmr.msrb.gmra.mxu2 %vm241_vm1, %v352_v22  ;;  %1102 = vmatmul.msk.bf16.gmra.mxu3 %vm241_vm1, %v441_v23  ;;  %v808_v22 = vsel %vm797_vm4, %v803_v51, %v807_v5  ;;  %v903_v23 = vrot.slane %v1264_v13, 3 }
  0x3c   : > { %1113 = vmatmul.msk.bf16.gmra.mxu0 %vm241_vm1, %v541_v8  ;;  %v904_v9 = vsel %vm899_vm6, %v901_v63, %v903_v23  ;;  %v816_v8 = vrot.slane %v814_v47, 2 }
  0x3e   : > { %v820_v29 = vor.u32 %v819_v27, %v816_v8 }
  0x49   : > { %1081 = vmatmul.msk.bf16.gmra.mxu1 %vm241_vm1, %v1260_v12  ;;  %v809_v12 = vrot.slane %v232_v26, 2 }
  0x4a   : > { %1091 = vmatmul.msk.bf16.gmra.mxu2 %vm241_vm1, %v354_v33  ;;  %1103 = vmatmul.msk.bf16.gmra.mxu3 %vm241_vm1, %v443_v34  ;;  %v722_v33 = vsel %vm634_vm5, %v719_v4, %v721_v31 }
  0x4b   : > { %v811_v28 = vor.u32 %v810_v21, %v809_v12  ;;  %v727_v12 = vrot.slane %v1452_v11, 2 }
  0x4c   : > { %1114 = vmatmul.msk.bf16.gmra.mxu0 %vm241_vm1, %v550_v14  ;;  %v906_v14 = vsel %vm899_vm6, %v903_v23, %v905_v35 }
  0x4d   : > { %v821_v26 = vsel %vm797_vm4, %v811_v28, %v820_v29  ;;  %v812_v34 = vsel %vm797_vm4, %v807_v5, %v811_v28 }
  0x59   : > { %1082 = vmatmul.msk.bf16.gmra.mxu1 %vm241_vm1, %v1264_v13 }
  0x5a   : > { %1092 = vmatmul.msk.bf16.gmra.mxu2 %vm241_vm1, %v356_v45  ;;  %1104 = vmatmul.msk.bf16.gmra.mxu3 %vm241_vm1, %v445_v48  ;;  %v642_v45 = vrot.slane %v1371_v36, 2  ;;  %v723_v48 = vrot.slane %v1276_v18, 2  ;;  %v909_v36 = vrot.slane %v1452_v11, 3 }
  0x5c   : > { %1115 = vmatmul.msk.bf16.gmra.mxu0 %vm241_vm1, %v559_v20  ;;  %v643_v52 = vsel %vm634_vm5, %v640_v30, %v642_v45  ;;  %v726_v4 = vsel %vm634_vm5, %v723_v48, %v725_v62 }
  0x69   : > { %1083 = vmatmul.msk.bf16.gmra.mxu1 %vm241_vm1, %v1276_v18 }
  0x6a   : > { %1093 = vmatmul.msk.bf16.gmra.mxu2 %vm241_vm1, %v358_v57  ;;  %1105 = vmatmul.msk.bf16.gmra.mxu3 %vm241_vm1, %v444_v40  ;;  %v826_v40 = vshll.u32 %v1452_v11, 16 }
  0x6c   : > { %1116 = vmatmul.msk.bf16.gmra.mxu0 %vm241_vm1, %v564_v16  ;;  %v828_v43 = vrot.slane %v826_v40, 3 }
  0x6e   : > { %v829_v15 = vor.u32 %v828_v43, %v825_v42 }
  0x70   : > { %v830_v49 = vsel %vm797_vm4, %v820_v29, %v829_v15  ;;  %v728_v29 = vsel %vm634_vm5, %v725_v62, %v727_v12 }
  0x79   : > { %1123 = vmatmul.msk.bf16.vlgmr.msra.gmra.mxu1 %vm241_vm1, %v637_v61  ;;  %v644_v61 = vrot.slane %v1396_v17, 2 }
  0x7a   : > { %1094 = vmatmul.msk.bf16.gmra.mxu2 %vm241_vm1, %v357_v55  ;;  %1145 = vmatmul.msk.bf16.vlgmr.msra.gmra.mxu3 %vm241_vm1, %v804_v54  ;;  %v724_v54 = vsel %vm634_vm5, %v721_v31, %v723_v48  ;;  %v907_v55 = vrot.slane %v1428_v24, 3 }
  0x7b   : > { %v645_v2 = vsel %vm634_vm5, %v642_v45, %v644_v61 }
  0x7c   : > { %1156 = vmatmul.msk.bf16.vlgmr.msra.gmra.mxu0 %vm241_vm1, %v902_v1  ;;  %v910_v18 = vsel %vm899_vm6, %v907_v55, %v909_v36  ;;  %v908_v57 = vsel %vm899_vm6, %v905_v35, %v907_v55 }
  0x89   : > { %1124 = vmatmul.msk.bf16.gmra.mxu1 %vm241_vm1, %v639_v6 }
  0x8a   : > { %1134 = vmatmul.msk.bf16.vlgmr.msra.gmra.mxu2 %vm241_vm1, %v720_v7  ;;  %1146 = vmatmul.msk.bf16.gmra.mxu3 %vm241_vm1, %v808_v22 }
  0x8c   : > { %1157 = vmatmul.msk.bf16.gmra.mxu0 %vm241_vm1, %v904_v9 }
  0x96   : > { %v271_v32 = vpop.f32.mrf.mxu1 }
  0x99   : > { %1125 = vmatmul.msk.bf16.gmra.mxu1 %vm241_vm1, %v641_v25  ;;  %v266_v13 = vpop.f32.mrf.mxu0 }
  0x9a   : > { %1135 = vmatmul.msk.bf16.gmra.mxu2 %vm241_vm1, %v722_v33  ;;  %1147 = vmatmul.msk.bf16.gmra.mxu3 %vm241_vm1, %v812_v34 }
  0x9c   : > { %1158 = vmatmul.msk.bf16.gmra.mxu0 %vm241_vm1, %v906_v14 }
  0x9d   : > { %v276_v37 = vpop.f32.mrf.mxu2  ;;  %v1455_v38 = vpop.f32.mrf.mxu3 }
  0x9e   : > { %v273_v41 = vpop.f32.mrf.mxu1 }
  0xa1   : > { %v268_v50 = vpop.f32.mrf.mxu0 }
  0xa5   : > { %v278_v19 = vpop.f32.mrf.mxu2  ;;  %v1463_v51 = vpop.f32.mrf.mxu3 }
  0xa6   : > { %v316_v20 = vpop.f32.mrf.mxu1 }
  0xa7   : > { %v317_v53 = vadd.f32 %v316_v20, %v266_v13 }
  0xa9   : > { %1126 = vmatmul.msk.bf16.gmra.mxu1 %vm241_vm1, %v643_v52  ;;  %v595_v56 = vpop.f32.mrf.mxu0 }
  0xaa   : > { %1136 = vmatmul.msk.bf16.gmra.mxu2 %vm241_vm1, %v724_v54  ;;  %1148 = vmatmul.msk.bf16.gmra.mxu3 %vm241_vm1, %v821_v26 }
  0xac   : > { %1159 = vmatmul.msk.bf16.gmra.mxu0 %vm241_vm1, %v908_v57 }
  0xad   : > { %v281_v58 = vpop.f32.mrf.mxu2  ;;  %v476_v16 = vpop.f32.mrf.mxu3 }
  0xae   : > { %v318_v59 = vpop.f32.mrf.mxu1 }
  0xaf   : > { %v319_v60 = vadd.f32 %v318_v59, %v268_v50 }
  0xb1   : > { %v597_v63 = vpop.f32.mrf.mxu0 }
  0xb5   : > { %v283_v1 = vpop.f32.mrf.mxu2  ;;  %v478_v44 = vpop.f32.mrf.mxu3 }
  0xb6   : > { %v321_v46 = vpop.f32.mrf.mxu1 }
  0xb7   : > { %v322_v3 = vadd.f32 %v321_v46, %v271_v32 }
  0xb9   : > { %1127 = vmatmul.msk.bf16.gmra.mxu1 %vm241_vm1, %v645_v2  ;;  %v600_v5 = vpop.f32.mrf.mxu0 }
  0xba   : > { %1137 = vmatmul.msk.bf16.gmra.mxu2 %vm241_vm1, %v726_v4  ;;  %1149 = vmatmul.msk.bf16.gmra.mxu3 %vm241_vm1, %v830_v49 }
  0xbc   : > { %1160 = vmatmul.msk.bf16.gmra.mxu0 %vm241_vm1, %v910_v18 }
  0xbd   : > { %v389_v6 = vpop.f32.mrf.mxu2  ;;  %v481_v17 = vpop.f32.mrf.mxu3 }
  0xbe   : > { %v414_v7 = vadd.f32 %v389_v6, %v317_v53  ;;  %v323_v22 = vpop.f32.mrf.mxu1 }
  0xbf   : > { %v324_v23 = vadd.f32 %v323_v22, %v273_v41 }
  0xc0   : > { %v501_v24 = vadd.f32 %v476_v16, %v414_v7 }
  0xc1   : > { %v602_v21 = vpop.f32.mrf.mxu0 }
  0xc2   : > { %v1483_v9 = vadd.f32 %v595_v56, %v501_v24 }
  0xc5   : > { %v391_v47 = vpop.f32.mrf.mxu2  ;;  %v483_v0 = vpop.f32.mrf.mxu3 }
  0xc6   : > { %v415_v8 = vadd.f32 %v391_v47, %v319_v60  ;;  %v326_v27 = vpop.f32.mrf.mxu1 }
  0xc7   : > { %v327_v28 = vadd.f32 %v326_v27, %v276_v37 }
  0xc8   : > { %v502_v30 = vadd.f32 %v478_v44, %v415_v8 }
  0xc9   : > { %v605_v26 = vpop.f32.mrf.mxu0 }
  0xca   : > { %1138 = vmatmul.msk.bf16.gmra.mxu2 %vm241_vm1, %v728_v29  ;;  %v1488_v31 = vadd.f32 %v597_v63, %v502_v30 }
  0xcd   : > { %v394_v32 = vpop.f32.mrf.mxu2  ;;  %v486_v25 = vpop.f32.mrf.mxu3 }
  0xce   : > { %v416_v33 = vadd.f32 %v394_v32, %v322_v3  ;;  %v328_v34 = vpop.f32.mrf.mxu1 }
  0xcf   : > { %v329_v35 = vadd.f32 %v328_v34, %v278_v19  ;;  %v1513_v34 = vld [vmem:[%s1563_s2] ss:$0 sm:$0xff] }
  0xd0   : > { %v503_v10 = vadd.f32 %v481_v17, %v416_v33 }
  0xd1   : > { %v607_v13 = vpop.f32.mrf.mxu0 }
  0xd2   : > { %v1490_v11 = vadd.f32 %v600_v5, %v503_v10 }
  0xd5   : > { %v396_v14 = vpop.f32.mrf.mxu2  ;;  %v488_v39 = vpop.f32.mrf.mxu3 }
  0xd6   : > { %v417_v37 = vadd.f32 %v396_v14, %v324_v23  ;;  %v331_v40 = vpop.f32.mrf.mxu1 }
  0xd7   : > { %v332_v41 = vadd.f32 %v331_v40, %v281_v58 }
  0xd8   : > { %v504_v42 = vadd.f32 %v483_v0, %v417_v37 }
  0xd9   : > { %v610_v15 = vpop.f32.mrf.mxu0 }
  0xda   : > { %v1492_v43 = vadd.f32 %v602_v21, %v504_v42 }
  0xdd   : > { %v399_v45 = vpop.f32.mrf.mxu2  ;;  %v491_v48 = vpop.f32.mrf.mxu3 }
  0xde   : > { %v418_v49 = vadd.f32 %v399_v45, %v327_v28  ;;  %v333_v50 = vpop.f32.mrf.mxu1 }
  0xdf   : > { %v334_v20 = vadd.f32 %v333_v50, %v283_v1 }
  0xe0   : > { %v505_v52 = vadd.f32 %v486_v25, %v418_v49 }
  0xe1   : > { %v612_v53 = vpop.f32.mrf.mxu0 }
  0xe2   : > { %v1494_v19 = vadd.f32 %v605_v26, %v505_v52 }
  0xe5   : > { %v401_v54 = vpop.f32.mrf.mxu2  ;;  %v493_v55 = vpop.f32.mrf.mxu3 }
  0xe6   : > { %v419_v36 = vadd.f32 %v401_v54, %v329_v35  ;;  %v336_v18 = vpop.f32.mrf.mxu1 }
  0xe7   : > { %v337_v6 = vadd.f32 %v336_v18, %v1455_v38 }
  0xe8   : > { %v506_v56 = vadd.f32 %v488_v39, %v419_v36 }
  0xe9   : > { %v615_v58 = vpop.f32.mrf.mxu0 }
  0xea   : > { %v1496_v57 = vadd.f32 %v607_v13, %v506_v56 }
  0xed   : > { %v404_v16 = vpop.f32.mrf.mxu2  ;;  %v496_v59 = vpop.f32.mrf.mxu3 }
  0xee   : > { %v420_v60 = vadd.f32 %v404_v16, %v332_v41  ;;  %v338_v61 = vpop.f32.mrf.mxu1 }
  0xef   : > { %v339_v47 = vadd.f32 %v338_v61, %v1463_v51 }
  0xf0   : > { %v507_v62 = vadd.f32 %v491_v48, %v420_v60 }
  0xf1   : > { %v617_v1 = vpop.f32.mrf.mxu0 }
  0xf2   : > { %v1498_v63 = vadd.f32 %v610_v15, %v507_v62 }
  0xf5   : > { %v406_v44 = vpop.f32.mrf.mxu2  ;;  %v498_v46 = vpop.f32.mrf.mxu3 }
  0xf6   : > { %v421_v2 = vadd.f32 %v406_v44, %v334_v20  ;;  %v676_v3 = vpop.f32.mrf.mxu1 }
  0xf7   : > { %v701_v38 = vadd.f32 %v676_v3, %v1483_v9 }
  0xf8   : > { %v508_v4 = vadd.f32 %v493_v55, %v421_v2 }
  0xf9   : > { %v941_v23 = vpop.f32.mrf.mxu0 }
  0xfa   : > { %v1500_v5 = vadd.f32 %v612_v53, %v508_v4 }
  0xfd   : > { %v409_v17 = vpop.f32.mrf.mxu2  ;;  %v861_v7 = vpop.f32.mrf.mxu3 }
  0xfe   : > { %v422_v22 = vadd.f32 %v409_v17, %v337_v6  ;;  %v678_v12 = vpop.f32.mrf.mxu1 }
  0xff   : > { %v702_v10 = vadd.f32 %v678_v12, %v1488_v31 }
 0x100   : > { %v509_v24 = vadd.f32 %v496_v59, %v422_v22 }
 0x101   : > { %v943_v29 = vpop.f32.mrf.mxu0 }
 0x102   : > { %v1503_v21 = vadd.f32 %v615_v58, %v509_v24 }
 0x105   : > { %v411_v0 = vpop.f32.mrf.mxu2  ;;  %v863_v27 = vpop.f32.mrf.mxu3 }
 0x106   : > { %v423_v8 = vadd.f32 %v411_v0, %v339_v47  ;;  %v681_v26 = vpop.f32.mrf.mxu1 }
 0x107   : > { %v703_v15 = vadd.f32 %v681_v26, %v1490_v11 }
 0x108   : > { %v510_v28 = vadd.f32 %v498_v46, %v423_v8 }
 0x109   : > { %v946_v9 = vpop.f32.mrf.mxu0 }
 0x10a   : > { %v1506_v30 = vadd.f32 %v617_v1, %v510_v28 }
 0x10d   : > { %v759_v32 = vpop.f32.mrf.mxu2  ;;  %v866_v51 = vpop.f32.mrf.mxu3 }
 0x10e   : > { %v784_v25 = vadd.f32 %v759_v32, %v701_v38  ;;  %v683_v14 = vpop.f32.mrf.mxu1 }
 0x10f   : > { %v704_v53 = vadd.f32 %v683_v14, %v1492_v43 }
 0x110   : > { %v886_v33 = vadd.f32 %v861_v7, %v784_v25 }
 0x111   : > { %v948_v49 = vpop.f32.mrf.mxu0 }
 0x112   : > { %v966_v35 = vadd.f32 %v941_v23, %v886_v33 }
 0x114   : > { %v980_v13 = vadd.f32 %v1513_v34, %v966_v35 }
 0x115   : > { %v761_v39 = vpop.f32.mrf.mxu2  ;;  %v868_v42 = vpop.f32.mrf.mxu3 }
 0x116   : > { %991 = vst.msk [vmem:[%s1518_s16] sm:$0xff] %vm990_vm7, %v980_v13  ;;  %v785_v37 = vadd.f32 %v761_v39, %v702_v10  ;;  %v686_v50 = vpop.f32.mrf.mxu1 }
 0x117   : > { %v705_v59 = vadd.f32 %v686_v50, %v1494_v19 }
 0x118   : > { %v887_v40 = vadd.f32 %v863_v27, %v785_v37 }
 0x119   : > { %v951_v18 = vpop.f32.mrf.mxu0 }
 0x11a   : > { %v967_v41 = vadd.f32 %v943_v29, %v887_v40 }
 0x11c   : > { %v981_v45 = vadd.f32 %v1513_v34, %v967_v41 }
 0x11d   : > { %v764_v48 = vpop.f32.mrf.mxu2  ;;  %v871_v36 = vpop.f32.mrf.mxu3 }
 0x11e   : > { %992 = vst.msk [vmem:[%s1518_s16 + $0x8] sm:$0xff] %vm990_vm7, %v981_v45  ;;  %v786_v31 = vadd.f32 %v764_v48, %v703_v15  ;;  %v688_v58 = vpop.f32.mrf.mxu1 }
 0x11f   : > { %v706_v3 = vadd.f32 %v688_v58, %v1496_v57 }
 0x120   : > { %v888_v20 = vadd.f32 %v866_v51, %v786_v31 }
 0x121   : > { %v953_v44 = vpop.f32.mrf.mxu0 }
 0x122   : > { %v968_v52 = vadd.f32 %v946_v9, %v888_v20 }
 0x124   : > { %v982_v54 = vadd.f32 %v1513_v34, %v968_v52 }
 0x125   : > { %v766_v55 = vpop.f32.mrf.mxu2  ;;  %v873_v62 = vpop.f32.mrf.mxu3 }
 0x126   : > { %993 = vst.msk [vmem:[%s1518_s16 + $0x10] sm:$0xff] %vm990_vm7, %v982_v54  ;;  %v787_v11 = vadd.f32 %v766_v55, %v704_v53  ;;  %v691_v2 = vpop.f32.mrf.mxu1 }
 0x127   : > { %v707_v24 = vadd.f32 %v691_v2, %v1498_v63 }
 0x128   : > { %v889_v56 = vadd.f32 %v868_v42, %v787_v11 }
 0x129   : > { %v956_v23 = vpop.f32.mrf.mxu0 }
 0x12a   : > { %v969_v16 = vadd.f32 %v948_v49, %v889_v56 }
 0x12c   : > { %v983_v60 = vadd.f32 %v1513_v34, %v969_v16 }
 0x12d   : > { %v769_v61 = vpop.f32.mrf.mxu2  ;;  %v876_v7 = vpop.f32.mrf.mxu3 }
 0x12e   : > { %994 = vst.msk [vmem:[%s1518_s16 + $0x18] sm:$0xff] %vm990_vm7, %v983_v60  ;;  %v788_v43 = vadd.f32 %v769_v61, %v705_v59  ;;  %v693_v47 = vpop.f32.mrf.mxu1 }
 0x12f   : > { %v708_v29 = vadd.f32 %v693_v47, %v1500_v5 }
 0x130   : > { %v890_v1 = vadd.f32 %v871_v36, %v788_v43 }
 0x131   : > { %v958_v38 = vpop.f32.mrf.mxu0 }
 0x132   : > { %v970_v46 = vadd.f32 %v951_v18, %v890_v1 }
 0x134   : > { %v984_v4 = vadd.f32 %v1513_v34, %v970_v46 }
 0x135   : > { %v771_v6 = vpop.f32.mrf.mxu2  ;;  %v878_v28 = vpop.f32.mrf.mxu3 }
 0x136   : > { %995 = vst.msk [vmem:[%s1518_s16 + $0x20] sm:$0xff] %vm990_vm7, %v984_v4  ;;  %v789_v19 = vadd.f32 %v771_v6, %v706_v3  ;;  %v696_v25 = vpop.f32.mrf.mxu1 }
 0x137   : > { %v709_v35 = vadd.f32 %v696_v25, %v1503_v21 }
 0x138   : > { %v891_v17 = vadd.f32 %v873_v62, %v789_v19 }
 0x139   : > { %v961_v14 = vpop.f32.mrf.mxu0 }
 0x13a   : > { %v971_v22 = vadd.f32 %v953_v44, %v891_v17 }
 0x13c   : > { %v985_v12 = vadd.f32 %v1513_v34, %v971_v22 }
 0x13d   : > { %v774_v0 = vpop.f32.mrf.mxu2  ;;  %v881_v10 = vpop.f32.mrf.mxu3 }
 0x13e   : > { %996 = vst.msk [vmem:[%s1518_s16 + $0x28] sm:$0xff] %vm990_vm7, %v985_v12  ;;  %v790_v57 = vadd.f32 %v774_v0, %v707_v24  ;;  %v698_v37 = vpop.f32.mrf.mxu1 }
 0x13f   : > { %v710_v41 = vadd.f32 %v698_v37, %v1506_v30 }
 0x140   : > { %v892_v8 = vadd.f32 %v876_v7, %v790_v57 }
 0x141   : > { %v963_v49 = vpop.f32.mrf.mxu0 }
 0x142   : > { %v972_v27 = vadd.f32 %v956_v23, %v892_v8 }
 0x144   : > { %v986_v26 = vadd.f32 %v1513_v34, %v972_v27 }
 0x145   : > { %v776_v32 = vpop.f32.mrf.mxu2  ;;  %v883_v45 = vpop.f32.mrf.mxu3 }
 0x146   : > { %997 = vst.msk [vmem:[%s1518_s16 + $0x30] sm:$0xff] %vm990_vm7, %v986_v26  ;;  %v791_v63 = vadd.f32 %v776_v32, %v708_v29 }
 0x148   : > { %v893_v33 = vadd.f32 %v878_v28, %v791_v63 }
 0x14a   : > { %v973_v51 = vadd.f32 %v958_v38, %v893_v33 }
 0x14c   : > { %v987_v9 = vadd.f32 %v1513_v34, %v973_v51 }
 0x14d   : > { %v779_v13 = vpop.f32.mrf.mxu2 }
 0x14e   : > { %998 = vst.msk [vmem:[%s1518_s16 + $0x38] sm:$0xff] %vm990_vm7, %v987_v9  ;;  %v792_v5 = vadd.f32 %v779_v13, %v709_v35 }
 0x150   : > { %v894_v39 = vadd.f32 %v881_v10, %v792_v5 }
 0x152   : > { %v974_v40 = vadd.f32 %v961_v14, %v894_v39 }
 0x154   : > { %v988_v42 = vadd.f32 %v1513_v34, %v974_v40 }
 0x155   : > { %v781_v15 = vpop.f32.mrf.mxu2 }
 0x156   : > { %999 = vst.msk [vmem:[%s1518_s16 + $0x40] sm:$0xff] %vm990_vm7, %v988_v42  ;;  %v793_v21 = vadd.f32 %v781_v15, %v710_v41 }
 0x158   : > { %v895_v48 = vadd.f32 %v883_v45, %v793_v21 }
 0x15a   : > { %v975_v31 = vadd.f32 %v963_v49, %v895_v48 }
 0x15c   : > { %v989_v50 = vadd.f32 %v1513_v34, %v975_v31 }
 0x15e   : > { %1001 = vst.msk [vmem:[%s1518_s16 + $0x48] sm:$0x3f] %vm1000_vm8, %v989_v50 }
 0x15f PF: > { %s13_s12 = sadd.s32 1, %s1192_s12  }
 0x160   : > { %p10_p4 = scmp.ge.s32.totalorder %s13_s12, 4  }
 0x162   :  { %12 = sbr.rel (!%p10_p4) target bundleno = 1 (0x1), region = 70 }

// kernel: value_network_forward.26
= control target key start
LH: loop header
LB: loop body
LE: loop exit
PB: predicated region body
PF: predicated region fallthrough
CT: control target
= control target key end

     0   :  { %s487_s15 = smov 0   ;;  %s536_s0 = inlined_call_operand.vmem [shape: f32[2,5,5,32], index: 0, kind: input, shape index: {}]   ;;  %s537_s1 = inlined_call_operand.vmem [shape: f32[2,5,5,32], index: 1, kind: input, shape index: {}]   ;;  %s538_s2 = inlined_call_operand.vmem [shape: f32[2,5,5,32], index: 2, kind: input, shape index: {}]   ;;  %s539_s3 = inlined_call_operand.vmem [shape: f32[2,5,5,32], index: 3, kind: input, shape index: {}]   ;;  %s540_s4 = inlined_call_operand.vmem [shape: f32[2,4,4,32], index: 4, kind: output, shape index: {}]  }
   0x1 LB: > { %s431_s16 = sadd.s32 4294967295, %s460_s15   ;;  %p435_p0 = scmp.ge.s32.totalorder %s460_s15, 1  ;;  %s460_s15 = sphi %s487_s15, %s14_s15  }
   0x2   : > { %p192_p1 = scmp.lt.s32.totalorder %s460_s15, 3 }
   0x4   : > { %p193_p2 = pnand %p435_p0, %p192_p1 }
   0x5   : > { %p233_p3 = scmp.lt.s32.totalorder (!%p193_p2), %s431_s16, 1 }
   0x6   : > { %196 = sbr.rel (%p193_p2) target bundleno = 38 (0x26), region = 36 }
   0xb   : > { %s542_s16 = smov (!%p233_p3, %s431_s16), 1  ;;  %vm335_vm0 = vcmask 257024  }
   0xc   : > { %s498_s17 = smul.u32 40, %s542_s16  ;;  %s444_s30 = sshll.u32 %s542_s16, 4 }
   0xd   : > { %s257_s7 = scalar_lea.vmem %s540_s4, %s444_s30 }
   0xe   : > { %s237_s20 = scalar_lea.vmem %s536_s0, %s498_s17  ;;  %s508_s23 = scalar_lea.vmem %s537_s1, %s498_s17 }
   0xf   : > { %v258_v0 = vld [vmem:[%s237_s20] sm:$0x1f]  ;;  %v259_v1 = vld [vmem:[%s237_s20 + $0x8] sm:$0x1f]  ;;  %v260_v4 = vld [vmem:[%s237_s20 + $0x10] sm:$0x1f]  ;;  %s514_s26 = scalar_lea.vmem %s538_s2, %s498_s17  ;;  %s252_s29 = scalar_lea.vmem %s539_s3, %s498_s17 }
  0x10   : > { %v280_v2 = vrot.slane %v258_v0, 1  ;;  %v281_v3 = vrot.slane %v259_v1, 1  ;;  %v282_v6 = vrot.slane %v260_v4, 1  ;;  %v261_v8 = vld [vmem:[%s237_s20 + $0x18] sm:$0x1f] }
  0x11   : > { %v283_v9 = vrot.slane %v261_v8, 1  ;;  %v262_v13 = vld [vmem:[%s237_s20 + $0x20] sm:$0x1f]  ;;  %v264_v15 = vld [vmem:[%s508_s23 + $0x8] sm:$0x1f] }
  0x12   : > { %v288_v5 = vmax.f32 %v258_v0, %v280_v2  ;;  %v289_v7 = vmax.f32 %v259_v1, %v281_v3  ;;  %v290_v12 = vmax.f32 %v260_v4, %v282_v6  ;;  %v263_v14 = vld [vmem:[%s508_s23] sm:$0x1f]  ;;  %v297_v17 = vrot.slane %v262_v13, 1  ;;  %v265_v22 = vld [vmem:[%s508_s23 + $0x10] sm:$0x1f] }
  0x13   : > { %v291_v16 = vmax.f32 %v261_v8, %v283_v9  ;;  %v268_v18 = vld [vmem:[%s514_s26] sm:$0x1f]  ;;  %v269_v23 = vld [vmem:[%s514_s26 + $0x8] sm:$0x1f]  ;;  %v266_v27 = vld [vmem:[%s508_s23 + $0x18] sm:$0x1f] }
  0x14   : > { %v292_v10 = vmax.f32 %v288_v5, %v259_v1  ;;  %v293_v11 = vmax.f32 %v289_v7, %v260_v4  ;;  %v294_v21 = vmax.f32 %v290_v12, %v261_v8  ;;  %v319_v29 = vrot.slane %v268_v18, 1  ;;  %v270_v30 = vld [vmem:[%s514_s26 + $0x10] sm:$0x1f]  ;;  %v267_v36 = vld [vmem:[%s508_s23 + $0x20] sm:$0x1f] }
  0x15   : > { %v295_v24 = vmax.f32 %v291_v16, %v262_v13  ;;  %v320_v34 = vrot.slane %v269_v23, 1  ;;  %v271_v37 = vld [vmem:[%s514_s26 + $0x18] sm:$0x1f]  ;;  %v321_v42 = vrot.slane %v270_v30, 1  ;;  %v272_v43 = vld [vmem:[%s252_s29] sm:$0x1f] }
  0x16   : > { %v299_v19 = vmax.f32 %v292_v10, %v281_v3  ;;  %v300_v20 = vmax.f32 %v293_v11, %v282_v6  ;;  %v301_v28 = vmax.f32 %v294_v21, %v283_v9  ;;  %v273_v44 = vld [vmem:[%s252_s29 + $0x8] sm:$0x1f]  ;;  %v322_v46 = vrot.slane %v271_v37, 1  ;;  %v274_v50 = vld [vmem:[%s252_s29 + $0x10] sm:$0x1f] }
  0x17   : > { %v302_v31 = vmax.f32 %v295_v24, %v297_v17  ;;  %v275_v55 = vld [vmem:[%s252_s29 + $0x18] sm:$0x1f] }
  0x18   : > { %v303_v25 = vmax.f32 %v299_v19, %v263_v14  ;;  %v304_v26 = vmax.f32 %v300_v20, %v264_v15  ;;  %v305_v35 = vmax.f32 %v301_v28, %v265_v22 }
  0x19   : > { %v306_v38 = vmax.f32 %v302_v31, %v266_v27 }
  0x1a   : > { %v307_v32 = vmax.f32 %v303_v25, %v264_v15  ;;  %v308_v33 = vmax.f32 %v304_v26, %v265_v22  ;;  %v309_v41 = vmax.f32 %v305_v35, %v266_v27 }
  0x1b   : > { %v310_v45 = vmax.f32 %v306_v38, %v267_v36 }
  0x1c   : > { %v311_v39 = vmax.f32 %v307_v32, %v268_v18  ;;  %v312_v40 = vmax.f32 %v308_v33, %v269_v23  ;;  %v313_v49 = vmax.f32 %v309_v41, %v270_v30 }
  0x1d   : > { %v314_v51 = vmax.f32 %v310_v45, %v271_v37 }
  0x1e   : > { %v327_v47 = vmax.f32 %v311_v39, %v319_v29  ;;  %v328_v48 = vmax.f32 %v312_v40, %v320_v34  ;;  %v329_v54 = vmax.f32 %v313_v49, %v321_v42 }
  0x1f   : > { %v330_v56 = vmax.f32 %v314_v51, %v322_v46 }
  0x20   : > { %v331_v52 = vmax.f32 %v327_v47, %v272_v43  ;;  %v332_v53 = vmax.f32 %v328_v48, %v273_v44  ;;  %v333_v57 = vmax.f32 %v329_v54, %v274_v50 }
  0x21   : > { %v334_v58 = vmax.f32 %v330_v56, %v275_v55 }
  0x22   : > { %336 = vst.msk [vmem:[%s257_s7] sm:$0xf] %vm335_vm0, %v331_v52 }
  0x23   : > { %337 = vst.msk [vmem:[%s257_s7 + $0x4] sm:$0xf] %vm335_vm0, %v332_v53 }
  0x24   : > { %338 = vst.msk [vmem:[%s257_s7 + $0x8] sm:$0xf] %vm335_vm0, %v333_v57 }
  0x25   : > { %339 = vst.msk [vmem:[%s257_s7 + $0xc] sm:$0xf] %vm335_vm0, %v334_v58 }
  0x26 PF: > { %s14_s15 = sadd.s32 1, %s460_s15  }
  0x27   : > { %p11_p4 = scmp.ge.s32.totalorder %s14_s15, 4  }
  0x29   :  { %13 = sbr.rel (!%p11_p4) target bundleno = 1 (0x1), region = 75 }

// kernel: value_network_forward.27
= control target key start
LH: loop header
LB: loop body
LE: loop exit
PB: predicated region body
PF: predicated region fallthrough
CT: control target
= control target key end

     0   :  { %s901_s12 = smov 0   ;;  %s1024_s0 = inlined_call_operand.vmem [shape: f32[2,36,32], index: 0, kind: input, shape index: {}]   ;;  %s1025_s1 = inlined_call_operand.vmem [shape: bf16[9,32,32], index: 1, kind: input, shape index: {}]   ;;  %s1026_s2 = inlined_call_operand.vmem [shape: f32[1,32], index: 2, kind: input, shape index: {}]   ;;  %s1027_s3 = inlined_call_operand.vmem [shape: f32[2,22,32], index: 3, kind: output, shape index: {}]  }
   0x1 LB: > { %s711_s13 = sadd.s32 4294967295, %s879_s12   ;;  %p715_p0 = scmp.ge.s32.totalorder %s879_s12, 1  ;;  %s879_s12 = sphi %s901_s12, %s13_s12  }
   0x2   : > { %p137_p1 = scmp.lt.s32.totalorder %s879_s12, 3 }
   0x4   : > { %p138_p2 = pnand %p715_p0, %p137_p1 }
   0x5   : > { %p161_p3 = scmp.lt.s32.totalorder (!%p138_p2), %s711_s13, 1 }
   0x6   : > { %141 = sbr.rel (%p138_p2) target bundleno = 230 (0xe6), region = 32 }
   0xb   : > { %v845_v0 = vld [vmem:[%s1025_s1 + $0x18] sm:$0xff]  ;;  %v847_v1 = vld [vmem:[%s1025_s1 + $0x28] sm:$0xff]  ;;  %v844_v3 = vld [vmem:[%s1025_s1 + $0x10] sm:$0xff]  ;;  %s1029_s13 = smov (!%p161_p3, %s711_s13), 1  ;;  %vm287_vm0 = vcmask 1046528   ;;  %vm337_vm1 = vcmask 1044480  }
   0xc   : > { %v849_v2 = vld [vmem:[%s1025_s1 + $0x38] sm:$0xff]  ;;  %860 = vmatpush.bf16.msra.mxu1 %v845_v0  ;;  %234 = vmatpush.bf16.msra.mxu0 %v845_v0  ;;  %v843_v4 = vld [vmem:[%s1025_s1 + $0x8] sm:$0xff]  ;;  %v846_v5 = vld [vmem:[%s1025_s1 + $0x20] sm:$0xff]  ;;  %s862_s26 = smul.u32 40, %s1029_s13  ;;  %vm221_vm2 = vcmask 261120   ;;  %vm491_vm5 = vcmask 1045504  }
   0xd   : > { %315 = vmatpush.bf16.msra.mxu2 %v847_v1  ;;  %365 = vmatpush.bf16.msra.mxu3 %v849_v2  ;;  %v848_v6 = vld [vmem:[%s1025_s1 + $0x30] sm:$0xff]  ;;  %v851_v7 = vld [vmem:[%s1025_s1 + $0x48] sm:$0xff]  ;;  %v857_v9 = vld [vmem:[%s1025_s1 + $0x78] sm:$0xff]  ;;  %vm193_vm3 = vsmask.f32 7424  ;;  %s863_s4 = smul.u32 24, %s1029_s13 }
   0xe   : > { %v855_v8 = vld [vmem:[%s1025_s1 + $0x68] sm:$0xff]  ;;  %s945_s10 = scalar_lea.vmem %s1024_s0, %s862_s26  ;;  %v842_v10 = vld [vmem:[%s1025_s1] sm:$0xff]  ;;  %v856_v21 = vld [vmem:[%s1025_s1 + $0x70] sm:$0xff]  ;;  %vm385_vm4 = vsmask.f32 4352  ;;  %vm654_vm7 = vcmask 259072  }
   0xf   : > { %v174_v11 = vld [vmem:[%s945_s10 + $0x10] sm:$0xff]  ;;  %v172_v12 = vld [vmem:[%s945_s10] sm:$0xff]  ;;  %v953_v13 = vld [vmem:[%s945_s10 + $0x8] sm:$0xff]  ;;  %vm539_vm6 = vsmask.f32 5376  ;;  %s170_s7 = scalar_lea.vmem %s1027_s3, %s863_s4 }
  0x10   : > { %861 = vmatpush.bf16.msra.mxu1 %v844_v3  ;;  %235 = vmatpush.bf16.msra.mxu0 %v844_v3  ;;  %v179_v14 = vmax.f32 %v174_v11, 0.0  ;;  %v177_v15 = vmax.f32 %v172_v12, 0.0  ;;  %v178_v16 = vmax.f32 %v953_v13, 0.0  ;;  %v175_v17 = vld [vmem:[%s945_s10 + $0x18] sm:$0xff]  ;;  %v850_v18 = vld [vmem:[%s1025_s1 + $0x40] sm:$0xff]  ;;  %v859_v40 = vld [vmem:[%s1025_s1 + $0x88] sm:$0xff] }
  0x11   : > { %316 = vmatpush.bf16.msra.mxu2 %v846_v5  ;;  %366 = vmatpush.bf16.msra.mxu3 %v848_v6  ;;  %v960_v19 = vmax.f32 %v175_v17, 0.0  ;;  %v854_v20 = vld [vmem:[%s1025_s1 + $0x60] sm:$0xff]  ;;  %v853_v37 = vld [vmem:[%s1025_s1 + $0x58] sm:$0xff]  ;;  %v852_v42 = vld [vmem:[%s1025_s1 + $0x50] sm:$0xff] }
  0x12   : > { %v968_v22 = vpack.c.bf16 %v179_v14, %v179_v14  ;;  %v182_v23 = vpack.c.bf16 %v178_v16, %v177_v15  ;;  %v858_v45 = vld [vmem:[%s1025_s1 + $0x80] sm:$0xff]  ;;  %v437_v54 = vpack.c.bf16 %v179_v14, %v178_v16 }
  0x13   : > { %v330_v24 = vpack.c.bf16 %v960_v19, %v179_v14  ;;  %v176_v46 = vld [vmem:[%s945_s10 + $0x20] sm:$0xf] }
  0x14   : > { %268 = vmatpush.bf16.msrb.mxu1 %v843_v4  ;;  %422 = vmatpush.bf16.msrb.mxu0 %v851_v7  ;;  %v202_v25 = vshll.u32 %v968_v22, 16  ;;  %v206_v26 = vshrl.u32 %v968_v22, 16  ;;  %v195_v27 = vshrl.u32 %v182_v23, 16  ;;  %v197_v28 = vshll.u32 %v182_v23, 16 }
  0x15   : > { %519 = vmatpush.bf16.msrb.mxu2 %v855_v8  ;;  %580 = vmatpush.bf16.msrb.mxu3 %v857_v9  ;;  %v288_v29 = vrot.slane %v182_v23, 1  ;;  %v289_v30 = vrot.slane %v968_v22, 1  ;;  %v338_v31 = vrot.slane %v182_v23, 3  ;;  %v339_v32 = vrot.slane %v330_v24, 3 }
  0x16   : > { %v204_v33 = vrot.slane %v202_v25, 1  ;;  %v199_v34 = vrot.slane %v197_v28, 1  ;;  %v390_v43 = vshrl.u32 %v330_v24, 16  ;;  %v393_v44 = vshll.u32 %v330_v24, 16 }
  0x17   : > { %v290_v35 = vsel %vm287_vm0, %v288_v29, %v289_v30  ;;  %v340_v36 = vsel %vm337_vm1, %v338_v31, %v339_v32  ;;  %v386_v47 = vrot.slane %v195_v27, 3  ;;  %v387_v48 = vrot.slane %v197_v28, 4 }
  0x18   : > { %269 = vmatpush.bf16.msrb.mxu1 %v842_v10  ;;  %423 = vmatpush.bf16.msrb.mxu0 %v850_v18  ;;  %v208_v38 = vor.u32 %v206_v26, %v204_v33  ;;  %v200_v39 = vor.u32 %v199_v34, %v195_v27  ;;  %v392_v49 = vrot.slane %v390_v43, 3  ;;  %v395_v50 = vrot.slane %v393_v44, 4 }
  0x19   : > { %520 = vmatpush.bf16.msrb.mxu2 %v854_v20  ;;  %581 = vmatpush.bf16.msrb.mxu3 %v856_v21  ;;  %v181_v51 = vmax.f32 %v176_v46, 0.0  ;;  %v388_v52 = vor.u32 %v387_v48, %v386_v47  ;;  %v540_v57 = vshrl.u32 %v437_v54, 16  ;;  %v543_v58 = vshll.u32 %v437_v54, 16 }
  0x1a   : > { %754 = vmatmul.msk.bf16.vlgmr.msra.gmra.mxu2 %vm221_vm2, %v290_v35  ;;  %768 = vmatmul.msk.bf16.vlgmr.msra.gmra.mxu3 %vm221_vm2, %v340_v36  ;;  %v205_v41 = vsel %vm193_vm3, %v200_v39, %v204_v33  ;;  %v396_v53 = vor.u32 %v395_v50, %v392_v49  ;;  %v492_v1 = vrot.slane %v437_v54, 2  ;;  %v600_v7 = vrot.slane %v437_v54, 3  ;;  %v872_v50 = vld [vmem:[%s1026_s2] ss:$0 sm:$0xff] }
  0x1b   : > { %731 = vmatmul.msk.bf16.vlgmr.msra.gmra.mxu1 %vm221_vm2, %v208_v38  ;;  %730 = vmatmul.msk.bf16.vlgmr.msra.gmra.mxu0 %vm221_vm2, %v205_v41  ;;  %v483_v55 = vpack.c.bf16 %v181_v51, %v960_v19  ;;  %v542_v61 = vrot.slane %v540_v57, 2  ;;  %v545_v62 = vrot.slane %v543_v58, 3  ;;  %v438_v10 = vpack.c.bf16 %v960_v19, %v960_v19 }
  0x1c   : > { %468 = vmatpush.bf16.msra.mxu1 %v853_v37  ;;  %627 = vmatpush.bf16.msra.mxu0 %v859_v40  ;;  %v397_v56 = vsel %vm385_vm4, %v388_v52, %v396_v53 }
  0x1d   : > { %v548_v59 = vshrl.u32 %v483_v55, 16  ;;  %v551_v60 = vshll.u32 %v483_v55, 16  ;;  %v493_v2 = vrot.slane %v483_v55, 2  ;;  %v546_v3 = vor.u32 %v545_v62, %v542_v61 }
  0x1e   : > { %v601_v8 = vrot.slane %v483_v55, 3 }
  0x1f   : > { %v550_v63 = vrot.slane %v548_v59, 2  ;;  %v553_v0 = vrot.slane %v551_v60, 3  ;;  %v494_v5 = vsel %vm491_vm5, %v492_v1, %v493_v2 }
  0x20   : > { %469 = vmatpush.bf16.msra.mxu1 %v852_v42  ;;  %628 = vmatpush.bf16.msra.mxu0 %v858_v45  ;;  %v602_v9 = vsel %vm337_vm1, %v600_v7, %v601_v8 }
  0x21   : > { %v554_v4 = vor.u32 %v553_v0, %v550_v63 }
  0x23   : > { %v555_v6 = vsel %vm539_vm6, %v546_v3, %v554_v4 }
  0x2a   : > { %755 = vmatmul.msk.bf16.gmra.mxu2 %vm221_vm2, %v289_v30  ;;  %769 = vmatmul.msk.bf16.gmra.mxu3 %vm221_vm2, %v339_v32 }
  0x2b   : > { %740 = vmatmul.msk.bf16.vlgmr.msrb.gmra.mxu1 %vm221_vm2, %v182_v23  ;;  %782 = vmatmul.msk.bf16.vlgmr.msrb.gmra.mxu0 %vm221_vm2, %v397_v56 }
  0x3a   : > { %810 = vmatmul.msk.bf16.vlgmr.msrb.gmra.mxu2 %vm221_vm2, %v494_v5  ;;  %824 = vmatmul.msk.bf16.vlgmr.msrb.gmra.mxu3 %vm221_vm2, %v555_v6 }
  0x3b   : > { %741 = vmatmul.msk.bf16.gmra.mxu1 %vm221_vm2, %v968_v22  ;;  %783 = vmatmul.msk.bf16.gmra.mxu0 %vm221_vm2, %v396_v53 }
  0x4a   : > { %811 = vmatmul.msk.bf16.gmra.mxu2 %vm221_vm2, %v493_v2  ;;  %825 = vmatmul.msk.bf16.gmra.mxu3 %vm221_vm2, %v554_v4 }
  0x4b   : > { %796 = vmatmul.msk.bf16.vlgmr.msra.gmra.mxu1 %vm221_vm2, %v437_v54  ;;  %838 = vmatmul.msk.bf16.vlgmr.msra.gmra.mxu0 %vm221_vm2, %v602_v9 }
  0x5b   : > { %797 = vmatmul.msk.bf16.gmra.mxu1 %vm221_vm2, %v438_v10  ;;  %839 = vmatmul.msk.bf16.gmra.mxu0 %vm221_vm2, %v601_v8 }
  0x98   : > { %v242_v11 = vpop.f32.mrf.mxu1  ;;  %v237_v12 = vpop.f32.mrf.mxu0 }
  0x9d   : > { %v318_v13 = vpop.f32.mrf.mxu2  ;;  %v368_v14 = vpop.f32.mrf.mxu3 }
  0xa0   : > { %v244_v15 = vpop.f32.mrf.mxu1  ;;  %v239_v16 = vpop.f32.mrf.mxu0 }
  0xa5   : > { %v320_v17 = vpop.f32.mrf.mxu2  ;;  %v370_v18 = vpop.f32.mrf.mxu3 }
  0xa8   : > { %v271_v20 = vpop.f32.mrf.mxu1  ;;  %v425_v21 = vpop.f32.mrf.mxu0 }
  0xa9   : > { %v272_v29 = vadd.f32 %v271_v20, %v237_v12 }
  0xab   : > { %v327_v32 = vadd.f32 %v318_v13, %v272_v29 }
  0xad   : > { %v323_v22 = vpop.f32.mrf.mxu2  ;;  %v373_v23 = vpop.f32.mrf.mxu3  ;;  %v377_v35 = vadd.f32 %v368_v14, %v327_v32 }
  0xaf   : > { %v434_v39 = vadd.f32 %v425_v21, %v377_v35 }
  0xb0   : > { %v273_v24 = vpop.f32.mrf.mxu1  ;;  %v427_v25 = vpop.f32.mrf.mxu0 }
  0xb1   : > { %v274_v36 = vadd.f32 %v273_v24, %v239_v16 }
  0xb3   : > { %v328_v40 = vadd.f32 %v320_v17, %v274_v36 }
  0xb5   : > { %v325_v26 = vpop.f32.mrf.mxu2  ;;  %v375_v19 = vpop.f32.mrf.mxu3  ;;  %v378_v44 = vadd.f32 %v370_v18, %v328_v40 }
  0xb7   : > { %v435_v51 = vadd.f32 %v427_v25, %v378_v44 }
  0xb8   : > { %v276_v27 = vpop.f32.mrf.mxu1  ;;  %v430_v28 = vpop.f32.mrf.mxu0 }
  0xb9   : > { %v277_v45 = vadd.f32 %v276_v27, %v242_v11 }
  0xbb   : > { %v329_v52 = vadd.f32 %v323_v22, %v277_v45 }
  0xbd   : > { %v522_v30 = vpop.f32.mrf.mxu2  ;;  %v583_v31 = vpop.f32.mrf.mxu3  ;;  %v379_v58 = vadd.f32 %v373_v23, %v329_v52 }
  0xbf   : > { %v436_v0 = vadd.f32 %v430_v28, %v379_v58 }
  0xc0   : > { %v278_v33 = vpop.f32.mrf.mxu1  ;;  %v432_v34 = vpop.f32.mrf.mxu0 }
  0xc5   : > { %v524_v37 = vpop.f32.mrf.mxu2  ;;  %v585_v38 = vpop.f32.mrf.mxu3 }
  0xc8   : > { %v471_v41 = vpop.f32.mrf.mxu1  ;;  %v630_v43 = vpop.f32.mrf.mxu0 }
  0xc9   : > { %v480_v42 = vadd.f32 %v471_v41, %v434_v39 }
  0xcb   : > { %v531_v46 = vadd.f32 %v522_v30, %v480_v42 }
  0xcd   : > { %v527_v47 = vpop.f32.mrf.mxu2  ;;  %v588_v48 = vpop.f32.mrf.mxu3  ;;  %v592_v49 = vadd.f32 %v583_v31, %v531_v46 }
  0xcf   : > { %v639_v53 = vadd.f32 %v630_v43, %v592_v49 }
  0xd0   : > { %v473_v54 = vpop.f32.mrf.mxu1  ;;  %v632_v57 = vpop.f32.mrf.mxu0 }
  0xd1   : > { %v646_v55 = vadd.f32 %v872_v50, %v639_v53  ;;  %v481_v56 = vadd.f32 %v473_v54, %v435_v51 }
  0xd3   : > { %v649_v59 = vmax.f32 %v646_v55, 0.0  ;;  %v532_v60 = vadd.f32 %v524_v37, %v481_v56 }
  0xd5   : > { %v529_v61 = vpop.f32.mrf.mxu2  ;;  %v590_v62 = vpop.f32.mrf.mxu3  ;;  %652 = vst.msk [vmem:[%s170_s7] sm:$0xff] %vm221_vm2, %v649_v59  ;;  %v593_v63 = vadd.f32 %v585_v38, %v532_v60 }
  0xd7   : > { %v640_v1 = vadd.f32 %v632_v57, %v593_v63 }
  0xd8   : > { %v476_v2 = vpop.f32.mrf.mxu1  ;;  %v635_v5 = vpop.f32.mrf.mxu0 }
  0xd9   : > { %v647_v3 = vadd.f32 %v872_v50, %v640_v1  ;;  %v482_v4 = vadd.f32 %v476_v2, %v436_v0 }
  0xdb   : > { %v650_v6 = vmax.f32 %v647_v3, 0.0  ;;  %v533_v7 = vadd.f32 %v527_v47, %v482_v4 }
  0xdd   : > { %653 = vst.msk [vmem:[%s170_s7 + $0x8] sm:$0xff] %vm221_vm2, %v650_v6  ;;  %v594_v8 = vadd.f32 %v588_v48, %v533_v7 }
  0xdf   : > { %v641_v9 = vadd.f32 %v635_v5, %v594_v8 }
  0xe0   : > { %v478_v10 = vpop.f32.mrf.mxu1  ;;  %v637_v12 = vpop.f32.mrf.mxu0 }
  0xe1   : > { %v648_v11 = vadd.f32 %v872_v50, %v641_v9 }
  0xe3   : > { %v651_v13 = vmax.f32 %v648_v11, 0.0 }
  0xe5   : > { %655 = vst.msk [vmem:[%s170_s7 + $0x10] sm:$0x3f] %vm654_vm7, %v651_v13 }
  0xe6 PF: > { %s13_s12 = sadd.s32 1, %s879_s12  }
  0xe7   : > { %p10_p4 = scmp.ge.s32.totalorder %s13_s12, 4  }
  0xe9   :  { %12 = sbr.rel (!%p10_p4) target bundleno = 1 (0x1), region = 70 }

// kernel: value_network_forward.28
= control target key start
LH: loop header
LB: loop body
LE: loop exit
PB: predicated region body
PF: predicated region fallthrough
CT: control target
= control target key end

     0   :  { %s964_s15 = smov 0   ;;  %s1099_s0 = inlined_call_operand.vmem [shape: f32[2,36,32], index: 0, kind: input, shape index: {}]   ;;  %s1100_s1 = inlined_call_operand.vmem [shape: bf16[9,32,32], index: 1, kind: input, shape index: {}]   ;;  %s1101_s2 = inlined_call_operand.vmem [shape: f32[1,32], index: 2, kind: input, shape index: {}]   ;;  %s1102_s3 = inlined_call_operand.vmem [shape: f32[2,22,32], index: 3, kind: input, shape index: {}]   ;;  %s1103_s4 = inlined_call_operand.vmem [shape: f32[2,22,32], index: 4, kind: output, shape index: {}]  }
   0x1 LB: > { %s768_s16 = sadd.s32 4294967295, %s937_s15   ;;  %p772_p0 = scmp.ge.s32.totalorder %s937_s15, 1  ;;  %s937_s15 = sphi %s964_s15, %s14_s15  }
   0x2   : > { %p172_p1 = scmp.lt.s32.totalorder %s937_s15, 3 }
   0x4   : > { %p173_p2 = pnand %p772_p0, %p172_p1 }
   0x5   : > { %p203_p3 = scmp.lt.s32.totalorder (!%p173_p2), %s768_s16, 1 }
   0x6   : > { %176 = sbr.rel (%p173_p2) target bundleno = 229 (0xe5), region = 36 }
   0xb   : > { %v903_v0 = vld [vmem:[%s1100_s1 + $0x18] sm:$0xff]  ;;  %v905_v1 = vld [vmem:[%s1100_s1 + $0x28] sm:$0xff]  ;;  %v902_v3 = vld [vmem:[%s1100_s1 + $0x10] sm:$0xff]  ;;  %s1105_s16 = smov (!%p203_p3, %s768_s16), 1  ;;  %vm329_vm0 = vcmask 1046528   ;;  %vm379_vm1 = vcmask 1044480  }
   0xc   : > { %v907_v2 = vld [vmem:[%s1100_s1 + $0x38] sm:$0xff]  ;;  %918 = vmatpush.bf16.msra.mxu1 %v903_v0  ;;  %276 = vmatpush.bf16.msra.mxu0 %v903_v0  ;;  %v901_v4 = vld [vmem:[%s1100_s1 + $0x8] sm:$0xff]  ;;  %v904_v5 = vld [vmem:[%s1100_s1 + $0x20] sm:$0xff]  ;;  %s920_s29 = smul.u32 40, %s1105_s16  ;;  %vm263_vm2 = vcmask 261120   ;;  %vm533_vm5 = vcmask 1045504  }
   0xd   : > { %357 = vmatpush.bf16.msra.mxu2 %v905_v1  ;;  %407 = vmatpush.bf16.msra.mxu3 %v907_v2  ;;  %v906_v6 = vld [vmem:[%s1100_s1 + $0x30] sm:$0xff]  ;;  %v909_v7 = vld [vmem:[%s1100_s1 + $0x48] sm:$0xff]  ;;  %v915_v9 = vld [vmem:[%s1100_s1 + $0x78] sm:$0xff]  ;;  %vm235_vm3 = vsmask.f32 7424  ;;  %s921_s7 = smul.u32 24, %s1105_s16 }
   0xe   : > { %v913_v8 = vld [vmem:[%s1100_s1 + $0x68] sm:$0xff]  ;;  %s1008_s14 = scalar_lea.vmem %s1099_s0, %s920_s29  ;;  %v900_v10 = vld [vmem:[%s1100_s1] sm:$0xff]  ;;  %v914_v20 = vld [vmem:[%s1100_s1 + $0x70] sm:$0xff]  ;;  %vm427_vm4 = vsmask.f32 4352  ;;  %vm699_vm7 = vcmask 259072  }
   0xf   : > { %v219_v11 = vld [vmem:[%s1008_s14] sm:$0xff]  ;;  %v220_v12 = vld [vmem:[%s1008_s14 + $0x8] sm:$0xff]  ;;  %v221_v13 = vld [vmem:[%s1008_s14 + $0x10] sm:$0xff]  ;;  %vm581_vm6 = vsmask.f32 5376  ;;  %s1083_s10 = scalar_lea.vmem %s1102_s3, %s921_s7 }
  0x10   : > { %919 = vmatpush.bf16.msra.mxu1 %v902_v3  ;;  %277 = vmatpush.bf16.msra.mxu0 %v902_v3  ;;  %v1016_v14 = vpack.c.bf16 %v220_v12, %v219_v11  ;;  %v1018_v15 = vpack.c.bf16 %v221_v13, %v221_v13  ;;  %v1021_v16 = vld [vmem:[%s1008_s14 + $0x18] sm:$0xff]  ;;  %v908_v17 = vld [vmem:[%s1100_s1 + $0x40] sm:$0xff]  ;;  %v917_v36 = vld [vmem:[%s1100_s1 + $0x88] sm:$0xff]  ;;  %v479_v49 = vpack.c.bf16 %v221_v13, %v220_v12 }
  0x11   : > { %358 = vmatpush.bf16.msra.mxu2 %v904_v5  ;;  %408 = vmatpush.bf16.msra.mxu3 %v906_v6  ;;  %v372_v18 = vpack.c.bf16 %v1021_v16, %v221_v13  ;;  %v912_v19 = vld [vmem:[%s1100_s1 + $0x60] sm:$0xff]  ;;  %v911_v33 = vld [vmem:[%s1100_s1 + $0x58] sm:$0xff]  ;;  %v910_v38 = vld [vmem:[%s1100_s1 + $0x50] sm:$0xff]  ;;  %v480_v5 = vpack.c.bf16 %v1021_v16, %v1021_v16 }
  0x12   : > { %v244_v21 = vshll.u32 %v1018_v15, 16  ;;  %v248_v22 = vshrl.u32 %v1018_v15, 16  ;;  %v237_v23 = vshrl.u32 %v1016_v14, 16  ;;  %v239_v24 = vshll.u32 %v1016_v14, 16  ;;  %v916_v41 = vld [vmem:[%s1100_s1 + $0x80] sm:$0xff] }
  0x13   : > { %v330_v25 = vrot.slane %v1016_v14, 1  ;;  %v331_v26 = vrot.slane %v1018_v15, 1  ;;  %v380_v27 = vrot.slane %v1016_v14, 3  ;;  %v381_v28 = vrot.slane %v372_v18, 3  ;;  %v223_v46 = vld [vmem:[%s1008_s14 + $0x20] sm:$0xf]  ;;  %s217_s14 = scalar_lea.vmem %s1103_s4, %s921_s7 }
  0x14   : > { %310 = vmatpush.bf16.msrb.mxu1 %v901_v4  ;;  %464 = vmatpush.bf16.msrb.mxu0 %v909_v7  ;;  %v246_v29 = vrot.slane %v244_v21, 1  ;;  %v241_v30 = vrot.slane %v239_v24, 1  ;;  %v432_v39 = vshrl.u32 %v372_v18, 16  ;;  %v435_v40 = vshll.u32 %v372_v18, 16 }
  0x15   : > { %561 = vmatpush.bf16.msrb.mxu2 %v913_v8  ;;  %622 = vmatpush.bf16.msrb.mxu3 %v915_v9  ;;  %v332_v31 = vsel %vm329_vm0, %v330_v25, %v331_v26  ;;  %v382_v32 = vsel %vm379_vm1, %v380_v27, %v381_v28  ;;  %v428_v42 = vrot.slane %v237_v23, 3  ;;  %v429_v43 = vrot.slane %v239_v24, 4 }
  0x16   : > { %v250_v34 = vor.u32 %v248_v22, %v246_v29  ;;  %v242_v35 = vor.u32 %v241_v30, %v237_v23  ;;  %812 = vmatmul.msk.bf16.vlgmr.msra.gmra.mxu2 %vm263_vm2, %v332_v31  ;;  %826 = vmatmul.msk.bf16.vlgmr.msra.gmra.mxu3 %vm263_vm2, %v382_v32  ;;  %v434_v44 = vrot.slane %v432_v39, 3  ;;  %v437_v45 = vrot.slane %v435_v40, 4 }
  0x17   : > { %v430_v47 = vor.u32 %v429_v43, %v428_v42  ;;  %v525_v50 = vpack.c.bf16 %v223_v46, %v1021_v16  ;;  %v582_v52 = vshrl.u32 %v479_v49, 16  ;;  %v585_v53 = vshll.u32 %v479_v49, 16 }
  0x18   : > { %311 = vmatpush.bf16.msrb.mxu1 %v900_v10  ;;  %465 = vmatpush.bf16.msrb.mxu0 %v908_v17  ;;  %v247_v37 = vsel %vm235_vm3, %v242_v35, %v246_v29  ;;  %v438_v48 = vor.u32 %v437_v45, %v434_v44  ;;  %v534_v60 = vrot.slane %v479_v49, 2  ;;  %v642_v2 = vrot.slane %v479_v49, 3  ;;  %v930_v45 = vld [vmem:[%s1101_s2] ss:$0 sm:$0xff] }
  0x19   : > { %562 = vmatpush.bf16.msrb.mxu2 %v912_v19  ;;  %623 = vmatpush.bf16.msrb.mxu3 %v914_v20  ;;  %v590_v54 = vshrl.u32 %v525_v50, 16  ;;  %v593_v55 = vshll.u32 %v525_v50, 16  ;;  %v584_v56 = vrot.slane %v582_v52, 2  ;;  %v587_v57 = vrot.slane %v585_v53, 3 }
  0x1a   : > { %789 = vmatmul.msk.bf16.vlgmr.msra.gmra.mxu1 %vm263_vm2, %v250_v34  ;;  %788 = vmatmul.msk.bf16.vlgmr.msra.gmra.mxu0 %vm263_vm2, %v247_v37  ;;  %v439_v51 = vsel %vm427_vm4, %v430_v47, %v438_v48  ;;  %v535_v61 = vrot.slane %v525_v50, 2  ;;  %v643_v3 = vrot.slane %v525_v50, 3 }
  0x1b   : > { %v592_v58 = vrot.slane %v590_v54, 2  ;;  %v595_v59 = vrot.slane %v593_v55, 3  ;;  %v588_v62 = vor.u32 %v587_v57, %v584_v56 }
  0x1c   : > { %510 = vmatpush.bf16.msra.mxu1 %v911_v33  ;;  %669 = vmatpush.bf16.msra.mxu0 %v917_v36  ;;  %v536_v0 = vsel %vm533_vm5, %v534_v60, %v535_v61  ;;  %v644_v4 = vsel %vm379_vm1, %v642_v2, %v643_v3 }
  0x1d   : > { %v596_v63 = vor.u32 %v595_v59, %v592_v58 }
  0x1f   : > { %v597_v1 = vsel %vm581_vm6, %v588_v62, %v596_v63  ;;  %v692_v62 = vld [vmem:[%s1083_s10 + $0x8] sm:$0xff] }
  0x20   : > { %511 = vmatpush.bf16.msra.mxu1 %v910_v38  ;;  %670 = vmatpush.bf16.msra.mxu0 %v916_v41 }
  0x26   : > { %813 = vmatmul.msk.bf16.gmra.mxu2 %vm263_vm2, %v331_v26  ;;  %827 = vmatmul.msk.bf16.gmra.mxu3 %vm263_vm2, %v381_v28 }
  0x2a   : > { %798 = vmatmul.msk.bf16.vlgmr.msrb.gmra.mxu1 %vm263_vm2, %v1016_v14  ;;  %840 = vmatmul.msk.bf16.vlgmr.msrb.gmra.mxu0 %vm263_vm2, %v439_v51 }
  0x36   : > { %868 = vmatmul.msk.bf16.vlgmr.msrb.gmra.mxu2 %vm263_vm2, %v536_v0  ;;  %882 = vmatmul.msk.bf16.vlgmr.msrb.gmra.mxu3 %vm263_vm2, %v597_v1 }
  0x3a   : > { %799 = vmatmul.msk.bf16.gmra.mxu1 %vm263_vm2, %v1018_v15  ;;  %841 = vmatmul.msk.bf16.gmra.mxu0 %vm263_vm2, %v438_v48 }
  0x46   : > { %869 = vmatmul.msk.bf16.gmra.mxu2 %vm263_vm2, %v535_v61  ;;  %883 = vmatmul.msk.bf16.gmra.mxu3 %vm263_vm2, %v596_v63 }
  0x4a   : > { %854 = vmatmul.msk.bf16.vlgmr.msra.gmra.mxu1 %vm263_vm2, %v479_v49  ;;  %896 = vmatmul.msk.bf16.vlgmr.msra.gmra.mxu0 %vm263_vm2, %v644_v4  ;;  %v691_v49 = vld [vmem:[%s1083_s10] sm:$0xff] }
  0x5a   : > { %855 = vmatmul.msk.bf16.gmra.mxu1 %vm263_vm2, %v480_v5  ;;  %897 = vmatmul.msk.bf16.gmra.mxu0 %vm263_vm2, %v643_v3 }
  0x97   : > { %v284_v6 = vpop.f32.mrf.mxu1  ;;  %v279_v7 = vpop.f32.mrf.mxu0 }
  0x99   : > { %v360_v8 = vpop.f32.mrf.mxu2  ;;  %v410_v9 = vpop.f32.mrf.mxu3 }
  0x9f   : > { %v286_v10 = vpop.f32.mrf.mxu1  ;;  %v281_v11 = vpop.f32.mrf.mxu0 }
  0xa1   : > { %v362_v12 = vpop.f32.mrf.mxu2  ;;  %v412_v13 = vpop.f32.mrf.mxu3 }
  0xa7   : > { %v313_v14 = vpop.f32.mrf.mxu1  ;;  %v467_v15 = vpop.f32.mrf.mxu0 }
  0xa8   : > { %v314_v24 = vadd.f32 %v313_v14, %v279_v7  ;;  %v693_v7 = vld [vmem:[%s1083_s10 + $0x10] sm:$0x3f] }
  0xa9   : > { %v365_v17 = vpop.f32.mrf.mxu2  ;;  %v415_v18 = vpop.f32.mrf.mxu3 }
  0xaa   : > { %v369_v27 = vadd.f32 %v360_v8, %v314_v24 }
  0xac   : > { %v419_v30 = vadd.f32 %v410_v9, %v369_v27 }
  0xae   : > { %v476_v34 = vadd.f32 %v467_v15, %v419_v30 }
  0xaf   : > { %v315_v19 = vpop.f32.mrf.mxu1  ;;  %v469_v20 = vpop.f32.mrf.mxu0 }
  0xb0   : > { %v316_v31 = vadd.f32 %v315_v19, %v281_v11 }
  0xb1   : > { %v367_v21 = vpop.f32.mrf.mxu2  ;;  %v417_v16 = vpop.f32.mrf.mxu3 }
  0xb2   : > { %v370_v35 = vadd.f32 %v362_v12, %v316_v31 }
  0xb4   : > { %v420_v39 = vadd.f32 %v412_v13, %v370_v35 }
  0xb6   : > { %v477_v46 = vadd.f32 %v469_v20, %v420_v39 }
  0xb7   : > { %v318_v22 = vpop.f32.mrf.mxu1  ;;  %v472_v23 = vpop.f32.mrf.mxu0 }
  0xb8   : > { %v319_v40 = vadd.f32 %v318_v22, %v284_v6 }
  0xb9   : > { %v564_v25 = vpop.f32.mrf.mxu2  ;;  %v625_v26 = vpop.f32.mrf.mxu3 }
  0xba   : > { %v371_v47 = vadd.f32 %v365_v17, %v319_v40 }
  0xbc   : > { %v421_v54 = vadd.f32 %v415_v18, %v371_v47 }
  0xbe   : > { %v478_v60 = vadd.f32 %v472_v23, %v421_v54 }
  0xbf   : > { %v320_v28 = vpop.f32.mrf.mxu1  ;;  %v474_v29 = vpop.f32.mrf.mxu0 }
  0xc1   : > { %v566_v32 = vpop.f32.mrf.mxu2  ;;  %v627_v33 = vpop.f32.mrf.mxu3 }
  0xc7   : > { %v513_v36 = vpop.f32.mrf.mxu1  ;;  %v672_v38 = vpop.f32.mrf.mxu0 }
  0xc8   : > { %v522_v37 = vadd.f32 %v513_v36, %v476_v34 }
  0xc9   : > { %v569_v42 = vpop.f32.mrf.mxu2  ;;  %v630_v43 = vpop.f32.mrf.mxu3 }
  0xca   : > { %v573_v41 = vadd.f32 %v564_v25, %v522_v37 }
  0xcc   : > { %v634_v44 = vadd.f32 %v625_v26, %v573_v41 }
  0xce   : > { %v681_v48 = vadd.f32 %v672_v38, %v634_v44 }
  0xcf   : > { %v515_v50 = vpop.f32.mrf.mxu1  ;;  %v674_v53 = vpop.f32.mrf.mxu0 }
  0xd0   : > { %v688_v51 = vadd.f32 %v930_v45, %v681_v48  ;;  %v523_v52 = vadd.f32 %v515_v50, %v477_v46 }
  0xd1   : > { %v571_v57 = vpop.f32.mrf.mxu2  ;;  %v632_v58 = vpop.f32.mrf.mxu3 }
  0xd2   : > { %v694_v55 = vadd.f32 %v691_v49, %v688_v51  ;;  %v574_v56 = vadd.f32 %v566_v32, %v523_v52 }
  0xd4   : > { %697 = vst.msk [vmem:[%s217_s14] sm:$0xff] %vm263_vm2, %v694_v55  ;;  %v635_v59 = vadd.f32 %v627_v33, %v574_v56 }
  0xd6   : > { %v682_v61 = vadd.f32 %v674_v53, %v635_v59 }
  0xd7   : > { %v518_v63 = vpop.f32.mrf.mxu1  ;;  %v677_v2 = vpop.f32.mrf.mxu0 }
  0xd8   : > { %v689_v0 = vadd.f32 %v930_v45, %v682_v61  ;;  %v524_v1 = vadd.f32 %v518_v63, %v478_v60 }
  0xda   : > { %v695_v3 = vadd.f32 %v692_v62, %v689_v0  ;;  %v575_v4 = vadd.f32 %v569_v42, %v524_v1 }
  0xdc   : > { %698 = vst.msk [vmem:[%s217_s14 + $0x8] sm:$0xff] %vm263_vm2, %v695_v3  ;;  %v636_v5 = vadd.f32 %v630_v43, %v575_v4 }
  0xde   : > { %v683_v6 = vadd.f32 %v677_v2, %v636_v5 }
  0xdf   : > { %v520_v8 = vpop.f32.mrf.mxu1  ;;  %v679_v10 = vpop.f32.mrf.mxu0 }
  0xe0   : > { %v690_v9 = vadd.f32 %v930_v45, %v683_v6 }
  0xe2   : > { %v696_v11 = vadd.f32 %v693_v7, %v690_v9 }
  0xe4   : > { %700 = vst.msk [vmem:[%s217_s14 + $0x10] sm:$0x3f] %vm699_vm7, %v696_v11 }
  0xe5 PF: > { %s14_s15 = sadd.s32 1, %s937_s15  }
  0xe6   : > { %p11_p4 = scmp.ge.s32.totalorder %s14_s15, 4  }
  0xe8   :  { %13 = sbr.rel (!%p11_p4) target bundleno = 1 (0x1), region = 77 }

// kernel: value_network_forward.31
= control target key start
LH: loop header
LB: loop body
LE: loop exit
PB: predicated region body
PF: predicated region fallthrough
CT: control target
= control target key end

     0   :  { %s893_s12 = smov 0   ;;  %s1020_s0 = inlined_call_operand.vmem [shape: f32[2,36,32], index: 0, kind: input, shape index: {}]   ;;  %s1021_s1 = inlined_call_operand.vmem [shape: bf16[9,32,32], index: 1, kind: input, shape index: {}]   ;;  %s1022_s2 = inlined_call_operand.vmem [shape: f32[1,32], index: 2, kind: input, shape index: {}]   ;;  %s1023_s3 = inlined_call_operand.vmem [shape: f32[2,22,32], index: 3, kind: output, shape index: {}]  }
   0x1 LB: > { %s703_s13 = sadd.s32 4294967295, %s871_s12   ;;  %p707_p0 = scmp.ge.s32.totalorder %s871_s12, 1  ;;  %s871_s12 = sphi %s893_s12, %s13_s12  }
   0x2   : > { %p137_p1 = scmp.lt.s32.totalorder %s871_s12, 3 }
   0x4   : > { %p138_p2 = pnand %p707_p0, %p137_p1 }
   0x5   : > { %p161_p3 = scmp.lt.s32.totalorder (!%p138_p2), %s703_s13, 1 }
   0x6   : > { %141 = sbr.rel (%p138_p2) target bundleno = 227 (0xe3), region = 32 }
   0xb   : > { %v837_v0 = vld [vmem:[%s1021_s1 + $0x18] sm:$0xff]  ;;  %v839_v1 = vld [vmem:[%s1021_s1 + $0x28] sm:$0xff]  ;;  %v836_v3 = vld [vmem:[%s1021_s1 + $0x10] sm:$0xff]  ;;  %s1025_s13 = smov (!%p161_p3, %s703_s13), 1  ;;  %vm282_vm0 = vcmask 1046528   ;;  %vm332_vm1 = vcmask 1044480  }
   0xc   : > { %v841_v2 = vld [vmem:[%s1021_s1 + $0x38] sm:$0xff]  ;;  %852 = vmatpush.bf16.msra.mxu1 %v837_v0  ;;  %229 = vmatpush.bf16.msra.mxu0 %v837_v0  ;;  %v835_v4 = vld [vmem:[%s1021_s1 + $0x8] sm:$0xff]  ;;  %v838_v5 = vld [vmem:[%s1021_s1 + $0x20] sm:$0xff]  ;;  %s854_s26 = smul.u32 40, %s1025_s13  ;;  %vm216_vm2 = vcmask 261120   ;;  %vm486_vm5 = vcmask 1045504  }
   0xd   : > { %310 = vmatpush.bf16.msra.mxu2 %v839_v1  ;;  %360 = vmatpush.bf16.msra.mxu3 %v841_v2  ;;  %v840_v6 = vld [vmem:[%s1021_s1 + $0x30] sm:$0xff]  ;;  %v843_v7 = vld [vmem:[%s1021_s1 + $0x48] sm:$0xff]  ;;  %v849_v9 = vld [vmem:[%s1021_s1 + $0x78] sm:$0xff]  ;;  %vm188_vm3 = vsmask.f32 7424  ;;  %s855_s29 = smul.u32 24, %s1025_s13 }
   0xe   : > { %v847_v8 = vld [vmem:[%s1021_s1 + $0x68] sm:$0xff]  ;;  %s937_s10 = scalar_lea.vmem %s1020_s0, %s854_s26  ;;  %v834_v10 = vld [vmem:[%s1021_s1] sm:$0xff]  ;;  %v848_v20 = vld [vmem:[%s1021_s1 + $0x70] sm:$0xff]  ;;  %vm380_vm4 = vsmask.f32 4352  ;;  %vm646_vm7 = vcmask 259072  }
   0xf   : > { %v172_v11 = vld [vmem:[%s937_s10] sm:$0xff]  ;;  %v173_v12 = vld [vmem:[%s937_s10 + $0x8] sm:$0xff]  ;;  %v174_v13 = vld [vmem:[%s937_s10 + $0x10] sm:$0xff]  ;;  %vm534_vm6 = vsmask.f32 5376  ;;  %s170_s7 = scalar_lea.vmem %s1023_s3, %s855_s29 }
  0x10   : > { %853 = vmatpush.bf16.msra.mxu1 %v836_v3  ;;  %230 = vmatpush.bf16.msra.mxu0 %v836_v3  ;;  %v945_v14 = vpack.c.bf16 %v173_v12, %v172_v11  ;;  %v947_v15 = vpack.c.bf16 %v174_v13, %v174_v13  ;;  %v950_v16 = vld [vmem:[%s937_s10 + $0x18] sm:$0xff]  ;;  %v842_v17 = vld [vmem:[%s1021_s1 + $0x40] sm:$0xff]  ;;  %v851_v36 = vld [vmem:[%s1021_s1 + $0x88] sm:$0xff]  ;;  %v432_v49 = vpack.c.bf16 %v174_v13, %v173_v12 }
  0x11   : > { %311 = vmatpush.bf16.msra.mxu2 %v838_v5  ;;  %361 = vmatpush.bf16.msra.mxu3 %v840_v6  ;;  %v325_v18 = vpack.c.bf16 %v950_v16, %v174_v13  ;;  %v846_v19 = vld [vmem:[%s1021_s1 + $0x60] sm:$0xff]  ;;  %v845_v33 = vld [vmem:[%s1021_s1 + $0x58] sm:$0xff]  ;;  %v844_v38 = vld [vmem:[%s1021_s1 + $0x50] sm:$0xff]  ;;  %v433_v5 = vpack.c.bf16 %v950_v16, %v950_v16 }
  0x12   : > { %v197_v21 = vshll.u32 %v947_v15, 16  ;;  %v201_v22 = vshrl.u32 %v947_v15, 16  ;;  %v190_v23 = vshrl.u32 %v945_v14, 16  ;;  %v192_v24 = vshll.u32 %v945_v14, 16  ;;  %v850_v41 = vld [vmem:[%s1021_s1 + $0x80] sm:$0xff] }
  0x13   : > { %v283_v25 = vrot.slane %v945_v14, 1  ;;  %v284_v26 = vrot.slane %v947_v15, 1  ;;  %v333_v27 = vrot.slane %v945_v14, 3  ;;  %v334_v28 = vrot.slane %v325_v18, 3  ;;  %v176_v46 = vld [vmem:[%s937_s10 + $0x20] sm:$0xf] }
  0x14   : > { %263 = vmatpush.bf16.msrb.mxu1 %v835_v4  ;;  %417 = vmatpush.bf16.msrb.mxu0 %v843_v7  ;;  %v199_v29 = vrot.slane %v197_v21, 1  ;;  %v194_v30 = vrot.slane %v192_v24, 1  ;;  %v385_v39 = vshrl.u32 %v325_v18, 16  ;;  %v388_v40 = vshll.u32 %v325_v18, 16 }
  0x15   : > { %514 = vmatpush.bf16.msrb.mxu2 %v847_v8  ;;  %575 = vmatpush.bf16.msrb.mxu3 %v849_v9  ;;  %v285_v31 = vsel %vm282_vm0, %v283_v25, %v284_v26  ;;  %v335_v32 = vsel %vm332_vm1, %v333_v27, %v334_v28  ;;  %v381_v42 = vrot.slane %v190_v23, 3  ;;  %v382_v43 = vrot.slane %v192_v24, 4 }
  0x16   : > { %v203_v34 = vor.u32 %v201_v22, %v199_v29  ;;  %v195_v35 = vor.u32 %v194_v30, %v190_v23  ;;  %746 = vmatmul.msk.bf16.vlgmr.msra.gmra.mxu2 %vm216_vm2, %v285_v31  ;;  %760 = vmatmul.msk.bf16.vlgmr.msra.gmra.mxu3 %vm216_vm2, %v335_v32  ;;  %v387_v44 = vrot.slane %v385_v39, 3  ;;  %v390_v45 = vrot.slane %v388_v40, 4 }
  0x17   : > { %v383_v47 = vor.u32 %v382_v43, %v381_v42  ;;  %v478_v50 = vpack.c.bf16 %v176_v46, %v950_v16  ;;  %v535_v52 = vshrl.u32 %v432_v49, 16  ;;  %v538_v53 = vshll.u32 %v432_v49, 16 }
  0x18   : > { %264 = vmatpush.bf16.msrb.mxu1 %v834_v10  ;;  %418 = vmatpush.bf16.msrb.mxu0 %v842_v17  ;;  %v200_v37 = vsel %vm188_vm3, %v195_v35, %v199_v29  ;;  %v391_v48 = vor.u32 %v390_v45, %v387_v44  ;;  %v487_v60 = vrot.slane %v432_v49, 2  ;;  %v595_v2 = vrot.slane %v432_v49, 3  ;;  %v864_v45 = vld [vmem:[%s1022_s2] ss:$0 sm:$0xff] }
  0x19   : > { %515 = vmatpush.bf16.msrb.mxu2 %v846_v19  ;;  %576 = vmatpush.bf16.msrb.mxu3 %v848_v20  ;;  %v543_v54 = vshrl.u32 %v478_v50, 16  ;;  %v546_v55 = vshll.u32 %v478_v50, 16  ;;  %v537_v56 = vrot.slane %v535_v52, 2  ;;  %v540_v57 = vrot.slane %v538_v53, 3 }
  0x1a   : > { %723 = vmatmul.msk.bf16.vlgmr.msra.gmra.mxu1 %vm216_vm2, %v203_v34  ;;  %722 = vmatmul.msk.bf16.vlgmr.msra.gmra.mxu0 %vm216_vm2, %v200_v37  ;;  %v392_v51 = vsel %vm380_vm4, %v383_v47, %v391_v48  ;;  %v488_v61 = vrot.slane %v478_v50, 2  ;;  %v596_v3 = vrot.slane %v478_v50, 3 }
  0x1b   : > { %v545_v58 = vrot.slane %v543_v54, 2  ;;  %v548_v59 = vrot.slane %v546_v55, 3  ;;  %v541_v62 = vor.u32 %v540_v57, %v537_v56 }
  0x1c   : > { %463 = vmatpush.bf16.msra.mxu1 %v845_v33  ;;  %622 = vmatpush.bf16.msra.mxu0 %v851_v36  ;;  %v489_v0 = vsel %vm486_vm5, %v487_v60, %v488_v61  ;;  %v597_v4 = vsel %vm332_vm1, %v595_v2, %v596_v3 }
  0x1d   : > { %v549_v63 = vor.u32 %v548_v59, %v545_v58 }
  0x1f   : > { %v550_v1 = vsel %vm534_vm6, %v541_v62, %v549_v63 }
  0x20   : > { %464 = vmatpush.bf16.msra.mxu1 %v844_v38  ;;  %623 = vmatpush.bf16.msra.mxu0 %v850_v41 }
  0x26   : > { %747 = vmatmul.msk.bf16.gmra.mxu2 %vm216_vm2, %v284_v26  ;;  %761 = vmatmul.msk.bf16.gmra.mxu3 %vm216_vm2, %v334_v28 }
  0x2a   : > { %732 = vmatmul.msk.bf16.vlgmr.msrb.gmra.mxu1 %vm216_vm2, %v945_v14  ;;  %774 = vmatmul.msk.bf16.vlgmr.msrb.gmra.mxu0 %vm216_vm2, %v392_v51 }
  0x36   : > { %802 = vmatmul.msk.bf16.vlgmr.msrb.gmra.mxu2 %vm216_vm2, %v489_v0  ;;  %816 = vmatmul.msk.bf16.vlgmr.msrb.gmra.mxu3 %vm216_vm2, %v550_v1 }
  0x3a   : > { %733 = vmatmul.msk.bf16.gmra.mxu1 %vm216_vm2, %v947_v15  ;;  %775 = vmatmul.msk.bf16.gmra.mxu0 %vm216_vm2, %v391_v48 }
  0x46   : > { %803 = vmatmul.msk.bf16.gmra.mxu2 %vm216_vm2, %v488_v61  ;;  %817 = vmatmul.msk.bf16.gmra.mxu3 %vm216_vm2, %v549_v63 }
  0x4a   : > { %788 = vmatmul.msk.bf16.vlgmr.msra.gmra.mxu1 %vm216_vm2, %v432_v49  ;;  %830 = vmatmul.msk.bf16.vlgmr.msra.gmra.mxu0 %vm216_vm2, %v597_v4 }
  0x5a   : > { %789 = vmatmul.msk.bf16.gmra.mxu1 %vm216_vm2, %v433_v5  ;;  %831 = vmatmul.msk.bf16.gmra.mxu0 %vm216_vm2, %v596_v3 }
  0x97   : > { %v237_v6 = vpop.f32.mrf.mxu1  ;;  %v232_v7 = vpop.f32.mrf.mxu0 }
  0x99   : > { %v313_v8 = vpop.f32.mrf.mxu2  ;;  %v363_v9 = vpop.f32.mrf.mxu3 }
  0x9f   : > { %v239_v10 = vpop.f32.mrf.mxu1  ;;  %v234_v11 = vpop.f32.mrf.mxu0 }
  0xa1   : > { %v315_v12 = vpop.f32.mrf.mxu2  ;;  %v365_v13 = vpop.f32.mrf.mxu3 }
  0xa7   : > { %v266_v14 = vpop.f32.mrf.mxu1  ;;  %v420_v15 = vpop.f32.mrf.mxu0 }
  0xa8   : > { %v267_v24 = vadd.f32 %v266_v14, %v232_v7 }
  0xa9   : > { %v318_v17 = vpop.f32.mrf.mxu2  ;;  %v368_v18 = vpop.f32.mrf.mxu3 }
  0xaa   : > { %v322_v27 = vadd.f32 %v313_v8, %v267_v24 }
  0xac   : > { %v372_v30 = vadd.f32 %v363_v9, %v322_v27 }
  0xae   : > { %v429_v34 = vadd.f32 %v420_v15, %v372_v30 }
  0xaf   : > { %v268_v19 = vpop.f32.mrf.mxu1  ;;  %v422_v20 = vpop.f32.mrf.mxu0 }
  0xb0   : > { %v269_v31 = vadd.f32 %v268_v19, %v234_v11 }
  0xb1   : > { %v320_v21 = vpop.f32.mrf.mxu2  ;;  %v370_v16 = vpop.f32.mrf.mxu3 }
  0xb2   : > { %v323_v35 = vadd.f32 %v315_v12, %v269_v31 }
  0xb4   : > { %v373_v39 = vadd.f32 %v365_v13, %v323_v35 }
  0xb6   : > { %v430_v46 = vadd.f32 %v422_v20, %v373_v39 }
  0xb7   : > { %v271_v22 = vpop.f32.mrf.mxu1  ;;  %v425_v23 = vpop.f32.mrf.mxu0 }
  0xb8   : > { %v272_v40 = vadd.f32 %v271_v22, %v237_v6 }
  0xb9   : > { %v517_v25 = vpop.f32.mrf.mxu2  ;;  %v578_v26 = vpop.f32.mrf.mxu3 }
  0xba   : > { %v324_v47 = vadd.f32 %v318_v17, %v272_v40 }
  0xbc   : > { %v374_v53 = vadd.f32 %v368_v18, %v324_v47 }
  0xbe   : > { %v431_v58 = vadd.f32 %v425_v23, %v374_v53 }
  0xbf   : > { %v273_v28 = vpop.f32.mrf.mxu1  ;;  %v427_v29 = vpop.f32.mrf.mxu0 }
  0xc1   : > { %v519_v32 = vpop.f32.mrf.mxu2  ;;  %v580_v33 = vpop.f32.mrf.mxu3 }
  0xc7   : > { %v466_v36 = vpop.f32.mrf.mxu1  ;;  %v625_v38 = vpop.f32.mrf.mxu0 }
  0xc8   : > { %v475_v37 = vadd.f32 %v466_v36, %v429_v34 }
  0xc9   : > { %v522_v42 = vpop.f32.mrf.mxu2  ;;  %v583_v43 = vpop.f32.mrf.mxu3 }
  0xca   : > { %v526_v41 = vadd.f32 %v517_v25, %v475_v37 }
  0xcc   : > { %v587_v44 = vadd.f32 %v578_v26, %v526_v41 }
  0xce   : > { %v634_v48 = vadd.f32 %v625_v38, %v587_v44 }
  0xcf   : > { %v468_v49 = vpop.f32.mrf.mxu1  ;;  %v627_v52 = vpop.f32.mrf.mxu0 }
  0xd0   : > { %v641_v50 = vadd.f32 %v864_v45, %v634_v48  ;;  %v476_v51 = vadd.f32 %v468_v49, %v430_v46 }
  0xd1   : > { %v524_v55 = vpop.f32.mrf.mxu2  ;;  %v585_v56 = vpop.f32.mrf.mxu3 }
  0xd2   : > { %644 = vst.msk [vmem:[%s170_s7] sm:$0xff] %vm216_vm2, %v641_v50  ;;  %v527_v54 = vadd.f32 %v519_v32, %v476_v51 }
  0xd4   : > { %v588_v57 = vadd.f32 %v580_v33, %v527_v54 }
  0xd6   : > { %v635_v59 = vadd.f32 %v627_v52, %v588_v57 }
  0xd7   : > { %v471_v60 = vpop.f32.mrf.mxu1  ;;  %v630_v63 = vpop.f32.mrf.mxu0 }
  0xd8   : > { %v642_v61 = vadd.f32 %v864_v45, %v635_v59  ;;  %v477_v62 = vadd.f32 %v471_v60, %v431_v58 }
  0xda   : > { %645 = vst.msk [vmem:[%s170_s7 + $0x8] sm:$0xff] %vm216_vm2, %v642_v61  ;;  %v528_v0 = vadd.f32 %v522_v42, %v477_v62 }
  0xdc   : > { %v589_v1 = vadd.f32 %v583_v43, %v528_v0 }
  0xde   : > { %v636_v2 = vadd.f32 %v630_v63, %v589_v1 }
  0xdf   : > { %v473_v3 = vpop.f32.mrf.mxu1  ;;  %v632_v5 = vpop.f32.mrf.mxu0 }
  0xe0   : > { %v643_v4 = vadd.f32 %v864_v45, %v636_v2 }
  0xe2   : > { %647 = vst.msk [vmem:[%s170_s7 + $0x10] sm:$0x3f] %vm646_vm7, %v643_v4 }
  0xe3 PF: > { %s13_s12 = sadd.s32 1, %s871_s12  }
  0xe4   : > { %p10_p4 = scmp.ge.s32.totalorder %s13_s12, 4  }
  0xe6   :  { %12 = sbr.rel (!%p10_p4) target bundleno = 1 (0x1), region = 70 }

// kernel: value_network_forward.32
= control target key start
LH: loop header
LB: loop body
LE: loop exit
PB: predicated region body
PF: predicated region fallthrough
CT: control target
= control target key end

     0   :  { %s449_s15 = smov 0   ;;  %s479_s0 = inlined_call_operand.vmem [shape: f32[2,3,3,32], index: 0, kind: input, shape index: {}]   ;;  %s480_s1 = inlined_call_operand.vmem [shape: f32[2,3,3,32], index: 1, kind: input, shape index: {}]   ;;  %s481_s2 = inlined_call_operand.vmem [shape: f32[2,3,3,32], index: 2, kind: input, shape index: {}]   ;;  %s482_s3 = inlined_call_operand.vmem [shape: f32[2,3,3,32], index: 3, kind: input, shape index: {}]   ;;  %s483_s4 = inlined_call_operand.vmem [shape: f32[2,2,2,32], index: 4, kind: output, shape index: {}]  }
   0x1 LB: > { %s393_s16 = sadd.s32 4294967295, %s422_s15   ;;  %p397_p0 = scmp.ge.s32.totalorder %s422_s15, 1  ;;  %s422_s15 = sphi %s449_s15, %s14_s15  }
   0x2   : > { %p192_p1 = scmp.lt.s32.totalorder %s422_s15, 3 }
   0x4   : > { %p193_p2 = pnand %p397_p0, %p192_p1 }
   0x5   : > { %p233_p3 = scmp.lt.s32.totalorder (!%p193_p2), %s393_s16, 1 }
   0x6   : > { %196 = sbr.rel (%p193_p2) target bundleno = 36 (0x24), region = 36 }
   0xb   : > { %s485_s16 = smov (!%p233_p3, %s393_s16), 1  ;;  %vm299_vm0 = vcmask 254976  }
   0xc   : > { %s407_s17 = smul.u32 12, %s485_s16  ;;  %s406_s30 = sshll.u32 %s485_s16, 2 }
   0xd   : > { %s257_s7 = scalar_lea.vmem %s483_s4, %s406_s30 }
   0xe   : > { %s237_s20 = scalar_lea.vmem %s479_s0, %s407_s17  ;;  %s242_s23 = scalar_lea.vmem %s480_s1, %s407_s17 }
   0xf   : > { %v258_v0 = vld [vmem:[%s237_s20] sm:$0x7]  ;;  %v259_v1 = vld [vmem:[%s237_s20 + $0x4] sm:$0x7]  ;;  %v260_v2 = vld [vmem:[%s237_s20 + $0x8] sm:$0x7]  ;;  %s247_s26 = scalar_lea.vmem %s481_s2, %s407_s17  ;;  %s252_s29 = scalar_lea.vmem %s482_s3, %s407_s17 }
  0x10   : > { %v270_v3 = vrot.slane %v258_v0, 1  ;;  %v271_v4 = vrot.slane %v259_v1, 1  ;;  %v279_v7 = vrot.slane %v260_v2, 1  ;;  %v261_v10 = vld [vmem:[%s242_s23] sm:$0x7] }
  0x11   : > { %v262_v11 = vld [vmem:[%s242_s23 + $0x4] sm:$0x7]  ;;  %v264_v14 = vld [vmem:[%s247_s26] sm:$0x7]  ;;  %v263_v15 = vld [vmem:[%s242_s23 + $0x8] sm:$0x7] }
  0x12   : > { %v274_v5 = vmax.f32 %v258_v0, %v270_v3  ;;  %v275_v6 = vmax.f32 %v259_v1, %v271_v4  ;;  %v265_v16 = vld [vmem:[%s247_s26 + $0x4] sm:$0x7]  ;;  %v291_v20 = vrot.slane %v264_v14, 1  ;;  %v266_v25 = vld [vmem:[%s252_s29] sm:$0x7] }
  0x13   : > { %v292_v22 = vrot.slane %v265_v16, 1  ;;  %v267_v26 = vld [vmem:[%s252_s29 + $0x4] sm:$0x7] }
  0x14   : > { %v276_v8 = vmax.f32 %v274_v5, %v259_v1  ;;  %v277_v9 = vmax.f32 %v275_v6, %v260_v2 }
  0x16   : > { %v281_v12 = vmax.f32 %v276_v8, %v271_v4  ;;  %v282_v13 = vmax.f32 %v277_v9, %v279_v7 }
  0x18   : > { %v283_v17 = vmax.f32 %v281_v12, %v261_v10  ;;  %v284_v18 = vmax.f32 %v282_v13, %v262_v11 }
  0x1a   : > { %v285_v19 = vmax.f32 %v283_v17, %v262_v11  ;;  %v286_v21 = vmax.f32 %v284_v18, %v263_v15 }
  0x1c   : > { %v287_v23 = vmax.f32 %v285_v19, %v264_v14  ;;  %v288_v24 = vmax.f32 %v286_v21, %v265_v16 }
  0x1e   : > { %v295_v27 = vmax.f32 %v287_v23, %v291_v20  ;;  %v296_v28 = vmax.f32 %v288_v24, %v292_v22 }
  0x20   : > { %v297_v29 = vmax.f32 %v295_v27, %v266_v25  ;;  %v298_v30 = vmax.f32 %v296_v28, %v267_v26 }
  0x22   : > { %300 = vst.msk [vmem:[%s257_s7] sm:$0x3] %vm299_vm0, %v297_v29 }
  0x23   : > { %301 = vst.msk [vmem:[%s257_s7 + $0x2] sm:$0x3] %vm299_vm0, %v298_v30 }
  0x24 PF: > { %s14_s15 = sadd.s32 1, %s422_s15  }
  0x25   : > { %p11_p4 = scmp.ge.s32.totalorder %s14_s15, 4  }
  0x27   :  { %13 = sbr.rel (!%p11_p4) target bundleno = 1 (0x1), region = 75 }

// kernel: value_network_forward.33
= control target key start
LH: loop header
LB: loop body
LE: loop exit
PB: predicated region body
PF: predicated region fallthrough
CT: control target
= control target key end

     0   :  { %s748_s12 = smov 0   ;;  %s835_s0 = inlined_call_operand.vmem [shape: f32[2,16,32], index: 0, kind: input, shape index: {}]   ;;  %s836_s1 = inlined_call_operand.vmem [shape: bf16[9,32,32], index: 1, kind: input, shape index: {}]   ;;  %s837_s2 = inlined_call_operand.vmem [shape: f32[1,32], index: 2, kind: input, shape index: {}]   ;;  %s838_s3 = inlined_call_operand.vmem [shape: f32[2,6,32], index: 3, kind: output, shape index: {}]  }
   0x1 LB: > { %s569_s13 = sadd.s32 4294967295, %s726_s12   ;;  %p573_p0 = scmp.ge.s32.totalorder %s726_s12, 1  ;;  %s726_s12 = sphi %s748_s12, %s13_s12  }
   0x2   : > { %p137_p1 = scmp.lt.s32.totalorder %s726_s12, 3 }
   0x4   : > { %p138_p2 = pnand %p573_p0, %p137_p1 }
   0x5   : > { %p160_p3 = scmp.lt.s32.totalorder (!%p138_p2), %s569_s13, 1 }
   0x6   : > { %141 = sbr.rel (%p138_p2) target bundleno = 192 (0xc0), region = 32 }
   0xb   : > { %v698_v0 = vld [vmem:[%s836_s1 + $0x28] sm:$0xff]  ;;  %v700_v1 = vld [vmem:[%s836_s1 + $0x38] sm:$0xff]  ;;  %v697_v4 = vld [vmem:[%s836_s1 + $0x20] sm:$0xff]  ;;  %s840_s13 = smov (!%p160_p3, %s569_s13), 1  ;;  %vm203_vm0 = vcmask 261120   ;;  %vm514_vm1 = vcmask 259072  }
   0xc   : > { %v696_v2 = vld [vmem:[%s836_s1 + $0x18] sm:$0xff]  ;;  %v694_v3 = vld [vmem:[%s836_s1 + $0x8] sm:$0xff]  ;;  %275 = vmatpush.bf16.msra.mxu2 %v698_v0  ;;  %312 = vmatpush.bf16.msra.mxu3 %v700_v1  ;;  %v699_v5 = vld [vmem:[%s836_s1 + $0x30] sm:$0xff]  ;;  %s692_s30 = sshll.u32 %s840_s13, 4  ;;  %s576_s4 = sshll.u32 %s840_s13, 3 }
   0xd   : > { %213 = vmatpush.bf16.msra.mxu0 %v696_v2  ;;  %240 = vmatpush.bf16.msra.mxu1 %v694_v3  ;;  %v695_v6 = vld [vmem:[%s836_s1 + $0x10] sm:$0xff]  ;;  %v693_v7 = vld [vmem:[%s836_s1] sm:$0xff]  ;;  %v702_v8 = vld [vmem:[%s836_s1 + $0x48] sm:$0xff]  ;;  %s164_s10 = scalar_lea.vmem %s835_s0, %s692_s30  ;;  %s168_s7 = scalar_lea.vmem %s838_s3, %s576_s4 }
   0xe   : > { %v706_v9 = vld [vmem:[%s836_s1 + $0x68] sm:$0xff]  ;;  %v708_v10 = vld [vmem:[%s836_s1 + $0x78] sm:$0xff]  ;;  %v170_v12 = vld [vmem:[%s164_s10] sm:$0xff] }
   0xf   : > { %v704_v11 = vld [vmem:[%s836_s1 + $0x58] sm:$0xff]  ;;  %v171_v13 = vld [vmem:[%s164_s10 + $0x8] sm:$0xff]  ;;  %v172_v14 = vmax.f32 %v170_v12, 0.0  ;;  %v701_v16 = vld [vmem:[%s836_s1 + $0x40] sm:$0xff] }
  0x10   : > { %276 = vmatpush.bf16.msra.mxu2 %v697_v4  ;;  %313 = vmatpush.bf16.msra.mxu3 %v699_v5  ;;  %v173_v15 = vmax.f32 %v171_v13, 0.0  ;;  %v705_v17 = vld [vmem:[%s836_s1 + $0x60] sm:$0xff]  ;;  %v707_v20 = vld [vmem:[%s836_s1 + $0x70] sm:$0xff]  ;;  %v710_v28 = vld [vmem:[%s836_s1 + $0x88] sm:$0xff] }
  0x11   : > { %214 = vmatpush.bf16.msra.mxu0 %v695_v6  ;;  %241 = vmatpush.bf16.msra.mxu1 %v693_v7  ;;  %v174_v18 = vpack.c.bf16 %v172_v14, %v172_v14  ;;  %v703_v21 = vld [vmem:[%s836_s1 + $0x50] sm:$0xff]  ;;  %v709_v31 = vld [vmem:[%s836_s1 + $0x80] sm:$0xff] }
  0x12   : > { %v283_v19 = vpack.c.bf16 %v173_v15, %v172_v14  ;;  %v397_v27 = vpack.c.bf16 %v173_v15, %v173_v15  ;;  %v719_v1 = vld [vmem:[%s837_s2] ss:$0 sm:$0xff] }
  0x13   : > { %v253_v22 = vrot.slane %v174_v18, 1  ;;  %v185_v24 = vshrl.u32 %v174_v18, 16  ;;  %v187_v25 = vshll.u32 %v174_v18, 16 }
  0x14   : > { %424 = vmatpush.bf16.msrb.mxu2 %v706_v9  ;;  %464 = vmatpush.bf16.msrb.mxu3 %v708_v10  ;;  %v290_v23 = vrot.slane %v283_v19, 2  ;;  %v439_v30 = vshll.u32 %v397_v27, 16  ;;  %v326_v32 = vshrl.u32 %v283_v19, 16  ;;  %v329_v33 = vshll.u32 %v283_v19, 16 }
  0x15   : > { %354 = vmatpush.bf16.msrb.mxu0 %v702_v8  ;;  %389 = vmatpush.bf16.msrb.mxu1 %v704_v11  ;;  %v189_v26 = vrot.slane %v187_v25, 1  ;;  %v437_v34 = vshrl.u32 %v397_v27, 16  ;;  %v367_v36 = vrot.slane %v283_v19, 3  ;;  %v478_v41 = vrot.slane %v397_v27, 1 }
  0x16   : > { %598 = vmatmul.msk.bf16.vlgmr.msra.gmra.mxu1 %vm203_vm0, %v174_v18  ;;  %611 = vmatmul.msk.bf16.vlgmr.msra.gmra.mxu2 %vm203_vm0, %v253_v22  ;;  %v441_v35 = vrot.slane %v439_v30, 1  ;;  %v328_v37 = vrot.slane %v326_v32, 2  ;;  %v331_v38 = vrot.slane %v329_v33, 3 }
  0x17   : > { %624 = vmatmul.msk.bf16.vlgmr.msra.gmra.mxu3 %vm203_vm0, %v290_v23  ;;  %v190_v29 = vor.u32 %v189_v26, %v185_v24 }
  0x18   : > { %425 = vmatpush.bf16.msrb.mxu2 %v705_v17  ;;  %465 = vmatpush.bf16.msrb.mxu3 %v707_v20  ;;  %v442_v39 = vor.u32 %v441_v35, %v437_v34  ;;  %v332_v40 = vor.u32 %v331_v38, %v328_v37 }
  0x19   : > { %355 = vmatpush.bf16.msrb.mxu0 %v701_v16  ;;  %390 = vmatpush.bf16.msrb.mxu1 %v703_v21 }
  0x1a   : > { %589 = vmatmul.msk.bf16.vlgmr.msra.gmra.mxu0 %vm203_vm0, %v190_v29 }
  0x1d   : > { %500 = vmatpush.bf16.msra.mxu0 %v710_v28 }
  0x21   : > { %501 = vmatpush.bf16.msra.mxu0 %v709_v31 }
  0x26   : > { %650 = vmatmul.msk.bf16.vlgmr.msrb.gmra.mxu1 %vm203_vm0, %v367_v36  ;;  %663 = vmatmul.msk.bf16.vlgmr.msrb.gmra.mxu2 %vm203_vm0, %v397_v27 }
  0x27   : > { %676 = vmatmul.msk.bf16.vlgmr.msrb.gmra.mxu3 %vm203_vm0, %v442_v39 }
  0x2a   : > { %637 = vmatmul.msk.bf16.vlgmr.msrb.gmra.mxu0 %vm203_vm0, %v332_v40 }
  0x3a   : > { %689 = vmatmul.msk.bf16.vlgmr.msra.gmra.mxu0 %vm203_vm0, %v478_v41 }
  0x93   : > { %v243_v42 = vpop.f32.mrf.mxu1 }
  0x97   : > { %v216_v43 = vpop.f32.mrf.mxu0 }
  0x98   : > { %v244_v48 = vadd.f32 %v243_v42, %v216_v43 }
  0x99   : > { %v278_v44 = vpop.f32.mrf.mxu2 }
  0x9a   : > { %v315_v45 = vpop.f32.mrf.mxu3  ;;  %v282_v52 = vadd.f32 %v278_v44, %v244_v48 }
  0x9b   : > { %v245_v46 = vpop.f32.mrf.mxu1 }
  0x9c   : > { %v319_v54 = vadd.f32 %v315_v45, %v282_v52 }
  0x9f   : > { %v218_v47 = vpop.f32.mrf.mxu0 }
  0xa1   : > { %v280_v49 = vpop.f32.mrf.mxu2 }
  0xa2   : > { %v317_v50 = vpop.f32.mrf.mxu3 }
  0xa3   : > { %v392_v51 = vpop.f32.mrf.mxu1 }
  0xa7   : > { %v357_v53 = vpop.f32.mrf.mxu0 }
  0xa8   : > { %v361_v57 = vadd.f32 %v357_v53, %v319_v54 }
  0xa9   : > { %v427_v55 = vpop.f32.mrf.mxu2 }
  0xaa   : > { %v467_v56 = vpop.f32.mrf.mxu3  ;;  %v396_v59 = vadd.f32 %v392_v51, %v361_v57 }
  0xab   : > { %v394_v58 = vpop.f32.mrf.mxu1 }
  0xac   : > { %v431_v63 = vadd.f32 %v427_v55, %v396_v59 }
  0xae   : > { %v471_v0 = vadd.f32 %v467_v56, %v431_v63 }
  0xaf   : > { %v359_v60 = vpop.f32.mrf.mxu0 }
  0xb1   : > { %v429_v61 = vpop.f32.mrf.mxu2 }
  0xb2   : > { %v469_v62 = vpop.f32.mrf.mxu3 }
  0xb7   : > { %v503_v2 = vpop.f32.mrf.mxu0 }
  0xb8   : > { %v507_v3 = vadd.f32 %v503_v2, %v471_v0 }
  0xba   : > { %v512_v4 = vadd.f32 %v719_v1, %v507_v3 }
  0xbc   : > { %v513_v5 = vmax.f32 %v512_v4, 0.0 }
  0xbe   : > { %515 = vst.msk [vmem:[%s168_s7] sm:$0x3f] %vm514_vm1, %v513_v5 }
  0xbf   : > { %v505_v6 = vpop.f32.mrf.mxu0 }
  0xc0 PF: > { %s13_s12 = sadd.s32 1, %s726_s12  }
  0xc1   : > { %p10_p4 = scmp.ge.s32.totalorder %s13_s12, 4  }
  0xc3   :  { %12 = sbr.rel (!%p10_p4) target bundleno = 1 (0x1), region = 70 }

// kernel: value_network_forward.34
= control target key start
LH: loop header
LB: loop body
LE: loop exit
PB: predicated region body
PF: predicated region fallthrough
CT: control target
= control target key end

     0   :  { %s809_s15 = smov 0   ;;  %s899_s0 = inlined_call_operand.vmem [shape: f32[2,16,32], index: 0, kind: input, shape index: {}]   ;;  %s900_s1 = inlined_call_operand.vmem [shape: bf16[9,32,32], index: 1, kind: input, shape index: {}]   ;;  %s901_s2 = inlined_call_operand.vmem [shape: f32[1,32], index: 2, kind: input, shape index: {}]   ;;  %s902_s3 = inlined_call_operand.vmem [shape: f32[2,6,32], index: 3, kind: input, shape index: {}]   ;;  %s903_s4 = inlined_call_operand.vmem [shape: f32[2,6,32], index: 4, kind: output, shape index: {}]  }
   0x1 LB: > { %s624_s16 = sadd.s32 4294967295, %s782_s15   ;;  %p628_p0 = scmp.ge.s32.totalorder %s782_s15, 1  ;;  %s782_s15 = sphi %s809_s15, %s14_s15  }
   0x2   : > { %p171_p1 = scmp.lt.s32.totalorder %s782_s15, 3 }
   0x4   : > { %p172_p2 = pnand %p628_p0, %p171_p1 }
   0x5   : > { %p200_p3 = scmp.lt.s32.totalorder (!%p172_p2), %s624_s16, 1 }
   0x6   : > { %175 = sbr.rel (%p172_p2) target bundleno = 189 (0xbd), region = 36 }
   0xb   : > { %v754_v0 = vld [vmem:[%s900_s1 + $0x28] sm:$0xff]  ;;  %v756_v1 = vld [vmem:[%s900_s1 + $0x38] sm:$0xff]  ;;  %v753_v4 = vld [vmem:[%s900_s1 + $0x20] sm:$0xff]  ;;  %s905_s16 = smov (!%p200_p3, %s624_s16), 1  ;;  %vm245_vm0 = vcmask 261120   ;;  %vm557_vm1 = vcmask 259072  }
   0xc   : > { %v752_v2 = vld [vmem:[%s900_s1 + $0x18] sm:$0xff]  ;;  %v750_v3 = vld [vmem:[%s900_s1 + $0x8] sm:$0xff]  ;;  %317 = vmatpush.bf16.msra.mxu2 %v754_v0  ;;  %354 = vmatpush.bf16.msra.mxu3 %v756_v1  ;;  %v755_v5 = vld [vmem:[%s900_s1 + $0x30] sm:$0xff]  ;;  %s748_s7 = sshll.u32 %s905_s16, 4 }
   0xd   : > { %255 = vmatpush.bf16.msra.mxu0 %v752_v2  ;;  %282 = vmatpush.bf16.msra.mxu1 %v750_v3  ;;  %v751_v6 = vld [vmem:[%s900_s1 + $0x10] sm:$0xff]  ;;  %v749_v7 = vld [vmem:[%s900_s1] sm:$0xff]  ;;  %v758_v8 = vld [vmem:[%s900_s1 + $0x48] sm:$0xff]  ;;  %s204_s14 = scalar_lea.vmem %s899_s0, %s748_s7  ;;  %s631_s7 = sshll.u32 %s905_s16, 3 }
   0xe   : > { %v762_v9 = vld [vmem:[%s900_s1 + $0x68] sm:$0xff]  ;;  %v764_v10 = vld [vmem:[%s900_s1 + $0x78] sm:$0xff]  ;;  %v214_v12 = vld [vmem:[%s204_s14] sm:$0xff]  ;;  %s208_s10 = scalar_lea.vmem %s902_s3, %s631_s7  ;;  %s212_s17 = scalar_lea.vmem %s903_s4, %s631_s7 }
   0xf   : > { %v760_v11 = vld [vmem:[%s900_s1 + $0x58] sm:$0xff]  ;;  %v215_v13 = vld [vmem:[%s204_s14 + $0x8] sm:$0xff]  ;;  %v216_v14 = vpack.c.bf16 %v214_v12, %v214_v12  ;;  %v757_v16 = vld [vmem:[%s900_s1 + $0x40] sm:$0xff] }
  0x10   : > { %318 = vmatpush.bf16.msra.mxu2 %v753_v4  ;;  %355 = vmatpush.bf16.msra.mxu3 %v755_v5  ;;  %v325_v15 = vpack.c.bf16 %v215_v13, %v214_v12  ;;  %v761_v17 = vld [vmem:[%s900_s1 + $0x60] sm:$0xff]  ;;  %v763_v22 = vld [vmem:[%s900_s1 + $0x70] sm:$0xff]  ;;  %v439_v25 = vpack.c.bf16 %v215_v13, %v215_v13  ;;  %v766_v26 = vld [vmem:[%s900_s1 + $0x88] sm:$0xff] }
  0x11   : > { %256 = vmatpush.bf16.msra.mxu0 %v751_v6  ;;  %283 = vmatpush.bf16.msra.mxu1 %v749_v7  ;;  %v295_v18 = vrot.slane %v216_v14, 1  ;;  %v227_v20 = vshrl.u32 %v216_v14, 16  ;;  %v229_v21 = vshll.u32 %v216_v14, 16  ;;  %v759_v23 = vld [vmem:[%s900_s1 + $0x50] sm:$0xff]  ;;  %v765_v29 = vld [vmem:[%s900_s1 + $0x80] sm:$0xff] }
  0x12   : > { %v332_v19 = vrot.slane %v325_v15, 2  ;;  %v481_v28 = vshll.u32 %v439_v25, 16  ;;  %v368_v30 = vshrl.u32 %v325_v15, 16  ;;  %v371_v31 = vshll.u32 %v325_v15, 16  ;;  %v775_v63 = vld [vmem:[%s901_s2] ss:$0 sm:$0xff] }
  0x13   : > { %667 = vmatmul.msk.bf16.vlgmr.msra.gmra.mxu2 %vm245_vm0, %v295_v18  ;;  %v231_v24 = vrot.slane %v229_v21, 1  ;;  %v479_v32 = vshrl.u32 %v439_v25, 16  ;;  %v409_v34 = vrot.slane %v325_v15, 3  ;;  %v520_v39 = vrot.slane %v439_v25, 1  ;;  %v555_v2 = vld [vmem:[%s208_s10] sm:$0x3f] }
  0x14   : > { %466 = vmatpush.bf16.msrb.mxu2 %v762_v9  ;;  %506 = vmatpush.bf16.msrb.mxu3 %v764_v10  ;;  %v483_v33 = vrot.slane %v481_v28, 1  ;;  %v370_v35 = vrot.slane %v368_v30, 2  ;;  %v373_v36 = vrot.slane %v371_v31, 3 }
  0x15   : > { %396 = vmatpush.bf16.msrb.mxu0 %v758_v8  ;;  %431 = vmatpush.bf16.msrb.mxu1 %v760_v11  ;;  %v232_v27 = vor.u32 %v231_v24, %v227_v20 }
  0x16   : > { %654 = vmatmul.msk.bf16.vlgmr.msra.gmra.mxu1 %vm245_vm0, %v216_v14  ;;  %680 = vmatmul.msk.bf16.vlgmr.msra.gmra.mxu3 %vm245_vm0, %v332_v19  ;;  %v484_v37 = vor.u32 %v483_v33, %v479_v32  ;;  %v374_v38 = vor.u32 %v373_v36, %v370_v35 }
  0x17   : > { %645 = vmatmul.msk.bf16.vlgmr.msra.gmra.mxu0 %vm245_vm0, %v232_v27 }
  0x18   : > { %467 = vmatpush.bf16.msrb.mxu2 %v761_v17  ;;  %507 = vmatpush.bf16.msrb.mxu3 %v763_v22 }
  0x19   : > { %397 = vmatpush.bf16.msrb.mxu0 %v757_v16  ;;  %432 = vmatpush.bf16.msrb.mxu1 %v759_v23 }
  0x1d   : > { %542 = vmatpush.bf16.msra.mxu0 %v766_v26 }
  0x21   : > { %543 = vmatpush.bf16.msra.mxu0 %v765_v29 }
  0x23   : > { %719 = vmatmul.msk.bf16.vlgmr.msrb.gmra.mxu2 %vm245_vm0, %v439_v25 }
  0x26   : > { %706 = vmatmul.msk.bf16.vlgmr.msrb.gmra.mxu1 %vm245_vm0, %v409_v34  ;;  %732 = vmatmul.msk.bf16.vlgmr.msrb.gmra.mxu3 %vm245_vm0, %v484_v37 }
  0x27   : > { %693 = vmatmul.msk.bf16.vlgmr.msrb.gmra.mxu0 %vm245_vm0, %v374_v38 }
  0x37   : > { %745 = vmatmul.msk.bf16.vlgmr.msra.gmra.mxu0 %vm245_vm0, %v520_v39 }
  0x93   : > { %v285_v40 = vpop.f32.mrf.mxu1 }
  0x94   : > { %v258_v41 = vpop.f32.mrf.mxu0 }
  0x95   : > { %v286_v46 = vadd.f32 %v285_v40, %v258_v41 }
  0x96   : > { %v320_v42 = vpop.f32.mrf.mxu2 }
  0x97   : > { %v324_v50 = vadd.f32 %v320_v42, %v286_v46 }
  0x99   : > { %v357_v43 = vpop.f32.mrf.mxu3 }
  0x9a   : > { %v361_v52 = vadd.f32 %v357_v43, %v324_v50 }
  0x9b   : > { %v287_v44 = vpop.f32.mrf.mxu1 }
  0x9c   : > { %v260_v45 = vpop.f32.mrf.mxu0 }
  0x9e   : > { %v322_v47 = vpop.f32.mrf.mxu2 }
  0xa1   : > { %v359_v48 = vpop.f32.mrf.mxu3 }
  0xa3   : > { %v434_v49 = vpop.f32.mrf.mxu1 }
  0xa4   : > { %v399_v51 = vpop.f32.mrf.mxu0 }
  0xa5   : > { %v403_v55 = vadd.f32 %v399_v51, %v361_v52 }
  0xa6   : > { %v469_v53 = vpop.f32.mrf.mxu2 }
  0xa7   : > { %v438_v57 = vadd.f32 %v434_v49, %v403_v55 }
  0xa9   : > { %v509_v54 = vpop.f32.mrf.mxu3  ;;  %v473_v61 = vadd.f32 %v469_v53, %v438_v57 }
  0xab   : > { %v436_v56 = vpop.f32.mrf.mxu1  ;;  %v513_v62 = vadd.f32 %v509_v54, %v473_v61 }
  0xac   : > { %v401_v58 = vpop.f32.mrf.mxu0 }
  0xae   : > { %v471_v59 = vpop.f32.mrf.mxu2 }
  0xb1   : > { %v511_v60 = vpop.f32.mrf.mxu3 }
  0xb4   : > { %v545_v0 = vpop.f32.mrf.mxu0 }
  0xb5   : > { %v549_v1 = vadd.f32 %v545_v0, %v513_v62 }
  0xb7   : > { %v554_v3 = vadd.f32 %v775_v63, %v549_v1 }
  0xb9   : > { %v556_v4 = vadd.f32 %v555_v2, %v554_v3 }
  0xbb   : > { %558 = vst.msk [vmem:[%s212_s17] sm:$0x3f] %vm557_vm1, %v556_v4 }
  0xbc   : > { %v547_v5 = vpop.f32.mrf.mxu0 }
  0xbd PF: > { %s14_s15 = sadd.s32 1, %s782_s15  }
  0xbe   : > { %p11_p4 = scmp.ge.s32.totalorder %s14_s15, 4  }
  0xc0   :  { %13 = sbr.rel (!%p11_p4) target bundleno = 1 (0x1), region = 77 }

// kernel: value_network_forward.37
= control target key start
LH: loop header
LB: loop body
LE: loop exit
PB: predicated region body
PF: predicated region fallthrough
CT: control target
= control target key end

     0   :  { %vm129_vm0 = vcmask 261120   ;;  %vm146_vm1 = vcmask 1024   ;;  %s277_s1 = inlined_call_operand.vmem [shape: bf16[128,32], index: 1, kind: input, shape index: {}]   ;;  %s278_s2 = inlined_call_operand.vmem [shape: f32[1,32], index: 2, kind: input, shape index: {}]   ;;  %s279_s0 = inlined_call_operand.vmem [shape: f32[2,128], index: 0, kind: input, shape index: {}]   ;;  %s280_s3 = inlined_call_operand.vmem [shape: bf16[32,1], index: 3, kind: input, shape index: {}]   ;;  %s281_s4 = inlined_call_operand.<no memory space> [shape: f32[1,1], index: 4, kind: input, shape index: {}]   ;;  %s282_s5 = inlined_call_operand.vmem [shape: f32[2,1], index: 5, kind: output, shape index: {}]  }
   0x1   :  { %v200_v0 = vld [vmem:[%s277_s1 + $0x38] sm:$0xff]  ;;  %v199_v1 = vld [vmem:[%s277_s1 + $0x30] sm:$0xff]  ;;  %v198_v2 = vld [vmem:[%s277_s1 + $0x28] sm:$0xff]  ;;  %v10_v13 = vstv %s281_s4 }
   0x2   :  { %94 = vmatpush.bf16.msra.mxu0 %v200_v0  ;;  %v197_v3 = vld [vmem:[%s277_s1 + $0x20] sm:$0xff]  ;;  %v196_v4 = vld [vmem:[%s277_s1 + $0x18] sm:$0xff]  ;;  %v195_v5 = vld [vmem:[%s277_s1 + $0x10] sm:$0xff]  ;;  %11 = vst [vmem:[#allocation2] sm:$0x1] %v10_v13 }
   0x3   :  { %v194_v6 = vld [vmem:[%s277_s1 + $0x8] sm:$0xff]  ;;  %v23_v7 = vld [vmem:[%s279_s0] sm:$0x3] }
   0x4   :  { %v24_v8 = vmax.f32 %v23_v7, 0.0  ;;  %v193_v9 = vld [vmem:[%s277_s1] sm:$0xff]  ;;  %v202_v11 = vld [vmem:[%s280_s3 + $0x8] sm:$0xff] }
   0x5   :  { %139 = vmatpush.bf16.msra.mxu1 %v202_v11  ;;  %v201_v12 = vld [vmem:[%s280_s3] sm:$0xff] }
   0x6   :  { %95 = vmatpush.bf16.msra.mxu0 %v199_v1  ;;  %v25_v10 = vpack.c.bf16 %v24_v8, %v24_v8  ;;  %v203_v14 = vld [vmem:[%s278_s2] ss:$0 sm:$0xff] }
   0x9   :  { %140 = vmatpush.bf16.msra.mxu1 %v201_v12  ;;  %v204_v20 = vld [vmem:[#allocation2] ss:$0 sm:$0xff] }
   0xa   :  { %96 = vmatpush.bf16.msra.mxu0 %v198_v2 }
   0xe   :  { %97 = vmatpush.bf16.msra.mxu0 %v197_v3 }
  0x12   :  { %98 = vmatpush.bf16.msra.mxu0 %v196_v4 }
  0x16   :  { %99 = vmatpush.bf16.msra.mxu0 %v195_v5 }
  0x1a   :  { %100 = vmatpush.bf16.msra.mxu0 %v194_v6 }
  0x1e   :  { %101 = vmatpush.bf16.msra.mxu0 %v193_v9 }
  0x21   :  { %102 = vmatmul.bf16.vlgmr.msra.gmra.mxu0 %v25_v10 }
  0x9e   :  { %v103_v15 = vpop.f32.mrf.mxu0 }
  0x9f   :  { %v104_v16 = vadd.f32 %v203_v14, %v103_v15 }
  0xa1   :  { %v107_v17 = vmax.f32 %v104_v16, 0.0 }
  0xa3   :  { %v108_v18 = vpack.c.bf16 %v107_v17, %v107_v17 }
  0xa5   :  { %192 = vmatmul.msk.bf16.vlgmr.msra.gmra.mxu1 %vm129_vm0, %v108_v18 }
  0xa6   :  { %v105_v19 = vpop.f32.mrf.mxu0 }
 0x122   :  { %v142_v21 = vpop.f32.mrf.mxu1 }
 0x123   :  { %v143_v22 = vadd.f32 %v204_v20, %v142_v21 }
 0x125   :  { %147 = vst.msk [vmem:[%s282_s5] sm:$0x3] %vm146_vm1, %v143_v22 }
 0x12a   :  { %v144_v23 = vpop.f32.mrf.mxu1 }

</bundles_post_ra>
